<compile_context>
chip_gen: v6e
topology: v6e:2x2x1
jax: 0.10.0
libtpu: 0.0.40
codegen_flags: <defaults>
</compile_context>

<pallas_src>
import functools

import jax
import jax.numpy as jnp
from jax.experimental import pallas as pl
from jax.experimental.pallas import tpu as pltpu


_LANE = 128  # pad channel dims to this so every output store is lane-dense


def _detect_vmem_limit_bytes():
    """~Half of physical VMEM: 32 MiB on v7x (64 MiB), 64 MiB on v5e/v6e (128 MiB)."""
    try:
        cap = int(pltpu.get_tpu_info().vmem_capacity_bytes)
    except Exception:  # interpret mode / older API: conservative default
        cap = 96 * 1024 * 1024
    return max(32 * 1024 * 1024, min(96 * 1024 * 1024, cap // 2))


_VMEM_LIMIT_BYTES = _detect_vmem_limit_bytes()
# Bigger M tiles amortize the ~0.35us/step pipeline overhead where VMEM allows
# (v5e/v6e); stay at 1024 on v7x.
_TM_MAX = 2048 if _VMEM_LIMIT_BYTES >= 64 * 1024 * 1024 else 1024


def _compiler_params():
    return pltpu.CompilerParams(
        dimension_semantics=("parallel",),
        vmem_limit_bytes=_VMEM_LIMIT_BYTES,
    )


def _round_up(v, m):
    return (v + m - 1) // m * m


def _pick_tm(m_rows):
    tm = min(_TM_MAX, m_rows)
    if tm < m_rows:
        tm = max(8, tm - tm % 8)
    return tm


def _silu(y):
    # sigmoid(y) == 0.5*tanh(0.5*y) + 0.5 : one exact EUP op instead of
    # exp + approximate reciprocal (keeps the f32 cv3 output exact too).
    return y * (0.5 * jnp.tanh(0.5 * y) + 0.5)


# ----------------------------------------------------------------------------
# Kernels
# ----------------------------------------------------------------------------
def _mm_bias_silu_kernel(x_ref, w_ref, b_ref, o_ref):
    y = jnp.dot(x_ref[...], w_ref[...], preferred_element_type=jnp.float32)
    o_ref[...] = _silu(y + b_ref[...]).astype(o_ref.dtype)


def _mm2_bias_silu_kernel(x1_ref, w1_ref, x2_ref, w2_ref, b_ref, o_ref):
    y = jnp.dot(x1_ref[...], w1_ref[...], preferred_element_type=jnp.float32)
    y = y + jnp.dot(x2_ref[...], w2_ref[...], preferred_element_type=jnp.float32)
    o_ref[...] = _silu(y + b_ref[...]).astype(o_ref.dtype)


def _mm_bias_silu_padrows_kernel(x_ref, w_ref, b_ref, o_ref, *, width):
    """1x1 conv whose per-image output is written with 2*width zero rows of
    vertical padding above and below (consumed by the fused 3x3 kernel)."""
    hw = x_ref.shape[0]
    co = o_ref.shape[1]
    y = jnp.dot(x_ref[...], w_ref[...], preferred_element_type=jnp.float32)
    y = _silu(y + b_ref[...]).astype(o_ref.dtype)
    pad = jnp.zeros((2 * width, co), o_ref.dtype)
    o_ref[pl.ds(0, 2 * width), :] = pad
    o_ref[pl.ds(2 * width, hw), :] = y
    o_ref[pl.ds(2 * width + hw, 2 * width), :] = pad


def _conv3x3_body(x_ref, w_ref, b_ref, r_ref, o_ref, *, width):
    """3x3 / stride 1 / pad 1 conv as 9 shifted bf16 matmuls on a row-padded,
    per-image flattened (H*W, C) tile, + bias + SiLU (+ residual)."""
    hw, co = o_ref.shape
    xb = x_ref[...]                      # bf16 (hw + 4*width, cin); no f32 upcast
    col = jax.lax.broadcasted_iota(jnp.int32, (hw, 1), 0) % width
    left = col == 0
    right = col == width - 1
    zero = jnp.zeros((), xb.dtype)
    acc = jnp.zeros((hw, co), jnp.float32)
    for dy in range(3):
        for dx in range(3):
            start = (dy + 1) * width + dx - 1
            slab = jax.lax.slice_in_dim(xb, start, start + hw, axis=0)
            if dx == 0:      # column w-1 is outside the image when w == 0
                slab = jnp.where(left, zero, slab)
            elif dx == 2:    # column w+1 is outside the image when w == W-1
                slab = jnp.where(right, zero, slab)
            acc = acc + jnp.dot(slab, w_ref[dy * 3 + dx],
                                preferred_element_type=jnp.float32)
    y = _silu(acc + b_ref[...])
    if r_ref is not None:
        y = y + r_ref[...].astype(jnp.float32)   # residual block already narrowed
    o_ref[...] = y.astype(o_ref.dtype)


def _conv3x3_kernel(x_ref, w_ref, b_ref, o_ref, *, width):
    _conv3x3_body(x_ref, w_ref, b_ref, None, o_ref, width=width)


def _conv3x3_res_kernel(x_ref, w_ref, b_ref, r_ref, o_ref, *, width):
    _conv3x3_body(x_ref, w_ref, b_ref, r_ref, o_ref, width=width)


# ----------------------------------------------------------------------------
# pallas_call wrappers
# ----------------------------------------------------------------------------
def matmul_bias_silu(x, w, b, *, out_dtype=jnp.bfloat16):
    """SiLU((M, K) @ (K, Co) + b), tiled over M."""
    M, K = x.shape
    Co = w.shape[1]
    tm = _pick_tm(M)
    return pl.pallas_call(
        _mm_bias_silu_kernel,
        out_shape=jax.ShapeDtypeStruct((M, Co), out_dtype),
        grid_spec=pltpu.PrefetchScalarGridSpec(
            num_scalar_prefetch=0,
            grid=(pl.cdiv(M, tm),),
            in_specs=[
                pl.BlockSpec((tm, K), lambda i: (i, 0)),
                pl.BlockSpec((K, Co), lambda i: (0, 0)),
                pl.BlockSpec((1, Co), lambda i: (0, 0)),
            ],
            out_specs=pl.BlockSpec((tm, Co), lambda i: (i, 0)),
        ),
        compiler_params=_compiler_params(),
    )(x, w, b)


def matmul2_bias_silu(x1, w1, x2, w2, b, *,
                      x1_cols=None, x1_col_block=0,
                      x2_cols=None, x2_col_block=0,
                      out_dtype=jnp.bfloat16):
    """SiLU(x1[:, blk1] @ w1 + x2[:, blk2] @ w2 + b): cv3 without the torch.cat
    and without zero-padded weights (column-block reads of the merged tensor)."""
    M = x1.shape[0]
    K1 = x1.shape[1] if x1_cols is None else x1_cols
    K2 = x2.shape[1] if x2_cols is None else x2_cols
    Co = w1.shape[1]
    tm = _pick_tm(M)
    cb1, cb2 = x1_col_block, x2_col_block
    return pl.pallas_call(
        _mm2_bias_silu_kernel,
        out_shape=jax.ShapeDtypeStruct((M, Co), out_dtype),
        grid_spec=pltpu.PrefetchScalarGridSpec(
            num_scalar_prefetch=0,
            grid=(pl.cdiv(M, tm),),
            in_specs=[
                pl.BlockSpec((tm, K1), lambda i: (i, cb1)),
                pl.BlockSpec((K1, Co), lambda i: (0, 0)),
                pl.BlockSpec((tm, K2), lambda i: (i, cb2)),
                pl.BlockSpec((K2, Co), lambda i: (0, 0)),
                pl.BlockSpec((1, Co), lambda i: (0, 0)),
            ],
            out_specs=pl.BlockSpec((tm, Co), lambda i: (i, 0)),
        ),
        compiler_params=_compiler_params(),
    )(x1, w1, x2, w2, b)


def matmul_bias_silu_padrows(x, w, b, n_img, hw, width, *,
                             x_cols=None, x_col_block=0,
                             out_dtype=jnp.bfloat16):
    """Per-image 1x1 conv whose output is (n_img*(hw + 4*width), Co) with
    2*width zero rows before/after each image (row halo for the 3x3 taps).
    Optionally reads only one column-block of a wider input (merged cv1|cv2)."""
    K = x.shape[1] if x_cols is None else x_cols
    Co = w.shape[1]
    hwp = hw + 4 * width
    cb = x_col_block
    return pl.pallas_call(
        functools.partial(_mm_bias_silu_padrows_kernel, width=width),
        out_shape=jax.ShapeDtypeStruct((n_img * hwp, Co), out_dtype),
        grid_spec=pltpu.PrefetchScalarGridSpec(
            num_scalar_prefetch=0,
            grid=(n_img,),
            in_specs=[
                pl.BlockSpec((hw, K), lambda i: (i, cb)),
                pl.BlockSpec((K, Co), lambda i: (0, 0)),
                pl.BlockSpec((1, Co), lambda i: (0, 0)),
            ],
            out_specs=pl.BlockSpec((hwp, Co), lambda i: (i, 0)),
        ),
        compiler_params=_compiler_params(),
    )(x, w, b)


def conv3x3_bias_silu(xp, w9, b, residual, n_img, hw, width, *,
                      r_cols=None, r_col_block=0, out_dtype=jnp.bfloat16):
    """Fused 3x3 conv + folded-BN bias + SiLU (+ shortcut add), per image.
    The residual read can be narrowed to one column-block of a wider tensor."""
    hwp = hw + 4 * width
    cin = xp.shape[1]
    Co = w9.shape[2]
    x_spec = pl.BlockSpec((hwp, cin), lambda i: (i, 0))
    w_spec = pl.BlockSpec((9, cin, Co), lambda i: (0, 0, 0))
    b_spec = pl.BlockSpec((1, Co), lambda i: (0, 0))
    o_spec = pl.BlockSpec((hw, Co), lambda i: (i, 0))
    if residual is None:
        kernel = functools.partial(_conv3x3_kernel, width=width)
        in_specs = [x_spec, w_spec, b_spec]
        args = (xp, w9, b)
    else:
        rk = residual.shape[1] if r_cols is None else r_cols
        rb = r_col_block
        r_spec = pl.BlockSpec((hw, rk), lambda i: (i, rb))
        kernel = functools.partial(_conv3x3_res_kernel, width=width)
        in_specs = [x_spec, w_spec, b_spec, r_spec]
        args = (xp, w9, b, residual)
    return pl.pallas_call(
        kernel,
        out_shape=jax.ShapeDtypeStruct((n_img * hw, Co), out_dtype),
        grid_spec=pltpu.PrefetchScalarGridSpec(
            num_scalar_prefetch=0,
            grid=(n_img,),
            in_specs=in_specs,
            out_specs=o_spec,
        ),
        compiler_params=_compiler_params(),
    )(*args)


# ----------------------------------------------------------------------------
# Deterministic parameters (mirror the PyTorch module, BN folded)
# ----------------------------------------------------------------------------
def _fold_bn(gamma, beta, mean, var, eps=1e-5):
    scale = gamma / jnp.sqrt(var + eps)
    return scale, beta - mean * scale


def _conv_bn_init(key, c_in, c_out, k):
    """Conv(c_in, c_out, k, bias=False) + BatchNorm2d(c_out), inference mode:
    BN scale folded into the weight, BN shift kept as a per-channel bias."""
    kw, kg, kb, km, kv = jax.random.split(key, 5)
    w_pt = 0.1 * jax.random.normal(kw, (c_out, c_in, k, k), jnp.float32)
    gamma = 1.0 + 0.1 * jax.random.normal(kg, (c_out,), jnp.float32)
    beta = 0.1 * jax.random.normal(kb, (c_out,), jnp.float32)
    mean = 0.1 * jax.random.normal(km, (c_out,), jnp.float32)
    var = 0.5 + jax.random.uniform(kv, (c_out,), jnp.float32)
    scale, bias = _fold_bn(gamma, beta, mean, var)
    w = jnp.transpose(w_pt, (2, 3, 1, 0)) * scale          # (k, k, c_in, c_out)
    if k == 1:
        w = w.reshape(c_in, c_out)
    else:
        w = w.reshape(k * k, c_in, c_out)                   # tap-major: dy*3 + dx
    return {"w": w.astype(jnp.bfloat16),
            "b": bias.reshape(1, c_out).astype(jnp.float32)}


def make_c3_params(key, c1, c2, n=1, e=0.5):
    c_ = int(c2 * e)
    keys = jax.random.split(key, 3 + 2 * n)
    raw = {
        "cv1": _conv_bn_init(keys[0], c1, c_, 1),
        "cv2": _conv_bn_init(keys[1], c1, c_, 1),
        "cv3": _conv_bn_init(keys[2], 2 * c_, c2, 1),
        "m": [{"cv1": _conv_bn_init(keys[3 + 2 * i], c_, c_, 1),    # Bottleneck e=1.0
               "cv2": _conv_bn_init(keys[4 + 2 * i], c_, c_, 3)}
              for i in range(n)],
    }
    return raw, c_


def fuse_c3_params(raw, c_):
    """Kernel-side layout: cv1|cv2 merged, channel dims padded to lane-dense
    multiples of 128 (zero weight columns/rows -> padded channels stay exactly
    0 through SiLU), cv3 kept as two UNpadded-K partial matmuls whose inputs
    are read as column-blocks of the merged activation."""
    w3, b3 = raw["cv3"]["w"], raw["cv3"]["b"]
    c2 = w3.shape[1]
    c1 = raw["cv1"]["w"].shape[0]
    cp = _round_up(max(c_, 1), _LANE)
    c2p = _round_up(c2, _LANE)

    def pad_w(w, rows, cols):
        return jnp.pad(w, ((0, rows - w.shape[0]), (0, cols - w.shape[1])))

    def pad_b(bias, cols):
        return jnp.pad(bias, ((0, 0), (0, cols - bias.shape[1])))

    fused = {
        "w12": jnp.concatenate([pad_w(raw["cv1"]["w"], c1, cp),
                                pad_w(raw["cv2"]["w"], c1, cp)], axis=1),
        "b12": jnp.concatenate([pad_b(raw["cv1"]["b"], cp),
                                pad_b(raw["cv2"]["b"], cp)], axis=1),
        "w3a": pad_w(w3[:c_], cp, c2p),
        "w3b": pad_w(w3[c_:], cp, c2p),
        "b3": pad_b(b3, c2p),
        "m": [],
    }
    for blk in raw["m"]:
        fused["m"].append({
            "w1": pad_w(blk["cv1"]["w"], cp, cp),
            "b1": pad_b(blk["cv1"]["b"], cp),
            "w2": jnp.pad(blk["cv2"]["w"], ((0, 0), (0, cp - c_), (0, cp - c_))),
            "b2": pad_b(blk["cv2"]["b"], cp),
        })
    return fused


# ----------------------------------------------------------------------------
# C3 forward:  cv3(cat(m(cv1(x)), cv2(x), dim=1))
# ----------------------------------------------------------------------------
def c3_forward(x_nchw, fused, *, c2, shortcut=True):
    N, C1, H, W = x_nchw.shape
    HW = H * W
    cp = fused["w3a"].shape[0]           # padded c_ (static shape)
    x = jnp.transpose(x_nchw, (0, 2, 3, 1)).reshape(N * HW, C1)
    x = x.astype(jnp.bfloat16)

    # cv1 and cv2 fused into one matmul: cols [0:cp] = cv1, [cp:2cp] = cv2.
    yc = matmul_bias_silu(x, fused["w12"], fused["b12"])

    y = yc
    for blk in fused["m"]:
        # Bottleneck cv1 (1x1): reads only the cv1 column-half of the merged
        # tensor; output emitted directly in row-padded (halo) layout.
        tp = matmul_bias_silu_padrows(y, blk["w1"], blk["b1"], N, HW, W,
                                      x_cols=cp, x_col_block=0)
        # Bottleneck cv2 (3x3): 9 fused taps + shortcut add (cv1 column-half).
        y = conv3x3_bias_silu(tp, blk["w2"], blk["b2"],
                              y if shortcut else None, N, HW, W,
                              r_cols=cp, r_col_block=0)

    # cv3 over cat(m(cv1(x)), cv2(x)) as two partial matmuls (no HBM concat,
    # the cv2 half is read straight out of the merged yc via a column block).
    out = matmul2_bias_silu(y, fused["w3a"], yc, fused["w3b"], fused["b3"],
                            x1_cols=cp, x1_col_block=0,
                            x2_cols=cp, x2_col_block=1,
                            out_dtype=jnp.float32)
    out = out[:, :c2]                    # drop lane-padding channels
    return jnp.transpose(out.reshape(N, H, W, c2), (0, 3, 1, 2))


# ----------------------------------------------------------------------------
# Pure-JAX f32 reference (mirrors the PyTorch module structure)
# ----------------------------------------------------------------------------
def c3_reference(x_nchw, raw, shortcut=True):
    def act(y):
        return y * jax.nn.sigmoid(y)

    def conv1x1(t, p):
        return act(jnp.einsum("nhwc,cd->nhwd", t, p["w"].astype(jnp.float32))
                   + p["b"][0])

    def conv3x3(t, p):
        n, h, w, _ = t.shape
        w9 = p["w"].astype(jnp.float32)
        tp = jnp.pad(t, ((0, 0), (1, 1), (1, 1), (0, 0)))
        z = jnp.zeros((n, h, w, w9.shape[2]), jnp.float32)
        for dy in range(3):
            for dx in range(3):
                z = z + jnp.einsum("nhwc,cd->nhwd",
                                   tp[:, dy:dy + h, dx:dx + w, :],
                                   w9[dy * 3 + dx])
        return act(z + p["b"][0])

    x = jnp.transpose(x_nchw, (0, 2, 3, 1)).astype(jnp.float32)
    y = conv1x1(x, raw["cv1"])
    y2 = conv1x1(x, raw["cv2"])
    for blk in raw["m"]:
        z = conv3x3(conv1x1(y, blk["cv1"]), blk["cv2"])
        y = y + z if shortcut else z
    out = conv1x1(jnp.concatenate([y, y2], axis=-1), raw["cv3"])
    return jnp.transpose(out, (0, 3, 1, 2))


if __name__ == "__main__":
    key = jax.random.PRNGKey(0)
    kx, kp = jax.random.split(key)

    Nb, c1, c2, H, W = 2, 4, 4, 16, 16
    n_bottlenecks = 1
    x = jax.random.normal(kx, (Nb, c1, H, W), jnp.float32)

    raw, c_ = make_c3_params(kp, c1, c2, n=n_bottlenecks, e=0.5)
    fused = fuse_c3_params(raw, c_)

    fwd = jax.jit(functools.partial(c3_forward, c2=c2, shortcut=True))
    out = jax.block_until_ready(fwd(x, fused))
    assert out.shape == (Nb, c2, H, W), out.shape

    ref = c3_reference(x, raw, shortcut=True)
    err = float(jnp.max(jnp.abs(out - ref)))
    assert err < 4e-2, f"max abs error {err}"
    print("KERNEL_OK")
</pallas_src>

<mosaic_0001>
module attributes {stable_mosaic.version = 11 : i64} {
  func.func @_mm_bias_silu_kernel(%arg0: i32, %arg1: memref<512x4xbf16, #tpu.memory_space<vmem>>, %arg2: memref<4x256xbf16, #tpu.memory_space<vmem>>, %arg3: memref<1x256xf32, #tpu.memory_space<vmem>>, %arg4: memref<512x256xbf16, #tpu.memory_space<vmem>>) attributes {dimension_semantics = [#tpu.dimension_semantics<parallel>], iteration_bounds = array<i64: 1>, scalar_prefetch = 0 : i64, scratch_operands = 0 : i64, tpu.core_type = #tpu.core_type<tc>, window_params = [{transform_indices = @transform_0, window_bounds = array<i64: 512, 4>}, {pipeline_mode = #tpu.pipeline_mode<synchronous>, transform_indices = @transform_1, window_bounds = array<i64: 4, 256>}, {pipeline_mode = #tpu.pipeline_mode<synchronous>, transform_indices = @transform_2, window_bounds = array<i64: 1, 256>}, {transform_indices = @transform_3, window_bounds = array<i64: 512, 256>}]} {
    %c0 = arith.constant 0 : index
    %c0_0 = arith.constant 0 : index
    %0 = vector.load %arg1[%c0, %c0_0] : memref<512x4xbf16, #tpu.memory_space<vmem>>, vector<512x4xbf16>
    %c0_1 = arith.constant 0 : index
    %c0_2 = arith.constant 0 : index
    %1 = vector.load %arg2[%c0_1, %c0_2] : memref<4x256xbf16, #tpu.memory_space<vmem>>, vector<4x256xbf16>
    %cst = arith.constant dense<0.000000e+00> : vector<512x256xf32>
    %2 = tpu.matmul %0, %1, %cst {dimension_numbers = #tpu.dot_dimension_numbers<[1], [0], [0], [1], [0, 0, 1, 1], [], []>} : vector<512x4xbf16>, vector<4x256xbf16>, vector<512x256xf32> -> vector<512x256xf32>
    %c0_3 = arith.constant 0 : index
    %c0_4 = arith.constant 0 : index
    %3 = vector.load %arg3[%c0_3, %c0_4] : memref<1x256xf32, #tpu.memory_space<vmem>>, vector<1x256xf32>
    %4 = vector.broadcast %3 : vector<1x256xf32> to vector<512x256xf32>
    %5 = arith.addf %2, %4 : vector<512x256xf32>
    %cst_5 = arith.constant 5.000000e-01 : f32
    %6 = vector.broadcast %cst_5 : f32 to vector<512x256xf32>
    %7 = arith.mulf %6, %5 : vector<512x256xf32>
    %8 = math.tanh %7 : vector<512x256xf32>
    %cst_6 = arith.constant 5.000000e-01 : f32
    %9 = vector.broadcast %cst_6 : f32 to vector<512x256xf32>
    %10 = arith.mulf %9, %8 : vector<512x256xf32>
    %cst_7 = arith.constant 5.000000e-01 : f32
    %11 = vector.broadcast %cst_7 : f32 to vector<512x256xf32>
    %12 = arith.addf %10, %11 : vector<512x256xf32>
    %13 = arith.mulf %5, %12 : vector<512x256xf32>
    %14 = arith.truncf %13 : vector<512x256xf32> to vector<512x256xbf16>
    %c0_8 = arith.constant 0 : index
    %c0_9 = arith.constant 0 : index
    %15 = vector.load %arg4[%c0_8, %c0_9] : memref<512x256xbf16, #tpu.memory_space<vmem>>, vector<512x256xbf16>
    tpu.vector_store %arg4[%c0_8, %c0_9], %14 {strides = array<i32>} : memref<512x256xbf16, #tpu.memory_space<vmem>>, vector<512x256xbf16>,
    return
  }
  func.func @transform_0(%arg0: i32) -> (i32, i32) {
    %c0_i32 = arith.constant 0 : i32
    %c0_i32_0 = arith.constant 0 : i32
    return %arg0, %c0_i32 : i32, i32
  }
  func.func @transform_1(%arg0: i32) -> (i32, i32) {
    %c0_i32 = arith.constant 0 : i32
    %c0_i32_0 = arith.constant 0 : i32
    %c0_i32_1 = arith.constant 0 : i32
    return %c0_i32, %c0_i32_0 : i32, i32
  }
  func.func @transform_2(%arg0: i32) -> (i32, i32) {
    %c0_i32 = arith.constant 0 : i32
    %c0_i32_0 = arith.constant 0 : i32
    %c0_i32_1 = arith.constant 0 : i32
    return %c0_i32, %c0_i32_0 : i32, i32
  }
  func.func @transform_3(%arg0: i32) -> (i32, i32) {
    %c0_i32 = arith.constant 0 : i32
    %c0_i32_0 = arith.constant 0 : i32
    return %arg0, %c0_i32 : i32, i32
  }
}

module attributes {stable_mosaic.version = 11 : i64} {
  func.func @_mm_bias_silu_padrows_kernel(%arg0: i32, %arg1: memref<256x128xbf16, #tpu.memory_space<vmem>>, %arg2: memref<128x128xbf16, #tpu.memory_space<vmem>>, %arg3: memref<1x128xf32, #tpu.memory_space<vmem>>, %arg4: memref<320x128xbf16, #tpu.memory_space<vmem>>) attributes {dimension_semantics = [#tpu.dimension_semantics<parallel>], iteration_bounds = array<i64: 2>, scalar_prefetch = 0 : i64, scratch_operands = 0 : i64, tpu.core_type = #tpu.core_type<tc>, window_params = [{transform_indices = @transform_0, window_bounds = array<i64: 256, 128>}, {pipeline_mode = #tpu.pipeline_mode<synchronous>, transform_indices = @transform_1, window_bounds = array<i64: 128, 128>}, {pipeline_mode = #tpu.pipeline_mode<synchronous>, transform_indices = @transform_2, window_bounds = array<i64: 1, 128>}, {transform_indices = @transform_3, window_bounds = array<i64: 320, 128>}]} {
    %c0 = arith.constant 0 : index
    %c0_0 = arith.constant 0 : index
    %0 = vector.load %arg1[%c0, %c0_0] : memref<256x128xbf16, #tpu.memory_space<vmem>>, vector<256x128xbf16>
    %c0_1 = arith.constant 0 : index
    %c0_2 = arith.constant 0 : index
    %1 = vector.load %arg2[%c0_1, %c0_2] : memref<128x128xbf16, #tpu.memory_space<vmem>>, vector<128x128xbf16>
    %cst = arith.constant dense<0.000000e+00> : vector<256x128xf32>
    %2 = tpu.matmul %0, %1, %cst {dimension_numbers = #tpu.dot_dimension_numbers<[1], [0], [0], [1], [0, 0, 1, 1], [], []>} : vector<256x128xbf16>, vector<128x128xbf16>, vector<256x128xf32> -> vector<256x128xf32>
    %c0_3 = arith.constant 0 : index
    %c0_4 = arith.constant 0 : index
    %3 = vector.load %arg3[%c0_3, %c0_4] : memref<1x128xf32, #tpu.memory_space<vmem>>, vector<1x128xf32>
    %4 = vector.broadcast %3 : vector<1x128xf32> to vector<256x128xf32>
    %5 = arith.addf %2, %4 : vector<256x128xf32>
    %cst_5 = arith.constant 5.000000e-01 : f32
    %6 = vector.broadcast %cst_5 : f32 to vector<256x128xf32>
    %7 = arith.mulf %6, %5 : vector<256x128xf32>
    %8 = math.tanh %7 : vector<256x128xf32>
    %cst_6 = arith.constant 5.000000e-01 : f32
    %9 = vector.broadcast %cst_6 : f32 to vector<256x128xf32>
    %10 = arith.mulf %9, %8 : vector<256x128xf32>
    %cst_7 = arith.constant 5.000000e-01 : f32
    %11 = vector.broadcast %cst_7 : f32 to vector<256x128xf32>
    %12 = arith.addf %10, %11 : vector<256x128xf32>
    %13 = arith.mulf %5, %12 : vector<256x128xf32>
    %14 = arith.truncf %13 : vector<256x128xf32> to vector<256x128xbf16>
    %cst_8 = arith.constant 0.000000e+00 : bf16
    %15 = vector.broadcast %cst_8 : bf16 to vector<32x128xbf16>
    %c0_9 = arith.constant 0 : index
    %c0_10 = arith.constant 0 : index
    %16 = vector.load %arg4[%c0_9, %c0_10] : memref<320x128xbf16, #tpu.memory_space<vmem>>, vector<32x128xbf16>
    tpu.vector_store %arg4[%c0_9, %c0_10], %15 {strides = array<i32>} : memref<320x128xbf16, #tpu.memory_space<vmem>>, vector<32x128xbf16>,
    %c32 = arith.constant 32 : index
    %c0_11 = arith.constant 0 : index
    %17 = vector.load %arg4[%c32, %c0_11] : memref<320x128xbf16, #tpu.memory_space<vmem>>, vector<256x128xbf16>
    tpu.vector_store %arg4[%c32, %c0_11], %14 {strides = array<i32>} : memref<320x128xbf16, #tpu.memory_space<vmem>>, vector<256x128xbf16>,
    %c288 = arith.constant 288 : index
    %c0_12 = arith.constant 0 : index
    %18 = vector.load %arg4[%c288, %c0_12] : memref<320x128xbf16, #tpu.memory_space<vmem>>, vector<32x128xbf16>
    tpu.vector_store %arg4[%c288, %c0_12], %15 {strides = array<i32>} : memref<320x128xbf16, #tpu.memory_space<vmem>>, vector<32x128xbf16>,
    return
  }
  func.func @transform_0(%arg0: i32) -> (i32, i32) {
    %c0_i32 = arith.constant 0 : i32
    %c0_i32_0 = arith.constant 0 : i32
    return %arg0, %c0_i32 : i32, i32
  }
  func.func @transform_1(%arg0: i32) -> (i32, i32) {
    %c0_i32 = arith.constant 0 : i32
    %c0_i32_0 = arith.constant 0 : i32
    %c0_i32_1 = arith.constant 0 : i32
    return %c0_i32, %c0_i32_0 : i32, i32
  }
  func.func @transform_2(%arg0: i32) -> (i32, i32) {
    %c0_i32 = arith.constant 0 : i32
    %c0_i32_0 = arith.constant 0 : i32
    %c0_i32_1 = arith.constant 0 : i32
    return %c0_i32, %c0_i32_0 : i32, i32
  }
  func.func @transform_3(%arg0: i32) -> (i32, i32) {
    %c0_i32 = arith.constant 0 : i32
    %c0_i32_0 = arith.constant 0 : i32
    return %arg0, %c0_i32 : i32, i32
  }
}

module attributes {stable_mosaic.version = 11 : i64} {
  func.func @_conv3x3_res_kernel(%arg0: i32, %arg1: memref<320x128xbf16, #tpu.memory_space<vmem>>, %arg2: memref<9x128x128xbf16, #tpu.memory_space<vmem>>, %arg3: memref<1x128xf32, #tpu.memory_space<vmem>>, %arg4: memref<256x128xbf16, #tpu.memory_space<vmem>>, %arg5: memref<256x128xbf16, #tpu.memory_space<vmem>>) attributes {dimension_semantics = [#tpu.dimension_semantics<parallel>], iteration_bounds = array<i64: 2>, scalar_prefetch = 0 : i64, scratch_operands = 0 : i64, tpu.core_type = #tpu.core_type<tc>, window_params = [{transform_indices = @transform_0, window_bounds = array<i64: 320, 128>}, {pipeline_mode = #tpu.pipeline_mode<synchronous>, transform_indices = @transform_1, window_bounds = array<i64: 9, 128, 128>}, {pipeline_mode = #tpu.pipeline_mode<synchronous>, transform_indices = @transform_2, window_bounds = array<i64: 1, 128>}, {transform_indices = @transform_3, window_bounds = array<i64: 256, 128>}, {transform_indices = @transform_4, window_bounds = array<i64: 256, 128>}]} {
    %c0 = arith.constant 0 : index
    %c0_0 = arith.constant 0 : index
    %0 = vector.load %arg1[%c0, %c0_0] : memref<320x128xbf16, #tpu.memory_space<vmem>>, vector<320x128xbf16>
    %1 = tpu.iota {dimensions = array<i32: 0>} : vector<256x1xi32>
    %c16_i32 = arith.constant 16 : i32
    %c0_i32 = arith.constant 0 : i32
    %2 = arith.cmpi eq, %c16_i32, %c0_i32 : i32
    %c1_i32 = arith.constant 1 : i32
    %3 = arith.select %2, %c1_i32, %c16_i32 : i32
    %4 = vector.broadcast %3 : i32 to vector<256x1xi32>
    %5 = arith.remsi %1, %4 : vector<256x1xi32>
    %c0_i32_1 = arith.constant 0 : i32
    %6 = vector.broadcast %c0_i32_1 : i32 to vector<256x1xi32>
    %7 = arith.cmpi ne, %5, %6 : vector<256x1xi32>
    %c0_i32_2 = arith.constant 0 : i32
    %8 = vector.broadcast %c0_i32_2 : i32 to vector<256x1xi32>
    %9 = arith.cmpi slt, %5, %8 : vector<256x1xi32>
    %c0_i32_3 = arith.constant 0 : i32
    %10 = arith.cmpi slt, %3, %c0_i32_3 : i32
    %11 = vector.broadcast %10 : i1 to vector<256x1xi1>
    %12 = vector.broadcast %11 : vector<256x1xi1> to vector<256x1xi1>
    %13 = arith.xori %9, %12 : vector<256x1xi1>
    %14 = arith.andi %13, %7 : vector<256x1xi1>
    %15 = vector.broadcast %3 : i32 to vector<256x1xi32>
    %16 = arith.addi %5, %15 : vector<256x1xi32>
    %17 = arith.select %14, %16, %5 : vector<256x1xi1>, vector<256x1xi32>
    %c0_i32_4 = arith.constant 0 : i32
    %18 = vector.broadcast %c0_i32_4 : i32 to vector<256x1xi32>
    %19 = arith.cmpi eq, %17, %18 : vector<256x1xi32>
    %c15_i32 = arith.constant 15 : i32
    %20 = vector.broadcast %c15_i32 : i32 to vector<256x1xi32>
    %21 = arith.cmpi eq, %17, %20 : vector<256x1xi32>
    %cst = arith.constant 0.000000e+00 : f32
    %22 = vector.broadcast %cst : f32 to vector<256x128xf32>
    %23 = vector.extract_strided_slice %0 {offsets = [15, 0], sizes = [256, 128], strides = [1, 1]} : vector<320x128xbf16> to vector<256x128xbf16>
    %cst_5 = arith.constant 0.000000e+00 : bf16
    %24 = vector.shape_cast %19 : vector<256x1xi1> to vector<256x1xi1>
    %25 = vector.broadcast %24 : vector<256x1xi1> to vector<256x128xi1>
    %26 = vector.broadcast %cst_5 : bf16 to vector<256x128xbf16>
    %27 = arith.select %25, %26, %23 : vector<256x128xi1>, vector<256x128xbf16>
    %c0_6 = arith.constant 0 : index
    %c0_7 = arith.constant 0 : index
    %c0_8 = arith.constant 0 : index
    %28 = vector.load %arg2[%c0_6, %c0_7, %c0_8] : memref<9x128x128xbf16, #tpu.memory_space<vmem>>, vector<1x128x128xbf16>
    %29 = vector.shape_cast %28 : vector<1x128x128xbf16> to vector<128x128xbf16>
    %cst_9 = arith.constant dense<0.000000e+00> : vector<256x128xf32>
    %30 = tpu.matmul %27, %29, %cst_9 {dimension_numbers = #tpu.dot_dimension_numbers<[1], [0], [0], [1], [0, 0, 1, 1], [], []>} : vector<256x128xbf16>, vector<128x128xbf16>, vector<256x128xf32> -> vector<256x128xf32>
    %31 = arith.addf %22, %30 : vector<256x128xf32>
    %32 = vector.extract_strided_slice %0 {offsets = [16, 0], sizes = [256, 128], strides = [1, 1]} : vector<320x128xbf16> to vector<256x128xbf16>
    %c1 = arith.constant 1 : index
    %c0_10 = arith.constant 0 : index
    %c0_11 = arith.constant 0 : index
    %33 = vector.load %arg2[%c1, %c0_10, %c0_11] : memref<9x128x128xbf16, #tpu.memory_space<vmem>>, vector<1x128x128xbf16>
    %34 = vector.shape_cast %33 : vector<1x128x128xbf16> to vector<128x128xbf16>
    %cst_12 = arith.constant dense<0.000000e+00> : vector<256x128xf32>
    %35 = tpu.matmul %32, %34, %cst_12 {dimension_numbers = #tpu.dot_dimension_numbers<[1], [0], [0], [1], [0, 0, 1, 1], [], []>} : vector<256x128xbf16>, vector<128x128xbf16>, vector<256x128xf32> -> vector<256x128xf32>
    %36 = arith.addf %31, %35 : vector<256x128xf32>
    %37 = vector.extract_strided_slice %0 {offsets = [17, 0], sizes = [256, 128], strides = [1, 1]} : vector<320x128xbf16> to vector<256x128xbf16>
    %cst_13 = arith.constant 0.000000e+00 : bf16
    %38 = vector.shape_cast %21 : vector<256x1xi1> to vector<256x1xi1>
    %39 = vector.broadcast %38 : vector<256x1xi1> to vector<256x128xi1>
    %40 = vector.broadcast %cst_13 : bf16 to vector<256x128xbf16>
    %41 = arith.select %39, %40, %37 : vector<256x128xi1>, vector<256x128xbf16>
    %c2 = arith.constant 2 : index
    %c0_14 = arith.constant 0 : index
    %c0_15 = arith.constant 0 : index
    %42 = vector.load %arg2[%c2, %c0_14, %c0_15] : memref<9x128x128xbf16, #tpu.memory_space<vmem>>, vector<1x128x128xbf16>
    %43 = vector.shape_cast %42 : vector<1x128x128xbf16> to vector<128x128xbf16>
    %cst_16 = arith.constant dense<0.000000e+00> : vector<256x128xf32>
    %44 = tpu.matmul %41, %43, %cst_16 {dimension_numbers = #tpu.dot_dimension_numbers<[1], [0], [0], [1], [0, 0, 1, 1], [], []>} : vector<256x128xbf16>, vector<128x128xbf16>, vector<256x128xf32> -> vector<256x128xf32>
    %45 = arith.addf %36, %44 : vector<256x128xf32>
    %46 = vector.extract_strided_slice %0 {offsets = [31, 0], sizes = [256, 128], strides = [1, 1]} : vector<320x128xbf16> to vector<256x128xbf16>
    %cst_17 = arith.constant 0.000000e+00 : bf16
    %47 = vector.shape_cast %19 : vector<256x1xi1> to vector<256x1xi1>
    %48 = vector.broadcast %47 : vector<256x1xi1> to vector<256x128xi1>
    %49 = vector.broadcast %cst_17 : bf16 to vector<256x128xbf16>
    %50 = arith.select %48, %49, %46 : vector<256x128xi1>, vector<256x128xbf16>
    %c3 = arith.constant 3 : index
    %c0_18 = arith.constant 0 : index
    %c0_19 = arith.constant 0 : index
    %51 = vector.load %arg2[%c3, %c0_18, %c0_19] : memref<9x128x128xbf16, #tpu.memory_space<vmem>>, vector<1x128x128xbf16>
    %52 = vector.shape_cast %51 : vector<1x128x128xbf16> to vector<128x128xbf16>
    %cst_20 = arith.constant dense<0.000000e+00> : vector<256x128xf32>
    %53 = tpu.matmul %50, %52, %cst_20 {dimension_numbers = #tpu.dot_dimension_numbers<[1], [0], [0], [1], [0, 0, 1, 1], [], []>} : vector<256x128xbf16>, vector<128x128xbf16>, vector<256x128xf32> -> vector<256x128xf32>
    %54 = arith.addf %45, %53 : vector<256x128xf32>
    %55 = vector.extract_strided_slice %0 {offsets = [32, 0], sizes = [256, 128], strides = [1, 1]} : vector<320x128xbf16> to vector<256x128xbf16>
    %c4 = arith.constant 4 : index
    %c0_21 = arith.constant 0 : index
    %c0_22 = arith.constant 0 : index
    %56 = vector.load %arg2[%c4, %c0_21, %c0_22] : memref<9x128x128xbf16, #tpu.memory_space<vmem>>, vector<1x128x128xbf16>
    %57 = vector.shape_cast %56 : vector<1x128x128xbf16> to vector<128x128xbf16>
    %cst_23 = arith.constant dense<0.000000e+00> : vector<256x128xf32>
    %58 = tpu.matmul %55, %57, %cst_23 {dimension_numbers = #tpu.dot_dimension_numbers<[1], [0], [0], [1], [0, 0, 1, 1], [], []>} : vector<256x128xbf16>, vector<128x128xbf16>, vector<256x128xf32> -> vector<256x128xf32>
    %59 = arith.addf %54, %58 : vector<256x128xf32>
    %60 = vector.extract_strided_slice %0 {offsets = [33, 0], sizes = [256, 128], strides = [1, 1]} : vector<320x128xbf16> to vector<256x128xbf16>
    %cst_24 = arith.constant 0.000000e+00 : bf16
    %61 = vector.shape_cast %21 : vector<256x1xi1> to vector<256x1xi1>
    %62 = vector.broadcast %61 : vector<256x1xi1> to vector<256x128xi1>
    %63 = vector.broadcast %cst_24 : bf16 to vector<256x128xbf16>
    %64 = arith.select %62, %63, %60 : vector<256x128xi1>, vector<256x128xbf16>
    %c5 = arith.constant 5 : index
    %c0_25 = arith.constant 0 : index
    %c0_26 = arith.constant 0 : index
    %65 = vector.load %arg2[%c5, %c0_25, %c0_26] : memref<9x128x128xbf16, #tpu.memory_space<vmem>>, vector<1x128x128xbf16>
    %66 = vector.shape_cast %65 : vector<1x128x128xbf16> to vector<128x128xbf16>
    %cst_27 = arith.constant dense<0.000000e+00> : vector<256x128xf32>
    %67 = tpu.matmul %64, %66, %cst_27 {dimension_numbers = #tpu.dot_dimension_numbers<[1], [0], [0], [1], [0, 0, 1, 1], [], []>} : vector<256x128xbf16>, vector<128x128xbf16>, vector<256x128xf32> -> vector<256x128xf32>
    %68 = arith.addf %59, %67 : vector<256x128xf32>
    %69 = vector.extract_strided_slice %0 {offsets = [47, 0], sizes = [256, 128], strides = [1, 1]} : vector<320x128xbf16> to vector<256x128xbf16>
    %cst_28 = arith.constant 0.000000e+00 : bf16
    %70 = vector.shape_cast %19 : vector<256x1xi1> to vector<256x1xi1>
    %71 = vector.broadcast %70 : vector<256x1xi1> to vector<256x128xi1>
    %72 = vector.broadcast %cst_28 : bf16 to vector<256x128xbf16>
    %73 = arith.select %71, %72, %69 : vector<256x128xi1>, vector<256x128xbf16>
    %c6 = arith.constant 6 : index
    %c0_29 = arith.constant 0 : index
    %c0_30 = arith.constant 0 : index
    %74 = vector.load %arg2[%c6, %c0_29, %c0_30] : memref<9x128x128xbf16, #tpu.memory_space<vmem>>, vector<1x128x128xbf16>
    %75 = vector.shape_cast %74 : vector<1x128x128xbf16> to vector<128x128xbf16>
    %cst_31 = arith.constant dense<0.000000e+00> : vector<256x128xf32>
    %76 = tpu.matmul %73, %75, %cst_31 {dimension_numbers = #tpu.dot_dimension_numbers<[1], [0], [0], [1], [0, 0, 1, 1], [], []>} : vector<256x128xbf16>, vector<128x128xbf16>, vector<256x128xf32> -> vector<256x128xf32>
    %77 = arith.addf %68, %76 : vector<256x128xf32>
    %78 = vector.extract_strided_slice %0 {offsets = [48, 0], sizes = [256, 128], strides = [1, 1]} : vector<320x128xbf16> to vector<256x128xbf16>
    %c7 = arith.constant 7 : index
    %c0_32 = arith.constant 0 : index
    %c0_33 = arith.constant 0 : index
    %79 = vector.load %arg2[%c7, %c0_32, %c0_33] : memref<9x128x128xbf16, #tpu.memory_space<vmem>>, vector<1x128x128xbf16>
    %80 = vector.shape_cast %79 : vector<1x128x128xbf16> to vector<128x128xbf16>
    %cst_34 = arith.constant dense<0.000000e+00> : vector<256x128xf32>
    %81 = tpu.matmul %78, %80, %cst_34 {dimension_numbers = #tpu.dot_dimension_numbers<[1], [0], [0], [1], [0, 0, 1, 1], [], []>} : vector<256x128xbf16>, vector<128x128xbf16>, vector<256x128xf32> -> vector<256x128xf32>
    %82 = arith.addf %77, %81 : vector<256x128xf32>
    %83 = vector.extract_strided_slice %0 {offsets = [49, 0], sizes = [256, 128], strides = [1, 1]} : vector<320x128xbf16> to vector<256x128xbf16>
    %cst_35 = arith.constant 0.000000e+00 : bf16
    %84 = vector.shape_cast %21 : vector<256x1xi1> to vector<256x1xi1>
    %85 = vector.broadcast %84 : vector<256x1xi1> to vector<256x128xi1>
    %86 = vector.broadcast %cst_35 : bf16 to vector<256x128xbf16>
    %87 = arith.select %85, %86, %83 : vector<256x128xi1>, vector<256x128xbf16>
    %c8 = arith.constant 8 : index
    %c0_36 = arith.constant 0 : index
    %c0_37 = arith.constant 0 : index
    %88 = vector.load %arg2[%c8, %c0_36, %c0_37] : memref<9x128x128xbf16, #tpu.memory_space<vmem>>, vector<1x128x128xbf16>
    %89 = vector.shape_cast %88 : vector<1x128x128xbf16> to vector<128x128xbf16>
    %cst_38 = arith.constant dense<0.000000e+00> : vector<256x128xf32>
    %90 = tpu.matmul %87, %89, %cst_38 {dimension_numbers = #tpu.dot_dimension_numbers<[1], [0], [0], [1], [0, 0, 1, 1], [], []>} : vector<256x128xbf16>, vector<128x128xbf16>, vector<256x128xf32> -> vector<256x128xf32>
    %91 = arith.addf %82, %90 : vector<256x128xf32>
    %c0_39 = arith.constant 0 : index
    %c0_40 = arith.constant 0 : index
    %92 = vector.load %arg3[%c0_39, %c0_40] : memref<1x128xf32, #tpu.memory_space<vmem>>, vector<1x128xf32>
    %93 = vector.broadcast %92 : vector<1x128xf32> to vector<256x128xf32>
    %94 = arith.addf %91, %93 : vector<256x128xf32>
    %cst_41 = arith.constant 5.000000e-01 : f32
    %95 = vector.broadcast %cst_41 : f32 to vector<256x128xf32>
    %96 = arith.mulf %95, %94 : vector<256x128xf32>
    %97 = math.tanh %96 : vector<256x128xf32>
    %cst_42 = arith.constant 5.000000e-01 : f32
    %98 = vector.broadcast %cst_42 : f32 to vector<256x128xf32>
    %99 = arith.mulf %98, %97 : vector<256x128xf32>
    %cst_43 = arith.constant 5.000000e-01 : f32
    %100 = vector.broadcast %cst_43 : f32 to vector<256x128xf32>
    %101 = arith.addf %99, %100 : vector<256x128xf32>
    %102 = arith.mulf %94, %101 : vector<256x128xf32>
    %c0_44 = arith.constant 0 : index
    %c0_45 = arith.constant 0 : index
    %103 = vector.load %arg4[%c0_44, %c0_45] : memref<256x128xbf16, #tpu.memory_space<vmem>>, vector<256x128xbf16>
    %104 = arith.extf %103 : vector<256x128xbf16> to vector<256x128xf32>
    %105 = arith.addf %102, %104 : vector<256x128xf32>
    %106 = arith.truncf %105 : vector<256x128xf32> to vector<256x128xbf16>
    %c0_46 = arith.constant 0 : index
    %c0_47 = arith.constant 0 : index
    %107 = vector.load %arg5[%c0_46, %c0_47] : memref<256x128xbf16, #tpu.memory_space<vmem>>, vector<256x128xbf16>
    tpu.vector_store %arg5[%c0_46, %c0_47], %106 {strides = array<i32>} : memref<256x128xbf16, #tpu.memory_space<vmem>>, vector<256x128xbf16>,
    return
  }
  func.func @transform_0(%arg0: i32) -> (i32, i32) {
    %c0_i32 = arith.constant 0 : i32
    %c0_i32_0 = arith.constant 0 : i32
    return %arg0, %c0_i32 : i32, i32
  }
  func.func @transform_1(%arg0: i32) -> (i32, i32, i32) {
    %c0_i32 = arith.constant 0 : i32
    %c0_i32_0 = arith.constant 0 : i32
    %c0_i32_1 = arith.constant 0 : i32
    %c0_i32_2 = arith.constant 0 : i32
    return %c0_i32, %c0_i32_0, %c0_i32_1 : i32, i32, i32
  }
  func.func @transform_2(%arg0: i32) -> (i32, i32) {
    %c0_i32 = arith.constant 0 : i32
    %c0_i32_0 = arith.constant 0 : i32
    %c0_i32_1 = arith.constant 0 : i32
    return %c0_i32, %c0_i32_0 : i32, i32
  }
  func.func @transform_3(%arg0: i32) -> (i32, i32) {
    %c0_i32 = arith.constant 0 : i32
    %c0_i32_0 = arith.constant 0 : i32
    return %arg0, %c0_i32 : i32, i32
  }
  func.func @transform_4(%arg0: i32) -> (i32, i32) {
    %c0_i32 = arith.constant 0 : i32
    %c0_i32_0 = arith.constant 0 : i32
    return %arg0, %c0_i32 : i32, i32
  }
}

module attributes {stable_mosaic.version = 11 : i64} {
  func.func @_mm2_bias_silu_kernel(%arg0: i32, %arg1: memref<512x128xbf16, #tpu.memory_space<vmem>>, %arg2: memref<128x128xbf16, #tpu.memory_space<vmem>>, %arg3: memref<512x128xbf16, #tpu.memory_space<vmem>>, %arg4: memref<128x128xbf16, #tpu.memory_space<vmem>>, %arg5: memref<1x128xf32, #tpu.memory_space<vmem>>, %arg6: memref<512x128xf32, #tpu.memory_space<vmem>>) attributes {dimension_semantics = [#tpu.dimension_semantics<parallel>], iteration_bounds = array<i64: 1>, scalar_prefetch = 0 : i64, scratch_operands = 0 : i64, tpu.core_type = #tpu.core_type<tc>, window_params = [{transform_indices = @transform_0, window_bounds = array<i64: 512, 128>}, {pipeline_mode = #tpu.pipeline_mode<synchronous>, transform_indices = @transform_1, window_bounds = array<i64: 128, 128>}, {transform_indices = @transform_2, window_bounds = array<i64: 512, 128>}, {pipeline_mode = #tpu.pipeline_mode<synchronous>, transform_indices = @transform_3, window_bounds = array<i64: 128, 128>}, {pipeline_mode = #tpu.pipeline_mode<synchronous>, transform_indices = @transform_4, window_bounds = array<i64: 1, 128>}, {transform_indices = @transform_5, window_bounds = array<i64: 512, 128>}]} {
    %c0 = arith.constant 0 : index
    %c0_0 = arith.constant 0 : index
    %0 = vector.load %arg1[%c0, %c0_0] : memref<512x128xbf16, #tpu.memory_space<vmem>>, vector<512x128xbf16>
    %c0_1 = arith.constant 0 : index
    %c0_2 = arith.constant 0 : index
    %1 = vector.load %arg2[%c0_1, %c0_2] : memref<128x128xbf16, #tpu.memory_space<vmem>>, vector<128x128xbf16>
    %cst = arith.constant dense<0.000000e+00> : vector<512x128xf32>
    %2 = tpu.matmul %0, %1, %cst {dimension_numbers = #tpu.dot_dimension_numbers<[1], [0], [0], [1], [0, 0, 1, 1], [], []>} : vector<512x128xbf16>, vector<128x128xbf16>, vector<512x128xf32> -> vector<512x128xf32>
    %c0_3 = arith.constant 0 : index
    %c0_4 = arith.constant 0 : index
    %3 = vector.load %arg3[%c0_3, %c0_4] : memref<512x128xbf16, #tpu.memory_space<vmem>>, vector<512x128xbf16>
    %c0_5 = arith.constant 0 : index
    %c0_6 = arith.constant 0 : index
    %4 = vector.load %arg4[%c0_5, %c0_6] : memref<128x128xbf16, #tpu.memory_space<vmem>>, vector<128x128xbf16>
    %cst_7 = arith.constant dense<0.000000e+00> : vector<512x128xf32>
    %5 = tpu.matmul %3, %4, %cst_7 {dimension_numbers = #tpu.dot_dimension_numbers<[1], [0], [0], [1], [0, 0, 1, 1], [], []>} : vector<512x128xbf16>, vector<128x128xbf16>, vector<512x128xf32> -> vector<512x128xf32>
    %6 = arith.addf %2, %5 : vector<512x128xf32>
    %c0_8 = arith.constant 0 : index
    %c0_9 = arith.constant 0 : index
    %7 = vector.load %arg5[%c0_8, %c0_9] : memref<1x128xf32, #tpu.memory_space<vmem>>, vector<1x128xf32>
    %8 = vector.broadcast %7 : vector<1x128xf32> to vector<512x128xf32>
    %9 = arith.addf %6, %8 : vector<512x128xf32>
    %cst_10 = arith.constant 5.000000e-01 : f32
    %10 = vector.broadcast %cst_10 : f32 to vector<512x128xf32>
    %11 = arith.mulf %10, %9 : vector<512x128xf32>
    %12 = math.tanh %11 : vector<512x128xf32>
    %cst_11 = arith.constant 5.000000e-01 : f32
    %13 = vector.broadcast %cst_11 : f32 to vector<512x128xf32>
    %14 = arith.mulf %13, %12 : vector<512x128xf32>
    %cst_12 = arith.constant 5.000000e-01 : f32
    %15 = vector.broadcast %cst_12 : f32 to vector<512x128xf32>
    %16 = arith.addf %14, %15 : vector<512x128xf32>
    %17 = arith.mulf %9, %16 : vector<512x128xf32>
    %c0_13 = arith.constant 0 : index
    %c0_14 = arith.constant 0 : index
    %18 = vector.load %arg6[%c0_13, %c0_14] : memref<512x128xf32, #tpu.memory_space<vmem>>, vector<512x128xf32>
    tpu.vector_store %arg6[%c0_13, %c0_14], %17 {strides = array<i32>} : memref<512x128xf32, #tpu.memory_space<vmem>>, vector<512x128xf32>,
    return
  }
  func.func @transform_0(%arg0: i32) -> (i32, i32) {
    %c0_i32 = arith.constant 0 : i32
    %c0_i32_0 = arith.constant 0 : i32
    return %arg0, %c0_i32 : i32, i32
  }
  func.func @transform_1(%arg0: i32) -> (i32, i32) {
    %c0_i32 = arith.constant 0 : i32
    %c0_i32_0 = arith.constant 0 : i32
    %c0_i32_1 = arith.constant 0 : i32
    return %c0_i32, %c0_i32_0 : i32, i32
  }
  func.func @transform_2(%arg0: i32) -> (i32, i32) {
    %c1_i32 = arith.constant 1 : i32
    %c0_i32 = arith.constant 0 : i32
    return %arg0, %c1_i32 : i32, i32
  }
  func.func @transform_3(%arg0: i32) -> (i32, i32) {
    %c0_i32 = arith.constant 0 : i32
    %c0_i32_0 = arith.constant 0 : i32
    %c0_i32_1 = arith.constant 0 : i32
    return %c0_i32, %c0_i32_0 : i32, i32
  }
  func.func @transform_4(%arg0: i32) -> (i32, i32) {
    %c0_i32 = arith.constant 0 : i32
    %c0_i32_0 = arith.constant 0 : i32
    %c0_i32_1 = arith.constant 0 : i32
    return %c0_i32, %c0_i32_0 : i32, i32
  }
  func.func @transform_5(%arg0: i32) -> (i32, i32) {
    %c0_i32 = arith.constant 0 : i32
    %c0_i32_0 = arith.constant 0 : i32
    return %arg0, %c0_i32 : i32, i32
  }
}

</mosaic_0001>

<bundles_post_ra>
// kernel: c3_forward.5
= control target key start
LH: loop header
LB: loop body
LE: loop exit
PB: predicated region body
PF: predicated region fallthrough
CT: control target
= control target key end

     0   :  { %s1539_s12 = smov 0   ;;  %s1541_s13 = smov 0   ;;  %s1892_s0 = inlined_call_operand.vmem [shape: bf16[512,256], index: 0, kind: input, shape index: {}]   ;;  %s1893_s1 = inlined_call_operand.vmem [shape: bf16[128,128], index: 1, kind: input, shape index: {}]   ;;  %s1894_s2 = inlined_call_operand.vmem [shape: f32[1,128], index: 2, kind: input, shape index: {}]   ;;  %s1895_s3 = inlined_call_operand.vmem [shape: bf16[640,128], index: 3, kind: output, shape index: {}]  }
   0x1   :  { %s1543_s14 = smov 0  }
   0x2 LB: > { %s1093_s15 = sadd.s32 4294967295, %s1516_s14   ;;  %s1556_s16 = sadd.s32 1, %s1516_s14   ;;  %s1516_s14 = sphi %s1543_s14, %s1898_s14   ;;  %s1512_s13 = sphi %s1541_s13, %s1897_s13   ;;  %s1508_s12 = sphi %s1539_s12, %s1896_s12  }
   0x3   : > { %s17_s17 = ssub.s32 %s1516_s14, %s1556_s16  ;;  %s20_s18 = sadd.s32 1, %s1512_s13 }
   0x4   : > { %p18_p0 = scmp.eq.s32.totalorder %s17_s17, 0  ;;  %p27_p1 = scmp.ne.s32.totalorder %s1512_s13, %s1508_s12 }
   0x5   : > { %p28_p2 = scmp.eq.s32.totalorder %s1516_s14, 0  ;;  %p1096_p4 = scmp.ge.s32.totalorder %s1516_s14, 2 }
   0x6   : > { %s1565_s19 = scalar_select %p18_p0, %s1512_s13, %s20_s18  }
   0x7   : > { %p29_p3 = por %p28_p2, %p27_p1  ;;  %127 = sbr.rel (%p1096_p4) target bundleno = 37 (0x25), region = 24 }
   0xc   : > { %130 = sbr.rel (!%p29_p3) target bundleno = 37 (0x25), region = 28  ;;  %s132_s20 = sand.u32 (%p29_p3), 1, %s1512_s13  }
   0xd   : > { %s1164_s21 = sshll.u32 (%p29_p3), %s1516_s14, 8  ;;  %s1097_s22 = sshll.u32 (%p29_p3), %s132_s20, 7 }
   0xe   : > { %s1573_s25 = scalar_lea.vmem (%p29_p3), %s1892_s0, %s1164_s21  ;;  %s1577_s26 = scalar_lea.vmem (%p29_p3), [#allocation2], %s1097_s22 }
   0xf   : > { %v155_v0 = vld [vmem:[%s1573_s25] sm:$0xf] (%p29_p3)  ;;  %v157_v1 = vld [vmem:[%s1573_s25 + $0x8] sm:$0xf] (%p29_p3)  ;;  %v159_v2 = vld [vmem:[%s1573_s25 + $0x10] sm:$0xf] (%p29_p3) }
  0x10   : > { %156 = vst [vmem:[%s1577_s26] sm:$0xf] (%p29_p3), %v155_v0  ;;  %158 = vst [vmem:[%s1577_s26 + $0x4] sm:$0xf] (%p29_p3), %v157_v1  ;;  %v161_v3 = vld [vmem:[%s1573_s25 + $0x18] sm:$0xf] (%p29_p3) }
  0x11   : > { %v163_v4 = vld [vmem:[%s1573_s25 + $0x20] sm:$0xf]  ;;  %160 = vst [vmem:[%s1577_s26 + $0x8] sm:$0xf] %v159_v2  ;;  %162 = vst [vmem:[%s1577_s26 + $0xc] sm:$0xf] %v161_v3 }
  0x12   : > { %164 = vst [vmem:[%s1577_s26 + $0x10] sm:$0xf] %v163_v4  ;;  %v165_v5 = vld [vmem:[%s1573_s25 + $0x28] sm:$0xf]  ;;  %v167_v6 = vld [vmem:[%s1573_s25 + $0x30] sm:$0xf] }
  0x13   : > { %v169_v7 = vld [vmem:[%s1573_s25 + $0x38] sm:$0xf]  ;;  %166 = vst [vmem:[%s1577_s26 + $0x14] sm:$0xf] %v165_v5  ;;  %168 = vst [vmem:[%s1577_s26 + $0x18] sm:$0xf] %v167_v6 }
  0x14   : > { %170 = vst [vmem:[%s1577_s26 + $0x1c] sm:$0xf] %v169_v7  ;;  %v171_v8 = vld [vmem:[%s1573_s25 + $0x40] sm:$0xf]  ;;  %v173_v9 = vld [vmem:[%s1573_s25 + $0x48] sm:$0xf] }
  0x15   : > { %v175_v10 = vld [vmem:[%s1573_s25 + $0x50] sm:$0xf]  ;;  %172 = vst [vmem:[%s1577_s26 + $0x20] sm:$0xf] %v171_v8  ;;  %174 = vst [vmem:[%s1577_s26 + $0x24] sm:$0xf] %v173_v9 }
  0x16   : > { %176 = vst [vmem:[%s1577_s26 + $0x28] sm:$0xf] %v175_v10  ;;  %v177_v11 = vld [vmem:[%s1573_s25 + $0x58] sm:$0xf]  ;;  %v179_v12 = vld [vmem:[%s1573_s25 + $0x60] sm:$0xf] }
  0x17   : > { %v181_v13 = vld [vmem:[%s1573_s25 + $0x68] sm:$0xf]  ;;  %178 = vst [vmem:[%s1577_s26 + $0x2c] sm:$0xf] %v177_v11  ;;  %180 = vst [vmem:[%s1577_s26 + $0x30] sm:$0xf] %v179_v12 }
  0x18   : > { %182 = vst [vmem:[%s1577_s26 + $0x34] sm:$0xf] %v181_v13  ;;  %v183_v14 = vld [vmem:[%s1573_s25 + $0x70] sm:$0xf]  ;;  %v185_v15 = vld [vmem:[%s1573_s25 + $0x78] sm:$0xf] }
  0x19   : > { %v187_v16 = vld [vmem:[%s1573_s25 + $0x80] sm:$0xf]  ;;  %184 = vst [vmem:[%s1577_s26 + $0x38] sm:$0xf] %v183_v14  ;;  %186 = vst [vmem:[%s1577_s26 + $0x3c] sm:$0xf] %v185_v15 }
  0x1a   : > { %188 = vst [vmem:[%s1577_s26 + $0x40] sm:$0xf] %v187_v16  ;;  %v189_v17 = vld [vmem:[%s1573_s25 + $0x88] sm:$0xf]  ;;  %v191_v18 = vld [vmem:[%s1573_s25 + $0x90] sm:$0xf] }
  0x1b   : > { %v193_v19 = vld [vmem:[%s1573_s25 + $0x98] sm:$0xf]  ;;  %190 = vst [vmem:[%s1577_s26 + $0x44] sm:$0xf] %v189_v17  ;;  %192 = vst [vmem:[%s1577_s26 + $0x48] sm:$0xf] %v191_v18 }
  0x1c   : > { %194 = vst [vmem:[%s1577_s26 + $0x4c] sm:$0xf] %v193_v19  ;;  %v195_v20 = vld [vmem:[%s1573_s25 + $0xa0] sm:$0xf]  ;;  %v197_v21 = vld [vmem:[%s1573_s25 + $0xa8] sm:$0xf] }
  0x1d   : > { %v199_v22 = vld [vmem:[%s1573_s25 + $0xb0] sm:$0xf]  ;;  %196 = vst [vmem:[%s1577_s26 + $0x50] sm:$0xf] %v195_v20  ;;  %198 = vst [vmem:[%s1577_s26 + $0x54] sm:$0xf] %v197_v21 }
  0x1e   : > { %200 = vst [vmem:[%s1577_s26 + $0x58] sm:$0xf] %v199_v22  ;;  %v201_v23 = vld [vmem:[%s1573_s25 + $0xb8] sm:$0xf]  ;;  %v203_v24 = vld [vmem:[%s1573_s25 + $0xc0] sm:$0xf] }
  0x1f   : > { %v205_v25 = vld [vmem:[%s1573_s25 + $0xc8] sm:$0xf]  ;;  %202 = vst [vmem:[%s1577_s26 + $0x5c] sm:$0xf] %v201_v23  ;;  %204 = vst [vmem:[%s1577_s26 + $0x60] sm:$0xf] %v203_v24 }
  0x20   : > { %206 = vst [vmem:[%s1577_s26 + $0x64] sm:$0xf] %v205_v25  ;;  %v207_v26 = vld [vmem:[%s1573_s25 + $0xd0] sm:$0xf]  ;;  %v209_v27 = vld [vmem:[%s1573_s25 + $0xd8] sm:$0xf] }
  0x21   : > { %v211_v28 = vld [vmem:[%s1573_s25 + $0xe0] sm:$0xf]  ;;  %208 = vst [vmem:[%s1577_s26 + $0x68] sm:$0xf] %v207_v26  ;;  %210 = vst [vmem:[%s1577_s26 + $0x6c] sm:$0xf] %v209_v27 }
  0x22   : > { %212 = vst [vmem:[%s1577_s26 + $0x70] sm:$0xf] %v211_v28  ;;  %v213_v29 = vld [vmem:[%s1573_s25 + $0xe8] sm:$0xf]  ;;  %v215_v30 = vld [vmem:[%s1573_s25 + $0xf0] sm:$0xf] }
  0x23   : > { %v217_v31 = vld [vmem:[%s1573_s25 + $0xf8] sm:$0xf]  ;;  %214 = vst [vmem:[%s1577_s26 + $0x74] sm:$0xf] %v213_v29  ;;  %216 = vst [vmem:[%s1577_s26 + $0x78] sm:$0xf] %v215_v30 }
  0x24   : > { %218 = vst [vmem:[%s1577_s26 + $0x7c] sm:$0xf] %v217_v31 }
  0x25 PF: > { %p1101_p5 = scmp.ge.s32.totalorder %s1516_s14, 1  ;;  %p305_p6 = scmp.lt.s32.totalorder %s1516_s14, 3 }
  0x27   : > { %p306_p7 = pnand %p1101_p5, %p305_p6 }
  0x28   : > { %s312_s29 = sand.u32 (!%p306_p7), 1, %s1508_s12   ;;  %s336_s24 = smul.u32 (!%p306_p7), 40, %s1093_s15 }
  0x29   : > { %309 = sbr.rel (%p306_p7) target bundleno = 343 (0x157), region = 69  ;;  %s1102_s5 = sshll.u32 (!%p306_p7), %s312_s29, 7 }
  0x2a   : > { %s1656_s10 = scalar_lea.vmem (!%p306_p7), [#allocation2], %s1102_s5  ;;  %p337_p8 = scmp.lt.s32.totalorder (!%p306_p7), %s336_s24, 79 }
  0x2e   : > { %v1406_v32 = vld [vmem:[%s1893_s1 + $0x38] sm:$0xff]   ;;  %v1407_v33 = vld [vmem:[%s1893_s1 + $0x30] sm:$0xff]   ;;  %v1408_v34 = vld [vmem:[%s1893_s1 + $0x28] sm:$0xff]   ;;  %s1900_s24 = smov (!%p337_p8, %s336_s24), 79  ;;  %v1518_v56 = vmov 0  }
  0x2f   : > { %1317 = vmatprep.subr.bf16.mxu0 %v1406_v32  ;;  %1365 = vmatprep.subr.bf16.mxu1 %v1406_v32  ;;  %v1409_v35 = vld [vmem:[%s1893_s1 + $0x20] sm:$0xff]   ;;  %v1410_v38 = vld [vmem:[%s1893_s1 + $0x18] sm:$0xff]   ;;  %v1411_v39 = vld [vmem:[%s1893_s1 + $0x10] sm:$0xff]   ;;  %s1103_s25 = sshll.u32 %s1900_s24, 2 }
  0x30   : > { %1318 = vmatpush3.bf16.msra.mxu0 %v1406_v32  ;;  %1373 = vmatpush3.bf16.msra.mxu1 %v1406_v32  ;;  %v1414_v36 = vld [vmem:[%s1656_s10] sm:$0xff]   ;;  %v1412_v40 = vld [vmem:[%s1893_s1 + $0x8] sm:$0xff]   ;;  %v1418_v44 = vld [vmem:[%s1656_s10 + $0x10] sm:$0xff]   ;;  %s1691_s28 = scalar_lea.vmem %s1895_s3, %s1103_s25 }
  0x31   : > { %1319 = vmatprep.subr.bf16.mxu0 %v1407_v33  ;;  %1366 = vmatprep.subr.bf16.mxu1 %v1407_v33  ;;  %v1415_v37 = vld [vmem:[%s1656_s10 + $0x40] sm:$0xff]   ;;  %v1416_v42 = vld [vmem:[%s1656_s10 + $0x8] sm:$0xff]   ;;  %v1419_v45 = vld [vmem:[%s1656_s10 + $0x50] sm:$0xff]   ;;  %879 = vst [vmem:[%s1691_s28] sm:$0xf] %v1518_v56 }
  0x32   : > { %1333 = vmatprep.mubr.bf16.mxu0 %v1414_v36  ;;  %1349 = vmatprep.mubr.bf16.mxu1 %v1415_v37  ;;  %v1413_v41 = vld [vmem:[%s1893_s1] sm:$0xff]   ;;  %v1417_v43 = vld [vmem:[%s1656_s10 + $0x48] sm:$0xff]   ;;  %v1420_v46 = vld [vmem:[%s1656_s10 + $0x18] sm:$0xff]   ;;  %880 = vst [vmem:[%s1691_s28 + $0x4] sm:$0xf] %v1518_v56 }
  0x33   : > { %v1421_v47 = vld [vmem:[%s1656_s10 + $0x58] sm:$0xff]   ;;  %v1422_v48 = vld [vmem:[%s1656_s10 + $0x20] sm:$0xff]   ;;  %v1424_v50 = vld [vmem:[%s1656_s10 + $0x28] sm:$0xff]   ;;  %881 = vst [vmem:[%s1691_s28 + $0x8] sm:$0xf] %v1518_v56 }
  0x34   : > { %1320 = vmatpush3.bf16.msra.mxu0 %v1407_v33  ;;  %1374 = vmatpush3.bf16.msra.mxu1 %v1407_v33  ;;  %v1423_v49 = vld [vmem:[%s1656_s10 + $0x60] sm:$0xff]   ;;  %v1425_v51 = vld [vmem:[%s1656_s10 + $0x68] sm:$0xff]   ;;  %v1426_v52 = vld [vmem:[%s1656_s10 + $0x30] sm:$0xff]   ;;  %882 = vst [vmem:[%s1691_s28 + $0xc] sm:$0xf] %v1518_v56 }
  0x35   : > { %1321 = vmatprep.subr.bf16.mxu0 %v1408_v34  ;;  %1367 = vmatprep.subr.bf16.mxu1 %v1408_v34  ;;  %v1427_v53 = vld [vmem:[%s1656_s10 + $0x70] sm:$0xff]   ;;  %v1428_v54 = vld [vmem:[%s1656_s10 + $0x38] sm:$0xff]   ;;  %1027 = vst [vmem:[%s1691_s28 + $0x90] sm:$0xf] %v1518_v56  ;;  %1028 = vst [vmem:[%s1691_s28 + $0x94] sm:$0xf] %v1518_v56 }
  0x36   : > { %v1429_v55 = vld [vmem:[%s1656_s10 + $0x78] sm:$0xff]   ;;  %1029 = vst [vmem:[%s1691_s28 + $0x98] sm:$0xf] %v1518_v56  ;;  %1030 = vst [vmem:[%s1691_s28 + $0x9c] sm:$0xf] %v1518_v56 }
  0x37   : > { %v1704_v57 = vld [vmem:[%s1894_s2] ss:$0 sm:$0xff] }
  0x38   : > { %1322 = vmatpush3.bf16.msra.mxu0 %v1408_v34  ;;  %1375 = vmatpush3.bf16.msra.mxu1 %v1408_v34 }
  0x39   : > { %1323 = vmatprep.subr.bf16.mxu0 %v1409_v35  ;;  %1368 = vmatprep.subr.bf16.mxu1 %v1409_v35 }
  0x3c   : > { %1324 = vmatpush3.bf16.msra.mxu0 %v1409_v35  ;;  %1376 = vmatpush3.bf16.msra.mxu1 %v1409_v35 }
  0x3d   : > { %1325 = vmatprep.subr.bf16.mxu0 %v1410_v38  ;;  %1369 = vmatprep.subr.bf16.mxu1 %v1410_v38 }
  0x40   : > { %1326 = vmatpush3.bf16.msra.mxu0 %v1410_v38  ;;  %1377 = vmatpush3.bf16.msra.mxu1 %v1410_v38 }
  0x41   : > { %1327 = vmatprep.subr.bf16.mxu0 %v1411_v39  ;;  %1370 = vmatprep.subr.bf16.mxu1 %v1411_v39 }
  0x44   : > { %1328 = vmatpush3.bf16.msra.mxu0 %v1411_v39  ;;  %1378 = vmatpush3.bf16.msra.mxu1 %v1411_v39 }
  0x45   : > { %1329 = vmatprep.subr.bf16.mxu0 %v1412_v40  ;;  %1371 = vmatprep.subr.bf16.mxu1 %v1412_v40 }
  0x48   : > { %1330 = vmatpush3.bf16.msra.mxu0 %v1412_v40  ;;  %1379 = vmatpush3.bf16.msra.mxu1 %v1412_v40 }
  0x49   : > { %1331 = vmatprep.subr.bf16.mxu0 %v1413_v41  ;;  %1372 = vmatprep.subr.bf16.mxu1 %v1413_v41 }
  0x4c   : > { %1332 = vmatpush3.bf16.msra.mxu0 %v1413_v41  ;;  %1380 = vmatpush3.bf16.msra.mxu1 %v1413_v41 }
  0x4f   : > { %1334 = vmatmul.mubr.bf16.vlgmr.msra.gmra.mxu0 %v1416_v42  ;;  %1350 = vmatmul.mubr.bf16.vlgmr.msra.gmra.mxu1 %v1417_v43 }
  0x50   : > { %1337 = vmatprep.mubr.bf16.mxu0 %v1418_v44  ;;  %1353 = vmatprep.mubr.bf16.mxu1 %v1419_v45 }
  0x57   : > { %1338 = vmatmul.mubr.bf16.gmra.mxu0 %v1420_v46  ;;  %1354 = vmatmul.mubr.bf16.gmra.mxu1 %v1421_v47 }
  0x58   : > { %1341 = vmatprep.mubr.bf16.mxu0 %v1422_v48  ;;  %1357 = vmatprep.mubr.bf16.mxu1 %v1423_v49 }
  0x5f   : > { %1342 = vmatmul.mubr.bf16.gmra.mxu0 %v1424_v50  ;;  %1358 = vmatmul.mubr.bf16.gmra.mxu1 %v1425_v51 }
  0x60   : > { %1345 = vmatprep.mubr.bf16.mxu0 %v1426_v52  ;;  %1361 = vmatprep.mubr.bf16.mxu1 %v1427_v53 }
  0x67   : > { %1346 = vmatmul.mubr.bf16.gmra.mxu0 %v1428_v54  ;;  %1362 = vmatmul.mubr.bf16.gmra.mxu1 %v1429_v55 }
 0x10f   : > { %v1335_v58 = vpop.f32.mrf.mxu0  ;;  %v1351_v59 = vpop.f32.mrf.mxu1 }
 0x110   : > { %v1707_v60 = vadd.f32 %v1335_v58, %v1704_v57  ;;  %v1710_v61 = vadd.f32 %v1351_v59, %v1704_v57 }
 0x111   : > { %v576_v62 = vpop.f32.mrf.mxu0  ;;  %v640_v63 = vpop.f32.mrf.mxu1 }
 0x112   : > { %v705_v0 = vmul.f32 0.5, %v1707_v60  ;;  %v721_v1 = vmul.f32 0.5, %v1710_v61  ;;  %v1715_v2 = vadd.f32 %v1704_v57, %v576_v62  ;;  %v1718_v3 = vadd.f32 %v1704_v57, %v640_v63 }
 0x113   : > { %v1336_v4 = vpop.f32.mrf.mxu0  ;;  %v1352_v5 = vpop.f32.mrf.mxu1 }
 0x114   : > { %1430 = vtanh.f32 %v705_v0  ;;  %v703_v6 = vmul.f32 0.5, %v1715_v2  ;;  %v719_v7 = vmul.f32 0.5, %v1718_v3  ;;  %v1723_v8 = vadd.f32 %v1336_v4, %v1704_v57 }
 0x115   : > { %1432 = vtanh.f32 %v721_v1  ;;  %v1726_v9 = vadd.f32 %v1352_v5, %v1704_v57  ;;  %v579_v10 = vpop.f32.mrf.mxu0  ;;  %v643_v11 = vpop.f32.mrf.mxu1 }
 0x116   : > { %1434 = vtanh.f32 %v703_v6  ;;  %v706_v12 = vmul.f32 0.5, %v1723_v8  ;;  %v1730_v13 = vadd.f32 %v1704_v57, %v579_v10  ;;  %v1733_v14 = vadd.f32 %v1704_v57, %v643_v11 }
 0x117   : > { %1436 = vtanh.f32 %v719_v7  ;;  %v722_v15 = vmul.f32 0.5, %v1726_v9  ;;  %v1339_v16 = vpop.f32.mrf.mxu0  ;;  %v1355_v17 = vpop.f32.mrf.mxu1 }
 0x118   : > { %1438 = vtanh.f32 %v706_v12  ;;  %v704_v18 = vmul.f32 0.5, %v1730_v13  ;;  %v720_v19 = vmul.f32 0.5, %v1733_v14  ;;  %v1739_v20 = vadd.f32 %v1339_v16, %v1704_v57 }
 0x119   : > { %1440 = vtanh.f32 %v722_v15  ;;  %v1742_v21 = vadd.f32 %v1355_v17, %v1704_v57  ;;  %v592_v22 = vpop.f32.mrf.mxu0  ;;  %v656_v23 = vpop.f32.mrf.mxu1 }
 0x11a   : > { %1442 = vtanh.f32 %v704_v18  ;;  %v709_v24 = vmul.f32 0.5, %v1739_v20  ;;  %v1746_v25 = vadd.f32 %v1704_v57, %v592_v22  ;;  %v1749_v26 = vadd.f32 %v1704_v57, %v656_v23 }
 0x11b   : > { %1444 = vtanh.f32 %v720_v19  ;;  %v725_v27 = vmul.f32 0.5, %v1742_v21  ;;  %v1340_v28 = vpop.f32.mrf.mxu0  ;;  %v1356_v29 = vpop.f32.mrf.mxu1 }
 0x11c   : > { %1446 = vtanh.f32 %v709_v24  ;;  %v707_v30 = vmul.f32 0.5, %v1746_v25  ;;  %v723_v31 = vmul.f32 0.5, %v1749_v26  ;;  %v1755_v32 = vadd.f32 %v1340_v28, %v1704_v57 }
 0x11d   : > { %1448 = vtanh.f32 %v725_v27  ;;  %v1758_v33 = vadd.f32 %v1356_v29, %v1704_v57  ;;  %v595_v34 = vpop.f32.mrf.mxu0  ;;  %v659_v35 = vpop.f32.mrf.mxu1 }
 0x11e   : > { %1450 = vtanh.f32 %v707_v30  ;;  %v710_v36 = vmul.f32 0.5, %v1755_v32  ;;  %v1762_v37 = vadd.f32 %v1704_v57, %v595_v34  ;;  %v1765_v38 = vadd.f32 %v1704_v57, %v659_v35 }
 0x11f   : > { %1452 = vtanh.f32 %v723_v31  ;;  %v726_v39 = vmul.f32 0.5, %v1758_v33  ;;  %v1343_v40 = vpop.f32.mrf.mxu0  ;;  %v1359_v41 = vpop.f32.mrf.mxu1 }
 0x120   : > { %1454 = vtanh.f32 %v710_v36  ;;  %v708_v42 = vmul.f32 0.5, %v1762_v37  ;;  %v724_v43 = vmul.f32 0.5, %v1765_v38  ;;  %v1771_v44 = vadd.f32 %v1343_v40, %v1704_v57 }
 0x121   : > { %v1431_v45 = vpop.eup %1430  ;;  %1456 = vtanh.f32 %v726_v39  ;;  %v1774_v46 = vadd.f32 %v1359_v41, %v1704_v57  ;;  %v608_v47 = vpop.f32.mrf.mxu0 }
 0x122   : > { %v672_v48 = vpop.f32.mrf.mxu1  ;;  %v1433_v49 = vpop.eup %1432  ;;  %v769_v50 = vmul.f32 0.5, %v1431_v45  ;;  %1458 = vtanh.f32 %v708_v42  ;;  %v713_v51 = vmul.f32 0.5, %v1771_v44  ;;  %v1778_v52 = vadd.f32 %v1704_v57, %v608_v47 }
 0x123   : > { %v1435_v53 = vpop.eup %1434  ;;  %v785_v54 = vmul.f32 0.5, %v1433_v49  ;;  %1460 = vtanh.f32 %v724_v43  ;;  %v729_v55 = vmul.f32 0.5, %v1774_v46  ;;  %v1782_v56 = vadd.f32 %v1704_v57, %v672_v48  ;;  %v1344_v63 = vpop.f32.mrf.mxu0 }
 0x124   : > { %v1437_v58 = vpop.eup %1436  ;;  %v801_v59 = vadd.f32 0.5, %v769_v50  ;;  %v767_v62 = vmul.f32 0.5, %v1435_v53  ;;  %v1360_v0 = vpop.f32.mrf.mxu1  ;;  %1462 = vtanh.f32 %v713_v51  ;;  %v711_v11 = vmul.f32 0.5, %v1778_v52 }
 0x125   : > { %v1439_v1 = vpop.eup %1438  ;;  %v817_v4 = vadd.f32 0.5, %v785_v54  ;;  %v783_v5 = vmul.f32 0.5, %v1437_v58  ;;  %1464 = vtanh.f32 %v729_v55  ;;  %v727_v17 = vmul.f32 0.5, %v1782_v56  ;;  %v611_v27 = vpop.f32.mrf.mxu0 }
 0x126   : > { %v1441_v6 = vpop.eup %1440  ;;  %v799_v7 = vadd.f32 0.5, %v767_v62  ;;  %v770_v10 = vmul.f32 0.5, %v1439_v1  ;;  %v833_v19 = vmul.f32 %v801_v59, %v1707_v60  ;;  %v1788_v24 = vadd.f32 %v1344_v63, %v1704_v57  ;;  %v675_v28 = vpop.f32.mrf.mxu1 }
 0x127   : > { %v1443_v12 = vpop.eup %1442  ;;  %v815_v15 = vadd.f32 0.5, %v783_v5  ;;  %v786_v16 = vmul.f32 0.5, %v1441_v6  ;;  %v849_v30 = vmul.f32 %v817_v4, %v1710_v61  ;;  %v1792_v35 = vadd.f32 %v1360_v0, %v1704_v57  ;;  %v1347_v53 = vpop.f32.mrf.mxu0 }
 0x128   : > { %v1445_v18 = vpop.eup %1444  ;;  %v802_v22 = vadd.f32 0.5, %v770_v10  ;;  %v768_v23 = vmul.f32 0.5, %v1443_v12  ;;  %v831_v39 = vmul.f32 %v799_v7, %v1715_v2  ;;  %v714_v2 = vmul.f32 0.5, %v1788_v24 }
 0x129   : > { %v1447_v29 = vpop.eup %1446  ;;  %v818_v31 = vadd.f32 0.5, %v786_v16  ;;  %v784_v34 = vmul.f32 0.5, %v1445_v18  ;;  %v847_v43 = vmul.f32 %v815_v15, %v1718_v3  ;;  %1466 = vtanh.f32 %v711_v11  ;;  %v624_v12 = vpop.f32.mrf.mxu0 }
 0x12a   : > { %v1449_v36 = vpop.eup %1448  ;;  %v834_v60 = vmul.f32 %v802_v22, %v1723_v8  ;;  %v800_v40 = vadd.f32 0.5, %v768_v23  ;;  %v773_v41 = vmul.f32 0.5, %v1447_v29  ;;  %v1363_v8 = vpop.f32.mrf.mxu1  ;;  %1468 = vtanh.f32 %v727_v17 }
 0x12b   : > { %v1451_v42 = vpop.eup %1450  ;;  %v850_v45 = vmul.f32 %v818_v31, %v1726_v9  ;;  %v816_v47 = vadd.f32 0.5, %v784_v34  ;;  %v789_v61 = vmul.f32 0.5, %v1449_v36  ;;  %v730_v9 = vmul.f32 0.5, %v1792_v35 }
 0x12c   : > { %v1453_v48 = vpop.eup %1452  ;;  %v1205_v49 = vpack.c.bf16 %v834_v60, %v833_v19  ;;  %v832_v50 = vmul.f32 %v800_v40, %v1730_v13  ;;  %v771_v51 = vmul.f32 0.5, %v1451_v42  ;;  %v805_v63 = vadd.f32 0.5, %v773_v41  ;;  %v688_v15 = vpop.f32.mrf.mxu1 }
 0x12d   : > { %v1455_v54 = vpop.eup %1454  ;;  %v1245_v55 = vpack.c.bf16 %v850_v45, %v849_v30  ;;  %v848_v58 = vmul.f32 %v816_v47, %v1733_v14  ;;  %v787_v3 = vmul.f32 0.5, %v1453_v48  ;;  %v821_v4 = vadd.f32 0.5, %v789_v61  ;;  %v1348_v40 = vpop.f32.mrf.mxu0 }
 0x12e   : > { %v1457_v59 = vpop.eup %1456  ;;  %1278 = vst [vmem:[%s1691_s28 + $0x18] sm:$0xff] %v1205_v49   ;;  %v1200_v62 = vpack.c.bf16 %v832_v50, %v831_v39  ;;  %v774_v0 = vmul.f32 0.5, %v1455_v54  ;;  %v803_v14 = vadd.f32 0.5, %v771_v51  ;;  %1470 = vtanh.f32 %v714_v2 }
 0x12f   : > { %v1459_v13 = vpop.eup %1458  ;;  %1286 = vst [vmem:[%s1691_s28 + $0x58] sm:$0xff] %v1245_v55   ;;  %v1240_v1 = vpack.c.bf16 %v848_v58, %v847_v43  ;;  %v790_v5 = vmul.f32 0.5, %v1457_v59  ;;  %v819_v16 = vadd.f32 0.5, %v787_v3  ;;  %1472 = vtanh.f32 %v730_v9  ;;  %v627_v47 = vpop.f32.mrf.mxu0 }
 0x130   : > { %v1461_v6 = vpop.eup %1460  ;;  %1277 = vst [vmem:[%s1691_s28 + $0x10] sm:$0xff] %v1200_v62   ;;  %v806_v7 = vadd.f32 0.5, %v774_v0  ;;  %v772_v10 = vmul.f32 0.5, %v1459_v13  ;;  %v837_v11 = vmul.f32 %v805_v63, %v1739_v20  ;;  %v1809_v17 = vadd.f32 %v1704_v57, %v611_v27  ;;  %v1364_v27 = vpop.f32.mrf.mxu1 }
 0x131   : > { %1285 = vst [vmem:[%s1691_s28 + $0x50] sm:$0xff] %v1240_v1   ;;  %v822_v18 = vadd.f32 0.5, %v790_v5  ;;  %v788_v19 = vmul.f32 0.5, %v1461_v6  ;;  %v1463_v29 = vpop.eup %1462  ;;  %v853_v30 = vmul.f32 %v821_v4, %v1742_v21  ;;  %v1814_v36 = vadd.f32 %v1704_v57, %v675_v28 }
 0x132   : > { %v838_v22 = vmul.f32 %v806_v7, %v1755_v32  ;;  %v804_v23 = vadd.f32 0.5, %v772_v10  ;;  %v1465_v39 = vpop.eup %1464  ;;  %v835_v20 = vmul.f32 %v803_v14, %v1746_v25  ;;  %v851_v41 = vmul.f32 %v819_v16, %v1749_v26  ;;  %v691_v61 = vpop.f32.mrf.mxu1 }
 0x133   : > { %v854_v31 = vmul.f32 %v822_v18, %v1758_v33  ;;  %v820_v34 = vadd.f32 0.5, %v788_v19  ;;  %v712_v28 = vmul.f32 0.5, %v1809_v17  ;;  %v728_v45 = vmul.f32 0.5, %v1814_v36 }
 0x134   : > { %v1215_v32 = vpack.c.bf16 %v838_v22, %v837_v11  ;;  %v836_v60 = vmul.f32 %v804_v23, %v1762_v37  ;;  %v777_v25 = vmul.f32 0.5, %v1463_v29  ;;  %v1826_v37 = vadd.f32 %v1347_v53, %v1704_v57 }
 0x135   : > { %v1255_v21 = vpack.c.bf16 %v854_v31, %v853_v30  ;;  %v852_v42 = vmul.f32 %v820_v34, %v1765_v38  ;;  %1474 = vtanh.f32 %v712_v28  ;;  %v1829_v26 = vadd.f32 %v1363_v8, %v1704_v57 }
 0x136   : > { %1280 = vst [vmem:[%s1691_s28 + $0x28] sm:$0xff] %v1215_v32   ;;  %v1210_v33 = vpack.c.bf16 %v836_v60, %v835_v20  ;;  %v793_v38 = vmul.f32 0.5, %v1465_v39  ;;  %1476 = vtanh.f32 %v728_v45  ;;  %v1833_v48 = vadd.f32 %v1704_v57, %v624_v12  ;;  %v1467_v8 = vpop.eup %1466 }
 0x137   : > { %1288 = vst [vmem:[%s1691_s28 + $0x68] sm:$0xff] %v1255_v21   ;;  %v1250_v43 = vpack.c.bf16 %v852_v42, %v851_v41  ;;  %v1836_v49 = vadd.f32 %v1704_v57, %v688_v15  ;;  %v717_v50 = vmul.f32 0.5, %v1826_v37  ;;  %v733_v51 = vmul.f32 0.5, %v1829_v26  ;;  %v1469_v9 = vpop.eup %1468 }
 0x138   : > { %1279 = vst [vmem:[%s1691_s28 + $0x20] sm:$0xff] %v1210_v33   ;;  %v1841_v2 = vadd.f32 %v1348_v40, %v1704_v57  ;;  %v1844_v53 = vadd.f32 %v1364_v27, %v1704_v57  ;;  %v715_v54 = vmul.f32 0.5, %v1833_v48  ;;  %v1849_v58 = vadd.f32 %v1704_v57, %v627_v47 }
 0x139   : > { %1287 = vst [vmem:[%s1691_s28 + $0x60] sm:$0xff] %v1250_v43   ;;  %v731_v55 = vmul.f32 0.5, %v1836_v49  ;;  %v1852_v3 = vadd.f32 %v1704_v57, %v691_v61  ;;  %1478 = vtanh.f32 %v717_v50  ;;  %v809_v13 = vadd.f32 0.5, %v777_v25 }
 0x13a   : > { %v718_v59 = vmul.f32 0.5, %v1841_v2  ;;  %1480 = vtanh.f32 %v733_v51  ;;  %v734_v63 = vmul.f32 0.5, %v1844_v53  ;;  %v716_v4 = vmul.f32 0.5, %v1849_v58 }
 0x13b   : > { %v1471_v62 = vpop.eup %1470  ;;  %1482 = vtanh.f32 %v715_v54  ;;  %v825_v5 = vadd.f32 0.5, %v793_v38  ;;  %v732_v57 = vmul.f32 0.5, %v1852_v3  ;;  %v841_v10 = vmul.f32 %v809_v13, %v1771_v44 }
 0x13c   : > { %v1473_v0 = vpop.eup %1472  ;;  %v778_v1 = vmul.f32 0.5, %v1471_v62  ;;  %1484 = vtanh.f32 %v731_v55  ;;  %v775_v12 = vmul.f32 0.5, %v1467_v8  ;;  %v791_v18 = vmul.f32 0.5, %v1469_v9 }
 0x13d   : > { %v794_v6 = vmul.f32 0.5, %v1473_v0  ;;  %1486 = vtanh.f32 %v718_v59  ;;  %v857_v16 = vmul.f32 %v825_v5, %v1774_v46 }
 0x13e   : > { %v810_v14 = vadd.f32 0.5, %v778_v1  ;;  %1488 = vtanh.f32 %v734_v63  ;;  %v807_v30 = vadd.f32 0.5, %v775_v12  ;;  %v823_v34 = vadd.f32 0.5, %v791_v18 }
 0x13f   : > { %v826_v7 = vadd.f32 0.5, %v794_v6  ;;  %1490 = vtanh.f32 %v716_v4 }
 0x140   : > { %v842_v15 = vmul.f32 %v810_v14, %v1788_v24  ;;  %1492 = vtanh.f32 %v732_v57  ;;  %v839_v46 = vmul.f32 %v807_v30, %v1778_v52  ;;  %v855_v27 = vmul.f32 %v823_v34, %v1782_v56 }
 0x141   : > { %v858_v19 = vmul.f32 %v826_v7, %v1792_v35 }
 0x142   : > { %v1225_v11 = vpack.c.bf16 %v842_v15, %v841_v10  ;;  %v1475_v22 = vpop.eup %1474 }
 0x143   : > { %v1265_v23 = vpack.c.bf16 %v858_v19, %v857_v16  ;;  %v1477_v29 = vpop.eup %1476  ;;  %v776_v31 = vmul.f32 0.5, %v1475_v22 }
 0x144   : > { %1282 = vst [vmem:[%s1691_s28 + $0x38] sm:$0xff] %v1225_v11   ;;  %v792_v44 = vmul.f32 0.5, %v1477_v29 }
 0x145   : > { %1290 = vst [vmem:[%s1691_s28 + $0x78] sm:$0xff] %v1265_v23   ;;  %v808_v39 = vadd.f32 0.5, %v776_v31 }
 0x146   : > { %v1479_v20 = vpop.eup %1478  ;;  %v824_v24 = vadd.f32 0.5, %v792_v44 }
 0x147   : > { %v1481_v32 = vpop.eup %1480  ;;  %v840_v35 = vmul.f32 %v808_v39, %v1809_v17  ;;  %v781_v60 = vmul.f32 0.5, %v1479_v20 }
 0x148   : > { %v1483_v40 = vpop.eup %1482  ;;  %v856_v41 = vmul.f32 %v824_v24, %v1814_v36  ;;  %v797_v21 = vmul.f32 0.5, %v1481_v32 }
 0x149   : > { %v1485_v42 = vpop.eup %1484  ;;  %v1220_v33 = vpack.c.bf16 %v840_v35, %v839_v46  ;;  %v779_v28 = vmul.f32 0.5, %v1483_v40  ;;  %v813_v61 = vadd.f32 0.5, %v781_v60 }
 0x14a   : > { %v1487_v43 = vpop.eup %1486  ;;  %v1260_v45 = vpack.c.bf16 %v856_v41, %v855_v27  ;;  %v795_v25 = vmul.f32 0.5, %v1485_v42  ;;  %v829_v17 = vadd.f32 0.5, %v797_v21 }
 0x14b   : > { %v1489_v47 = vpop.eup %1488  ;;  %1281 = vst [vmem:[%s1691_s28 + $0x30] sm:$0xff] %v1220_v33   ;;  %v782_v52 = vmul.f32 0.5, %v1487_v43  ;;  %v811_v8 = vadd.f32 0.5, %v779_v28  ;;  %v845_v59 = vmul.f32 %v813_v61, %v1826_v37 }
 0x14c   : > { %v1491_v38 = vpop.eup %1490  ;;  %1289 = vst [vmem:[%s1691_s28 + $0x70] sm:$0xff] %v1260_v45   ;;  %v798_v50 = vmul.f32 0.5, %v1489_v47  ;;  %v827_v36 = vadd.f32 0.5, %v795_v25  ;;  %v861_v0 = vmul.f32 %v829_v17, %v1829_v26 }
 0x14d   : > { %v1493_v51 = vpop.eup %1492  ;;  %v814_v56 = vadd.f32 0.5, %v782_v52  ;;  %v780_v54 = vmul.f32 0.5, %v1491_v38  ;;  %v843_v4 = vmul.f32 %v811_v8, %v1833_v48 }
 0x14e   : > { %v830_v55 = vadd.f32 0.5, %v798_v50  ;;  %v796_v9 = vmul.f32 0.5, %v1493_v51  ;;  %v859_v57 = vmul.f32 %v827_v36, %v1836_v49 }
 0x14f   : > { %v846_v62 = vmul.f32 %v814_v56, %v1841_v2  ;;  %v812_v63 = vadd.f32 0.5, %v780_v54 }
 0x150   : > { %v862_v13 = vmul.f32 %v830_v55, %v1844_v53  ;;  %v828_v1 = vadd.f32 0.5, %v796_v9 }
 0x151   : > { %v1235_v5 = vpack.c.bf16 %v846_v62, %v845_v59  ;;  %v844_v6 = vmul.f32 %v812_v63, %v1849_v58 }
 0x152   : > { %v1275_v14 = vpack.c.bf16 %v862_v13, %v861_v0  ;;  %v860_v37 = vmul.f32 %v828_v1, %v1852_v3 }
 0x153   : > { %1284 = vst [vmem:[%s1691_s28 + $0x48] sm:$0xff] %v1235_v5   ;;  %v1230_v7 = vpack.c.bf16 %v844_v6, %v843_v4 }
 0x154   : > { %1292 = vst [vmem:[%s1691_s28 + $0x88] sm:$0xff] %v1275_v14   ;;  %v1270_v2 = vpack.c.bf16 %v860_v37, %v859_v57 }
 0x155   : > { %1283 = vst [vmem:[%s1691_s28 + $0x40] sm:$0xff] %v1230_v7  }
 0x156   : > { %1291 = vst [vmem:[%s1691_s28 + $0x80] sm:$0xff] %v1270_v2  }
 0x157 PF: > { %p10_p9 = scmp.ge.s32.totalorder %s1556_s16, 4   ;;  %s1896_s12 = smov %s1512_s13 }
 0x158   : > { %s1897_s13 = smov %s1565_s19  ;;  %s1898_s14 = smov %s1556_s16 }
 0x159   :  { %12 = sbr.rel (!%p10_p9) target bundleno = 2 (0x2), region = 108 }

// kernel: c3_forward.4
= control target key start
LH: loop header
LB: loop body
LE: loop exit
PB: predicated region body
PF: predicated region fallthrough
CT: control target
= control target key end

     0   :  { %vm358_vm0 = vcmask 1041408   ;;  %v2295_v1 = vmov 0   ;;  %vm261_vm1 = vcmask 31744   ;;  %v82_v36 = vlaneseq  ;;  %s3591_s1 = inlined_call_operand.vmem [shape: bf16[4,256], index: 1, kind: input, shape index: {}]   ;;  %s3592_s0 = inlined_call_operand.vmem [shape: bf16[512,4], index: 0, kind: input, shape index: {}]   ;;  %s3593_s2 = inlined_call_operand.vmem [shape: f32[1,256], index: 2, kind: input, shape index: {}]   ;;  %s3594_s3 = inlined_call_operand.vmem [shape: bf16[512,256], index: 3, kind: output, shape index: {}]  }
   0x1   :  { %v1842_v0 = vld.sshfl [vmem:[%s3591_s1] sm:$0x33 pattern:$0x76325410]  ;;  %397 = vmatprep.mubr.bf16.mxu0 %v2295_v1  ;;  %557 = vmatprep.mubr.bf16.mxu1 %v2295_v1  ;;  %v2009_v6 = vld [vmem:[%s3592_s0 + $0x8] sm:$0xff]   ;;  %v2011_v8 = vld [vmem:[%s3592_s0 + $0x10] sm:$0xff]  }
   0x2   :  { %v260_v2 = vcombine.high %v1842_v0, %v1842_v0  ;;  %v360_v3 = vsel %vm358_vm0, %v1842_v0, 0  ;;  %v2007_v4 = vld [vmem:[%s3592_s0] sm:$0xff]   ;;  %v2010_v7 = vld [vmem:[%s3592_s0 + $0x88] sm:$0xff]   ;;  %v2012_v9 = vld [vmem:[%s3592_s0 + $0x90] sm:$0xff]   ;;  %v83_v37 = vshrl.u32 %v82_v36, 7 }
   0x3   :  { %v2008_v5 = vld [vmem:[%s3592_s0 + $0x80] sm:$0xff]   ;;  %v2013_v10 = vld [vmem:[%s3592_s0 + $0x18] sm:$0xff]   ;;  %v2017_v14 = vld [vmem:[%s3592_s0 + $0x28] sm:$0xff]  }
   0x4   :  { %1843 = vmatprep.subr.msk.bf16.mxu0 %vm358_vm0, %v260_v2  ;;  %2004 = vmatprep.subr.msk.bf16.mxu1 %vm358_vm0, %v260_v2  ;;  %v2014_v11 = vld [vmem:[%s3592_s0 + $0x98] sm:$0xff]   ;;  %v2015_v12 = vld [vmem:[%s3592_s0 + $0x20] sm:$0xff]   ;;  %v2018_v15 = vld [vmem:[%s3592_s0 + $0xa8] sm:$0xff]   ;;  %v84_v38 = vsub.s32 0, %v83_v37  ;;  %v88_v40 = vsub.s32 1, %v83_v37 }
   0x5   :  { %380 = vmatpush1.bf16.msra.mxu0 %v360_v3  ;;  %2005 = vmatpush1.bf16.msra.mxu1 %v360_v3  ;;  %v2016_v13 = vld [vmem:[%s3592_s0 + $0xa0] sm:$0xff]   ;;  %v2019_v16 = vld [vmem:[%s3592_s0 + $0x30] sm:$0xff]   ;;  %v2021_v18 = vld [vmem:[%s3592_s0 + $0x38] sm:$0xff]  }
   0x6   :  { %v2020_v17 = vld [vmem:[%s3592_s0 + $0xb0] sm:$0xff]   ;;  %v2022_v19 = vld [vmem:[%s3592_s0 + $0xb8] sm:$0xff]   ;;  %v2023_v20 = vld [vmem:[%s3592_s0 + $0x40] sm:$0xff]  }
   0x7   :  { %v2024_v21 = vld [vmem:[%s3592_s0 + $0xc0] sm:$0xff]   ;;  %v2025_v22 = vld [vmem:[%s3592_s0 + $0x48] sm:$0xff]   ;;  %v2027_v24 = vld [vmem:[%s3592_s0 + $0x50] sm:$0xff]  }
   0x8   :  { %1844 = vmatmul.mubr.msk.bf16.vlgmr.msra.gmra.mxu0 %vm261_vm1, %v2007_v4  ;;  %1860 = vmatmul.mubr.msk.bf16.vlgmr.msra.gmra.mxu1 %vm261_vm1, %v2008_v5  ;;  %v2026_v23 = vld [vmem:[%s3592_s0 + $0xc8] sm:$0xff]   ;;  %v2028_v25 = vld [vmem:[%s3592_s0 + $0xd0] sm:$0xff]   ;;  %v2029_v26 = vld [vmem:[%s3592_s0 + $0x58] sm:$0xff]  }
   0x9   :  { %407 = vmatprep.mubr.bf16.mxu0 %v2295_v1  ;;  %567 = vmatprep.mubr.bf16.mxu1 %v2295_v1  ;;  %v2030_v27 = vld [vmem:[%s3592_s0 + $0xd8] sm:$0xff]   ;;  %v2031_v28 = vld [vmem:[%s3592_s0 + $0x60] sm:$0xff]   ;;  %v2033_v30 = vld [vmem:[%s3592_s0 + $0x68] sm:$0xff]  }
   0xa   :  { %v2032_v29 = vld [vmem:[%s3592_s0 + $0xe0] sm:$0xff]   ;;  %v2034_v31 = vld [vmem:[%s3592_s0 + $0xe8] sm:$0xff]   ;;  %v2035_v32 = vld [vmem:[%s3592_s0 + $0x70] sm:$0xff]  }
   0xb   :  { %v2036_v33 = vld [vmem:[%s3592_s0 + $0xf0] sm:$0xff]   ;;  %v2037_v34 = vld [vmem:[%s3592_s0 + $0x78] sm:$0xff]   ;;  %v80_v39 = vld [vmem:[%s3593_s2] sm:$0x3] }
   0xc   :  { %v2038_v35 = vld [vmem:[%s3592_s0 + $0xf8] sm:$0xff]   ;;  %v2482_v41 = vrot.slane %v80_v39, %v84_v38  ;;  %v2484_v42 = vrot.slane %v80_v39, %v88_v40 }
  0x10   :  { %1845 = vmatmul.mubr.msk.bf16.gmra.mxu0 %vm261_vm1, %v2009_v6  ;;  %1861 = vmatmul.mubr.msk.bf16.gmra.mxu1 %vm261_vm1, %v2010_v7 }
  0x11   :  { %417 = vmatprep.mubr.bf16.mxu0 %v2295_v1  ;;  %577 = vmatprep.mubr.bf16.mxu1 %v2295_v1 }
  0x18   :  { %1846 = vmatmul.mubr.msk.bf16.gmra.mxu0 %vm261_vm1, %v2011_v8  ;;  %1862 = vmatmul.mubr.msk.bf16.gmra.mxu1 %vm261_vm1, %v2012_v9 }
  0x19   :  { %427 = vmatprep.mubr.bf16.mxu0 %v2295_v1  ;;  %587 = vmatprep.mubr.bf16.mxu1 %v2295_v1 }
  0x20   :  { %1847 = vmatmul.mubr.msk.bf16.gmra.mxu0 %vm261_vm1, %v2013_v10  ;;  %1863 = vmatmul.mubr.msk.bf16.gmra.mxu1 %vm261_vm1, %v2014_v11 }
  0x21   :  { %437 = vmatprep.mubr.bf16.mxu0 %v2295_v1  ;;  %597 = vmatprep.mubr.bf16.mxu1 %v2295_v1 }
  0x28   :  { %1848 = vmatmul.mubr.msk.bf16.gmra.mxu0 %vm261_vm1, %v2015_v12  ;;  %1864 = vmatmul.mubr.msk.bf16.gmra.mxu1 %vm261_vm1, %v2016_v13 }
  0x29   :  { %447 = vmatprep.mubr.bf16.mxu0 %v2295_v1  ;;  %607 = vmatprep.mubr.bf16.mxu1 %v2295_v1 }
  0x30   :  { %1849 = vmatmul.mubr.msk.bf16.gmra.mxu0 %vm261_vm1, %v2017_v14  ;;  %1865 = vmatmul.mubr.msk.bf16.gmra.mxu1 %vm261_vm1, %v2018_v15 }
  0x31   :  { %457 = vmatprep.mubr.bf16.mxu0 %v2295_v1  ;;  %617 = vmatprep.mubr.bf16.mxu1 %v2295_v1 }
  0x38   :  { %1850 = vmatmul.mubr.msk.bf16.gmra.mxu0 %vm261_vm1, %v2019_v16  ;;  %1866 = vmatmul.mubr.msk.bf16.gmra.mxu1 %vm261_vm1, %v2020_v17 }
  0x39   :  { %467 = vmatprep.mubr.bf16.mxu0 %v2295_v1  ;;  %627 = vmatprep.mubr.bf16.mxu1 %v2295_v1 }
  0x40   :  { %1851 = vmatmul.mubr.msk.bf16.gmra.mxu0 %vm261_vm1, %v2021_v18  ;;  %1867 = vmatmul.mubr.msk.bf16.gmra.mxu1 %vm261_vm1, %v2022_v19 }
  0x41   :  { %477 = vmatprep.mubr.bf16.mxu0 %v2295_v1  ;;  %637 = vmatprep.mubr.bf16.mxu1 %v2295_v1 }
  0x48   :  { %1852 = vmatmul.mubr.msk.bf16.gmra.mxu0 %vm261_vm1, %v2023_v20  ;;  %1868 = vmatmul.mubr.msk.bf16.gmra.mxu1 %vm261_vm1, %v2024_v21 }
  0x49   :  { %487 = vmatprep.mubr.bf16.mxu0 %v2295_v1  ;;  %647 = vmatprep.mubr.bf16.mxu1 %v2295_v1 }
  0x50   :  { %1853 = vmatmul.mubr.msk.bf16.gmra.mxu0 %vm261_vm1, %v2025_v22  ;;  %1869 = vmatmul.mubr.msk.bf16.gmra.mxu1 %vm261_vm1, %v2026_v23 }
  0x51   :  { %497 = vmatprep.mubr.bf16.mxu0 %v2295_v1  ;;  %657 = vmatprep.mubr.bf16.mxu1 %v2295_v1 }
  0x58   :  { %1854 = vmatmul.mubr.msk.bf16.gmra.mxu0 %vm261_vm1, %v2027_v24  ;;  %1870 = vmatmul.mubr.msk.bf16.gmra.mxu1 %vm261_vm1, %v2028_v25 }
  0x59   :  { %507 = vmatprep.mubr.bf16.mxu0 %v2295_v1  ;;  %667 = vmatprep.mubr.bf16.mxu1 %v2295_v1 }
  0x60   :  { %1855 = vmatmul.mubr.msk.bf16.gmra.mxu0 %vm261_vm1, %v2029_v26  ;;  %1871 = vmatmul.mubr.msk.bf16.gmra.mxu1 %vm261_vm1, %v2030_v27 }
  0x61   :  { %517 = vmatprep.mubr.bf16.mxu0 %v2295_v1  ;;  %677 = vmatprep.mubr.bf16.mxu1 %v2295_v1 }
  0x68   :  { %1856 = vmatmul.mubr.msk.bf16.gmra.mxu0 %vm261_vm1, %v2031_v28  ;;  %1872 = vmatmul.mubr.msk.bf16.gmra.mxu1 %vm261_vm1, %v2032_v29 }
  0x69   :  { %527 = vmatprep.mubr.bf16.mxu0 %v2295_v1  ;;  %687 = vmatprep.mubr.bf16.mxu1 %v2295_v1 }
  0x70   :  { %1857 = vmatmul.mubr.msk.bf16.gmra.mxu0 %vm261_vm1, %v2033_v30  ;;  %1873 = vmatmul.mubr.msk.bf16.gmra.mxu1 %vm261_vm1, %v2034_v31 }
  0x71   :  { %537 = vmatprep.mubr.bf16.mxu0 %v2295_v1  ;;  %697 = vmatprep.mubr.bf16.mxu1 %v2295_v1 }
  0x78   :  { %1858 = vmatmul.mubr.msk.bf16.gmra.mxu0 %vm261_vm1, %v2035_v32  ;;  %1874 = vmatmul.mubr.msk.bf16.gmra.mxu1 %vm261_vm1, %v2036_v33 }
  0x79   :  { %547 = vmatprep.mubr.bf16.mxu0 %v2295_v1  ;;  %707 = vmatprep.mubr.bf16.mxu1 %v2295_v1 }
  0x80   :  { %1859 = vmatmul.mubr.msk.bf16.gmra.mxu0 %vm261_vm1, %v2037_v34  ;;  %1875 = vmatmul.mubr.msk.bf16.gmra.mxu1 %vm261_vm1, %v2038_v35 }
  0xc8   :  { %v399_v43 = vpop.f32.mrf.mxu0  ;;  %v559_v44 = vpop.f32.mrf.mxu1 }
  0xc9   :  { %v2487_v45 = vadd.f32 %v399_v43, %v2482_v41  ;;  %v2490_v46 = vadd.f32 %v559_v44, %v2482_v41 }
  0xca   :  { %v401_v47 = vpop.f32.mrf.mxu0  ;;  %v561_v48 = vpop.f32.mrf.mxu1 }
  0xcb   :  { %v718_v49 = vmul.f32 0.5, %v2487_v45  ;;  %v782_v50 = vmul.f32 0.5, %v2490_v46  ;;  %v2495_v51 = vadd.f32 %v401_v47, %v2484_v42  ;;  %v2498_v52 = vadd.f32 %v561_v48, %v2484_v42 }
  0xcc   :  { %v403_v53 = vpop.f32.mrf.mxu0  ;;  %v563_v54 = vpop.f32.mrf.mxu1 }
  0xcd   :  { %2039 = vtanh.f32 %v718_v49  ;;  %v719_v55 = vmul.f32 0.5, %v2495_v51  ;;  %v783_v56 = vmul.f32 0.5, %v2498_v52  ;;  %v2503_v57 = vadd.f32 %v403_v53, %v2482_v41 }
  0xce   :  { %2041 = vtanh.f32 %v782_v50  ;;  %v2506_v58 = vadd.f32 %v563_v54, %v2482_v41  ;;  %v405_v59 = vpop.f32.mrf.mxu0  ;;  %v565_v60 = vpop.f32.mrf.mxu1 }
  0xcf   :  { %2043 = vtanh.f32 %v719_v55  ;;  %v720_v61 = vmul.f32 0.5, %v2503_v57  ;;  %v2510_v62 = vadd.f32 %v405_v59, %v2484_v42  ;;  %v2513_v63 = vadd.f32 %v565_v60, %v2484_v42 }
  0xd0   :  { %2045 = vtanh.f32 %v783_v56  ;;  %v784_v0 = vmul.f32 0.5, %v2506_v58  ;;  %v409_v1 = vpop.f32.mrf.mxu0  ;;  %v569_v2 = vpop.f32.mrf.mxu1 }
  0xd1   :  { %2047 = vtanh.f32 %v720_v61  ;;  %v721_v3 = vmul.f32 0.5, %v2510_v62  ;;  %v785_v4 = vmul.f32 0.5, %v2513_v63  ;;  %v2519_v5 = vadd.f32 %v409_v1, %v2482_v41 }
  0xd2   :  { %2049 = vtanh.f32 %v784_v0  ;;  %v2522_v6 = vadd.f32 %v569_v2, %v2482_v41  ;;  %v411_v7 = vpop.f32.mrf.mxu0  ;;  %v571_v8 = vpop.f32.mrf.mxu1 }
  0xd3   :  { %2051 = vtanh.f32 %v721_v3  ;;  %v722_v9 = vmul.f32 0.5, %v2519_v5  ;;  %v2526_v10 = vadd.f32 %v411_v7, %v2484_v42  ;;  %v2529_v11 = vadd.f32 %v571_v8, %v2484_v42 }
  0xd4   :  { %2053 = vtanh.f32 %v785_v4  ;;  %v786_v12 = vmul.f32 0.5, %v2522_v6  ;;  %v413_v13 = vpop.f32.mrf.mxu0  ;;  %v573_v14 = vpop.f32.mrf.mxu1 }
  0xd5   :  { %2055 = vtanh.f32 %v722_v9  ;;  %v723_v15 = vmul.f32 0.5, %v2526_v10  ;;  %v787_v16 = vmul.f32 0.5, %v2529_v11  ;;  %v2535_v17 = vadd.f32 %v413_v13, %v2482_v41 }
  0xd6   :  { %2057 = vtanh.f32 %v786_v12  ;;  %v2538_v18 = vadd.f32 %v573_v14, %v2482_v41  ;;  %v415_v19 = vpop.f32.mrf.mxu0  ;;  %v575_v20 = vpop.f32.mrf.mxu1 }
  0xd7   :  { %2059 = vtanh.f32 %v723_v15  ;;  %v724_v21 = vmul.f32 0.5, %v2535_v17  ;;  %v2542_v22 = vadd.f32 %v415_v19, %v2484_v42  ;;  %v2545_v23 = vadd.f32 %v575_v20, %v2484_v42 }
  0xd8   :  { %2061 = vtanh.f32 %v787_v16  ;;  %v788_v24 = vmul.f32 0.5, %v2538_v18  ;;  %v419_v25 = vpop.f32.mrf.mxu0  ;;  %v579_v26 = vpop.f32.mrf.mxu1 }
  0xd9   :  { %2063 = vtanh.f32 %v724_v21  ;;  %v725_v27 = vmul.f32 0.5, %v2542_v22  ;;  %v789_v28 = vmul.f32 0.5, %v2545_v23  ;;  %v2551_v29 = vadd.f32 %v419_v25, %v2482_v41 }
  0xda   :  { %v2040_v30 = vpop.eup %2039  ;;  %2065 = vtanh.f32 %v788_v24  ;;  %v2554_v31 = vadd.f32 %v579_v26, %v2482_v41  ;;  %v421_v32 = vpop.f32.mrf.mxu0 }
  0xdb   :  { %v581_v33 = vpop.f32.mrf.mxu1  ;;  %v2042_v34 = vpop.eup %2041  ;;  %v974_v35 = vmul.f32 0.5, %v2040_v30  ;;  %2067 = vtanh.f32 %v725_v27  ;;  %v726_v36 = vmul.f32 0.5, %v2551_v29  ;;  %v2558_v37 = vadd.f32 %v421_v32, %v2484_v42 }
  0xdc   :  { %v2044_v38 = vpop.eup %2043  ;;  %v1038_v39 = vmul.f32 0.5, %v2042_v34  ;;  %2069 = vtanh.f32 %v789_v28  ;;  %v790_v40 = vmul.f32 0.5, %v2554_v31  ;;  %v2562_v43 = vadd.f32 %v581_v33, %v2484_v42  ;;  %v423_v44 = vpop.f32.mrf.mxu0 }
  0xdd   :  { %v583_v47 = vpop.f32.mrf.mxu1  ;;  %v2046_v48 = vpop.eup %2045  ;;  %v1102_v49 = vadd.f32 0.5, %v974_v35  ;;  %v975_v50 = vmul.f32 0.5, %v2044_v38  ;;  %2071 = vtanh.f32 %v726_v36  ;;  %v727_v53 = vmul.f32 0.5, %v2558_v37 }
  0xde   :  { %v2048_v54 = vpop.eup %2047  ;;  %v1166_v55 = vadd.f32 0.5, %v1038_v39  ;;  %v1039_v56 = vmul.f32 0.5, %v2046_v48  ;;  %2073 = vtanh.f32 %v790_v40  ;;  %v791_v59 = vmul.f32 0.5, %v2562_v43  ;;  %v2566_v60 = vpop.f32.mrf.mxu0 }
  0xdf   :  { %v2568_v61 = vpop.f32.mrf.mxu1  ;;  %v2050_v0 = vpop.eup %2049  ;;  %v1230_v1 = vmul.f32 %v1102_v49, %v2487_v45  ;;  %v1103_v2 = vadd.f32 0.5, %v975_v50  ;;  %v976_v3 = vmul.f32 0.5, %v2048_v54  ;;  %2075 = vtanh.f32 %v727_v53 }
  0xe0   :  { %v2052_v4 = vpop.eup %2051  ;;  %v1294_v7 = vmul.f32 %v1166_v55, %v2490_v46  ;;  %v1167_v8 = vadd.f32 0.5, %v1039_v56  ;;  %v1040_v9 = vmul.f32 0.5, %v2050_v0  ;;  %2077 = vtanh.f32 %v791_v59  ;;  %v2572_v12 = vpop.f32.mrf.mxu0 }
  0xe1   :  { %v2574_v13 = vpop.f32.mrf.mxu1  ;;  %v2054_v14 = vpop.eup %2053  ;;  %v1231_v15 = vmul.f32 %v1103_v2, %v2495_v51  ;;  %v1104_v16 = vadd.f32 0.5, %v976_v3  ;;  %v977_v19 = vmul.f32 0.5, %v2052_v4  ;;  %v2578_v45 = vadd.f32 %v423_v44, %v2482_v41 }
  0xe2   :  { %v2056_v20 = vpop.eup %2055  ;;  %v1295_v21 = vmul.f32 %v1167_v8, %v2498_v52  ;;  %v1168_v24 = vadd.f32 0.5, %v1040_v9  ;;  %v1041_v46 = vmul.f32 0.5, %v2054_v14  ;;  %v2582_v25 = vadd.f32 %v583_v47, %v2482_v41  ;;  %v2584_v26 = vpop.f32.mrf.mxu0 }
  0xe3   :  { %v2586_v27 = vpop.f32.mrf.mxu1  ;;  %v2058_v28 = vpop.eup %2057  ;;  %v1940_v30 = vpack.c.bf16 %v1231_v15, %v1230_v1  ;;  %v1232_v51 = vmul.f32 %v1104_v16, %v2503_v57  ;;  %v1105_v32 = vadd.f32 0.5, %v977_v19  ;;  %v978_v33 = vmul.f32 0.5, %v2056_v20 }
  0xe4   :  { %v2060_v34 = vpop.eup %2059  ;;  %v1972_v35 = vpack.c.bf16 %v1295_v21, %v1294_v7  ;;  %v1296_v36 = vmul.f32 %v1168_v24, %v2506_v58  ;;  %v1169_v52 = vadd.f32 0.5, %v1041_v46  ;;  %v1042_v38 = vmul.f32 0.5, %v2058_v28  ;;  %v2590_v39 = vpop.f32.mrf.mxu0 }
  0xe5   :  { %v2592_v40 = vpop.f32.mrf.mxu1  ;;  %v2062_v44 = vpop.eup %2061  ;;  %1742 = vst [vmem:[%s3594_s3] sm:$0xff] %v1940_v30  ;;  %v1233_v47 = vmul.f32 %v1105_v32, %v2510_v62  ;;  %v1106_v57 = vadd.f32 0.5, %v978_v33  ;;  %v979_v48 = vmul.f32 0.5, %v2060_v34  ;;  %v728_v49 = vmul.f32 0.5, %v2578_v45 }
  0xe6   :  { %v2064_v50 = vpop.eup %2063  ;;  %1774 = vst [vmem:[%s3594_s3 + $0x100] sm:$0xff] %v1972_v35  ;;  %v1297_v58 = vmul.f32 %v1169_v52, %v2513_v63  ;;  %v1170_v53 = vadd.f32 0.5, %v1042_v38  ;;  %v1043_v54 = vmul.f32 0.5, %v2062_v44  ;;  %v792_v55 = vmul.f32 0.5, %v2582_v25  ;;  %v2604_v56 = vpop.f32.mrf.mxu0 }
  0xe7   :  { %v2606_v59 = vpop.f32.mrf.mxu1  ;;  %v2066_v62 = vpop.eup %2065  ;;  %v1941_v0 = vpack.c.bf16 %v1233_v47, %v1232_v51  ;;  %v1234_v1 = vmul.f32 %v1106_v57, %v2519_v5  ;;  %v1107_v2 = vadd.f32 0.5, %v979_v48  ;;  %v980_v3 = vmul.f32 0.5, %v2064_v50 }
  0xe8   :  { %v2068_v4 = vpop.eup %2067  ;;  %v1973_v7 = vpack.c.bf16 %v1297_v58, %v1296_v36  ;;  %v1298_v8 = vmul.f32 %v1170_v53, %v2522_v6  ;;  %v1171_v9 = vadd.f32 0.5, %v1043_v54  ;;  %v1044_v63 = vmul.f32 0.5, %v2066_v62  ;;  %v2610_v14 = vpop.f32.mrf.mxu0 }
  0xe9   :  { %v2612_v15 = vpop.f32.mrf.mxu1  ;;  %v2070_v16 = vpop.eup %2069  ;;  %1743 = vst [vmem:[%s3594_s3 + $0x8] sm:$0xff] %v1941_v0  ;;  %v1235_v19 = vmul.f32 %v1107_v2, %v2526_v10  ;;  %v1108_v5 = vadd.f32 0.5, %v980_v3  ;;  %v981_v20 = vmul.f32 0.5, %v2068_v4  ;;  %2079 = vtanh.f32 %v728_v49 }
  0xea   :  { %v2072_v21 = vpop.eup %2071  ;;  %1775 = vst [vmem:[%s3594_s3 + $0x108] sm:$0xff] %v1973_v7  ;;  %v1299_v6 = vmul.f32 %v1171_v9, %v2529_v11  ;;  %v1172_v24 = vadd.f32 0.5, %v1044_v63  ;;  %v1045_v46 = vmul.f32 0.5, %v2070_v16  ;;  %2081 = vtanh.f32 %v792_v55  ;;  %v2622_v28 = vpop.f32.mrf.mxu0 }
  0xeb   :  { %v2624_v30 = vpop.f32.mrf.mxu1  ;;  %v2074_v51 = vpop.eup %2073  ;;  %v1942_v32 = vpack.c.bf16 %v1235_v19, %v1234_v1  ;;  %v1236_v10 = vmul.f32 %v1108_v5, %v2535_v17  ;;  %v1109_v33 = vadd.f32 0.5, %v981_v20  ;;  %v982_v34 = vmul.f32 0.5, %v2072_v21 }
  0xec   :  { %v2076_v35 = vpop.eup %2075  ;;  %v1974_v36 = vpack.c.bf16 %v1299_v6, %v1298_v8  ;;  %v1300_v52 = vmul.f32 %v1172_v24, %v2538_v18  ;;  %v1173_v38 = vadd.f32 0.5, %v1045_v46  ;;  %v1046_v44 = vmul.f32 0.5, %v2074_v51  ;;  %v2628_v11 = vpop.f32.mrf.mxu0 }
  0xed   :  { %v2630_v47 = vpop.f32.mrf.mxu1  ;;  %v2078_v57 = vpop.eup %2077  ;;  %1744 = vst [vmem:[%s3594_s3 + $0x10] sm:$0xff] %v1942_v32  ;;  %v1237_v48 = vmul.f32 %v1109_v33, %v2542_v22  ;;  %v1110_v17 = vadd.f32 0.5, %v982_v34  ;;  %v983_v49 = vmul.f32 0.5, %v2076_v35  ;;  %v2638_v50 = vadd.f32 %v2566_v60, %v2484_v42 }
  0xee   :  { %1776 = vst [vmem:[%s3594_s3 + $0x110] sm:$0xff] %v1974_v36  ;;  %v1301_v18 = vmul.f32 %v1173_v38, %v2545_v23  ;;  %v1174_v58 = vadd.f32 0.5, %v1046_v44  ;;  %v1047_v53 = vmul.f32 0.5, %v2078_v57  ;;  %v2646_v54 = vadd.f32 %v2568_v61, %v2484_v42  ;;  %v2648_v55 = vpop.f32.mrf.mxu0 }
  0xef   :  { %v2650_v22 = vpop.f32.mrf.mxu1  ;;  %v1943_v62 = vpack.c.bf16 %v1237_v48, %v1236_v10  ;;  %v1238_v60 = vmul.f32 %v1110_v17, %v2551_v29  ;;  %v1111_v0 = vadd.f32 0.5, %v983_v49  ;;  %v729_v1 = vmul.f32 0.5, %v2638_v50 }
  0xf0   :  { %v1975_v2 = vpack.c.bf16 %v1301_v18, %v1300_v52  ;;  %v1302_v3 = vmul.f32 %v1174_v58, %v2554_v31  ;;  %v1175_v23 = vadd.f32 0.5, %v1047_v53  ;;  %v793_v4 = vmul.f32 0.5, %v2646_v54  ;;  %v2656_v7 = vpop.f32.mrf.mxu0 }
  0xf1   :  { %v2658_v61 = vpop.f32.mrf.mxu1  ;;  %1745 = vst [vmem:[%s3594_s3 + $0x18] sm:$0xff] %v1943_v62  ;;  %v1239_v8 = vmul.f32 %v1111_v0, %v2558_v37  ;;  %2083 = vtanh.f32 %v729_v1  ;;  %v2666_v29 = vadd.f32 %v2572_v12, %v2482_v41  ;;  %v2670_v31 = vadd.f32 %v2574_v13, %v2482_v41 }
  0xf2   :  { %1777 = vst [vmem:[%s3594_s3 + $0x118] sm:$0xff] %v1975_v2  ;;  %v1303_v9 = vmul.f32 %v1175_v23, %v2562_v43  ;;  %2085 = vtanh.f32 %v793_v4  ;;  %v2678_v63 = vadd.f32 %v2584_v26, %v2484_v42  ;;  %v2682_v37 = vadd.f32 %v2586_v27, %v2484_v42  ;;  %v2684_v12 = vpop.f32.mrf.mxu0 }
  0xf3   :  { %v2686_v16 = vpop.f32.mrf.mxu1  ;;  %v1944_v13 = vpack.c.bf16 %v1239_v8, %v1238_v60  ;;  %v730_v19 = vmul.f32 0.5, %v2666_v29  ;;  %v794_v5 = vmul.f32 0.5, %v2670_v31  ;;  %v2692_v43 = vadd.f32 %v2590_v39, %v2482_v41 }
  0xf4   :  { %v1976_v20 = vpack.c.bf16 %v1303_v9, %v1302_v3  ;;  %v731_v26 = vmul.f32 0.5, %v2678_v63  ;;  %v795_v21 = vmul.f32 0.5, %v2682_v37  ;;  %v2698_v27 = vadd.f32 %v2592_v40, %v2482_v41  ;;  %v2700_v6 = vpop.f32.mrf.mxu0 }
  0xf5   :  { %v2702_v24 = vpop.f32.mrf.mxu1  ;;  %1746 = vst [vmem:[%s3594_s3 + $0x20] sm:$0xff] %v1944_v13  ;;  %2087 = vtanh.f32 %v730_v19  ;;  %v732_v39 = vmul.f32 0.5, %v2692_v43  ;;  %v2710_v46 = vadd.f32 %v2604_v56, %v2484_v42  ;;  %v2714_v51 = vadd.f32 %v2606_v59, %v2484_v42 }
  0xf6   :  { %v2080_v40 = vpop.eup %2079  ;;  %1778 = vst [vmem:[%s3594_s3 + $0x120] sm:$0xff] %v1976_v20  ;;  %2089 = vtanh.f32 %v794_v5  ;;  %v796_v32 = vmul.f32 0.5, %v2698_v27  ;;  %v2722_v10 = vadd.f32 %v2610_v14, %v2482_v41  ;;  %v2726_v56 = vadd.f32 %v2612_v15, %v2482_v41  ;;  %v2728_v33 = vpop.f32.mrf.mxu0 }
  0xf7   :  { %v2730_v59 = vpop.f32.mrf.mxu1  ;;  %v2082_v34 = vpop.eup %2081  ;;  %v984_v35 = vmul.f32 0.5, %v2080_v40  ;;  %2091 = vtanh.f32 %v731_v26  ;;  %v733_v36 = vmul.f32 0.5, %v2710_v46  ;;  %v797_v52 = vmul.f32 0.5, %v2714_v51 }
  0xf8   :  { %v1048_v38 = vmul.f32 0.5, %v2082_v34  ;;  %2093 = vtanh.f32 %v795_v21  ;;  %v734_v14 = vmul.f32 0.5, %v2722_v10  ;;  %v798_v44 = vmul.f32 0.5, %v2726_v56  ;;  %v2736_v57 = vpop.f32.mrf.mxu0 }
  0xf9   :  { %v2738_v15 = vpop.f32.mrf.mxu1  ;;  %v1112_v48 = vadd.f32 0.5, %v984_v35  ;;  %2095 = vtanh.f32 %v732_v39  ;;  %v2742_v17 = vadd.f32 %v2622_v28, %v2484_v42  ;;  %v2746_v49 = vadd.f32 %v2624_v30, %v2484_v42 }
  0xfa   :  { %v1176_v18 = vadd.f32 0.5, %v1048_v38  ;;  %2097 = vtanh.f32 %v796_v32  ;;  %v2750_v58 = vadd.f32 %v2628_v11, %v2482_v41  ;;  %v2754_v53 = vadd.f32 %v2630_v47, %v2482_v41  ;;  %v2756_v62 = vpop.f32.mrf.mxu0 }
  0xfb   :  { %v2758_v60 = vpop.f32.mrf.mxu1  ;;  %v2761_v28 = vmul.f32 %v1112_v48, %v2578_v45  ;;  %2099 = vtanh.f32 %v733_v36  ;;  %v735_v30 = vmul.f32 0.5, %v2742_v17  ;;  %v799_v0 = vmul.f32 0.5, %v2746_v49 }
  0xfc   :  { %v2766_v1 = vmul.f32 %v1176_v18, %v2582_v25  ;;  %2101 = vtanh.f32 %v797_v52  ;;  %v736_v11 = vmul.f32 0.5, %v2750_v58  ;;  %v800_v47 = vmul.f32 0.5, %v2754_v53  ;;  %v2770_v2 = vpop.f32.mrf.mxu0 }
  0xfd   :  { %v2772_v3 = vpop.f32.mrf.mxu1  ;;  %2103 = vtanh.f32 %v734_v14  ;;  %v2776_v45 = vadd.f32 %v2648_v55, %v2484_v42  ;;  %v2780_v23 = vadd.f32 %v2650_v22, %v2484_v42  ;;  %v2784_v25 = vadd.f32 %v2656_v7, %v2482_v41 }
  0xfe   :  { %v2084_v4 = vpop.eup %2083  ;;  %2105 = vtanh.f32 %v798_v44  ;;  %v2788_v8 = vadd.f32 %v2658_v61, %v2482_v41  ;;  %v2792_v9 = vadd.f32 %v2684_v12, %v2484_v42  ;;  %v2796_v55 = vadd.f32 %v2686_v16, %v2484_v42  ;;  %v2798_v22 = vpop.f32.mrf.mxu0 }
  0xff   :  { %v2800_v13 = vpop.f32.mrf.mxu1  ;;  %v2086_v7 = vpop.eup %2085  ;;  %v985_v19 = vmul.f32 0.5, %v2084_v4  ;;  %2107 = vtanh.f32 %v735_v30  ;;  %v737_v5 = vmul.f32 0.5, %v2776_v45  ;;  %v801_v61 = vmul.f32 0.5, %v2780_v23 }
 0x100   :  { %v1049_v20 = vmul.f32 0.5, %v2086_v7  ;;  %2109 = vtanh.f32 %v799_v0  ;;  %v738_v12 = vmul.f32 0.5, %v2784_v25  ;;  %v802_v26 = vmul.f32 0.5, %v2788_v8  ;;  %v2806_v21 = vpop.f32.mrf.mxu0 }
 0x101   :  { %v2808_v16 = vpop.f32.mrf.mxu1  ;;  %v1113_v39 = vadd.f32 0.5, %v985_v19  ;;  %2111 = vtanh.f32 %v736_v11  ;;  %v739_v40 = vmul.f32 0.5, %v2792_v9  ;;  %v803_v32 = vmul.f32 0.5, %v2796_v55 }
 0x102   :  { %v2088_v34 = vpop.eup %2087  ;;  %v1177_v35 = vadd.f32 0.5, %v1049_v20  ;;  %2113 = vtanh.f32 %v800_v47  ;;  %v2814_v36 = vadd.f32 %v2700_v6, %v2482_v41  ;;  %v2818_v52 = vadd.f32 %v2702_v24, %v2482_v41  ;;  %v2820_v38 = vpop.f32.mrf.mxu0 }
 0x103   :  { %v2822_v14 = vpop.f32.mrf.mxu1  ;;  %v2090_v44 = vpop.eup %2089  ;;  %v1241_v48 = vmul.f32 %v1113_v39, %v2638_v50  ;;  %v986_v18 = vmul.f32 0.5, %v2088_v34  ;;  %2115 = vtanh.f32 %v737_v5  ;;  %v2827_v30 = vadd.f32 %v2728_v33, %v2484_v42 }
 0x104   :  { %v2092_v0 = vpop.eup %2091  ;;  %v1305_v6 = vmul.f32 %v1177_v35, %v2646_v54  ;;  %v1050_v11 = vmul.f32 0.5, %v2090_v44  ;;  %2117 = vtanh.f32 %v801_v61  ;;  %v740_v24 = vmul.f32 0.5, %v2814_v36  ;;  %v2831_v47 = vpop.f32.mrf.mxu0 }
 0x105   :  { %v2833_v4 = vpop.f32.mrf.mxu1  ;;  %v2094_v7 = vpop.eup %2093  ;;  %v1945_v50 = vpack.c.bf16 %v1241_v48, %v2761_v28  ;;  %v1114_v19 = vadd.f32 0.5, %v986_v18  ;;  %v987_v5 = vmul.f32 0.5, %v2092_v0  ;;  %2119 = vtanh.f32 %v738_v12 }
 0x106   :  { %v2096_v20 = vpop.eup %2095  ;;  %v1977_v33 = vpack.c.bf16 %v1305_v6, %v2766_v1  ;;  %v1178_v39 = vadd.f32 0.5, %v1050_v11  ;;  %v1051_v34 = vmul.f32 0.5, %v2094_v7  ;;  %2121 = vtanh.f32 %v802_v26  ;;  %v2837_v54 = vpop.f32.mrf.mxu0 }
 0x107   :  { %v2098_v61 = vpop.eup %2097  ;;  %1747 = vst [vmem:[%s3594_s3 + $0x28] sm:$0xff] %v1945_v50  ;;  %v1242_v35 = vmul.f32 %v1114_v19, %v2666_v29  ;;  %v1115_v44 = vadd.f32 0.5, %v987_v5  ;;  %v988_v28 = vmul.f32 0.5, %v2096_v20  ;;  %2123 = vtanh.f32 %v739_v40  ;;  %v2843_v48 = vpop.f32.mrf.mxu1 }
 0x108   :  { %v2100_v12 = vpop.eup %2099  ;;  %1779 = vst [vmem:[%s3594_s3 + $0x128] sm:$0xff] %v1977_v33  ;;  %v1306_v1 = vmul.f32 %v1178_v39, %v2670_v31  ;;  %v1179_v26 = vadd.f32 0.5, %v1051_v34  ;;  %v1052_v18 = vmul.f32 0.5, %v2098_v61  ;;  %2125 = vtanh.f32 %v803_v32  ;;  %v2849_v0 = vpop.f32.mrf.mxu0 }
 0x109   :  { %3595 = vst [vmem:[#allocation2_spill] sm:$0xff] %v2849_v0  ;;  %v2102_v6 = vpop.eup %2101  ;;  %v1243_v29 = vmul.f32 %v1115_v44, %v2678_v63  ;;  %v1116_v11 = vadd.f32 0.5, %v988_v28  ;;  %v989_v7 = vmul.f32 0.5, %v2100_v12  ;;  %2127 = vtanh.f32 %v740_v24  ;;  %v2855_v61 = vpop.f32.mrf.mxu1 }
 0x10a   :  { %v2104_v40 = vpop.eup %2103  ;;  %v1307_v50 = vmul.f32 %v1179_v26, %v2682_v37  ;;  %v1180_v19 = vadd.f32 0.5, %v1052_v18  ;;  %v1053_v5 = vmul.f32 0.5, %v2102_v6  ;;  %v804_v20 = vmul.f32 0.5, %v2818_v52  ;;  %v2858_v12 = vpop.f32.mrf.mxu0 }
 0x10b   :  { %v2106_v33 = vpop.eup %2105  ;;  %v1946_v31 = vpack.c.bf16 %v1243_v29, %v1242_v35  ;;  %v1244_v39 = vmul.f32 %v1116_v11, %v2692_v43  ;;  %v1117_v32 = vadd.f32 0.5, %v989_v7  ;;  %v990_v34 = vmul.f32 0.5, %v2104_v40 }
 0x10c   :  { %v2108_v0 = vpop.eup %2107  ;;  %v1978_v63 = vpack.c.bf16 %v1307_v50, %v1306_v1  ;;  %v1308_v44 = vmul.f32 %v1180_v19, %v2698_v27  ;;  %v1181_v24 = vadd.f32 0.5, %v1053_v5  ;;  %v1054_v28 = vmul.f32 0.5, %v2106_v33  ;;  %v2870_v19 = vpop.f32.mrf.mxu1 }
 0x10d   :  { %v2110_v37 = vpop.eup %2109  ;;  %1748 = vst [vmem:[%s3594_s3 + $0x30] sm:$0xff] %v1946_v31  ;;  %v1245_v35 = vmul.f32 %v1117_v32, %v2710_v46  ;;  %v1118_v43 = vadd.f32 0.5, %v990_v34  ;;  %v991_v26 = vmul.f32 0.5, %v2108_v0  ;;  %2129 = vtanh.f32 %v804_v20  ;;  %v2873_v32 = vpop.f32.mrf.mxu0 }
 0x10e   :  { %v2112_v18 = vpop.eup %2111  ;;  %1780 = vst [vmem:[%s3594_s3 + $0x130] sm:$0xff] %v1978_v63  ;;  %v1309_v27 = vmul.f32 %v1181_v24, %v2714_v51  ;;  %v1182_v1 = vadd.f32 0.5, %v1054_v28  ;;  %v1055_v6 = vmul.f32 0.5, %v2110_v37  ;;  %v741_v29 = vmul.f32 0.5, %v2827_v30 }
 0x10f   :  { %v2114_v11 = vpop.eup %2113  ;;  %v1947_v7 = vpack.c.bf16 %v1245_v35, %v1244_v39  ;;  %v1246_v40 = vmul.f32 %v1118_v43, %v2722_v10  ;;  %v1119_v50 = vadd.f32 0.5, %v991_v26  ;;  %v992_v46 = vmul.f32 0.5, %v2112_v18  ;;  %v2888_v18 = vpop.f32.mrf.mxu1 }
 0x110   :  { %v2116_v0 = vpop.eup %2115  ;;  %v1979_v5 = vpack.c.bf16 %v1309_v27, %v1308_v44  ;;  %v1310_v20 = vmul.f32 %v1182_v1, %v2726_v56  ;;  %v1183_v33 = vadd.f32 0.5, %v1055_v6  ;;  %v1056_v31 = vmul.f32 0.5, %v2114_v11  ;;  %v2891_v11 = vpop.f32.mrf.mxu0 }
 0x111   :  { %v2118_v51 = vpop.eup %2117  ;;  %1749 = vst [vmem:[%s3594_s3 + $0x38] sm:$0xff] %v1947_v7  ;;  %v1247_v39 = vmul.f32 %v1119_v50, %v2742_v17  ;;  %v1120_v10 = vadd.f32 0.5, %v992_v46  ;;  %v993_v34 = vmul.f32 0.5, %v2116_v0  ;;  %2131 = vtanh.f32 %v741_v29 }
 0x112   :  { %v2120_v63 = vpop.eup %2119  ;;  %1781 = vst [vmem:[%s3594_s3 + $0x138] sm:$0xff] %v1979_v5  ;;  %v1311_v56 = vmul.f32 %v1183_v33, %v2746_v49  ;;  %v1184_v44 = vadd.f32 0.5, %v1056_v31  ;;  %v1057_v24 = vmul.f32 0.5, %v2118_v51  ;;  %v2885_v28 = vadd.f32 %v2730_v59, %v2484_v42 }
 0x113   :  { %v2122_v37 = vpop.eup %2121  ;;  %v1948_v35 = vpack.c.bf16 %v1247_v39, %v1246_v40  ;;  %v1248_v17 = vmul.f32 %v1120_v10, %v2750_v58  ;;  %v1121_v43 = vadd.f32 0.5, %v993_v34  ;;  %v994_v26 = vmul.f32 0.5, %v2120_v63  ;;  %v2907_v39 = vpop.f32.mrf.mxu1 }
 0x114   :  { %v2124_v27 = vpop.eup %2123  ;;  %v1980_v1 = vpack.c.bf16 %v1311_v56, %v1310_v20  ;;  %v1312_v6 = vmul.f32 %v1184_v44, %v2754_v53  ;;  %v1185_v29 = vadd.f32 0.5, %v1057_v24  ;;  %v1058_v49 = vmul.f32 0.5, %v2122_v37  ;;  %v2910_v56 = vpop.f32.mrf.mxu0 }
 0x115   :  { %v2126_v7 = vpop.eup %2125  ;;  %1750 = vst [vmem:[%s3594_s3 + $0x40] sm:$0xff] %v1948_v35  ;;  %v1249_v59 = vmul.f32 %v1121_v43, %v2776_v45  ;;  %v1122_v58 = vadd.f32 0.5, %v994_v26  ;;  %v995_v40 = vmul.f32 0.5, %v2124_v27  ;;  %v805_v50 = vmul.f32 0.5, %v2885_v28  ;;  %v2938_v26 = vpop.f32.mrf.mxu1 }
 0x116   :  { %v2128_v46 = vpop.eup %2127  ;;  %1782 = vst [vmem:[%s3594_s3 + $0x140] sm:$0xff] %v1980_v1  ;;  %v1313_v53 = vmul.f32 %v1185_v29, %v2780_v23  ;;  %v1186_v0 = vadd.f32 0.5, %v1058_v49  ;;  %v1059_v5 = vmul.f32 0.5, %v2126_v7  ;;  %v2904_v20 = vadd.f32 %v2736_v57, %v2482_v41 }
 0x117   :  { %v1949_v33 = vpack.c.bf16 %v1249_v59, %v1248_v17  ;;  %v1250_v45 = vmul.f32 %v1122_v58, %v2784_v25  ;;  %v1123_v31 = vadd.f32 0.5, %v995_v40  ;;  %v996_v51 = vmul.f32 0.5, %v2128_v46 }
 0x118   :  { %v1981_v10 = vpack.c.bf16 %v1313_v53, %v1312_v6  ;;  %v1314_v34 = vmul.f32 %v1186_v0, %v2788_v8  ;;  %v1187_v63 = vadd.f32 0.5, %v1059_v5  ;;  %2133 = vtanh.f32 %v805_v50  ;;  %v2976_v50 = vpop.f32.mrf.mxu1 }
 0x119   :  { %1751 = vst [vmem:[%s3594_s3 + $0x48] sm:$0xff] %v1949_v33  ;;  %v1251_v57 = vmul.f32 %v1123_v31, %v2792_v9  ;;  %v1124_v23 = vadd.f32 0.5, %v996_v51  ;;  %v742_v25 = vmul.f32 0.5, %v2904_v20  ;;  %v2919_v44 = vadd.f32 %v2738_v15, %v2482_v41 }
 0x11a   :  { %v2130_v24 = vpop.eup %2129  ;;  %1783 = vst [vmem:[%s3594_s3 + $0x148] sm:$0xff] %v1981_v10  ;;  %v1315_v8 = vmul.f32 %v1187_v63, %v2796_v55  ;;  %v2927_v37 = vadd.f32 %v2756_v62, %v2484_v42  ;;  %v2931_v9 = vadd.f32 %v2758_v60, %v2484_v42  ;;  %v2935_v35 = vadd.f32 %v2770_v2, %v2482_v41  ;;  %v2943_v60 = vpop.f32.mrf.mxu0 }
 0x11b   :  { %v1950_v15 = vpack.c.bf16 %v1251_v57, %v1250_v45  ;;  %v1252_v17 = vmul.f32 %v1124_v23, %v2814_v36  ;;  %v1060_v43 = vmul.f32 0.5, %v2130_v24  ;;  %2135 = vtanh.f32 %v742_v25  ;;  %v3006_v10 = vpop.f32.mrf.mxu1  ;;  %v3596_v25 = vld [vmem:[#allocation2_spill] sm:$0xff] }
 0x11c   :  { %v1982_v55 = vpack.c.bf16 %v1315_v8, %v1314_v34  ;;  %v806_v27 = vmul.f32 0.5, %v2919_v44  ;;  %v743_v62 = vmul.f32 0.5, %v2927_v37  ;;  %v807_v1 = vmul.f32 0.5, %v2931_v9  ;;  %v2981_v53 = vpop.f32.mrf.mxu0 }
 0x11d   :  { %1752 = vst [vmem:[%s3594_s3 + $0x50] sm:$0xff] %v1950_v15  ;;  %v1188_v2 = vadd.f32 0.5, %v1060_v43  ;;  %v744_v36 = vmul.f32 0.5, %v2935_v35  ;;  %v2951_v6 = vadd.f32 %v2772_v3, %v2482_v41  ;;  %v2955_v29 = vadd.f32 %v2798_v22, %v2484_v42  ;;  %v3038_v43 = vpop.f32.mrf.mxu1 }
 0x11e   :  { %v2132_v49 = vpop.eup %2131  ;;  %1784 = vst [vmem:[%s3594_s3 + $0x150] sm:$0xff] %v1982_v55  ;;  %2137 = vtanh.f32 %v806_v27  ;;  %v2962_v7 = vadd.f32 %v2800_v13, %v2484_v42  ;;  %v2966_v59 = vadd.f32 %v2806_v21, %v2482_v41  ;;  %v2970_v3 = vadd.f32 %v2808_v16, %v2482_v41 }
 0x11f   :  { %v2973_v22 = vmul.f32 %v1188_v2, %v2818_v52  ;;  %v997_v58 = vmul.f32 0.5, %v2132_v49  ;;  %2139 = vtanh.f32 %v743_v62  ;;  %v808_v40 = vmul.f32 0.5, %v2951_v6 }
 0x120   :  { %2141 = vtanh.f32 %v807_v1  ;;  %v745_v13 = vmul.f32 0.5, %v2955_v29  ;;  %v809_v46 = vmul.f32 0.5, %v2962_v7  ;;  %v746_v21 = vmul.f32 0.5, %v2966_v59 }
 0x121   :  { %v1125_v16 = vadd.f32 0.5, %v997_v58  ;;  %2143 = vtanh.f32 %v744_v36  ;;  %v810_v52 = vmul.f32 0.5, %v2970_v3  ;;  %v2986_v0 = vadd.f32 %v2820_v38, %v2484_v42 }
 0x122   :  { %2145 = vtanh.f32 %v808_v40  ;;  %v2990_v5 = vadd.f32 %v2822_v14, %v2484_v42  ;;  %v2994_v33 = vadd.f32 %v2831_v47, %v2482_v41  ;;  %v2998_v45 = vadd.f32 %v2833_v4, %v2482_v41  ;;  %v3011_v4 = vpop.f32.mrf.mxu0 }
 0x123   :  { %v1253_v31 = vmul.f32 %v1125_v16, %v2827_v30  ;;  %2147 = vtanh.f32 %v745_v13  ;;  %v747_v51 = vmul.f32 0.5, %v2986_v0  ;;  %v3004_v38 = vadd.f32 %v2837_v54, %v2484_v42 }
 0x124   :  { %2149 = vtanh.f32 %v809_v46  ;;  %v811_v14 = vmul.f32 0.5, %v2990_v5  ;;  %v748_v47 = vmul.f32 0.5, %v2994_v33  ;;  %v812_v34 = vmul.f32 0.5, %v2998_v45  ;;  %v3042_v1 = vpop.f32.mrf.mxu0 }
 0x125   :  { %v2134_v63 = vpop.eup %2133  ;;  %v1951_v30 = vpack.c.bf16 %v1253_v31, %v1252_v17  ;;  %2151 = vtanh.f32 %v746_v21  ;;  %v749_v57 = vmul.f32 0.5, %v3004_v38  ;;  %v3016_v54 = vadd.f32 %v2843_v48, %v2484_v42 }
 0x126   :  { %v1061_v23 = vmul.f32 0.5, %v2134_v63  ;;  %2153 = vtanh.f32 %v810_v52  ;;  %v3020_v24 = vadd.f32 %v3596_v25, %v2482_v41  ;;  %v3024_v8 = vadd.f32 %v2855_v61, %v2482_v41  ;;  %v3067_v31 = vpop.f32.mrf.mxu0 }
 0x127   :  { %1753 = vst [vmem:[%s3594_s3 + $0x58] sm:$0xff] %v1951_v30  ;;  %2155 = vtanh.f32 %v747_v51  ;;  %v813_v15 = vmul.f32 0.5, %v3016_v54  ;;  %v3032_v48 = vadd.f32 %v2858_v12, %v2484_v42  ;;  %v3036_v17 = vadd.f32 %v2870_v19, %v2484_v42 }
 0x128   :  { %v2136_v55 = vpop.eup %2135  ;;  %v1189_v61 = vadd.f32 0.5, %v1061_v23  ;;  %2157 = vtanh.f32 %v811_v14  ;;  %v750_v27 = vmul.f32 0.5, %v3020_v24  ;;  %v814_v62 = vmul.f32 0.5, %v3024_v8 }
 0x129   :  { %v998_v2 = vmul.f32 0.5, %v2136_v55  ;;  %2159 = vtanh.f32 %v748_v47  ;;  %v751_v12 = vmul.f32 0.5, %v3032_v48  ;;  %v815_v36 = vmul.f32 0.5, %v3036_v17 }
 0x12a   :  { %v1317_v19 = vmul.f32 %v1189_v61, %v2885_v28  ;;  %2161 = vtanh.f32 %v812_v34  ;;  %v3049_v49 = vadd.f32 %v2873_v32, %v2482_v41  ;;  %v3053_v58 = vadd.f32 %v2888_v18, %v2482_v41  ;;  %v3063_v28 = vpop.f32.mrf.mxu1 }
 0x12b   :  { %v2138_v40 = vpop.eup %2137  ;;  %v1126_v13 = vadd.f32 0.5, %v998_v2  ;;  %2163 = vtanh.f32 %v749_v57  ;;  %v3057_v46 = vadd.f32 %v2891_v11, %v2484_v42  ;;  %v3061_v21 = vadd.f32 %v2907_v39, %v2484_v42  ;;  %v3079_v2 = vpop.f32.mrf.mxu0 }
 0x12c   :  { %v2140_v16 = vpop.eup %2139  ;;  %v1983_v32 = vpack.c.bf16 %v1317_v19, %v2973_v22  ;;  %v1062_v52 = vmul.f32 0.5, %v2138_v40  ;;  %2165 = vtanh.f32 %v813_v15  ;;  %v752_v18 = vmul.f32 0.5, %v3049_v49  ;;  %v3076_v25 = vpop.f32.mrf.mxu1 }
 0x12d   :  { %v2142_v51 = vpop.eup %2141  ;;  %v1254_v14 = vmul.f32 %v1126_v13, %v2904_v20  ;;  %v999_v11 = vmul.f32 0.5, %v2140_v16  ;;  %2167 = vtanh.f32 %v750_v27  ;;  %v816_v47 = vmul.f32 0.5, %v3053_v58 }
 0x12e   :  { %v2144_v39 = vpop.eup %2143  ;;  %1785 = vst [vmem:[%s3594_s3 + $0x158] sm:$0xff] %v1983_v32  ;;  %v1190_v34 = vadd.f32 0.5, %v1062_v52  ;;  %v1063_v22 = vmul.f32 0.5, %v2142_v51  ;;  %2169 = vtanh.f32 %v814_v62  ;;  %v753_v63 = vmul.f32 0.5, %v3057_v46 }
 0x12f   :  { %v2146_v30 = vpop.eup %2145  ;;  %v1127_v57 = vadd.f32 0.5, %v999_v11  ;;  %v1000_v23 = vmul.f32 0.5, %v2144_v39  ;;  %2171 = vtanh.f32 %v751_v12  ;;  %v817_v20 = vmul.f32 0.5, %v3061_v21 }
 0x130   :  { %v2148_v15 = vpop.eup %2147  ;;  %v1318_v55 = vmul.f32 %v1190_v34, %v2919_v44  ;;  %v1191_v61 = vadd.f32 0.5, %v1063_v22  ;;  %v1064_v27 = vmul.f32 0.5, %v2146_v30  ;;  %2173 = vtanh.f32 %v815_v36  ;;  %v3084_v34 = vpop.f32.mrf.mxu1 }
 0x131   :  { %v2150_v19 = vpop.eup %2149  ;;  %v1255_v62 = vmul.f32 %v1127_v57, %v2927_v37  ;;  %v1128_v40 = vadd.f32 0.5, %v1000_v23  ;;  %v1001_v13 = vmul.f32 0.5, %v2148_v15  ;;  %2175 = vtanh.f32 %v752_v18  ;;  %v3087_v23 = vpop.f32.mrf.mxu0 }
 0x132   :  { %v2152_v16 = vpop.eup %2151  ;;  %v1319_v12 = vmul.f32 %v1191_v61, %v2931_v9  ;;  %v1192_v32 = vadd.f32 0.5, %v1064_v27  ;;  %v1065_v52 = vmul.f32 0.5, %v2150_v19  ;;  %2177 = vtanh.f32 %v816_v47 }
 0x133   :  { %v2154_v51 = vpop.eup %2153  ;;  %v1952_v11 = vpack.c.bf16 %v1255_v62, %v1254_v14  ;;  %v1256_v44 = vmul.f32 %v1128_v40, %v2935_v35  ;;  %v1129_v39 = vadd.f32 0.5, %v1001_v13  ;;  %v1002_v36 = vmul.f32 0.5, %v2152_v16 }
 0x134   :  { %v2156_v22 = vpop.eup %2155  ;;  %v1984_v30 = vpack.c.bf16 %v1319_v12, %v1318_v55  ;;  %v1320_v37 = vmul.f32 %v1192_v32, %v2951_v6  ;;  %v1193_v57 = vadd.f32 0.5, %v1065_v52  ;;  %v1066_v18 = vmul.f32 0.5, %v2154_v51  ;;  %v3101_v51 = vpop.f32.mrf.mxu0 }
 0x135   :  { %v2158_v9 = vpop.eup %2157  ;;  %1754 = vst [vmem:[%s3594_s3 + $0x60] sm:$0xff] %v1952_v11  ;;  %v1257_v14 = vmul.f32 %v1129_v39, %v2955_v29  ;;  %v1130_v35 = vadd.f32 0.5, %v1002_v36  ;;  %v1003_v47 = vmul.f32 0.5, %v2156_v22  ;;  %2179 = vtanh.f32 %v753_v63  ;;  %v3098_v29 = vpop.f32.mrf.mxu1 }
 0x136   :  { %v2160_v15 = vpop.eup %2159  ;;  %1786 = vst [vmem:[%s3594_s3 + $0x160] sm:$0xff] %v1984_v30  ;;  %v1321_v6 = vmul.f32 %v1193_v57, %v2962_v7  ;;  %v1194_v55 = vadd.f32 0.5, %v1066_v18  ;;  %v1067_v61 = vmul.f32 0.5, %v2158_v9  ;;  %2181 = vtanh.f32 %v817_v20 }
 0x137   :  { %v2162_v27 = vpop.eup %2161  ;;  %v1953_v19 = vpack.c.bf16 %v1257_v14, %v1256_v44  ;;  %v1258_v62 = vmul.f32 %v1130_v35, %v2966_v59  ;;  %v1131_v40 = vadd.f32 0.5, %v1003_v47  ;;  %v1004_v13 = vmul.f32 0.5, %v2160_v15  ;;  %v3120_v9 = vpop.f32.mrf.mxu1 }
 0x138   :  { %v2164_v16 = vpop.eup %2163  ;;  %v1985_v63 = vpack.c.bf16 %v1321_v6, %v1320_v37  ;;  %v1322_v12 = vmul.f32 %v1194_v55, %v2970_v3  ;;  %v1195_v32 = vadd.f32 0.5, %v1067_v61  ;;  %v1068_v52 = vmul.f32 0.5, %v2162_v27  ;;  %v3123_v6 = vpop.f32.mrf.mxu0 }
 0x139   :  { %v2166_v7 = vpop.eup %2165  ;;  %1755 = vst [vmem:[%s3594_s3 + $0x68] sm:$0xff] %v1953_v19  ;;  %v1259_v20 = vmul.f32 %v1131_v40, %v2986_v0  ;;  %v1132_v59 = vadd.f32 0.5, %v1004_v13  ;;  %v1005_v11 = vmul.f32 0.5, %v2164_v16  ;;  %v3109_v44 = vadd.f32 %v2910_v56, %v2482_v41 }
 0x13a   :  { %v2168_v39 = vpop.eup %2167  ;;  %1787 = vst [vmem:[%s3594_s3 + $0x168] sm:$0xff] %v1985_v63  ;;  %v1323_v3 = vmul.f32 %v1195_v32, %v2990_v5  ;;  %v1196_v36 = vadd.f32 0.5, %v1068_v52  ;;  %v1069_v22 = vmul.f32 0.5, %v2166_v7  ;;  %v3117_v30 = vadd.f32 %v2938_v26, %v2482_v41  ;;  %v3136_v52 = vpop.f32.mrf.mxu1 }
 0x13b   :  { %v2170_v0 = vpop.eup %2169  ;;  %v1954_v37 = vpack.c.bf16 %v1259_v20, %v1258_v62  ;;  %v1260_v57 = vmul.f32 %v1132_v59, %v2994_v33  ;;  %v1133_v18 = vadd.f32 0.5, %v1005_v11  ;;  %v1006_v56 = vmul.f32 0.5, %v2168_v39  ;;  %v3139_v39 = vpop.f32.mrf.mxu0 }
 0x13c   :  { %v2172_v14 = vpop.eup %2171  ;;  %v1986_v35 = vpack.c.bf16 %v1323_v3, %v1322_v12  ;;  %v1324_v47 = vmul.f32 %v1196_v36, %v2998_v45  ;;  %v1197_v15 = vadd.f32 0.5, %v1069_v22  ;;  %v1070_v5 = vmul.f32 0.5, %v2170_v0 }
 0x13d   :  { %v2174_v55 = vpop.eup %2173  ;;  %1756 = vst [vmem:[%s3594_s3 + $0x70] sm:$0xff] %v1954_v37  ;;  %v1261_v26 = vmul.f32 %v1133_v18, %v3004_v38  ;;  %v1134_v33 = vadd.f32 0.5, %v1006_v56  ;;  %v1007_v61 = vmul.f32 0.5, %v2172_v14  ;;  %v754_v27 = vmul.f32 0.5, %v3109_v44  ;;  %v3159_v56 = vpop.f32.mrf.mxu1 }
 0x13e   :  { %v2176_v19 = vpop.eup %2175  ;;  %1788 = vst [vmem:[%s3594_s3 + $0x170] sm:$0xff] %v1986_v35  ;;  %v1325_v45 = vmul.f32 %v1197_v15, %v3016_v54  ;;  %v1198_v62 = vadd.f32 0.5, %v1070_v5  ;;  %v1071_v40 = vmul.f32 0.5, %v2174_v55  ;;  %v818_v13 = vmul.f32 0.5, %v3117_v30  ;;  %v3163_v15 = vpop.f32.mrf.mxu0 }
 0x13f   :  { %v2178_v16 = vpop.eup %2177  ;;  %v1955_v63 = vpack.c.bf16 %v1261_v26, %v1260_v57  ;;  %v1262_v12 = vmul.f32 %v1134_v33, %v3020_v24  ;;  %v1135_v38 = vadd.f32 0.5, %v1007_v61  ;;  %v1008_v32 = vmul.f32 0.5, %v2176_v19 }
 0x140   :  { %v1987_v7 = vpack.c.bf16 %v1325_v45, %v1324_v47  ;;  %v1326_v20 = vmul.f32 %v1198_v62, %v3024_v8  ;;  %v1199_v59 = vadd.f32 0.5, %v1071_v40  ;;  %v1072_v11 = vmul.f32 0.5, %v2178_v16 }
 0x141   :  { %1757 = vst [vmem:[%s3594_s3 + $0x78] sm:$0xff] %v1955_v63  ;;  %v1263_v54 = vmul.f32 %v1135_v38, %v3032_v48  ;;  %v1136_v3 = vadd.f32 0.5, %v1008_v32  ;;  %2183 = vtanh.f32 %v754_v27  ;;  %v3147_v24 = vadd.f32 %v2943_v60, %v2484_v42  ;;  %v3194_v27 = vpop.f32.mrf.mxu1 }
 0x142   :  { %v2180_v36 = vpop.eup %2179  ;;  %1789 = vst [vmem:[%s3594_s3 + $0x178] sm:$0xff] %v1987_v7  ;;  %v1327_v8 = vmul.f32 %v1199_v59, %v3036_v17  ;;  %v1200_v22 = vadd.f32 0.5, %v1072_v11  ;;  %2185 = vtanh.f32 %v818_v13  ;;  %v3155_v0 = vadd.f32 %v2976_v50, %v2484_v42 }
 0x143   :  { %v2182_v48 = vpop.eup %2181  ;;  %v1956_v37 = vpack.c.bf16 %v1263_v54, %v1262_v12  ;;  %v1264_v57 = vmul.f32 %v1136_v3, %v3049_v49  ;;  %v1009_v18 = vmul.f32 0.5, %v2180_v36  ;;  %v755_v60 = vmul.f32 0.5, %v3147_v24  ;;  %v679_v12 = vpop.f32.mrf.mxu1 }
 0x144   :  { %v1988_v14 = vpack.c.bf16 %v1327_v8, %v1326_v20  ;;  %v1328_v35 = vmul.f32 %v1200_v22, %v3053_v58  ;;  %v1073_v47 = vmul.f32 0.5, %v2182_v48  ;;  %v819_v17 = vmul.f32 0.5, %v3155_v0 }
 0x145   :  { %1758 = vst [vmem:[%s3594_s3 + $0x80] sm:$0xff] %v1956_v37  ;;  %v1137_v50 = vadd.f32 0.5, %v1009_v18  ;;  %2187 = vtanh.f32 %v755_v60  ;;  %v3170_v49 = vadd.f32 %v2981_v53, %v2482_v41  ;;  %v3174_v5 = vadd.f32 %v3006_v10, %v2482_v41 }
 0x146   :  { %1790 = vst [vmem:[%s3594_s3 + $0x180] sm:$0xff] %v1988_v14  ;;  %v1201_v58 = vadd.f32 0.5, %v1073_v47  ;;  %2189 = vtanh.f32 %v819_v17  ;;  %v3181_v55 = vadd.f32 %v3011_v4, %v2484_v42  ;;  %v3185_v26 = vadd.f32 %v3038_v43, %v2484_v42 }
 0x147   :  { %v1265_v53 = vmul.f32 %v1137_v50, %v3057_v46  ;;  %v756_v33 = vmul.f32 0.5, %v3170_v49  ;;  %v820_v10 = vmul.f32 0.5, %v3174_v5  ;;  %v3192_v61 = vadd.f32 %v3042_v1, %v2482_v41  ;;  %v3203_v46 = vpop.f32.mrf.mxu0 }
 0x148   :  { %v1329_v19 = vmul.f32 %v1201_v58, %v3061_v21  ;;  %v757_v4 = vmul.f32 0.5, %v3181_v55  ;;  %v821_v45 = vmul.f32 0.5, %v3185_v26  ;;  %v3201_v43 = vadd.f32 %v3063_v28, %v2482_v41 }
 0x149   :  { %v1957_v62 = vpack.c.bf16 %v1265_v53, %v1264_v57  ;;  %2191 = vtanh.f32 %v756_v33  ;;  %v758_v40 = vmul.f32 0.5, %v3192_v61  ;;  %v3208_v1 = vadd.f32 %v3067_v31, %v2484_v42  ;;  %v3239_v32 = vpop.f32.mrf.mxu0 }
 0x14a   :  { %v1989_v13 = vpack.c.bf16 %v1329_v19, %v1328_v35  ;;  %2193 = vtanh.f32 %v820_v10  ;;  %v822_v21 = vmul.f32 0.5, %v3201_v43  ;;  %v3213_v16 = vadd.f32 %v3076_v25, %v2484_v42 }
 0x14b   :  { %1759 = vst [vmem:[%s3594_s3 + $0x88] sm:$0xff] %v1957_v62  ;;  %2195 = vtanh.f32 %v757_v4  ;;  %v759_v28 = vmul.f32 0.5, %v3208_v1  ;;  %v3221_v63 = vadd.f32 %v3079_v2, %v2482_v41  ;;  %v3225_v31 = vadd.f32 %v3084_v34, %v2482_v41 }
 0x14c   :  { %1791 = vst [vmem:[%s3594_s3 + $0x188] sm:$0xff] %v1989_v13  ;;  %2197 = vtanh.f32 %v821_v45  ;;  %v823_v25 = vmul.f32 0.5, %v3213_v16  ;;  %v3233_v38 = vadd.f32 %v3087_v23, %v2484_v42  ;;  %v3237_v2 = vadd.f32 %v3098_v29, %v2484_v42 }
 0x14d   :  { %2199 = vtanh.f32 %v758_v40  ;;  %v760_v34 = vmul.f32 0.5, %v3221_v63  ;;  %v824_v7 = vmul.f32 0.5, %v3225_v31  ;;  %v3245_v20 = vadd.f32 %v3101_v51, %v2482_v41  ;;  %v3258_v51 = vpop.f32.mrf.mxu1 }
 0x14e   :  { %v2184_v59 = vpop.eup %2183  ;;  %2201 = vtanh.f32 %v822_v21  ;;  %v761_v23 = vmul.f32 0.5, %v3233_v38  ;;  %v825_v11 = vmul.f32 0.5, %v3237_v2  ;;  %v3251_v29 = vadd.f32 %v3120_v9, %v2482_v41  ;;  %v3265_v9 = vpop.f32.mrf.mxu0 }
 0x14f   :  { %v2186_v54 = vpop.eup %2185  ;;  %v1010_v3 = vmul.f32 0.5, %v2184_v59  ;;  %2203 = vtanh.f32 %v759_v28  ;;  %v762_v36 = vmul.f32 0.5, %v3245_v20  ;;  %v3256_v8 = vadd.f32 %v3123_v6, %v2484_v42  ;;  %v3279_v53 = vpop.f32.mrf.mxu1 }
 0x150   :  { %v1074_v22 = vmul.f32 0.5, %v2186_v54  ;;  %2205 = vtanh.f32 %v823_v25  ;;  %v826_v48 = vmul.f32 0.5, %v3251_v29  ;;  %v3263_v37 = vadd.f32 %v3136_v52, %v2484_v42  ;;  %v3283_v19 = vpop.f32.mrf.mxu0 }
 0x151   :  { %v1138_v57 = vadd.f32 0.5, %v1010_v3  ;;  %2207 = vtanh.f32 %v760_v34  ;;  %v763_v18 = vmul.f32 0.5, %v3256_v8  ;;  %v3270_v6 = vadd.f32 %v3139_v39, %v2482_v41  ;;  %v3302_v25 = vpop.f32.mrf.mxu1 }
 0x152   :  { %v2188_v60 = vpop.eup %2187  ;;  %v1202_v14 = vadd.f32 0.5, %v1074_v22  ;;  %2209 = vtanh.f32 %v824_v7  ;;  %v827_v35 = vmul.f32 0.5, %v3263_v37  ;;  %v3275_v47 = vadd.f32 %v3159_v56, %v2482_v41  ;;  %v3306_v59 = vpop.f32.mrf.mxu0 }
 0x153   :  { %v2190_v52 = vpop.eup %2189  ;;  %v1266_v17 = vmul.f32 %v1138_v57, %v3109_v44  ;;  %v1011_v50 = vmul.f32 0.5, %v2188_v60  ;;  %2211 = vtanh.f32 %v761_v23  ;;  %v764_v58 = vmul.f32 0.5, %v3270_v6  ;;  %v3312_v60 = vpop.f32.mrf.mxu1 }
 0x154   :  { %v1330_v39 = vmul.f32 %v1202_v14, %v3117_v30  ;;  %v1075_v33 = vmul.f32 0.5, %v2190_v52  ;;  %2213 = vtanh.f32 %v825_v11  ;;  %v828_v10 = vmul.f32 0.5, %v3275_v47 }
 0x155   :  { %v1139_v4 = vadd.f32 0.5, %v1011_v50  ;;  %2215 = vtanh.f32 %v762_v36  ;;  %v3287_v56 = vadd.f32 %v3163_v15, %v2484_v42  ;;  %v3291_v44 = vadd.f32 %v3194_v27, %v2484_v42  ;;  %v3318_v50 = vpop.f32.mrf.mxu0 }
 0x156   :  { %v2192_v45 = vpop.eup %2191  ;;  %v1203_v62 = vadd.f32 0.5, %v1075_v33  ;;  %2217 = vtanh.f32 %v826_v48  ;;  %v3295_v30 = vadd.f32 %v3203_v46, %v2482_v41  ;;  %v3298_v40 = vadd.f32 %v679_v12, %v2482_v41 }
 0x157   :  { %v2194_v13 = vpop.eup %2193  ;;  %v1267_v21 = vmul.f32 %v1139_v4, %v3147_v24  ;;  %v1012_v28 = vmul.f32 0.5, %v2192_v45  ;;  %2219 = vtanh.f32 %v763_v18  ;;  %v765_v15 = vmul.f32 0.5, %v3287_v56 }
 0x158   :  { %v2196_v27 = vpop.eup %2195  ;;  %v1331_v34 = vmul.f32 %v1203_v62, %v3155_v0  ;;  %v1076_v7 = vmul.f32 0.5, %v2194_v13  ;;  %2221 = vtanh.f32 %v827_v35  ;;  %v829_v46 = vmul.f32 0.5, %v3291_v44 }
 0x159   :  { %v2198_v12 = vpop.eup %2197  ;;  %v1958_v23 = vpack.c.bf16 %v1267_v21, %v1266_v17  ;;  %v1140_v11 = vadd.f32 0.5, %v1012_v28  ;;  %v1013_v54 = vmul.f32 0.5, %v2196_v27  ;;  %2223 = vtanh.f32 %v764_v58 }
 0x15a   :  { %v2200_v24 = vpop.eup %2199  ;;  %v1990_v3 = vpack.c.bf16 %v1331_v34, %v1330_v39  ;;  %v1204_v36 = vadd.f32 0.5, %v1076_v7  ;;  %v1077_v22 = vmul.f32 0.5, %v2198_v12  ;;  %2225 = vtanh.f32 %v828_v10  ;;  %v3325_v7 = vpop.f32.mrf.mxu1 }
 0x15b   :  { %v2202_v48 = vpop.eup %2201  ;;  %1760 = vst [vmem:[%s3594_s3 + $0x90] sm:$0xff] %v1958_v23  ;;  %v1268_v0 = vmul.f32 %v1140_v11, %v3170_v49  ;;  %v1141_v57 = vadd.f32 0.5, %v1013_v54  ;;  %v1014_v18 = vmul.f32 0.5, %v2200_v24  ;;  %2227 = vtanh.f32 %v765_v15  ;;  %v3328_v54 = vpop.f32.mrf.mxu0 }
 0x15c   :  { %v2204_v14 = vpop.eup %2203  ;;  %1792 = vst [vmem:[%s3594_s3 + $0x190] sm:$0xff] %v1990_v3  ;;  %v1332_v35 = vmul.f32 %v1204_v36, %v3174_v5  ;;  %v1205_v52 = vadd.f32 0.5, %v1077_v22  ;;  %v1078_v17 = vmul.f32 0.5, %v2202_v48  ;;  %2229 = vtanh.f32 %v829_v46 }
 0x15d   :  { %v2206_v58 = vpop.eup %2205  ;;  %v1269_v49 = vmul.f32 %v1141_v57, %v3181_v55  ;;  %v1142_v39 = vadd.f32 0.5, %v1014_v18  ;;  %v1015_v33 = vmul.f32 0.5, %v2204_v14  ;;  %v766_v10 = vmul.f32 0.5, %v3295_v30 }
 0x15e   :  { %v2208_v4 = vpop.eup %2207  ;;  %v1333_v45 = vmul.f32 %v1205_v52, %v3185_v26  ;;  %v1206_v62 = vadd.f32 0.5, %v1078_v17  ;;  %v1079_v13 = vmul.f32 0.5, %v2206_v58  ;;  %v830_v21 = vmul.f32 0.5, %v3298_v40 }
 0x15f   :  { %v2210_v5 = vpop.eup %2209  ;;  %v1959_v28 = vpack.c.bf16 %v1269_v49, %v1268_v0  ;;  %v1270_v15 = vmul.f32 %v1142_v39, %v3192_v61  ;;  %v1143_v27 = vadd.f32 0.5, %v1015_v33  ;;  %v1016_v34 = vmul.f32 0.5, %v2208_v4  ;;  %v3342_v33 = vpop.f32.mrf.mxu0 }
 0x160   :  { %v2212_v55 = vpop.eup %2211  ;;  %v1991_v46 = vpack.c.bf16 %v1333_v45, %v1332_v35  ;;  %v1334_v12 = vmul.f32 %v1206_v62, %v3201_v43  ;;  %v1207_v23 = vadd.f32 0.5, %v1079_v13  ;;  %v1080_v11 = vmul.f32 0.5, %v2210_v5 }
 0x161   :  { %v2214_v26 = vpop.eup %2213  ;;  %1761 = vst [vmem:[%s3594_s3 + $0x98] sm:$0xff] %v1959_v28  ;;  %v1271_v24 = vmul.f32 %v1143_v27, %v3208_v1  ;;  %v1144_v61 = vadd.f32 0.5, %v1016_v34  ;;  %v1017_v3 = vmul.f32 0.5, %v2212_v55  ;;  %2231 = vtanh.f32 %v766_v10  ;;  %v3339_v1 = vpop.f32.mrf.mxu1 }
 0x162   :  { %v2216_v36 = vpop.eup %2215  ;;  %1793 = vst [vmem:[%s3594_s3 + $0x198] sm:$0xff] %v1991_v46  ;;  %v1335_v43 = vmul.f32 %v1207_v23, %v3213_v16  ;;  %v1208_v22 = vadd.f32 0.5, %v1080_v11  ;;  %v1081_v48 = vmul.f32 0.5, %v2214_v26  ;;  %2233 = vtanh.f32 %v830_v21  ;;  %v3364_v11 = vpop.f32.mrf.mxu0 }
 0x163   :  { %v2218_v0 = vpop.eup %2217  ;;  %v1960_v57 = vpack.c.bf16 %v1271_v24, %v1270_v15  ;;  %v1272_v18 = vmul.f32 %v1144_v61, %v3221_v63  ;;  %v1145_v14 = vadd.f32 0.5, %v1017_v3  ;;  %v1018_v35 = vmul.f32 0.5, %v2216_v36  ;;  %v3361_v34 = vpop.f32.mrf.mxu1 }
 0x164   :  { %v2220_v52 = vpop.eup %2219  ;;  %v1992_v17 = vpack.c.bf16 %v1335_v43, %v1334_v12  ;;  %v1336_v58 = vmul.f32 %v1208_v22, %v3225_v31  ;;  %v1209_v49 = vadd.f32 0.5, %v1081_v48  ;;  %v1082_v39 = vmul.f32 0.5, %v2218_v0 }
 0x165   :  { %v2222_v16 = vpop.eup %2221  ;;  %1762 = vst [vmem:[%s3594_s3 + $0xa0] sm:$0xff] %v1960_v57  ;;  %v1273_v10 = vmul.f32 %v1145_v14, %v3233_v38  ;;  %v1146_v63 = vadd.f32 0.5, %v1018_v35  ;;  %v1019_v4 = vmul.f32 0.5, %v2220_v52  ;;  %v3350_v45 = vadd.f32 %v3239_v32, %v2484_v42  ;;  %v541_v35 = vpop.f32.mrf.mxu0 }
 0x166   :  { %v2224_v62 = vpop.eup %2223  ;;  %1794 = vst [vmem:[%s3594_s3 + $0x1a0] sm:$0xff] %v1992_v17  ;;  %v1337_v31 = vmul.f32 %v1209_v49, %v3237_v2  ;;  %v1210_v13 = vadd.f32 0.5, %v1082_v39  ;;  %v1083_v21 = vmul.f32 0.5, %v2222_v16  ;;  %v3358_v5 = vadd.f32 %v3258_v51, %v2484_v42 }
 0x167   :  { %v2226_v38 = vpop.eup %2225  ;;  %v1961_v28 = vpack.c.bf16 %v1273_v10, %v1272_v18  ;;  %v1274_v15 = vmul.f32 %v1146_v63, %v3245_v20  ;;  %v1147_v27 = vadd.f32 0.5, %v1019_v4  ;;  %v1020_v32 = vmul.f32 0.5, %v2224_v62 }
 0x168   :  { %v2228_v55 = vpop.eup %2227  ;;  %v1993_v46 = vpack.c.bf16 %v1337_v31, %v1336_v58  ;;  %v1338_v12 = vmul.f32 %v1210_v13, %v3251_v29  ;;  %v1211_v23 = vadd.f32 0.5, %v1083_v21  ;;  %v1084_v2 = vmul.f32 0.5, %v2226_v38 }
 0x169   :  { %v2230_v26 = vpop.eup %2229  ;;  %1763 = vst [vmem:[%s3594_s3 + $0xa8] sm:$0xff] %v1961_v28  ;;  %v1275_v51 = vmul.f32 %v1147_v27, %v3256_v8  ;;  %v1148_v20 = vadd.f32 0.5, %v1020_v32  ;;  %v1021_v24 = vmul.f32 0.5, %v2228_v55  ;;  %v767_v61 = vmul.f32 0.5, %v3350_v45  ;;  %v699_v8 = vpop.f32.mrf.mxu1 }
 0x16a   :  { %1795 = vst [vmem:[%s3594_s3 + $0x1a8] sm:$0xff] %v1993_v46  ;;  %v1339_v29 = vmul.f32 %v1211_v23, %v3263_v37  ;;  %v1212_v3 = vadd.f32 0.5, %v1084_v2  ;;  %v1085_v36 = vmul.f32 0.5, %v2230_v26  ;;  %v831_v43 = vmul.f32 0.5, %v3358_v5 }
 0x16b   :  { %v1962_v22 = vpack.c.bf16 %v1275_v51, %v1274_v15  ;;  %v1276_v48 = vmul.f32 %v1148_v20, %v3270_v6  ;;  %v1149_v0 = vadd.f32 0.5, %v1021_v24  ;;  %2235 = vtanh.f32 %v767_v61 }
 0x16c   :  { %v1994_v57 = vpack.c.bf16 %v1339_v29, %v1338_v12  ;;  %v1340_v18 = vmul.f32 %v1212_v3, %v3275_v47  ;;  %v1213_v14 = vadd.f32 0.5, %v1085_v36  ;;  %2237 = vtanh.f32 %v831_v43 }
 0x16d   :  { %1764 = vst [vmem:[%s3594_s3 + $0xb0] sm:$0xff] %v1962_v22  ;;  %v1277_v37 = vmul.f32 %v1149_v0, %v3287_v56  ;;  %v3384_v52 = vadd.f32 %v3265_v9, %v2482_v41  ;;  %v3388_v6 = vadd.f32 %v3279_v53, %v2482_v41  ;;  %v3392_v47 = vadd.f32 %v3283_v19, %v2484_v42 }
 0x16e   :  { %v2232_v17 = vpop.eup %2231  ;;  %1796 = vst [vmem:[%s3594_s3 + $0x1b0] sm:$0xff] %v1994_v57  ;;  %v1341_v58 = vmul.f32 %v1213_v14, %v3291_v44  ;;  %v3400_v56 = vadd.f32 %v3302_v25, %v2484_v42  ;;  %v3404_v9 = vadd.f32 %v3306_v59, %v2482_v41  ;;  %v3408_v53 = vadd.f32 %v3312_v60, %v2482_v41  ;;  %v701_v44 = vpop.f32.mrf.mxu1 }
 0x16f   :  { %v2234_v19 = vpop.eup %2233  ;;  %v1963_v49 = vpack.c.bf16 %v1277_v37, %v1276_v48  ;;  %v1022_v39 = vmul.f32 0.5, %v2232_v17  ;;  %v768_v16 = vmul.f32 0.5, %v3384_v52  ;;  %v832_v10 = vmul.f32 0.5, %v3388_v6  ;;  %v543_v59 = vpop.f32.mrf.mxu0 }
 0x170   :  { %v1995_v63 = vpack.c.bf16 %v1341_v58, %v1340_v18  ;;  %v1086_v4 = vmul.f32 0.5, %v2234_v19  ;;  %v769_v25 = vmul.f32 0.5, %v3392_v47  ;;  %v833_v62 = vmul.f32 0.5, %v3400_v56  ;;  %v703_v55 = vpop.f32.mrf.mxu1 }
 0x171   :  { %1765 = vst [vmem:[%s3594_s3 + $0xb8] sm:$0xff] %v1963_v49  ;;  %v1150_v60 = vadd.f32 0.5, %v1022_v39  ;;  %2239 = vtanh.f32 %v768_v16  ;;  %v770_v31 = vmul.f32 0.5, %v3404_v9  ;;  %v834_v13 = vmul.f32 0.5, %v3408_v53 }
 0x172   :  { %1797 = vst [vmem:[%s3594_s3 + $0x1b8] sm:$0xff] %v1995_v63  ;;  %v1214_v21 = vadd.f32 0.5, %v1086_v4  ;;  %2241 = vtanh.f32 %v832_v10  ;;  %v3424_v38 = vadd.f32 %v3318_v50, %v2484_v42  ;;  %v3428_v28 = vadd.f32 %v3325_v7, %v2484_v42  ;;  %v705_v20 = vpop.f32.mrf.mxu1 }
 0x173   :  { %v3431_v15 = vmul.f32 %v1150_v60, %v3295_v30  ;;  %2243 = vtanh.f32 %v769_v25  ;;  %v3435_v27 = vadd.f32 %v3328_v54, %v2482_v41  ;;  %v3439_v32 = vadd.f32 %v3339_v1, %v2482_v41  ;;  %v545_v30 = vpop.f32.mrf.mxu0 }
 0x174   :  { %v3442_v50 = vmul.f32 %v1214_v21, %v3298_v40  ;;  %2245 = vtanh.f32 %v833_v62  ;;  %v771_v7 = vmul.f32 0.5, %v3424_v38  ;;  %v835_v46 = vmul.f32 0.5, %v3428_v28 }
 0x175   :  { %2247 = vtanh.f32 %v770_v31  ;;  %v772_v12 = vmul.f32 0.5, %v3435_v27  ;;  %v836_v54 = vmul.f32 0.5, %v3439_v32  ;;  %v3450_v23 = vadd.f32 %v3342_v33, %v2484_v42  ;;  %v549_v29 = vpop.f32.mrf.mxu0 }
 0x176   :  { %2249 = vtanh.f32 %v834_v13  ;;  %v3454_v40 = vadd.f32 %v3361_v34, %v2484_v42  ;;  %v3458_v1 = vadd.f32 %v3364_v11, %v2482_v41  ;;  %v3461_v2 = vadd.f32 %v699_v8, %v2482_v41 }
 0x177   :  { %2251 = vtanh.f32 %v771_v7  ;;  %v773_v26 = vmul.f32 0.5, %v3450_v23  ;;  %v3465_v51 = vadd.f32 %v541_v35, %v2484_v42  ;;  %v3468_v33 = vadd.f32 %v701_v44, %v2484_v42  ;;  %v709_v35 = vpop.f32.mrf.mxu1  ;;  %v551_v19 = vpop.f32.mrf.mxu0 }
 0x178   :  { %v2236_v24 = vpop.eup %2235  ;;  %2253 = vtanh.f32 %v835_v46  ;;  %v837_v34 = vmul.f32 0.5, %v3454_v40  ;;  %v774_v11 = vmul.f32 0.5, %v3458_v1  ;;  %v838_v61 = vmul.f32 0.5, %v3461_v2 }
 0x179   :  { %v2238_v3 = vpop.eup %2237  ;;  %v1023_v36 = vmul.f32 0.5, %v2236_v24  ;;  %2255 = vtanh.f32 %v772_v12  ;;  %v775_v43 = vmul.f32 0.5, %v3465_v51  ;;  %v839_v22 = vmul.f32 0.5, %v3468_v33 }
 0x17a   :  { %v1087_v48 = vmul.f32 0.5, %v2238_v3  ;;  %2257 = vtanh.f32 %v836_v54  ;;  %v3476_v0 = vadd.f32 %v543_v59, %v2482_v41  ;;  %v3479_v8 = vadd.f32 %v703_v55, %v2482_v41 }
 0x17b   :  { %v1151_v57 = vadd.f32 0.5, %v1023_v36  ;;  %2259 = vtanh.f32 %v773_v26  ;;  %v3482_v18 = vadd.f32 %v545_v30, %v2484_v42  ;;  %v3485_v14 = vadd.f32 %v705_v20, %v2484_v42 }
 0x17c   :  { %v1215_v37 = vadd.f32 0.5, %v1087_v48  ;;  %2261 = vtanh.f32 %v837_v34  ;;  %v776_v17 = vmul.f32 0.5, %v3476_v0  ;;  %v840_v58 = vmul.f32 0.5, %v3479_v8 }
 0x17d   :  { %v1279_v49 = vmul.f32 %v1151_v57, %v3350_v45  ;;  %2263 = vtanh.f32 %v774_v11  ;;  %v777_v39 = vmul.f32 0.5, %v3482_v18  ;;  %v841_v16 = vmul.f32 0.5, %v3485_v14 }
 0x17e   :  { %v2240_v10 = vpop.eup %2239  ;;  %v1343_v44 = vmul.f32 %v1215_v37, %v3358_v5  ;;  %2265 = vtanh.f32 %v838_v61  ;;  %v3494_v63 = vadd.f32 %v549_v29, %v2482_v41  ;;  %v3497_v4 = vadd.f32 %v709_v35, %v2482_v41 }
 0x17f   :  { %v2242_v25 = vpop.eup %2241  ;;  %v1964_v62 = vpack.c.bf16 %v1279_v49, %v3431_v15  ;;  %v1024_v59 = vmul.f32 0.5, %v2240_v10  ;;  %2267 = vtanh.f32 %v775_v43  ;;  %v3501_v45 = vadd.f32 %v551_v19, %v2484_v42  ;;  %v711_v49 = vpop.f32.mrf.mxu1 }
 0x180   :  { %v2244_v60 = vpop.eup %2243  ;;  %v1996_v31 = vpack.c.bf16 %v1343_v44, %v3442_v50  ;;  %v1088_v13 = vmul.f32 0.5, %v2242_v25  ;;  %2269 = vtanh.f32 %v839_v22  ;;  %v778_v5 = vmul.f32 0.5, %v3494_v63 }
 0x181   :  { %v2246_v21 = vpop.eup %2245  ;;  %1766 = vst [vmem:[%s3594_s3 + $0xc0] sm:$0xff] %v1964_v62  ;;  %v1152_v55 = vadd.f32 0.5, %v1024_v59  ;;  %v1025_v7 = vmul.f32 0.5, %v2244_v60  ;;  %2271 = vtanh.f32 %v776_v17  ;;  %v842_v15 = vmul.f32 0.5, %v3497_v4 }
 0x182   :  { %v2248_v46 = vpop.eup %2247  ;;  %1798 = vst [vmem:[%s3594_s3 + $0x1c0] sm:$0xff] %v1996_v31  ;;  %v1216_v50 = vadd.f32 0.5, %v1088_v13  ;;  %v1089_v30 = vmul.f32 0.5, %v2246_v21  ;;  %2273 = vtanh.f32 %v840_v58  ;;  %v779_v12 = vmul.f32 0.5, %v3501_v45 }
 0x183   :  { %v2250_v54 = vpop.eup %2249  ;;  %v1280_v26 = vmul.f32 %v1152_v55, %v3384_v52  ;;  %v1153_v20 = vadd.f32 0.5, %v1025_v7  ;;  %v1026_v24 = vmul.f32 0.5, %v2248_v46  ;;  %2275 = vtanh.f32 %v777_v39 }
 0x184   :  { %v2252_v34 = vpop.eup %2251  ;;  %v1344_v11 = vmul.f32 %v1216_v50, %v3388_v6  ;;  %v1217_v61 = vadd.f32 0.5, %v1089_v30  ;;  %v1090_v29 = vmul.f32 0.5, %v2250_v54  ;;  %2277 = vtanh.f32 %v841_v16 }
 0x185   :  { %v2254_v3 = vpop.eup %2253  ;;  %v1281_v36 = vmul.f32 %v1153_v20, %v3392_v47  ;;  %v1154_v43 = vadd.f32 0.5, %v1026_v24  ;;  %v1027_v22 = vmul.f32 0.5, %v2252_v34  ;;  %2279 = vtanh.f32 %v778_v5 }
 0x186   :  { %v2256_v48 = vpop.eup %2255  ;;  %v1345_v57 = vmul.f32 %v1217_v61, %v3400_v56  ;;  %v1218_v35 = vadd.f32 0.5, %v1090_v29  ;;  %v1091_v52 = vmul.f32 0.5, %v2254_v3  ;;  %2281 = vtanh.f32 %v842_v15  ;;  %v553_v15 = vpop.f32.mrf.mxu0 }
 0x187   :  { %v2258_v37 = vpop.eup %2257  ;;  %v1965_v17 = vpack.c.bf16 %v1281_v36, %v1280_v26  ;;  %v1282_v58 = vmul.f32 %v1154_v43, %v3404_v9  ;;  %v1155_v6 = vadd.f32 0.5, %v1027_v22  ;;  %v1028_v19 = vmul.f32 0.5, %v2256_v48  ;;  %v713_v48 = vpop.f32.mrf.mxu1 }
 0x188   :  { %v2260_v39 = vpop.eup %2259  ;;  %v1997_v16 = vpack.c.bf16 %v1345_v57, %v1344_v11  ;;  %v1346_v47 = vmul.f32 %v1218_v35, %v3408_v53  ;;  %v1219_v10 = vadd.f32 0.5, %v1091_v52  ;;  %v1092_v44 = vmul.f32 0.5, %v2258_v37 }
 0x189   :  { %v2262_v25 = vpop.eup %2261  ;;  %1767 = vst [vmem:[%s3594_s3 + $0xc8] sm:$0xff] %v1965_v17  ;;  %v1283_v56 = vmul.f32 %v1155_v6, %v3424_v38  ;;  %v1156_v62 = vadd.f32 0.5, %v1028_v19  ;;  %v1029_v59 = vmul.f32 0.5, %v2260_v39  ;;  %2283 = vtanh.f32 %v779_v12 }
 0x18a   :  { %v2264_v9 = vpop.eup %2263  ;;  %1799 = vst [vmem:[%s3594_s3 + $0x1c8] sm:$0xff] %v1997_v16  ;;  %v1347_v60 = vmul.f32 %v1219_v10, %v3428_v28  ;;  %v1220_v53 = vadd.f32 0.5, %v1092_v44  ;;  %v1093_v31 = vmul.f32 0.5, %v2262_v25  ;;  %v3528_v13 = vadd.f32 %v711_v49, %v2484_v42 }
 0x18b   :  { %v2266_v5 = vpop.eup %2265  ;;  %v1966_v21 = vpack.c.bf16 %v1283_v56, %v1282_v58  ;;  %v1284_v55 = vmul.f32 %v1156_v62, %v3435_v27  ;;  %v1157_v38 = vadd.f32 0.5, %v1029_v59  ;;  %v1030_v7 = vmul.f32 0.5, %v2264_v9  ;;  %v555_v56 = vpop.f32.mrf.mxu0 }
 0x18c   :  { %v2268_v46 = vpop.eup %2267  ;;  %v1998_v50 = vpack.c.bf16 %v1347_v60, %v1346_v47  ;;  %v1348_v30 = vmul.f32 %v1220_v53, %v3439_v32  ;;  %v1221_v12 = vadd.f32 0.5, %v1093_v31  ;;  %v1094_v54 = vmul.f32 0.5, %v2266_v5 }
 0x18d   :  { %v2270_v26 = vpop.eup %2269  ;;  %1768 = vst [vmem:[%s3594_s3 + $0xd0] sm:$0xff] %v1966_v21  ;;  %v1285_v28 = vmul.f32 %v1157_v38, %v3450_v23  ;;  %v1158_v20 = vadd.f32 0.5, %v1030_v7  ;;  %v1031_v24 = vmul.f32 0.5, %v2268_v46  ;;  %v843_v27 = vmul.f32 0.5, %v3528_v13 }
 0x18e   :  { %v2272_v34 = vpop.eup %2271  ;;  %1800 = vst [vmem:[%s3594_s3 + $0x1d0] sm:$0xff] %v1998_v50  ;;  %v1349_v32 = vmul.f32 %v1221_v12, %v3454_v40  ;;  %v1222_v11 = vadd.f32 0.5, %v1094_v54  ;;  %v1095_v61 = vmul.f32 0.5, %v2270_v26  ;;  %v3542_v29 = vadd.f32 %v553_v15, %v2482_v41 }
 0x18f   :  { %v2274_v3 = vpop.eup %2273  ;;  %v1967_v36 = vpack.c.bf16 %v1285_v28, %v1284_v55  ;;  %v1286_v23 = vmul.f32 %v1158_v20, %v3458_v1  ;;  %v1159_v43 = vadd.f32 0.5, %v1031_v24  ;;  %v1032_v22 = vmul.f32 0.5, %v2272_v34 }
 0x190   :  { %v2276_v57 = vpop.eup %2275  ;;  %v1999_v35 = vpack.c.bf16 %v1349_v32, %v1348_v30  ;;  %v1350_v52 = vmul.f32 %v1222_v11, %v3461_v2  ;;  %v1223_v37 = vadd.f32 0.5, %v1095_v61  ;;  %v1096_v17 = vmul.f32 0.5, %v2274_v3 }
 0x191   :  { %v2278_v58 = vpop.eup %2277  ;;  %1769 = vst [vmem:[%s3594_s3 + $0xd8] sm:$0xff] %v1967_v36  ;;  %v1287_v40 = vmul.f32 %v1159_v43, %v3465_v51  ;;  %v1160_v6 = vadd.f32 0.5, %v1032_v22  ;;  %v1033_v19 = vmul.f32 0.5, %v2276_v57  ;;  %2285 = vtanh.f32 %v843_v27  ;;  %v715_v51 = vpop.f32.mrf.mxu1 }
 0x192   :  { %v2280_v1 = vpop.eup %2279  ;;  %1801 = vst [vmem:[%s3594_s3 + $0x1d8] sm:$0xff] %v1999_v35  ;;  %v1351_v49 = vmul.f32 %v1223_v37, %v3468_v33  ;;  %v1224_v2 = vadd.f32 0.5, %v1096_v17  ;;  %v1097_v39 = vmul.f32 0.5, %v2278_v58  ;;  %v780_v16 = vmul.f32 0.5, %v3542_v29 }
 0x193   :  { %v2282_v47 = vpop.eup %2281  ;;  %v1968_v10 = vpack.c.bf16 %v1287_v40, %v1286_v23  ;;  %v1161_v44 = vadd.f32 0.5, %v1033_v19  ;;  %v1034_v25 = vmul.f32 0.5, %v2280_v1  ;;  %v1288_v9 = vmul.f32 %v1160_v6, %v3476_v0 }
 0x194   :  { %v2000_v62 = vpack.c.bf16 %v1351_v49, %v1350_v52  ;;  %v1225_v59 = vadd.f32 0.5, %v1097_v39  ;;  %2287 = vtanh.f32 %v780_v16  ;;  %v714_v60 = vadd.f32 %v713_v48, %v2482_v41 }
 0x195   :  { %1770 = vst [vmem:[%s3594_s3 + $0xe0] sm:$0xff] %v1968_v10  ;;  %v1289_v33 = vmul.f32 %v1161_v44, %v3482_v18  ;;  %v1352_v31 = vmul.f32 %v1224_v2, %v3479_v8  ;;  %v556_v21 = vadd.f32 %v555_v56, %v2484_v42  ;;  %v716_v55 = vadd.f32 %v715_v51, %v2484_v42 }
 0x196   :  { %v2284_v53 = vpop.eup %2283  ;;  %1802 = vst [vmem:[%s3594_s3 + $0x1e0] sm:$0xff] %v2000_v62  ;;  %v1353_v5 = vmul.f32 %v1225_v59, %v3485_v14  ;;  %v1162_v0 = vadd.f32 0.5, %v1034_v25  ;;  %v844_v18 = vmul.f32 0.5, %v714_v60  ;;  %v1098_v8 = vmul.f32 0.5, %v2282_v47 }
 0x197   :  { %v1969_v38 = vpack.c.bf16 %v1289_v33, %v1288_v9  ;;  %v1035_v7 = vmul.f32 0.5, %v2284_v53  ;;  %v781_v46 = vmul.f32 0.5, %v556_v21  ;;  %v845_v41 = vmul.f32 0.5, %v716_v55 }
 0x198   :  { %v2001_v15 = vpack.c.bf16 %v1353_v5, %v1352_v31  ;;  %2289 = vtanh.f32 %v844_v18  ;;  %v1290_v42 = vmul.f32 %v1162_v0, %v3494_v63  ;;  %v1226_v54 = vadd.f32 0.5, %v1098_v8 }
 0x199   :  { %1771 = vst [vmem:[%s3594_s3 + $0xe8] sm:$0xff] %v1969_v38  ;;  %v1163_v50 = vadd.f32 0.5, %v1035_v7  ;;  %2291 = vtanh.f32 %v781_v46 }
 0x19a   :  { %1803 = vst [vmem:[%s3594_s3 + $0x1e8] sm:$0xff] %v2001_v15  ;;  %2293 = vtanh.f32 %v845_v41  ;;  %v1354_v24 = vmul.f32 %v1226_v54, %v3497_v4 }
 0x19b   :  { %v1291_v14 = vmul.f32 %v1163_v50, %v3501_v45 }
 0x19d   :  { %v1970_v30 = vpack.c.bf16 %v1291_v14, %v1290_v42 }
 0x19e   :  { %v2286_v12 = vpop.eup %2285 }
 0x19f   :  { %1772 = vst [vmem:[%s3594_s3 + $0xf0] sm:$0xff] %v1970_v30  ;;  %v1099_v26 = vmul.f32 0.5, %v2286_v12 }
 0x1a1   :  { %v1227_v28 = vadd.f32 0.5, %v1099_v26  ;;  %v2288_v20 = vpop.eup %2287 }
 0x1a2   :  { %v1036_v34 = vmul.f32 0.5, %v2288_v20 }
 0x1a3   :  { %v1355_v27 = vmul.f32 %v1227_v28, %v3528_v13 }
 0x1a4   :  { %v1164_v3 = vadd.f32 0.5, %v1036_v34 }
 0x1a5   :  { %v2002_v63 = vpack.c.bf16 %v1355_v27, %v1354_v24  ;;  %v2290_v32 = vpop.eup %2289 }
 0x1a6   :  { %v2292_v11 = vpop.eup %2291  ;;  %v1100_v45 = vmul.f32 0.5, %v2290_v32  ;;  %v1292_v4 = vmul.f32 %v1164_v3, %v3542_v29 }
 0x1a7   :  { %1804 = vst [vmem:[%s3594_s3 + $0x1f0] sm:$0xff] %v2002_v63  ;;  %v2294_v61 = vpop.eup %2293  ;;  %v1037_v36 = vmul.f32 0.5, %v2292_v11 }
 0x1a8   :  { %v1228_v23 = vadd.f32 0.5, %v1100_v45  ;;  %v1101_v43 = vmul.f32 0.5, %v2294_v61 }
 0x1a9   :  { %v1165_v22 = vadd.f32 0.5, %v1037_v36 }
 0x1aa   :  { %v1229_v48 = vadd.f32 0.5, %v1101_v43  ;;  %v1356_v13 = vmul.f32 %v1228_v23, %v714_v60 }
 0x1ab   :  { %v1293_v57 = vmul.f32 %v1165_v22, %v556_v21 }
 0x1ac   :  { %v1357_v35 = vmul.f32 %v1229_v48, %v716_v55 }
 0x1ad   :  { %v1971_v52 = vpack.c.bf16 %v1293_v57, %v1292_v4 }
 0x1ae   :  { %v2003_v37 = vpack.c.bf16 %v1357_v35, %v1356_v13 }
 0x1af   :  { %1773 = vst [vmem:[%s3594_s3 + $0xf8] sm:$0xff] %v1971_v52 }
 0x1b0   :  { %1805 = vst [vmem:[%s3594_s3 + $0x1f8] sm:$0xff] %v2003_v37 }

// kernel: c3_forward.7
= control target key start
LH: loop header
LB: loop body
LE: loop exit
PB: predicated region body
PF: predicated region fallthrough
CT: control target
= control target key end

     0   :  { %s3472_s0 = inlined_call_operand.vmem [shape: bf16[512,128], index: 0, kind: input, shape index: {}]   ;;  %s3473_s1 = inlined_call_operand.vmem [shape: bf16[128,128], index: 1, kind: input, shape index: {}]   ;;  %s3474_s2 = inlined_call_operand.vmem [shape: bf16[512,256], index: 2, kind: input, shape index: {}]   ;;  %s3475_s3 = inlined_call_operand.vmem [shape: bf16[128,128], index: 3, kind: input, shape index: {}]   ;;  %s3476_s4 = inlined_call_operand.vmem [shape: f32[1,128], index: 4, kind: input, shape index: {}]   ;;  %s3477_s5 = inlined_call_operand.vmem [shape: f32[512,128], index: 5, kind: output, shape index: {}]  }
   0x1   :  { %v2383_v0 = vld [vmem:[%s3475_s3 + $0x38] sm:$0xff]   ;;  %v2385_v2 = vld [vmem:[%s3475_s3 + $0x30] sm:$0xff]   ;;  %v2387_v4 = vld [vmem:[%s3475_s3 + $0x28] sm:$0xff]  }
   0x2   :  { %v2384_v1 = vld [vmem:[%s3473_s1 + $0x38] sm:$0xff]   ;;  %2223 = vmatprep.subr.bf16.mxu0 %v2383_v0  ;;  %v2386_v3 = vld [vmem:[%s3473_s1 + $0x30] sm:$0xff]   ;;  %v2388_v5 = vld [vmem:[%s3473_s1 + $0x28] sm:$0xff]  }
   0x3   :  { %2303 = vmatprep.subr.bf16.mxu1 %v2384_v1  ;;  %2224 = vmatpush3.bf16.msra.mxu0 %v2383_v0  ;;  %v2389_v6 = vld [vmem:[%s3475_s3 + $0x20] sm:$0xff]   ;;  %v2391_v8 = vld [vmem:[%s3475_s3 + $0x18] sm:$0xff]   ;;  %v2393_v10 = vld [vmem:[%s3475_s3 + $0x10] sm:$0xff]  }
   0x4   :  { %2304 = vmatpush3.bf16.msra.mxu1 %v2384_v1  ;;  %2225 = vmatprep.subr.bf16.mxu0 %v2385_v2  ;;  %v2390_v7 = vld [vmem:[%s3473_s1 + $0x20] sm:$0xff]   ;;  %v2392_v9 = vld [vmem:[%s3473_s1 + $0x18] sm:$0xff]   ;;  %v2394_v11 = vld [vmem:[%s3473_s1 + $0x10] sm:$0xff]  }
   0x5   :  { %2305 = vmatprep.subr.bf16.mxu1 %v2386_v3  ;;  %v1998_v12 = vld [vmem:[%s3474_s2 + $0x4] sm:$0xf]  ;;  %v1999_v13 = vld [vmem:[%s3474_s2 + $0xc] sm:$0xf]  ;;  %v2000_v15 = vld [vmem:[%s3474_s2 + $0x14] sm:$0xf] }
   0x6   :  { %34 = vst [vmem:[#allocation2] sm:$0xf] %v1998_v12  ;;  %36 = vst [vmem:[#allocation2 + $0x4] sm:$0xf] %v1999_v13  ;;  %v2400_v14 = vld [vmem:[%s3472_s0] sm:$0xff]   ;;  %v2395_v17 = vld [vmem:[%s3475_s3 + $0x8] sm:$0xff]  }
   0x7   :  { %2226 = vmatpush3.bf16.msra.mxu0 %v2385_v2  ;;  %38 = vst [vmem:[#allocation2 + $0x8] sm:$0xf] %v2000_v15  ;;  %v2001_v16 = vld [vmem:[%s3474_s2 + $0x1c] sm:$0xf]  ;;  %2319 = vmatprep.mubr.bf16.mxu1 %v2400_v14  ;;  %v2002_v18 = vld [vmem:[%s3474_s2 + $0x24] sm:$0xf] }
   0x8   :  { %2306 = vmatpush3.bf16.msra.mxu1 %v2386_v3  ;;  %2227 = vmatprep.subr.bf16.mxu0 %v2387_v4  ;;  %40 = vst [vmem:[#allocation2 + $0xc] sm:$0xf] %v2001_v16  ;;  %v2003_v19 = vld [vmem:[%s3474_s2 + $0x2c] sm:$0xf]  ;;  %42 = vst [vmem:[#allocation2 + $0x10] sm:$0xf] %v2002_v18 }
   0x9   :  { %2307 = vmatprep.subr.bf16.mxu1 %v2388_v5  ;;  %v2396_v20 = vld [vmem:[%s3473_s1 + $0x8] sm:$0xff]   ;;  %44 = vst [vmem:[#allocation2 + $0x14] sm:$0xf] %v2003_v19  ;;  %v2004_v21 = vld [vmem:[%s3474_s2 + $0x34] sm:$0xf]  ;;  %v2397_v23 = vld [vmem:[%s3475_s3] sm:$0xff]  }
   0xa   :  { %v2005_v22 = vld [vmem:[%s3474_s2 + $0x3c] sm:$0xf]  ;;  %46 = vst [vmem:[#allocation2 + $0x18] sm:$0xf] %v2004_v21  ;;  %v2006_v24 = vld [vmem:[%s3474_s2 + $0x44] sm:$0xf] }
   0xb   :  { %2228 = vmatpush3.bf16.msra.mxu0 %v2387_v4  ;;  %48 = vst [vmem:[#allocation2 + $0x1c] sm:$0xf] %v2005_v22  ;;  %50 = vst [vmem:[#allocation2 + $0x20] sm:$0xf] %v2006_v24  ;;  %v2007_v25 = vld [vmem:[%s3474_s2 + $0x4c] sm:$0xf] }
   0xc   :  { %2308 = vmatpush3.bf16.msra.mxu1 %v2388_v5  ;;  %2229 = vmatprep.subr.bf16.mxu0 %v2389_v6  ;;  %52 = vst [vmem:[#allocation2 + $0x24] sm:$0xf] %v2007_v25  ;;  %v2398_v27 = vld [vmem:[%s3473_s1] sm:$0xff]   ;;  %v2008_v28 = vld [vmem:[%s3474_s2 + $0x54] sm:$0xf]  ;;  %v2402_v31 = vld [vmem:[%s3472_s0 + $0x8] sm:$0xff]  }
   0xd   :  { %2309 = vmatprep.subr.bf16.mxu1 %v2390_v7  ;;  %v2399_v26 = vld [vmem:[#allocation2] sm:$0xff]   ;;  %54 = vst [vmem:[#allocation2 + $0x28] sm:$0xf] %v2008_v28  ;;  %v2009_v29 = vld [vmem:[%s3474_s2 + $0x5c] sm:$0xf]  ;;  %v2404_v35 = vld [vmem:[%s3472_s0 + $0x10] sm:$0xff]  }
   0xe   :  { %2239 = vmatprep.mubr.bf16.mxu0 %v2399_v26  ;;  %56 = vst [vmem:[#allocation2 + $0x2c] sm:$0xf] %v2009_v29  ;;  %v2010_v32 = vld [vmem:[%s3474_s2 + $0x64] sm:$0xf]  ;;  %v2011_v33 = vld [vmem:[%s3474_s2 + $0x6c] sm:$0xf] }
   0xf   :  { %2230 = vmatpush3.bf16.msra.mxu0 %v2389_v6  ;;  %v2401_v30 = vld [vmem:[#allocation2 + $0x8] sm:$0xff]   ;;  %58 = vst [vmem:[#allocation2 + $0x30] sm:$0xf] %v2010_v32  ;;  %60 = vst [vmem:[#allocation2 + $0x34] sm:$0xf] %v2011_v33  ;;  %v2406_v40 = vld [vmem:[%s3472_s0 + $0x18] sm:$0xff]  }
  0x10   :  { %2310 = vmatpush3.bf16.msra.mxu1 %v2390_v7  ;;  %2231 = vmatprep.subr.bf16.mxu0 %v2391_v8  ;;  %v2403_v34 = vld [vmem:[#allocation2 + $0x10] sm:$0xff]   ;;  %v2013_v37 = vld [vmem:[%s3474_s2 + $0x7c] sm:$0xf]  ;;  %v2014_v38 = vld [vmem:[%s3474_s2 + $0x84] sm:$0xf] }
  0x11   :  { %2311 = vmatprep.subr.bf16.mxu1 %v2392_v9  ;;  %v2012_v36 = vld [vmem:[%s3474_s2 + $0x74] sm:$0xf]  ;;  %64 = vst [vmem:[#allocation2 + $0x3c] sm:$0xf] %v2013_v37  ;;  %v2015_v39 = vld [vmem:[%s3474_s2 + $0x8c] sm:$0xf] }
  0x12   :  { %62 = vst [vmem:[#allocation2 + $0x38] sm:$0xf] %v2012_v36  ;;  %66 = vst [vmem:[#allocation2 + $0x40] sm:$0xf] %v2014_v38  ;;  %v2016_v41 = vld [vmem:[%s3474_s2 + $0x94] sm:$0xf] }
  0x13   :  { %2232 = vmatpush3.bf16.msra.mxu0 %v2391_v8  ;;  %68 = vst [vmem:[#allocation2 + $0x44] sm:$0xf] %v2015_v39  ;;  %v2017_v42 = vld [vmem:[%s3474_s2 + $0x9c] sm:$0xf]  ;;  %v2408_v44 = vld [vmem:[%s3472_s0 + $0x20] sm:$0xff]   ;;  %v2410_v51 = vld [vmem:[%s3472_s0 + $0x28] sm:$0xff]  }
  0x14   :  { %2312 = vmatpush3.bf16.msra.mxu1 %v2392_v9  ;;  %2233 = vmatprep.subr.bf16.mxu0 %v2393_v10  ;;  %v2405_v43 = vld [vmem:[#allocation2 + $0x18] sm:$0xff]   ;;  %70 = vst [vmem:[#allocation2 + $0x48] sm:$0xf] %v2016_v41  ;;  %72 = vst [vmem:[#allocation2 + $0x4c] sm:$0xf] %v2017_v42  ;;  %v2407_v45 = vld [vmem:[#allocation2 + $0x20] sm:$0xff]  }
  0x15   :  { %2313 = vmatprep.subr.bf16.mxu1 %v2394_v11  ;;  %v2018_v46 = vld [vmem:[%s3474_s2 + $0xa4] sm:$0xf]  ;;  %v2019_v47 = vld [vmem:[%s3474_s2 + $0xac] sm:$0xf]  ;;  %v2020_v48 = vld [vmem:[%s3474_s2 + $0xb4] sm:$0xf] }
  0x16   :  { %74 = vst [vmem:[#allocation2 + $0x50] sm:$0xf] %v2018_v46  ;;  %76 = vst [vmem:[#allocation2 + $0x54] sm:$0xf] %v2019_v47  ;;  %v2021_v49 = vld [vmem:[%s3474_s2 + $0xbc] sm:$0xf] }
  0x17   :  { %2234 = vmatpush3.bf16.msra.mxu0 %v2393_v10  ;;  %78 = vst [vmem:[#allocation2 + $0x58] sm:$0xf] %v2020_v48  ;;  %80 = vst [vmem:[#allocation2 + $0x5c] sm:$0xf] %v2021_v49  ;;  %v2409_v50 = vld [vmem:[#allocation2 + $0x28] sm:$0xff]   ;;  %v2411_v54 = vld [vmem:[#allocation2 + $0x30] sm:$0xff]  }
  0x18   :  { %2314 = vmatpush3.bf16.msra.mxu1 %v2394_v11  ;;  %2235 = vmatprep.subr.bf16.mxu0 %v2395_v17  ;;  %v2022_v52 = vld [vmem:[%s3474_s2 + $0xc4] sm:$0xf]  ;;  %v2023_v53 = vld [vmem:[%s3474_s2 + $0xcc] sm:$0xf]  ;;  %v2412_v55 = vld [vmem:[%s3472_s0 + $0x30] sm:$0xff]  }
  0x19   :  { %2315 = vmatprep.subr.bf16.mxu1 %v2396_v20  ;;  %82 = vst [vmem:[#allocation2 + $0x60] sm:$0xf] %v2022_v52  ;;  %84 = vst [vmem:[#allocation2 + $0x64] sm:$0xf] %v2023_v53  ;;  %v2024_v56 = vld [vmem:[%s3474_s2 + $0xd4] sm:$0xf] }
  0x1a   :  { %86 = vst [vmem:[#allocation2 + $0x68] sm:$0xf] %v2024_v56  ;;  %v2025_v57 = vld [vmem:[%s3474_s2 + $0xdc] sm:$0xf]  ;;  %v2026_v58 = vld [vmem:[%s3474_s2 + $0xe4] sm:$0xf] }
  0x1b   :  { %2236 = vmatpush3.bf16.msra.mxu0 %v2395_v17  ;;  %88 = vst [vmem:[#allocation2 + $0x6c] sm:$0xf] %v2025_v57  ;;  %v2027_v59 = vld [vmem:[%s3474_s2 + $0xec] sm:$0xf]  ;;  %90 = vst [vmem:[#allocation2 + $0x70] sm:$0xf] %v2026_v58 }
  0x1c   :  { %2316 = vmatpush3.bf16.msra.mxu1 %v2396_v20  ;;  %2237 = vmatprep.subr.bf16.mxu0 %v2397_v23  ;;  %92 = vst [vmem:[#allocation2 + $0x74] sm:$0xf] %v2027_v59  ;;  %v2414_v60 = vld [vmem:[%s3472_s0 + $0x38] sm:$0xff]   ;;  %v2028_v61 = vld [vmem:[%s3474_s2 + $0xf4] sm:$0xf]  ;;  %v2416_v0 = vld [vmem:[%s3472_s0 + $0x40] sm:$0xff]  }
  0x1d   :  { %2317 = vmatprep.subr.bf16.mxu1 %v2398_v27  ;;  %v2029_v62 = vld [vmem:[%s3474_s2 + $0xfc] sm:$0xf]  ;;  %94 = vst [vmem:[#allocation2 + $0x78] sm:$0xf] %v2028_v61  ;;  %v2415_v1 = vld [vmem:[#allocation2 + $0x40] sm:$0xff]   ;;  %v2417_v6 = vld [vmem:[#allocation2 + $0x48] sm:$0xff]  }
  0x1e   :  { %v2413_v63 = vld [vmem:[#allocation2 + $0x38] sm:$0xff]   ;;  %96 = vst [vmem:[#allocation2 + $0x7c] sm:$0xf] %v2029_v62  ;;  %v2030_v2 = vld [vmem:[%s3474_s2 + $0x104] sm:$0xf]  ;;  %v2418_v7 = vld [vmem:[%s3472_s0 + $0x48] sm:$0xff]  }
  0x1f   :  { %2238 = vmatpush3.bf16.msra.mxu0 %v2397_v23  ;;  %98 = vst [vmem:[#allocation2 + $0x80] sm:$0xf] %v2030_v2  ;;  %v2031_v3 = vld [vmem:[%s3474_s2 + $0x10c] sm:$0xf]  ;;  %v2032_v4 = vld [vmem:[%s3474_s2 + $0x114] sm:$0xf] }
  0x20   :  { %2318 = vmatpush3.bf16.msra.mxu1 %v2398_v27  ;;  %100 = vst [vmem:[#allocation2 + $0x84] sm:$0xf] %v2031_v3  ;;  %v2033_v5 = vld [vmem:[%s3474_s2 + $0x11c] sm:$0xf]  ;;  %102 = vst [vmem:[#allocation2 + $0x88] sm:$0xf] %v2032_v4 }
  0x21   :  { %104 = vst [vmem:[#allocation2 + $0x8c] sm:$0xf] %v2033_v5  ;;  %v2034_v8 = vld [vmem:[%s3474_s2 + $0x124] sm:$0xf]  ;;  %v2035_v9 = vld [vmem:[%s3474_s2 + $0x12c] sm:$0xf] }
  0x22   :  { %2240 = vmatmul.mubr.bf16.vlgmr.msra.gmra.mxu0 %v2401_v30  ;;  %v2419_v10 = vld [vmem:[#allocation2 + $0x50] sm:$0xff]   ;;  %106 = vst [vmem:[#allocation2 + $0x90] sm:$0xf] %v2034_v8  ;;  %108 = vst [vmem:[#allocation2 + $0x94] sm:$0xf] %v2035_v9  ;;  %v2422_v16 = vld [vmem:[%s3472_s0 + $0x58] sm:$0xff]  }
  0x23   :  { %2320 = vmatmul.mubr.bf16.vlgmr.msra.gmra.mxu1 %v2402_v31  ;;  %2243 = vmatprep.mubr.bf16.mxu0 %v2403_v34  ;;  %v2420_v11 = vld [vmem:[%s3472_s0 + $0x50] sm:$0xff]   ;;  %v2037_v13 = vld [vmem:[%s3474_s2 + $0x13c] sm:$0xf]  ;;  %v2038_v14 = vld [vmem:[%s3474_s2 + $0x144] sm:$0xf] }
  0x24   :  { %2323 = vmatprep.mubr.bf16.mxu1 %v2404_v35  ;;  %v2036_v12 = vld [vmem:[%s3474_s2 + $0x134] sm:$0xf]  ;;  %112 = vst [vmem:[#allocation2 + $0x9c] sm:$0xf] %v2037_v13  ;;  %v2039_v15 = vld [vmem:[%s3474_s2 + $0x14c] sm:$0xf] }
  0x25   :  { %110 = vst [vmem:[#allocation2 + $0x98] sm:$0xf] %v2036_v12  ;;  %114 = vst [vmem:[#allocation2 + $0xa0] sm:$0xf] %v2038_v14  ;;  %v2040_v17 = vld [vmem:[%s3474_s2 + $0x154] sm:$0xf] }
  0x26   :  { %116 = vst [vmem:[#allocation2 + $0xa4] sm:$0xf] %v2039_v15  ;;  %v2041_v18 = vld [vmem:[%s3474_s2 + $0x15c] sm:$0xf]  ;;  %v2424_v20 = vld [vmem:[%s3472_s0 + $0x60] sm:$0xff]   ;;  %v2425_v26 = vld [vmem:[#allocation2 + $0x68] sm:$0xff]  }
  0x27   :  { %v2421_v19 = vld [vmem:[#allocation2 + $0x58] sm:$0xff]   ;;  %118 = vst [vmem:[#allocation2 + $0xa8] sm:$0xf] %v2040_v17  ;;  %120 = vst [vmem:[#allocation2 + $0xac] sm:$0xf] %v2041_v18  ;;  %v2423_v21 = vld [vmem:[#allocation2 + $0x60] sm:$0xff]  }
  0x28   :  { %v2042_v22 = vld [vmem:[%s3474_s2 + $0x164] sm:$0xf]  ;;  %v2043_v23 = vld [vmem:[%s3474_s2 + $0x16c] sm:$0xf]  ;;  %v2044_v24 = vld [vmem:[%s3474_s2 + $0x174] sm:$0xf] }
  0x29   :  { %122 = vst [vmem:[#allocation2 + $0xb0] sm:$0xf] %v2042_v22  ;;  %124 = vst [vmem:[#allocation2 + $0xb4] sm:$0xf] %v2043_v23  ;;  %v2045_v25 = vld [vmem:[%s3474_s2 + $0x17c] sm:$0xf] }
  0x2a   :  { %2244 = vmatmul.mubr.bf16.gmra.mxu0 %v2405_v43  ;;  %126 = vst [vmem:[#allocation2 + $0xb8] sm:$0xf] %v2044_v24  ;;  %128 = vst [vmem:[#allocation2 + $0xbc] sm:$0xf] %v2045_v25  ;;  %v2426_v27 = vld [vmem:[%s3472_s0 + $0x68] sm:$0xff]   ;;  %v2427_v30 = vld [vmem:[#allocation2 + $0x70] sm:$0xff]  }
  0x2b   :  { %2324 = vmatmul.mubr.bf16.gmra.mxu1 %v2406_v40  ;;  %2247 = vmatprep.mubr.bf16.mxu0 %v2407_v45  ;;  %v2046_v28 = vld [vmem:[%s3474_s2 + $0x184] sm:$0xf]  ;;  %v2047_v29 = vld [vmem:[%s3474_s2 + $0x18c] sm:$0xf]  ;;  %v2428_v31 = vld [vmem:[%s3472_s0 + $0x70] sm:$0xff]  }
  0x2c   :  { %2327 = vmatprep.mubr.bf16.mxu1 %v2408_v44  ;;  %130 = vst [vmem:[#allocation2 + $0xc0] sm:$0xf] %v2046_v28  ;;  %132 = vst [vmem:[#allocation2 + $0xc4] sm:$0xf] %v2047_v29  ;;  %v2048_v32 = vld [vmem:[%s3474_s2 + $0x194] sm:$0xf] }
  0x2d   :  { %134 = vst [vmem:[#allocation2 + $0xc8] sm:$0xf] %v2048_v32  ;;  %v2049_v33 = vld [vmem:[%s3474_s2 + $0x19c] sm:$0xf]  ;;  %v2050_v34 = vld [vmem:[%s3474_s2 + $0x1a4] sm:$0xf] }
  0x2e   :  { %136 = vst [vmem:[#allocation2 + $0xcc] sm:$0xf] %v2049_v33  ;;  %v2051_v35 = vld [vmem:[%s3474_s2 + $0x1ac] sm:$0xf]  ;;  %138 = vst [vmem:[#allocation2 + $0xd0] sm:$0xf] %v2050_v34 }
  0x2f   :  { %140 = vst [vmem:[#allocation2 + $0xd4] sm:$0xf] %v2051_v35  ;;  %v2430_v36 = vld [vmem:[%s3472_s0 + $0x78] sm:$0xff]   ;;  %v2052_v37 = vld [vmem:[%s3474_s2 + $0x1b4] sm:$0xf]  ;;  %v2432_v40 = vld [vmem:[%s3472_s0 + $0x80] sm:$0xff]  }
  0x30   :  { %v2053_v38 = vld [vmem:[%s3474_s2 + $0x1bc] sm:$0xf]  ;;  %142 = vst [vmem:[#allocation2 + $0xd8] sm:$0xf] %v2052_v37  ;;  %v2431_v41 = vld [vmem:[#allocation2 + $0x80] sm:$0xff]   ;;  %v2433_v46 = vld [vmem:[#allocation2 + $0x88] sm:$0xff]  }
  0x31   :  { %v2429_v39 = vld [vmem:[#allocation2 + $0x78] sm:$0xff]   ;;  %144 = vst [vmem:[#allocation2 + $0xdc] sm:$0xf] %v2053_v38  ;;  %v2054_v42 = vld [vmem:[%s3474_s2 + $0x1c4] sm:$0xf]  ;;  %v2434_v47 = vld [vmem:[%s3472_s0 + $0x88] sm:$0xff]  }
  0x32   :  { %2248 = vmatmul.mubr.bf16.gmra.mxu0 %v2409_v50  ;;  %146 = vst [vmem:[#allocation2 + $0xe0] sm:$0xf] %v2054_v42  ;;  %v2055_v43 = vld [vmem:[%s3474_s2 + $0x1cc] sm:$0xf]  ;;  %v2056_v44 = vld [vmem:[%s3474_s2 + $0x1d4] sm:$0xf] }
  0x33   :  { %2328 = vmatmul.mubr.bf16.gmra.mxu1 %v2410_v51  ;;  %2251 = vmatprep.mubr.bf16.mxu0 %v2411_v54  ;;  %148 = vst [vmem:[#allocation2 + $0xe4] sm:$0xf] %v2055_v43  ;;  %v2057_v45 = vld [vmem:[%s3474_s2 + $0x1dc] sm:$0xf]  ;;  %150 = vst [vmem:[#allocation2 + $0xe8] sm:$0xf] %v2056_v44 }
  0x34   :  { %2331 = vmatprep.mubr.bf16.mxu1 %v2412_v55  ;;  %152 = vst [vmem:[#allocation2 + $0xec] sm:$0xf] %v2057_v45  ;;  %v2058_v48 = vld [vmem:[%s3474_s2 + $0x1e4] sm:$0xf]  ;;  %v2059_v49 = vld [vmem:[%s3474_s2 + $0x1ec] sm:$0xf] }
  0x35   :  { %v2435_v50 = vld [vmem:[#allocation2 + $0x90] sm:$0xff]   ;;  %154 = vst [vmem:[#allocation2 + $0xf0] sm:$0xf] %v2058_v48  ;;  %156 = vst [vmem:[#allocation2 + $0xf4] sm:$0xf] %v2059_v49  ;;  %v2437_v54 = vld [vmem:[#allocation2 + $0x98] sm:$0xff]  }
  0x36   :  { %v2436_v51 = vld [vmem:[%s3472_s0 + $0x90] sm:$0xff]   ;;  %v2061_v53 = vld [vmem:[%s3474_s2 + $0x1fc] sm:$0xf]  ;;  %v2439_v56 = vld [vmem:[#allocation2 + $0xa0] sm:$0xff]  }
  0x37   :  { %v2060_v52 = vld [vmem:[%s3474_s2 + $0x1f4] sm:$0xf]  ;;  %160 = vst [vmem:[#allocation2 + $0xfc] sm:$0xf] %v2061_v53  ;;  %v2438_v55 = vld [vmem:[%s3472_s0 + $0x98] sm:$0xff]   ;;  %v2440_v57 = vld [vmem:[%s3472_s0 + $0xa0] sm:$0xff]  }
  0x38   :  { %158 = vst [vmem:[#allocation2 + $0xf8] sm:$0xf] %v2060_v52  ;;  %v2441_v58 = vld [vmem:[#allocation2 + $0xa8] sm:$0xff]   ;;  %v2444_v61 = vld [vmem:[%s3472_s0 + $0xb0] sm:$0xff]   ;;  %v2445_v62 = vld [vmem:[#allocation2 + $0xb8] sm:$0xff]  }
  0x39   :  { %v2442_v59 = vld [vmem:[%s3472_s0 + $0xa8] sm:$0xff]   ;;  %v2451_v4 = vld [vmem:[#allocation2 + $0xd0] sm:$0xff]   ;;  %v2456_v9 = vld [vmem:[%s3472_s0 + $0xe0] sm:$0xff]  }
  0x3a   :  { %2252 = vmatmul.mubr.bf16.gmra.mxu0 %v2413_v63  ;;  %v2446_v63 = vld [vmem:[%s3472_s0 + $0xb8] sm:$0xff]   ;;  %v2449_v2 = vld [vmem:[#allocation2 + $0xc8] sm:$0xff]   ;;  %v2452_v5 = vld [vmem:[%s3472_s0 + $0xd0] sm:$0xff]  }
  0x3b   :  { %2332 = vmatmul.mubr.bf16.gmra.mxu1 %v2414_v60  ;;  %2255 = vmatprep.mubr.bf16.mxu0 %v2415_v1  ;;  %v2443_v60 = vld [vmem:[#allocation2 + $0xb0] sm:$0xff]   ;;  %v2448_v1 = vld [vmem:[%s3472_s0 + $0xc0] sm:$0xff]   ;;  %v2450_v3 = vld [vmem:[%s3472_s0 + $0xc8] sm:$0xff]  }
  0x3c   :  { %2335 = vmatprep.mubr.bf16.mxu1 %v2416_v0  ;;  %v2447_v0 = vld [vmem:[#allocation2 + $0xc0] sm:$0xff]   ;;  %v2459_v12 = vld [vmem:[#allocation2 + $0xf0] sm:$0xff]   ;;  %v2462_v15 = vld [vmem:[%s3472_s0 + $0xf8] sm:$0xff]  }
  0x3d   :  { %v2455_v8 = vld [vmem:[#allocation2 + $0xe0] sm:$0xff]   ;;  %v2460_v13 = vld [vmem:[%s3472_s0 + $0xf0] sm:$0xff]  }
  0x3e   :  { %v2961_v18 = vld [vmem:[%s3476_s4] ss:$0 sm:$0xff] }
  0x3f   :  { %v2461_v14 = vld [vmem:[#allocation2 + $0xf8] sm:$0xff]  }
  0x42   :  { %2256 = vmatmul.mubr.bf16.gmra.mxu0 %v2417_v6  ;;  %v2453_v6 = vld [vmem:[#allocation2 + $0xd8] sm:$0xff]  }
  0x43   :  { %2336 = vmatmul.mubr.bf16.gmra.mxu1 %v2418_v7  ;;  %2259 = vmatprep.mubr.bf16.mxu0 %v2419_v10  ;;  %v2454_v7 = vld [vmem:[%s3472_s0 + $0xd8] sm:$0xff]   ;;  %v2457_v10 = vld [vmem:[#allocation2 + $0xe8] sm:$0xff]  }
  0x44   :  { %2339 = vmatprep.mubr.bf16.mxu1 %v2420_v11  ;;  %v2458_v11 = vld [vmem:[%s3472_s0 + $0xe8] sm:$0xff]  }
  0x4a   :  { %2260 = vmatmul.mubr.bf16.gmra.mxu0 %v2421_v19 }
  0x4b   :  { %2340 = vmatmul.mubr.bf16.gmra.mxu1 %v2422_v16  ;;  %2263 = vmatprep.mubr.bf16.mxu0 %v2423_v21 }
  0x4c   :  { %2343 = vmatprep.mubr.bf16.mxu1 %v2424_v20 }
  0x52   :  { %2264 = vmatmul.mubr.bf16.gmra.mxu0 %v2425_v26 }
  0x53   :  { %2344 = vmatmul.mubr.bf16.gmra.mxu1 %v2426_v27  ;;  %2267 = vmatprep.mubr.bf16.mxu0 %v2427_v30 }
  0x54   :  { %2347 = vmatprep.mubr.bf16.mxu1 %v2428_v31 }
  0x5a   :  { %2268 = vmatmul.mubr.bf16.gmra.mxu0 %v2429_v39 }
  0x5b   :  { %2348 = vmatmul.mubr.bf16.gmra.mxu1 %v2430_v36  ;;  %2271 = vmatprep.mubr.bf16.mxu0 %v2431_v41 }
  0x5c   :  { %2351 = vmatprep.mubr.bf16.mxu1 %v2432_v40 }
  0x62   :  { %2272 = vmatmul.mubr.bf16.gmra.mxu0 %v2433_v46 }
  0x63   :  { %2352 = vmatmul.mubr.bf16.gmra.mxu1 %v2434_v47  ;;  %2275 = vmatprep.mubr.bf16.mxu0 %v2435_v50 }
  0x64   :  { %2355 = vmatprep.mubr.bf16.mxu1 %v2436_v51 }
  0x6a   :  { %2276 = vmatmul.mubr.bf16.gmra.mxu0 %v2437_v54 }
  0x6b   :  { %2356 = vmatmul.mubr.bf16.gmra.mxu1 %v2438_v55  ;;  %2279 = vmatprep.mubr.bf16.mxu0 %v2439_v56 }
  0x6c   :  { %2359 = vmatprep.mubr.bf16.mxu1 %v2440_v57 }
  0x72   :  { %2280 = vmatmul.mubr.bf16.gmra.mxu0 %v2441_v58 }
  0x73   :  { %2360 = vmatmul.mubr.bf16.gmra.mxu1 %v2442_v59  ;;  %2283 = vmatprep.mubr.bf16.mxu0 %v2443_v60 }
  0x74   :  { %2363 = vmatprep.mubr.bf16.mxu1 %v2444_v61 }
  0x7a   :  { %2284 = vmatmul.mubr.bf16.gmra.mxu0 %v2445_v62 }
  0x7b   :  { %2364 = vmatmul.mubr.bf16.gmra.mxu1 %v2446_v63  ;;  %2287 = vmatprep.mubr.bf16.mxu0 %v2447_v0 }
  0x7c   :  { %2367 = vmatprep.mubr.bf16.mxu1 %v2448_v1 }
  0x82   :  { %2288 = vmatmul.mubr.bf16.gmra.mxu0 %v2449_v2 }
  0x83   :  { %2368 = vmatmul.mubr.bf16.gmra.mxu1 %v2450_v3  ;;  %2291 = vmatprep.mubr.bf16.mxu0 %v2451_v4 }
  0x84   :  { %2371 = vmatprep.mubr.bf16.mxu1 %v2452_v5 }
  0x8a   :  { %2292 = vmatmul.mubr.bf16.gmra.mxu0 %v2453_v6 }
  0x8b   :  { %2372 = vmatmul.mubr.bf16.gmra.mxu1 %v2454_v7  ;;  %2295 = vmatprep.mubr.bf16.mxu0 %v2455_v8 }
  0x8c   :  { %2375 = vmatprep.mubr.bf16.mxu1 %v2456_v9 }
  0x92   :  { %2296 = vmatmul.mubr.bf16.gmra.mxu0 %v2457_v10 }
  0x93   :  { %2376 = vmatmul.mubr.bf16.gmra.mxu1 %v2458_v11  ;;  %2299 = vmatprep.mubr.bf16.mxu0 %v2459_v12 }
  0x94   :  { %2379 = vmatprep.mubr.bf16.mxu1 %v2460_v13 }
  0x9a   :  { %2300 = vmatmul.mubr.bf16.gmra.mxu0 %v2461_v14 }
  0x9b   :  { %2380 = vmatmul.mubr.bf16.gmra.mxu1 %v2462_v15 }
  0xe2   :  { %v2241_v16 = vpop.f32.mrf.mxu0 }
  0xe3   :  { %v2321_v17 = vpop.f32.mrf.mxu1 }
  0xe4   :  { %v1289_v19 = vadd.f32 %v2321_v17, %v2241_v16  ;;  %v751_v20 = vpop.f32.mrf.mxu0 }
  0xe5   :  { %v1280_v21 = vpop.f32.mrf.mxu1 }
  0xe6   :  { %v2964_v22 = vadd.f32 %v2961_v18, %v1289_v19  ;;  %v1281_v23 = vadd.f32 %v1280_v21, %v751_v20  ;;  %v2242_v24 = vpop.f32.mrf.mxu0 }
  0xe7   :  { %v2322_v25 = vpop.f32.mrf.mxu1 }
  0xe8   :  { %v1608_v26 = vmul.f32 0.5, %v2964_v22  ;;  %v2968_v27 = vadd.f32 %v2961_v18, %v1281_v23  ;;  %v1292_v28 = vadd.f32 %v2322_v25, %v2242_v24  ;;  %v754_v29 = vpop.f32.mrf.mxu0 }
  0xe9   :  { %v1283_v30 = vpop.f32.mrf.mxu1 }
  0xea   :  { %2463 = vtanh.f32 %v1608_v26  ;;  %v1606_v31 = vmul.f32 0.5, %v2968_v27  ;;  %v2972_v32 = vadd.f32 %v2961_v18, %v1292_v28  ;;  %v1284_v33 = vadd.f32 %v1283_v30, %v754_v29  ;;  %v2245_v34 = vpop.f32.mrf.mxu0 }
  0xeb   :  { %v2325_v35 = vpop.f32.mrf.mxu1 }
  0xec   :  { %2465 = vtanh.f32 %v1606_v31  ;;  %v1609_v36 = vmul.f32 0.5, %v2972_v32  ;;  %v2976_v37 = vadd.f32 %v2961_v18, %v1284_v33  ;;  %v1305_v38 = vadd.f32 %v2325_v35, %v2245_v34  ;;  %v767_v39 = vpop.f32.mrf.mxu0 }
  0xed   :  { %v1296_v40 = vpop.f32.mrf.mxu1 }
  0xee   :  { %2467 = vtanh.f32 %v1609_v36  ;;  %v1607_v41 = vmul.f32 0.5, %v2976_v37  ;;  %v2980_v42 = vadd.f32 %v2961_v18, %v1305_v38  ;;  %v1297_v43 = vadd.f32 %v1296_v40, %v767_v39  ;;  %v2246_v44 = vpop.f32.mrf.mxu0 }
  0xef   :  { %v2326_v45 = vpop.f32.mrf.mxu1 }
  0xf0   :  { %2469 = vtanh.f32 %v1607_v41  ;;  %v1612_v46 = vmul.f32 0.5, %v2980_v42  ;;  %v2984_v47 = vadd.f32 %v2961_v18, %v1297_v43  ;;  %v1308_v48 = vadd.f32 %v2326_v45, %v2246_v44  ;;  %v770_v49 = vpop.f32.mrf.mxu0 }
  0xf1   :  { %v1299_v50 = vpop.f32.mrf.mxu1 }
  0xf2   :  { %2471 = vtanh.f32 %v1612_v46  ;;  %v1610_v51 = vmul.f32 0.5, %v2984_v47  ;;  %v2988_v52 = vadd.f32 %v2961_v18, %v1308_v48  ;;  %v1300_v53 = vadd.f32 %v1299_v50, %v770_v49  ;;  %v2249_v54 = vpop.f32.mrf.mxu0 }
  0xf3   :  { %v2329_v55 = vpop.f32.mrf.mxu1 }
  0xf4   :  { %2473 = vtanh.f32 %v1610_v51  ;;  %v1613_v56 = vmul.f32 0.5, %v2988_v52  ;;  %v2992_v57 = vadd.f32 %v2961_v18, %v1300_v53  ;;  %v1321_v58 = vadd.f32 %v2329_v55, %v2249_v54  ;;  %v783_v59 = vpop.f32.mrf.mxu0 }
  0xf5   :  { %v1312_v60 = vpop.f32.mrf.mxu1 }
  0xf6   :  { %2475 = vtanh.f32 %v1613_v56  ;;  %v1611_v61 = vmul.f32 0.5, %v2992_v57  ;;  %v2996_v62 = vadd.f32 %v2961_v18, %v1321_v58  ;;  %v1313_v63 = vadd.f32 %v1312_v60, %v783_v59  ;;  %v2250_v0 = vpop.f32.mrf.mxu0 }
  0xf7   :  { %v2464_v1 = vpop.eup %2463  ;;  %v2330_v2 = vpop.f32.mrf.mxu1 }
  0xf8   :  { %v1736_v3 = vmul.f32 0.5, %v2464_v1  ;;  %2477 = vtanh.f32 %v1611_v61  ;;  %v1616_v4 = vmul.f32 0.5, %v2996_v62  ;;  %v3000_v5 = vadd.f32 %v2961_v18, %v1313_v63  ;;  %v786_v6 = vpop.f32.mrf.mxu0 }
  0xf9   :  { %v2466_v7 = vpop.eup %2465  ;;  %v1324_v8 = vadd.f32 %v2330_v2, %v2250_v0  ;;  %v1315_v9 = vpop.f32.mrf.mxu1 }
  0xfa   :  { %v1800_v10 = vadd.f32 0.5, %v1736_v3  ;;  %v1734_v11 = vmul.f32 0.5, %v2466_v7  ;;  %2479 = vtanh.f32 %v1616_v4  ;;  %v1614_v12 = vmul.f32 0.5, %v3000_v5  ;;  %v2253_v13 = vpop.f32.mrf.mxu0 }
  0xfb   :  { %v2468_v14 = vpop.eup %2467  ;;  %v3004_v15 = vadd.f32 %v2961_v18, %v1324_v8  ;;  %v1316_v16 = vadd.f32 %v1315_v9, %v786_v6  ;;  %v2333_v17 = vpop.f32.mrf.mxu1 }
  0xfc   :  { %v1864_v19 = vmul.f32 %v1800_v10, %v2964_v22  ;;  %v1798_v20 = vadd.f32 0.5, %v1734_v11  ;;  %v1737_v21 = vmul.f32 0.5, %v2468_v14  ;;  %2481 = vtanh.f32 %v1614_v12  ;;  %v799_v23 = vpop.f32.mrf.mxu0 }
  0xfd   :  { %v2470_v24 = vpop.eup %2469  ;;  %v1617_v25 = vmul.f32 0.5, %v3004_v15  ;;  %v3009_v26 = vadd.f32 %v2961_v18, %v1316_v16  ;;  %v1337_v28 = vadd.f32 %v2333_v17, %v2253_v13  ;;  %v1328_v29 = vpop.f32.mrf.mxu1 }
  0xfe   :  { %1928 = vst [vmem:[%s3477_s5 + $0x10] sm:$0xff] %v1864_v19  ;;  %v1862_v30 = vmul.f32 %v1798_v20, %v2968_v27  ;;  %v1801_v31 = vadd.f32 0.5, %v1737_v21  ;;  %v1735_v22 = vmul.f32 0.5, %v2470_v24  ;;  %v1329_v33 = vadd.f32 %v1328_v29, %v799_v23  ;;  %v2254_v34 = vpop.f32.mrf.mxu0 }
  0xff   :  { %v2472_v35 = vpop.eup %2471  ;;  %2483 = vtanh.f32 %v1617_v25  ;;  %v1615_v36 = vmul.f32 0.5, %v3009_v26  ;;  %v3017_v38 = vadd.f32 %v2961_v18, %v1337_v28  ;;  %v2334_v39 = vpop.f32.mrf.mxu1 }
 0x100   :  { %1926 = vst [vmem:[%s3477_s5] sm:$0xff] %v1862_v30  ;;  %v1865_v40 = vmul.f32 %v1801_v31, %v2972_v32  ;;  %v1799_v41 = vadd.f32 0.5, %v1735_v22  ;;  %v1740_v27 = vmul.f32 0.5, %v2472_v35  ;;  %v3024_v43 = vadd.f32 %v2961_v18, %v1329_v33  ;;  %v802_v44 = vpop.f32.mrf.mxu0 }
 0x101   :  { %v2474_v45 = vpop.eup %2473  ;;  %2485 = vtanh.f32 %v1615_v36  ;;  %v1620_v46 = vmul.f32 0.5, %v3017_v38  ;;  %v1340_v48 = vadd.f32 %v2334_v39, %v2254_v34  ;;  %v1331_v49 = vpop.f32.mrf.mxu1 }
 0x102   :  { %1929 = vst [vmem:[%s3477_s5 + $0x18] sm:$0xff] %v1865_v40  ;;  %v1863_v50 = vmul.f32 %v1799_v41, %v2976_v37  ;;  %v1804_v51 = vadd.f32 0.5, %v1740_v27  ;;  %v1738_v32 = vmul.f32 0.5, %v2474_v45  ;;  %v1618_v53 = vmul.f32 0.5, %v3024_v43  ;;  %v2257_v54 = vpop.f32.mrf.mxu0 }
 0x103   :  { %v2476_v55 = vpop.eup %2475  ;;  %2487 = vtanh.f32 %v1620_v46  ;;  %v3033_v56 = vadd.f32 %v2961_v18, %v1340_v48  ;;  %v1332_v58 = vadd.f32 %v1331_v49, %v802_v44  ;;  %v2337_v59 = vpop.f32.mrf.mxu1 }
 0x104   :  { %1927 = vst [vmem:[%s3477_s5 + $0x8] sm:$0xff] %v1863_v50  ;;  %v1868_v60 = vmul.f32 %v1804_v51, %v2980_v42  ;;  %v1802_v61 = vadd.f32 0.5, %v1738_v32  ;;  %v1741_v37 = vmul.f32 0.5, %v2476_v55  ;;  %2489 = vtanh.f32 %v1618_v53  ;;  %v815_v63 = vpop.f32.mrf.mxu0 }
 0x105   :  { %v2478_v0 = vpop.eup %2477  ;;  %v1621_v1 = vmul.f32 0.5, %v3033_v56  ;;  %v3041_v2 = vadd.f32 %v2961_v18, %v1332_v58  ;;  %v1353_v3 = vadd.f32 %v2337_v59, %v2257_v54  ;;  %v1344_v4 = vpop.f32.mrf.mxu1 }
 0x106   :  { %1932 = vst [vmem:[%s3477_s5 + $0x30] sm:$0xff] %v1868_v60  ;;  %v1866_v6 = vmul.f32 %v1802_v61, %v2984_v47  ;;  %v1805_v7 = vadd.f32 0.5, %v1741_v37  ;;  %v1739_v42 = vmul.f32 0.5, %v2478_v0  ;;  %v1345_v8 = vadd.f32 %v1344_v4, %v815_v63  ;;  %v2258_v9 = vpop.f32.mrf.mxu0 }
 0x107   :  { %v2480_v10 = vpop.eup %2479  ;;  %2491 = vtanh.f32 %v1621_v1  ;;  %v1619_v11 = vmul.f32 0.5, %v3041_v2  ;;  %v3049_v12 = vadd.f32 %v2961_v18, %v1353_v3  ;;  %v2338_v13 = vpop.f32.mrf.mxu1 }
 0x108   :  { %1930 = vst [vmem:[%s3477_s5 + $0x20] sm:$0xff] %v1866_v6  ;;  %v1869_v14 = vmul.f32 %v1805_v7, %v2988_v52  ;;  %v1803_v16 = vadd.f32 0.5, %v1739_v42  ;;  %v1744_v47 = vmul.f32 0.5, %v2480_v10  ;;  %v3056_v17 = vadd.f32 %v2961_v18, %v1345_v8  ;;  %v818_v19 = vpop.f32.mrf.mxu0 }
 0x109   :  { %v2482_v20 = vpop.eup %2481  ;;  %2493 = vtanh.f32 %v1619_v11  ;;  %v1624_v21 = vmul.f32 0.5, %v3049_v12  ;;  %v1356_v23 = vadd.f32 %v2338_v13, %v2258_v9  ;;  %v1347_v24 = vpop.f32.mrf.mxu1 }
 0x10a   :  { %1933 = vst [vmem:[%s3477_s5 + $0x38] sm:$0xff] %v1869_v14  ;;  %v1867_v25 = vmul.f32 %v1803_v16, %v2992_v57  ;;  %v1808_v28 = vadd.f32 0.5, %v1744_v47  ;;  %v1742_v52 = vmul.f32 0.5, %v2482_v20  ;;  %v1622_v29 = vmul.f32 0.5, %v3056_v17  ;;  %v2261_v30 = vpop.f32.mrf.mxu0 }
 0x10b   :  { %2495 = vtanh.f32 %v1624_v21  ;;  %v3065_v31 = vadd.f32 %v2961_v18, %v1356_v23  ;;  %v1348_v22 = vadd.f32 %v1347_v24, %v818_v19  ;;  %v2341_v33 = vpop.f32.mrf.mxu1 }
 0x10c   :  { %v2484_v34 = vpop.eup %2483  ;;  %1931 = vst [vmem:[%s3477_s5 + $0x28] sm:$0xff] %v1867_v25  ;;  %v1872_v35 = vmul.f32 %v1808_v28, %v2996_v62  ;;  %v1806_v36 = vadd.f32 0.5, %v1742_v52  ;;  %2497 = vtanh.f32 %v1622_v29  ;;  %v1369_v57 = vadd.f32 %v2341_v33, %v2261_v30  ;;  %v831_v39 = vpop.f32.mrf.mxu0 }
 0x10d   :  { %v1745_v40 = vmul.f32 0.5, %v2484_v34  ;;  %v1625_v41 = vmul.f32 0.5, %v3065_v31  ;;  %v3073_v27 = vadd.f32 %v2961_v18, %v1348_v22  ;;  %v1360_v44 = vpop.f32.mrf.mxu1 }
 0x10e   :  { %v2486_v45 = vpop.eup %2485  ;;  %1936 = vst [vmem:[%s3477_s5 + $0x50] sm:$0xff] %v1872_v35  ;;  %v1870_v46 = vmul.f32 %v1806_v36, %v3000_v5  ;;  %v3080_v62 = vadd.f32 %v2961_v18, %v1369_v57  ;;  %v1361_v48 = vadd.f32 %v1360_v44, %v831_v39  ;;  %v2262_v49 = vpop.f32.mrf.mxu0 }
 0x10f   :  { %v1809_v50 = vadd.f32 0.5, %v1745_v40  ;;  %v1743_v51 = vmul.f32 0.5, %v2486_v45  ;;  %2499 = vtanh.f32 %v1625_v41  ;;  %v1623_v32 = vmul.f32 0.5, %v3073_v27  ;;  %v2342_v53 = vpop.f32.mrf.mxu1 }
 0x110   :  { %v2488_v54 = vpop.eup %2487  ;;  %1934 = vst [vmem:[%s3477_s5 + $0x40] sm:$0xff] %v1870_v46  ;;  %v1628_v55 = vmul.f32 0.5, %v3080_v62  ;;  %v3088_v5 = vadd.f32 %v2961_v18, %v1361_v48  ;;  %v1372_v58 = vadd.f32 %v2342_v53, %v2262_v49  ;;  %v834_v59 = vpop.f32.mrf.mxu0 }
 0x111   :  { %v2490_v60 = vpop.eup %2489  ;;  %v1873_v61 = vmul.f32 %v1809_v50, %v3004_v15  ;;  %v1807_v37 = vadd.f32 0.5, %v1743_v51  ;;  %v1748_v63 = vmul.f32 0.5, %v2488_v54  ;;  %2501 = vtanh.f32 %v1623_v32  ;;  %v1363_v0 = vpop.f32.mrf.mxu1 }
 0x112   :  { %v1746_v1 = vmul.f32 0.5, %v2490_v60  ;;  %2503 = vtanh.f32 %v1628_v55  ;;  %v1626_v3 = vmul.f32 0.5, %v3088_v5  ;;  %v3093_v4 = vadd.f32 %v2961_v18, %v1372_v58  ;;  %v2265_v6 = vpop.f32.mrf.mxu0 }
 0x113   :  { %1937 = vst [vmem:[%s3477_s5 + $0x58] sm:$0xff] %v1873_v61  ;;  %v1871_v7 = vmul.f32 %v1807_v37, %v3009_v26  ;;  %v1812_v42 = vadd.f32 0.5, %v1748_v63  ;;  %v1364_v15 = vadd.f32 %v1363_v0, %v834_v59  ;;  %v2345_v8 = vpop.f32.mrf.mxu1 }
 0x114   :  { %v2492_v9 = vpop.eup %2491  ;;  %v1810_v10 = vadd.f32 0.5, %v1746_v1  ;;  %2505 = vtanh.f32 %v1626_v3  ;;  %v1629_v11 = vmul.f32 0.5, %v3093_v4  ;;  %v1385_v13 = vadd.f32 %v2345_v8, %v2265_v6  ;;  %v847_v14 = vpop.f32.mrf.mxu0 }
 0x115   :  { %1935 = vst [vmem:[%s3477_s5 + $0x48] sm:$0xff] %v1871_v7  ;;  %v1876_v16 = vmul.f32 %v1812_v42, %v3017_v38  ;;  %v1749_v47 = vmul.f32 0.5, %v2492_v9  ;;  %v3105_v19 = vadd.f32 %v2961_v18, %v1364_v15  ;;  %v1376_v26 = vpop.f32.mrf.mxu1 }
 0x116   :  { %v2494_v20 = vpop.eup %2493  ;;  %v1874_v21 = vmul.f32 %v1810_v10, %v3024_v43  ;;  %2507 = vtanh.f32 %v1629_v11  ;;  %v3109_v23 = vadd.f32 %v2961_v18, %v1385_v13  ;;  %v1377_v24 = vadd.f32 %v1376_v26, %v847_v14  ;;  %v2266_v25 = vpop.f32.mrf.mxu0 }
 0x117   :  { %1940 = vst [vmem:[%s3477_s5 + $0x70] sm:$0xff] %v1876_v16  ;;  %v1813_v28 = vadd.f32 0.5, %v1749_v47  ;;  %v1747_v38 = vmul.f32 0.5, %v2494_v20  ;;  %v1627_v52 = vmul.f32 0.5, %v3105_v19  ;;  %v2346_v29 = vpop.f32.mrf.mxu1 }
 0x118   :  { %v2496_v30 = vpop.eup %2495  ;;  %1938 = vst [vmem:[%s3477_s5 + $0x60] sm:$0xff] %v1874_v21  ;;  %v1632_v43 = vmul.f32 0.5, %v3109_v23  ;;  %v3120_v22 = vadd.f32 %v2961_v18, %v1377_v24  ;;  %v1388_v33 = vadd.f32 %v2346_v29, %v2266_v25  ;;  %v850_v34 = vpop.f32.mrf.mxu0 }
 0x119   :  { %v2498_v35 = vpop.eup %2497  ;;  %v1877_v36 = vmul.f32 %v1813_v28, %v3033_v56  ;;  %v1811_v57 = vadd.f32 0.5, %v1747_v38  ;;  %v1752_v39 = vmul.f32 0.5, %v2496_v30  ;;  %2509 = vtanh.f32 %v1627_v52  ;;  %v1379_v40 = vpop.f32.mrf.mxu1 }
 0x11a   :  { %v1750_v41 = vmul.f32 0.5, %v2498_v35  ;;  %2511 = vtanh.f32 %v1632_v43  ;;  %v1630_v44 = vmul.f32 0.5, %v3120_v22  ;;  %v3125_v45 = vadd.f32 %v2961_v18, %v1388_v33  ;;  %v2269_v46 = vpop.f32.mrf.mxu0 }
 0x11b   :  { %1941 = vst [vmem:[%s3477_s5 + $0x78] sm:$0xff] %v1877_v36  ;;  %v1875_v48 = vmul.f32 %v1811_v57, %v3041_v2  ;;  %v1816_v49 = vadd.f32 0.5, %v1752_v39  ;;  %v1380_v56 = vadd.f32 %v1379_v40, %v850_v34  ;;  %v2349_v50 = vpop.f32.mrf.mxu1 }
 0x11c   :  { %v2500_v51 = vpop.eup %2499  ;;  %v1814_v32 = vadd.f32 0.5, %v1750_v41  ;;  %2513 = vtanh.f32 %v1630_v44  ;;  %v1633_v53 = vmul.f32 0.5, %v3125_v45  ;;  %v1401_v54 = vadd.f32 %v2349_v50, %v2269_v46  ;;  %v863_v55 = vpop.f32.mrf.mxu0 }
 0x11d   :  { %1939 = vst [vmem:[%s3477_s5 + $0x68] sm:$0xff] %v1875_v48  ;;  %v1880_v58 = vmul.f32 %v1816_v49, %v3049_v12  ;;  %v1753_v59 = vmul.f32 0.5, %v2500_v51  ;;  %v3137_v60 = vadd.f32 %v2961_v18, %v1380_v56  ;;  %v1392_v2 = vpop.f32.mrf.mxu1 }
 0x11e   :  { %v2502_v61 = vpop.eup %2501  ;;  %v1878_v37 = vmul.f32 %v1814_v32, %v3056_v17  ;;  %2515 = vtanh.f32 %v1633_v53  ;;  %v3141_v63 = vadd.f32 %v2961_v18, %v1401_v54  ;;  %v1393_v0 = vadd.f32 %v1392_v2, %v863_v55  ;;  %v2270_v1 = vpop.f32.mrf.mxu0 }
 0x11f   :  { %v2504_v3 = vpop.eup %2503  ;;  %1944 = vst [vmem:[%s3477_s5 + $0x90] sm:$0xff] %v1880_v58  ;;  %v1817_v12 = vadd.f32 0.5, %v1753_v59  ;;  %v1751_v6 = vmul.f32 0.5, %v2502_v61  ;;  %v1631_v7 = vmul.f32 0.5, %v3137_v60  ;;  %v2350_v42 = vpop.f32.mrf.mxu1 }
 0x120   :  { %1942 = vst [vmem:[%s3477_s5 + $0x80] sm:$0xff] %v1878_v37  ;;  %v1756_v17 = vmul.f32 0.5, %v2504_v3  ;;  %v1636_v15 = vmul.f32 0.5, %v3141_v63  ;;  %v3152_v8 = vadd.f32 %v2961_v18, %v1393_v0  ;;  %v1404_v9 = vadd.f32 %v2350_v42, %v2270_v1  ;;  %v866_v10 = vpop.f32.mrf.mxu0 }
 0x121   :  { %v2506_v11 = vpop.eup %2505  ;;  %v1881_v13 = vmul.f32 %v1817_v12, %v3065_v31  ;;  %v1815_v14 = vadd.f32 0.5, %v1751_v6  ;;  %2517 = vtanh.f32 %v1631_v7  ;;  %v1395_v16 = vpop.f32.mrf.mxu1 }
 0x122   :  { %v1820_v47 = vadd.f32 0.5, %v1756_v17  ;;  %v1754_v26 = vmul.f32 0.5, %v2506_v11  ;;  %2519 = vtanh.f32 %v1636_v15  ;;  %v1634_v20 = vmul.f32 0.5, %v3152_v8  ;;  %v2273_v21 = vpop.f32.mrf.mxu0 }
 0x123   :  { %v2508_v24 = vpop.eup %2507  ;;  %1945 = vst [vmem:[%s3477_s5 + $0x98] sm:$0xff] %v1881_v13  ;;  %v1879_v25 = vmul.f32 %v1815_v14, %v3073_v27  ;;  %v3161_v28 = vadd.f32 %v2961_v18, %v1404_v9  ;;  %v1396_v31 = vadd.f32 %v1395_v16, %v866_v10  ;;  %v2353_v38 = vpop.f32.mrf.mxu1 }
 0x124   :  { %v1884_v52 = vmul.f32 %v1820_v47, %v3080_v62  ;;  %v1818_v29 = vadd.f32 0.5, %v1754_v26  ;;  %v1757_v30 = vmul.f32 0.5, %v2508_v24  ;;  %2521 = vtanh.f32 %v1634_v20  ;;  %v879_v43 = vpop.f32.mrf.mxu0 }
 0x125   :  { %1943 = vst [vmem:[%s3477_s5 + $0x88] sm:$0xff] %v1879_v25  ;;  %v1637_v33 = vmul.f32 0.5, %v3161_v28  ;;  %v3169_v34 = vadd.f32 %v2961_v18, %v1396_v31  ;;  %v1417_v27 = vadd.f32 %v2353_v38, %v2273_v21  ;;  %v1408_v35 = vpop.f32.mrf.mxu1 }
 0x126   :  { %v2510_v36 = vpop.eup %2509  ;;  %1948 = vst [vmem:[%s3477_s5 + $0xb0] sm:$0xff] %v1884_v52  ;;  %v1882_v62 = vmul.f32 %v1818_v29, %v3088_v5  ;;  %v1821_v57 = vadd.f32 0.5, %v1757_v30  ;;  %v1409_v39 = vadd.f32 %v1408_v35, %v879_v43  ;;  %v2274_v40 = vpop.f32.mrf.mxu0 }
 0x127   :  { %v2512_v41 = vpop.eup %2511  ;;  %v1755_v44 = vmul.f32 0.5, %v2510_v36  ;;  %2523 = vtanh.f32 %v1637_v33  ;;  %v1635_v46 = vmul.f32 0.5, %v3169_v34  ;;  %v3177_v48 = vadd.f32 %v2961_v18, %v1417_v27  ;;  %v2354_v49 = vpop.f32.mrf.mxu1 }
 0x128   :  { %1946 = vst [vmem:[%s3477_s5 + $0xa0] sm:$0xff] %v1882_v62  ;;  %v1885_v56 = vmul.f32 %v1821_v57, %v3093_v4  ;;  %v1760_v50 = vmul.f32 0.5, %v2512_v41  ;;  %v3184_v5 = vadd.f32 %v2961_v18, %v1409_v39  ;;  %v1420_v51 = vadd.f32 %v2354_v49, %v2274_v40  ;;  %v882_v32 = vpop.f32.mrf.mxu0 }
 0x129   :  { %v2514_v53 = vpop.eup %2513  ;;  %v1819_v54 = vadd.f32 0.5, %v1755_v44  ;;  %2525 = vtanh.f32 %v1635_v46  ;;  %v1640_v55 = vmul.f32 0.5, %v3177_v48  ;;  %v1411_v58 = vpop.f32.mrf.mxu1 }
 0x12a   :  { %1949 = vst [vmem:[%s3477_s5 + $0xb8] sm:$0xff] %v1885_v56  ;;  %v1824_v59 = vadd.f32 0.5, %v1760_v50  ;;  %v1758_v2 = vmul.f32 0.5, %v2514_v53  ;;  %v1638_v4 = vmul.f32 0.5, %v3184_v5  ;;  %v3192_v61 = vadd.f32 %v2961_v18, %v1420_v51  ;;  %v2277_v37 = vpop.f32.mrf.mxu0 }
 0x12b   :  { %v2516_v0 = vpop.eup %2515  ;;  %v1883_v1 = vmul.f32 %v1819_v54, %v3105_v19  ;;  %2527 = vtanh.f32 %v1640_v55  ;;  %v1412_v3 = vadd.f32 %v1411_v58, %v882_v32  ;;  %v2357_v12 = vpop.f32.mrf.mxu1 }
 0x12c   :  { %v1888_v6 = vmul.f32 %v1824_v59, %v3109_v23  ;;  %v1822_v7 = vadd.f32 0.5, %v1758_v2  ;;  %v1761_v42 = vmul.f32 0.5, %v2516_v0  ;;  %2529 = vtanh.f32 %v1638_v4  ;;  %v895_v17 = vpop.f32.mrf.mxu0 }
 0x12d   :  { %1947 = vst [vmem:[%s3477_s5 + $0xa8] sm:$0xff] %v1883_v1  ;;  %v1641_v15 = vmul.f32 0.5, %v3192_v61  ;;  %v3201_v9 = vadd.f32 %v2961_v18, %v1412_v3  ;;  %v1433_v10 = vadd.f32 %v2357_v12, %v2277_v37  ;;  %v1424_v19 = vpop.f32.mrf.mxu1 }
 0x12e   :  { %v2518_v11 = vpop.eup %2517  ;;  %1952 = vst [vmem:[%s3477_s5 + $0xd0] sm:$0xff] %v1888_v6  ;;  %v1886_v23 = vmul.f32 %v1822_v7, %v3120_v22  ;;  %v1825_v13 = vadd.f32 0.5, %v1761_v42  ;;  %v1425_v14 = vadd.f32 %v1424_v19, %v895_v17  ;;  %v2278_v16 = vpop.f32.mrf.mxu0 }
 0x12f   :  { %v2520_v47 = vpop.eup %2519  ;;  %v1759_v26 = vmul.f32 0.5, %v2518_v11  ;;  %2531 = vtanh.f32 %v1641_v15  ;;  %v1639_v20 = vmul.f32 0.5, %v3201_v9  ;;  %v3209_v21 = vadd.f32 %v2961_v18, %v1433_v10  ;;  %v2358_v24 = vpop.f32.mrf.mxu1 }
 0x130   :  { %1950 = vst [vmem:[%s3477_s5 + $0xc0] sm:$0xff] %v1886_v23  ;;  %v1889_v25 = vmul.f32 %v1825_v13, %v3125_v45  ;;  %v1764_v31 = vmul.f32 0.5, %v2520_v47  ;;  %v3216_v22 = vadd.f32 %v2961_v18, %v1425_v14  ;;  %v1436_v38 = vadd.f32 %v2358_v24, %v2278_v16  ;;  %v898_v52 = vpop.f32.mrf.mxu0 }
 0x131   :  { %v2522_v29 = vpop.eup %2521  ;;  %v1823_v30 = vadd.f32 0.5, %v1759_v26  ;;  %2533 = vtanh.f32 %v1639_v20  ;;  %v1644_v43 = vmul.f32 0.5, %v3209_v21  ;;  %v1427_v33 = vpop.f32.mrf.mxu1 }
 0x132   :  { %1953 = vst [vmem:[%s3477_s5 + $0xd8] sm:$0xff] %v1889_v25  ;;  %v1828_v27 = vadd.f32 0.5, %v1764_v31  ;;  %v1762_v35 = vmul.f32 0.5, %v2522_v29  ;;  %v1642_v45 = vmul.f32 0.5, %v3216_v22  ;;  %v3224_v36 = vadd.f32 %v2961_v18, %v1436_v38  ;;  %v2281_v62 = vpop.f32.mrf.mxu0 }
 0x133   :  { %v1887_v57 = vmul.f32 %v1823_v30, %v3137_v60  ;;  %2535 = vtanh.f32 %v1644_v43  ;;  %v1428_v39 = vadd.f32 %v1427_v33, %v898_v52  ;;  %v2361_v40 = vpop.f32.mrf.mxu1 }
 0x134   :  { %v2524_v41 = vpop.eup %2523  ;;  %v1892_v44 = vmul.f32 %v1828_v27, %v3141_v63  ;;  %v1826_v46 = vadd.f32 0.5, %v1762_v35  ;;  %2537 = vtanh.f32 %v1642_v45  ;;  %v1645_v49 = vmul.f32 0.5, %v3224_v36  ;;  %v911_v56 = vpop.f32.mrf.mxu0 }
 0x135   :  { %1951 = vst [vmem:[%s3477_s5 + $0xc8] sm:$0xff] %v1887_v57  ;;  %v1765_v50 = vmul.f32 0.5, %v2524_v41  ;;  %v3233_v51 = vadd.f32 %v2961_v18, %v1428_v39  ;;  %v1449_v60 = vadd.f32 %v2361_v40, %v2281_v62  ;;  %v1440_v32 = vpop.f32.mrf.mxu1 }
 0x136   :  { %v2526_v53 = vpop.eup %2525  ;;  %1956 = vst [vmem:[%s3477_s5 + $0xf0] sm:$0xff] %v1892_v44  ;;  %v1890_v63 = vmul.f32 %v1826_v46, %v3152_v8  ;;  %2539 = vtanh.f32 %v1645_v49  ;;  %v1441_v54 = vadd.f32 %v1440_v32, %v911_v56  ;;  %v2282_v55 = vpop.f32.mrf.mxu0 }
 0x137   :  { %v1829_v58 = vadd.f32 0.5, %v1765_v50  ;;  %v1763_v59 = vmul.f32 0.5, %v2526_v53  ;;  %v1643_v2 = vmul.f32 0.5, %v3233_v51  ;;  %v3241_v4 = vadd.f32 %v2961_v18, %v1449_v60  ;;  %v2362_v37 = vpop.f32.mrf.mxu1 }
 0x138   :  { %v2528_v0 = vpop.eup %2527  ;;  %1954 = vst [vmem:[%s3477_s5 + $0xe0] sm:$0xff] %v1890_v63  ;;  %v3247_v1 = vadd.f32 %v2961_v18, %v1441_v54  ;;  %v1452_v8 = vadd.f32 %v2362_v37, %v2282_v55  ;;  %v914_v3 = vpop.f32.mrf.mxu0 }
 0x139   :  { %v2530_v12 = vpop.eup %2529  ;;  %v1893_v6 = vmul.f32 %v1829_v58, %v3161_v28  ;;  %v1827_v7 = vadd.f32 0.5, %v1763_v59  ;;  %v1768_v42 = vmul.f32 0.5, %v2528_v0  ;;  %2541 = vtanh.f32 %v1643_v2  ;;  %v1443_v17 = vpop.f32.mrf.mxu1 }
 0x13a   :  { %v1766_v15 = vmul.f32 0.5, %v2530_v12  ;;  %v1648_v10 = vmul.f32 0.5, %v3241_v4  ;;  %v1646_v19 = vmul.f32 0.5, %v3247_v1  ;;  %v3253_v11 = vadd.f32 %v2961_v18, %v1452_v8  ;;  %v2285_v23 = vpop.f32.mrf.mxu0 }
 0x13b   :  { %1957 = vst [vmem:[%s3477_s5 + $0xf8] sm:$0xff] %v1893_v6  ;;  %v1891_v13 = vmul.f32 %v1827_v7, %v3169_v34  ;;  %v1832_v28 = vadd.f32 0.5, %v1768_v42  ;;  %v1444_v14 = vadd.f32 %v1443_v17, %v914_v3  ;;  %v2365_v16 = vpop.f32.mrf.mxu1 }
 0x13c   :  { %v2532_v47 = vpop.eup %2531  ;;  %v1830_v26 = vadd.f32 0.5, %v1766_v15  ;;  %2543 = vtanh.f32 %v1648_v10  ;;  %v1649_v20 = vmul.f32 0.5, %v3253_v11  ;;  %v1465_v24 = vadd.f32 %v2365_v16, %v2285_v23  ;;  %v927_v25 = vpop.f32.mrf.mxu0 }
 0x13d   :  { %1955 = vst [vmem:[%s3477_s5 + $0xe8] sm:$0xff] %v1891_v13  ;;  %v1896_v31 = vmul.f32 %v1832_v28, %v3177_v48  ;;  %v1769_v38 = vmul.f32 0.5, %v2532_v47  ;;  %2545 = vtanh.f32 %v1646_v19  ;;  %v3265_v34 = vadd.f32 %v2961_v18, %v1444_v14  ;;  %v1456_v52 = vpop.f32.mrf.mxu1 }
 0x13e   :  { %v2534_v29 = vpop.eup %2533  ;;  %v1894_v30 = vmul.f32 %v1830_v26, %v3184_v5  ;;  %2547 = vtanh.f32 %v1649_v20  ;;  %v3269_v43 = vadd.f32 %v2961_v18, %v1465_v24  ;;  %v1457_v33 = vadd.f32 %v1456_v52, %v927_v25  ;;  %v2286_v27 = vpop.f32.mrf.mxu0 }
 0x13f   :  { %1960 = vst [vmem:[%s3477_s5 + $0x110] sm:$0xff] %v1896_v31  ;;  %v1833_v48 = vadd.f32 0.5, %v1769_v38  ;;  %v1767_v35 = vmul.f32 0.5, %v2534_v29  ;;  %v1647_v45 = vmul.f32 0.5, %v3265_v34  ;;  %v2366_v62 = vpop.f32.mrf.mxu1 }
 0x140   :  { %v2536_v57 = vpop.eup %2535  ;;  %1958 = vst [vmem:[%s3477_s5 + $0x100] sm:$0xff] %v1894_v30  ;;  %v1652_v5 = vmul.f32 0.5, %v3269_v43  ;;  %v3280_v39 = vadd.f32 %v2961_v18, %v1457_v33  ;;  %v1468_v40 = vadd.f32 %v2366_v62, %v2286_v27  ;;  %v930_v41 = vpop.f32.mrf.mxu0 }
 0x141   :  { %v2538_v44 = vpop.eup %2537  ;;  %v1897_v46 = vmul.f32 %v1833_v48, %v3192_v61  ;;  %v1831_v49 = vadd.f32 0.5, %v1767_v35  ;;  %v1772_v56 = vmul.f32 0.5, %v2536_v57  ;;  %2549 = vtanh.f32 %v1647_v45  ;;  %v1459_v50 = vpop.f32.mrf.mxu1 }
 0x142   :  { %v1770_v60 = vmul.f32 0.5, %v2538_v44  ;;  %2551 = vtanh.f32 %v1652_v5  ;;  %v1650_v32 = vmul.f32 0.5, %v3280_v39  ;;  %v3285_v53 = vadd.f32 %v2961_v18, %v1468_v40  ;;  %v2289_v63 = vpop.f32.mrf.mxu0  ;;  %v3330_v5 = vld [vmem:[%s3476_s4] ss:$0 sm:$0xff] }
 0x143   :  { %v2540_v54 = vpop.eup %2539  ;;  %1961 = vst [vmem:[%s3477_s5 + $0x118] sm:$0xff] %v1897_v46  ;;  %v1895_v55 = vmul.f32 %v1831_v49, %v3201_v9  ;;  %v1836_v61 = vadd.f32 0.5, %v1772_v56  ;;  %v1460_v58 = vadd.f32 %v1459_v50, %v930_v41  ;;  %v2369_v59 = vpop.f32.mrf.mxu1 }
 0x144   :  { %v1834_v2 = vadd.f32 0.5, %v1770_v60  ;;  %v1773_v37 = vmul.f32 0.5, %v2540_v54  ;;  %2553 = vtanh.f32 %v1650_v32  ;;  %v1653_v0 = vmul.f32 0.5, %v3285_v53  ;;  %v943_v8 = vpop.f32.mrf.mxu0 }
 0x145   :  { %1959 = vst [vmem:[%s3477_s5 + $0x108] sm:$0xff] %v1895_v55  ;;  %v1900_v3 = vmul.f32 %v1836_v61, %v3209_v21  ;;  %v3297_v12 = vadd.f32 %v2961_v18, %v1460_v58  ;;  %v1481_v6 = vadd.f32 %v2369_v59, %v2289_v63  ;;  %v1472_v9 = vpop.f32.mrf.mxu1 }
 0x146   :  { %v2542_v7 = vpop.eup %2541  ;;  %v1898_v42 = vmul.f32 %v1834_v2, %v3216_v22  ;;  %v1837_v17 = vadd.f32 0.5, %v1773_v37  ;;  %2555 = vtanh.f32 %v1653_v0  ;;  %v1473_v15 = vadd.f32 %v1472_v9, %v943_v8  ;;  %v2290_v10 = vpop.f32.mrf.mxu0 }
 0x147   :  { %1964 = vst [vmem:[%s3477_s5 + $0x130] sm:$0xff] %v1900_v3  ;;  %v1771_v19 = vmul.f32 0.5, %v2542_v7  ;;  %v1651_v23 = vmul.f32 0.5, %v3297_v12  ;;  %v3305_v21 = vadd.f32 %v2961_v18, %v1481_v6  ;;  %v2370_v13 = vpop.f32.mrf.mxu1 }
 0x148   :  { %1962 = vst [vmem:[%s3477_s5 + $0x120] sm:$0xff] %v1898_v42  ;;  %v1901_v22 = vmul.f32 %v1837_v17, %v3224_v36  ;;  %v3312_v28 = vadd.f32 %v2961_v18, %v1473_v15  ;;  %v1484_v14 = vadd.f32 %v2370_v13, %v2290_v10  ;;  %v946_v16 = vpop.f32.mrf.mxu0 }
 0x149   :  { %v2544_v47 = vpop.eup %2543  ;;  %v1835_v26 = vadd.f32 0.5, %v1771_v19  ;;  %2557 = vtanh.f32 %v1651_v23  ;;  %v1656_v20 = vmul.f32 0.5, %v3305_v21  ;;  %v1475_v24 = vpop.f32.mrf.mxu1 }
 0x14a   :  { %v2546_v25 = vpop.eup %2545  ;;  %1965 = vst [vmem:[%s3477_s5 + $0x138] sm:$0xff] %v1901_v22  ;;  %v1776_v31 = vmul.f32 0.5, %v2544_v47  ;;  %v1654_v38 = vmul.f32 0.5, %v3312_v28  ;;  %v3320_v36 = vadd.f32 %v2961_v18, %v1484_v14  ;;  %v1476_v52 = vadd.f32 %v1475_v24, %v946_v16  ;;  %v2293_v29 = vpop.f32.mrf.mxu0 }
 0x14b   :  { %v2548_v30 = vpop.eup %2547  ;;  %v1899_v33 = vmul.f32 %v1835_v26, %v3233_v51  ;;  %v1774_v27 = vmul.f32 0.5, %v2546_v25  ;;  %2559 = vtanh.f32 %v1656_v20  ;;  %v2373_v48 = vpop.f32.mrf.mxu1 }
 0x14c   :  { %v1840_v35 = vadd.f32 0.5, %v1776_v31  ;;  %v1777_v45 = vmul.f32 0.5, %v2548_v30  ;;  %2561 = vtanh.f32 %v1654_v38  ;;  %v1657_v62 = vmul.f32 0.5, %v3320_v36  ;;  %v959_v57 = vpop.f32.mrf.mxu0 }
 0x14d   :  { %1963 = vst [vmem:[%s3477_s5 + $0x128] sm:$0xff] %v1899_v33  ;;  %v1838_v18 = vadd.f32 0.5, %v1774_v27  ;;  %v3333_v51 = vadd.f32 %v3330_v5, %v1476_v52  ;;  %v1497_v40 = vadd.f32 %v2373_v48, %v2293_v29  ;;  %v1488_v41 = vpop.f32.mrf.mxu1 }
 0x14e   :  { %v2550_v44 = vpop.eup %2549  ;;  %v1904_v46 = vmul.f32 %v1840_v35, %v3241_v4  ;;  %v1841_v49 = vadd.f32 0.5, %v1777_v45  ;;  %2563 = vtanh.f32 %v1657_v62  ;;  %v1489_v56 = vadd.f32 %v1488_v41, %v959_v57  ;;  %v2294_v50 = vpop.f32.mrf.mxu0 }
 0x14f   :  { %v2552_v60 = vpop.eup %2551  ;;  %v1902_v32 = vmul.f32 %v1838_v18, %v3247_v1  ;;  %v1775_v63 = vmul.f32 0.5, %v2550_v44  ;;  %v1655_v54 = vmul.f32 0.5, %v3333_v51  ;;  %v3339_v55 = vadd.f32 %v3330_v5, %v1497_v40  ;;  %v2374_v61 = vpop.f32.mrf.mxu1 }
 0x150   :  { %1968 = vst [vmem:[%s3477_s5 + $0x150] sm:$0xff] %v1904_v46  ;;  %v1905_v4 = vmul.f32 %v1841_v49, %v3253_v11  ;;  %v1780_v58 = vmul.f32 0.5, %v2552_v60  ;;  %v3346_v59 = vadd.f32 %v3330_v5, %v1489_v56  ;;  %v1500_v2 = vadd.f32 %v2374_v61, %v2294_v50  ;;  %v962_v37 = vpop.f32.mrf.mxu0 }
 0x151   :  { %v2554_v1 = vpop.eup %2553  ;;  %1966 = vst [vmem:[%s3477_s5 + $0x140] sm:$0xff] %v1902_v32  ;;  %v1839_v0 = vadd.f32 0.5, %v1775_v63  ;;  %2565 = vtanh.f32 %v1655_v54  ;;  %v1660_v8 = vmul.f32 0.5, %v3339_v55  ;;  %v1491_v3 = vpop.f32.mrf.mxu1 }
 0x152   :  { %1969 = vst [vmem:[%s3477_s5 + $0x158] sm:$0xff] %v1905_v4  ;;  %v1844_v11 = vadd.f32 0.5, %v1780_v58  ;;  %v1778_v6 = vmul.f32 0.5, %v2554_v1  ;;  %v1658_v9 = vmul.f32 0.5, %v3346_v59  ;;  %v3357_v7 = vadd.f32 %v3330_v5, %v1500_v2  ;;  %v2297_v42 = vpop.f32.mrf.mxu0 }
 0x153   :  { %v2556_v17 = vpop.eup %2555  ;;  %v1903_v15 = vmul.f32 %v1839_v0, %v3265_v34  ;;  %2567 = vtanh.f32 %v1660_v8  ;;  %v1492_v10 = vadd.f32 %v1491_v3, %v962_v37  ;;  %v2377_v19 = vpop.f32.mrf.mxu1 }
 0x154   :  { %v1908_v23 = vmul.f32 %v1844_v11, %v3269_v43  ;;  %v1842_v13 = vadd.f32 0.5, %v1778_v6  ;;  %v1781_v22 = vmul.f32 0.5, %v2556_v17  ;;  %2569 = vtanh.f32 %v1658_v9  ;;  %v975_v14 = vpop.f32.mrf.mxu0 }
 0x155   :  { %1967 = vst [vmem:[%s3477_s5 + $0x148] sm:$0xff] %v1903_v15  ;;  %v1661_v16 = vmul.f32 0.5, %v3357_v7  ;;  %v3366_v47 = vadd.f32 %v3330_v5, %v1492_v10  ;;  %v1513_v26 = vadd.f32 %v2377_v19, %v2297_v42  ;;  %v1504_v34 = vpop.f32.mrf.mxu1 }
 0x156   :  { %v2558_v20 = vpop.eup %2557  ;;  %1972 = vst [vmem:[%s3477_s5 + $0x170] sm:$0xff] %v1908_v23  ;;  %v1906_v43 = vmul.f32 %v1842_v13, %v3280_v39  ;;  %v1845_v24 = vadd.f32 0.5, %v1781_v22  ;;  %v1505_v25 = vadd.f32 %v1504_v34, %v975_v14  ;;  %v2298_v31 = vpop.f32.mrf.mxu0 }
 0x157   :  { %v1779_v38 = vmul.f32 0.5, %v2558_v20  ;;  %2571 = vtanh.f32 %v1661_v16  ;;  %v1659_v52 = vmul.f32 0.5, %v3366_v47  ;;  %v3374_v29 = vadd.f32 %v3330_v5, %v1513_v26  ;;  %v2378_v30 = vpop.f32.mrf.mxu1 }
 0x158   :  { %v2560_v33 = vpop.eup %2559  ;;  %1970 = vst [vmem:[%s3477_s5 + $0x160] sm:$0xff] %v1906_v43  ;;  %v1909_v27 = vmul.f32 %v1845_v24, %v3285_v53  ;;  %v3381_v39 = vadd.f32 %v3330_v5, %v1505_v25  ;;  %v1516_v48 = vadd.f32 %v2378_v30, %v2298_v31  ;;  %v978_v35 = vpop.f32.mrf.mxu0 }
 0x159   :  { %v2562_v45 = vpop.eup %2561  ;;  %v1843_v62 = vadd.f32 0.5, %v1779_v38  ;;  %v1784_v57 = vmul.f32 0.5, %v2560_v33  ;;  %2573 = vtanh.f32 %v1659_v52  ;;  %v1664_v18 = vmul.f32 0.5, %v3374_v29  ;;  %v1507_v40 = vpop.f32.mrf.mxu1 }
 0x15a   :  { %1973 = vst [vmem:[%s3477_s5 + $0x178] sm:$0xff] %v1909_v27  ;;  %v1782_v41 = vmul.f32 0.5, %v2562_v45  ;;  %v1662_v44 = vmul.f32 0.5, %v3381_v39  ;;  %v3389_v53 = vadd.f32 %v3330_v5, %v1516_v48  ;;  %v1508_v46 = vadd.f32 %v1507_v40, %v978_v35  ;;  %v2301_v49 = vpop.f32.mrf.mxu0 }
 0x15b   :  { %v2564_v56 = vpop.eup %2563  ;;  %v1907_v50 = vmul.f32 %v1843_v62, %v3297_v12  ;;  %v1848_v60 = vadd.f32 0.5, %v1784_v57  ;;  %2575 = vtanh.f32 %v1664_v18  ;;  %v2381_v32 = vpop.f32.mrf.mxu1 }
 0x15c   :  { %v1846_v63 = vadd.f32 0.5, %v1782_v41  ;;  %v1785_v54 = vmul.f32 0.5, %v2564_v56  ;;  %2577 = vtanh.f32 %v1662_v44  ;;  %v1665_v61 = vmul.f32 0.5, %v3389_v53  ;;  %v991_v4 = vpop.f32.mrf.mxu0 }
 0x15d   :  { %1971 = vst [vmem:[%s3477_s5 + $0x168] sm:$0xff] %v1907_v50  ;;  %v1912_v58 = vmul.f32 %v1848_v60, %v3305_v21  ;;  %v3398_v2 = vadd.f32 %v3330_v5, %v1508_v46  ;;  %v1529_v37 = vadd.f32 %v2381_v32, %v2301_v49  ;;  %v1520_v12 = vpop.f32.mrf.mxu1 }
 0x15e   :  { %v2566_v1 = vpop.eup %2565  ;;  %v1910_v0 = vmul.f32 %v1846_v63, %v3312_v28  ;;  %v1849_v8 = vadd.f32 0.5, %v1785_v54  ;;  %2579 = vtanh.f32 %v1665_v61  ;;  %v1521_v3 = vadd.f32 %v1520_v12, %v991_v4  ;;  %v2302_v11 = vpop.f32.mrf.mxu0 }
 0x15f   :  { %1976 = vst [vmem:[%s3477_s5 + $0x190] sm:$0xff] %v1912_v58  ;;  %v1783_v6 = vmul.f32 0.5, %v2566_v1  ;;  %v1663_v9 = vmul.f32 0.5, %v3398_v2  ;;  %v3406_v21 = vadd.f32 %v3330_v5, %v1529_v37  ;;  %v2382_v42 = vpop.f32.mrf.mxu1 }
 0x160   :  { %v2568_v17 = vpop.eup %2567  ;;  %1974 = vst [vmem:[%s3477_s5 + $0x180] sm:$0xff] %v1910_v0  ;;  %v1913_v28 = vmul.f32 %v1849_v8, %v3320_v36  ;;  %v3413_v15 = vadd.f32 %v3330_v5, %v1521_v3  ;;  %v1532_v10 = vadd.f32 %v2382_v42, %v2302_v11  ;;  %v994_v19 = vpop.f32.mrf.mxu0 }
 0x161   :  { %v2570_v23 = vpop.eup %2569  ;;  %v1847_v13 = vadd.f32 0.5, %v1783_v6  ;;  %v1788_v22 = vmul.f32 0.5, %v2568_v17  ;;  %2581 = vtanh.f32 %v1663_v9  ;;  %v1668_v14 = vmul.f32 0.5, %v3406_v21  ;;  %v1523_v16 = vpop.f32.mrf.mxu1 }
 0x162   :  { %1977 = vst [vmem:[%s3477_s5 + $0x198] sm:$0xff] %v1913_v28  ;;  %v1786_v26 = vmul.f32 0.5, %v2570_v23  ;;  %v1666_v34 = vmul.f32 0.5, %v3413_v15  ;;  %v1605_v36 = vadd.f32 %v3330_v5, %v1532_v10  ;;  %v1524_v20 = vadd.f32 %v1523_v16, %v994_v19 }
 0x163   :  { %v1911_v43 = vmul.f32 %v1847_v13, %v3333_v51  ;;  %v1852_v24 = vadd.f32 0.5, %v1788_v22  ;;  %2583 = vtanh.f32 %v1668_v14 }
 0x164   :  { %v2572_v25 = vpop.eup %2571  ;;  %v1850_v31 = vadd.f32 0.5, %v1786_v26  ;;  %2585 = vtanh.f32 %v1666_v34  ;;  %v1669_v38 = vmul.f32 0.5, %v1605_v36  ;;  %v1603_v52 = vadd.f32 %v3330_v5, %v1524_v20 }
 0x165   :  { %1975 = vst [vmem:[%s3477_s5 + $0x188] sm:$0xff] %v1911_v43  ;;  %v1916_v30 = vmul.f32 %v1852_v24, %v3339_v55  ;;  %v1789_v33 = vmul.f32 0.5, %v2572_v25 }
 0x166   :  { %v2574_v27 = vpop.eup %2573  ;;  %v1914_v48 = vmul.f32 %v1850_v31, %v3346_v59  ;;  %2587 = vtanh.f32 %v1669_v38  ;;  %v1667_v51 = vmul.f32 0.5, %v1603_v52 }
 0x167   :  { %1980 = vst [vmem:[%s3477_s5 + $0x1b0] sm:$0xff] %v1916_v30  ;;  %v1853_v35 = vadd.f32 0.5, %v1789_v33  ;;  %v1787_v45 = vmul.f32 0.5, %v2574_v27 }
 0x168   :  { %v2576_v62 = vpop.eup %2575  ;;  %1978 = vst [vmem:[%s3477_s5 + $0x1a0] sm:$0xff] %v1914_v48  ;;  %2589 = vtanh.f32 %v1667_v51 }
 0x169   :  { %v2578_v5 = vpop.eup %2577  ;;  %v1917_v55 = vmul.f32 %v1853_v35, %v3357_v7  ;;  %v1851_v57 = vadd.f32 0.5, %v1787_v45  ;;  %v1792_v18 = vmul.f32 0.5, %v2576_v62 }
 0x16a   :  { %v1790_v59 = vmul.f32 0.5, %v2578_v5 }
 0x16b   :  { %v2580_v40 = vpop.eup %2579  ;;  %1981 = vst [vmem:[%s3477_s5 + $0x1b8] sm:$0xff] %v1917_v55  ;;  %v1915_v41 = vmul.f32 %v1851_v57, %v3366_v47  ;;  %v1856_v44 = vadd.f32 0.5, %v1792_v18 }
 0x16c   :  { %v1854_v46 = vadd.f32 0.5, %v1790_v59  ;;  %v1793_v49 = vmul.f32 0.5, %v2580_v40 }
 0x16d   :  { %1979 = vst [vmem:[%s3477_s5 + $0x1a8] sm:$0xff] %v1915_v41  ;;  %v1920_v56 = vmul.f32 %v1856_v44, %v3374_v29 }
 0x16e   :  { %v2582_v7 = vpop.eup %2581  ;;  %v1918_v50 = vmul.f32 %v1854_v46, %v3381_v39  ;;  %v1857_v60 = vadd.f32 0.5, %v1793_v49 }
 0x16f   :  { %1984 = vst [vmem:[%s3477_s5 + $0x1d0] sm:$0xff] %v1920_v56  ;;  %v1791_v32 = vmul.f32 0.5, %v2582_v7 }
 0x170   :  { %v2584_v63 = vpop.eup %2583  ;;  %1982 = vst [vmem:[%s3477_s5 + $0x1c0] sm:$0xff] %v1918_v50  ;;  %v1921_v47 = vmul.f32 %v1857_v60, %v3389_v53 }
 0x171   :  { %v2586_v54 = vpop.eup %2585  ;;  %v1855_v61 = vadd.f32 0.5, %v1791_v32  ;;  %v1796_v4 = vmul.f32 0.5, %v2584_v63 }
 0x172   :  { %1985 = vst [vmem:[%s3477_s5 + $0x1d8] sm:$0xff] %v1921_v47  ;;  %v1794_v29 = vmul.f32 0.5, %v2586_v54 }
 0x173   :  { %v2588_v39 = vpop.eup %2587  ;;  %v1919_v58 = vmul.f32 %v1855_v61, %v3398_v2  ;;  %v1860_v37 = vadd.f32 0.5, %v1796_v4 }
 0x174   :  { %v1858_v12 = vadd.f32 0.5, %v1794_v29  ;;  %v1797_v1 = vmul.f32 0.5, %v2588_v39 }
 0x175   :  { %v2590_v0 = vpop.eup %2589  ;;  %1983 = vst [vmem:[%s3477_s5 + $0x1c8] sm:$0xff] %v1919_v58  ;;  %v1924_v53 = vmul.f32 %v1860_v37, %v3406_v21 }
 0x176   :  { %v1922_v8 = vmul.f32 %v1858_v12, %v3413_v15  ;;  %v1861_v3 = vadd.f32 0.5, %v1797_v1  ;;  %v1795_v11 = vmul.f32 0.5, %v2590_v0 }
 0x177   :  { %1988 = vst [vmem:[%s3477_s5 + $0x1f0] sm:$0xff] %v1924_v53 }
 0x178   :  { %1986 = vst [vmem:[%s3477_s5 + $0x1e0] sm:$0xff] %v1922_v8  ;;  %v1925_v2 = vmul.f32 %v1861_v3, %v1605_v36  ;;  %v1859_v6 = vadd.f32 0.5, %v1795_v11 }
 0x17a   :  { %1989 = vst [vmem:[%s3477_s5 + $0x1f8] sm:$0xff] %v1925_v2  ;;  %v1923_v9 = vmul.f32 %v1859_v6, %v1603_v52 }
 0x17c   :  { %1987 = vst [vmem:[%s3477_s5 + $0x1e8] sm:$0xff] %v1923_v9 }

// kernel: c3_forward.6
= control target key start
LH: loop header
LB: loop body
LE: loop exit
PB: predicated region body
PF: predicated region fallthrough
CT: control target
= control target key end

     0   :  { %s7917_s15 = smov 0   ;;  %s7919_s16 = smov 0   ;;  %s10789_s0 = inlined_call_operand.vmem [shape: bf16[640,128], index: 0, kind: input, shape index: {}]   ;;  %s10790_s1 = inlined_call_operand.vmem [shape: bf16[9,128,128], index: 1, kind: input, shape index: {}]   ;;  %s10791_s2 = inlined_call_operand.vmem [shape: f32[1,128], index: 2, kind: input, shape index: {}]   ;;  %s10792_s3 = inlined_call_operand.vmem [shape: bf16[512,256], index: 3, kind: input, shape index: {}]   ;;  %s10793_s4 = inlined_call_operand.vmem [shape: bf16[512,128], index: 4, kind: output, shape index: {}]  }
   0x1   :  { %s7921_s17 = smov 0  }
   0x2 LB: > { %s6387_s18 = sadd.s32 4294967295, %s7888_s17   ;;  %s7934_s19 = sadd.s32 1, %s7888_s17   ;;  %s7888_s17 = sphi %s7921_s17, %s11598_s17   ;;  %s7884_s16 = sphi %s7919_s16, %s11597_s16   ;;  %s7880_s15 = sphi %s7917_s15, %s11596_s15  }
   0x3   : > { %s86_s20 = ssub.s32 %s7888_s17, %s7934_s19  ;;  %s89_s21 = sadd.s32 1, %s7884_s16 }
   0x4   : > { %p87_p0 = scmp.eq.s32.totalorder %s86_s20, 0  ;;  %p96_p1 = scmp.ne.s32.totalorder %s7884_s16, %s7880_s15 }
   0x5   : > { %p97_p2 = scmp.eq.s32.totalorder %s7888_s17, 0  ;;  %p6390_p4 = scmp.ge.s32.totalorder %s7888_s17, 2 }
   0x6   : > { %s7943_s22 = scalar_select %p87_p0, %s7884_s16, %s89_s21  }
   0x7   : > { %p98_p3 = por %p97_p2, %p96_p1  ;;  %154 = sbr.rel (%p6390_p4) target bundleno = 37 (0x25), region = 24 }
   0xc   : > { %166 = sbr.rel (!%p98_p3) target bundleno = 37 (0x25), region = 32  ;;  %s168_s23 = sand.u32 (%p98_p3), 1, %s7884_s16  }
   0xd   : > { %s6756_s24 = sshll.u32 (%p98_p3), %s7888_s17, 8  ;;  %s6391_s25 = sshll.u32 (%p98_p3), %s168_s23, 7 }
   0xe   : > { %s7951_s28 = scalar_lea.vmem (%p98_p3), %s10792_s3, %s6756_s24  ;;  %s7955_s29 = scalar_lea.vmem (%p98_p3), [#allocation2], %s6391_s25 }
   0xf   : > { %v191_v0 = vld [vmem:[%s7951_s28] sm:$0xf] (%p98_p3)  ;;  %v193_v1 = vld [vmem:[%s7951_s28 + $0x8] sm:$0xf] (%p98_p3)  ;;  %v195_v2 = vld [vmem:[%s7951_s28 + $0x10] sm:$0xf] (%p98_p3) }
  0x10   : > { %192 = vst [vmem:[%s7955_s29] sm:$0xf] (%p98_p3), %v191_v0  ;;  %194 = vst [vmem:[%s7955_s29 + $0x4] sm:$0xf] (%p98_p3), %v193_v1  ;;  %v197_v3 = vld [vmem:[%s7951_s28 + $0x18] sm:$0xf] (%p98_p3) }
  0x11   : > { %v199_v4 = vld [vmem:[%s7951_s28 + $0x20] sm:$0xf]  ;;  %196 = vst [vmem:[%s7955_s29 + $0x8] sm:$0xf] %v195_v2  ;;  %198 = vst [vmem:[%s7955_s29 + $0xc] sm:$0xf] %v197_v3 }
  0x12   : > { %200 = vst [vmem:[%s7955_s29 + $0x10] sm:$0xf] %v199_v4  ;;  %v201_v5 = vld [vmem:[%s7951_s28 + $0x28] sm:$0xf]  ;;  %v203_v6 = vld [vmem:[%s7951_s28 + $0x30] sm:$0xf] }
  0x13   : > { %v205_v7 = vld [vmem:[%s7951_s28 + $0x38] sm:$0xf]  ;;  %202 = vst [vmem:[%s7955_s29 + $0x14] sm:$0xf] %v201_v5  ;;  %204 = vst [vmem:[%s7955_s29 + $0x18] sm:$0xf] %v203_v6 }
  0x14   : > { %206 = vst [vmem:[%s7955_s29 + $0x1c] sm:$0xf] %v205_v7  ;;  %v207_v8 = vld [vmem:[%s7951_s28 + $0x40] sm:$0xf]  ;;  %v209_v9 = vld [vmem:[%s7951_s28 + $0x48] sm:$0xf] }
  0x15   : > { %v211_v10 = vld [vmem:[%s7951_s28 + $0x50] sm:$0xf]  ;;  %208 = vst [vmem:[%s7955_s29 + $0x20] sm:$0xf] %v207_v8  ;;  %210 = vst [vmem:[%s7955_s29 + $0x24] sm:$0xf] %v209_v9 }
  0x16   : > { %212 = vst [vmem:[%s7955_s29 + $0x28] sm:$0xf] %v211_v10  ;;  %v213_v11 = vld [vmem:[%s7951_s28 + $0x58] sm:$0xf]  ;;  %v215_v12 = vld [vmem:[%s7951_s28 + $0x60] sm:$0xf] }
  0x17   : > { %v217_v13 = vld [vmem:[%s7951_s28 + $0x68] sm:$0xf]  ;;  %214 = vst [vmem:[%s7955_s29 + $0x2c] sm:$0xf] %v213_v11  ;;  %216 = vst [vmem:[%s7955_s29 + $0x30] sm:$0xf] %v215_v12 }
  0x18   : > { %218 = vst [vmem:[%s7955_s29 + $0x34] sm:$0xf] %v217_v13  ;;  %v219_v14 = vld [vmem:[%s7951_s28 + $0x70] sm:$0xf]  ;;  %v221_v15 = vld [vmem:[%s7951_s28 + $0x78] sm:$0xf] }
  0x19   : > { %v223_v16 = vld [vmem:[%s7951_s28 + $0x80] sm:$0xf]  ;;  %220 = vst [vmem:[%s7955_s29 + $0x38] sm:$0xf] %v219_v14  ;;  %222 = vst [vmem:[%s7955_s29 + $0x3c] sm:$0xf] %v221_v15 }
  0x1a   : > { %224 = vst [vmem:[%s7955_s29 + $0x40] sm:$0xf] %v223_v16  ;;  %v225_v17 = vld [vmem:[%s7951_s28 + $0x88] sm:$0xf]  ;;  %v227_v18 = vld [vmem:[%s7951_s28 + $0x90] sm:$0xf] }
  0x1b   : > { %v229_v19 = vld [vmem:[%s7951_s28 + $0x98] sm:$0xf]  ;;  %226 = vst [vmem:[%s7955_s29 + $0x44] sm:$0xf] %v225_v17  ;;  %228 = vst [vmem:[%s7955_s29 + $0x48] sm:$0xf] %v227_v18 }
  0x1c   : > { %230 = vst [vmem:[%s7955_s29 + $0x4c] sm:$0xf] %v229_v19  ;;  %v231_v20 = vld [vmem:[%s7951_s28 + $0xa0] sm:$0xf]  ;;  %v233_v21 = vld [vmem:[%s7951_s28 + $0xa8] sm:$0xf] }
  0x1d   : > { %v235_v22 = vld [vmem:[%s7951_s28 + $0xb0] sm:$0xf]  ;;  %232 = vst [vmem:[%s7955_s29 + $0x50] sm:$0xf] %v231_v20  ;;  %234 = vst [vmem:[%s7955_s29 + $0x54] sm:$0xf] %v233_v21 }
  0x1e   : > { %236 = vst [vmem:[%s7955_s29 + $0x58] sm:$0xf] %v235_v22  ;;  %v237_v23 = vld [vmem:[%s7951_s28 + $0xb8] sm:$0xf]  ;;  %v239_v24 = vld [vmem:[%s7951_s28 + $0xc0] sm:$0xf] }
  0x1f   : > { %v241_v25 = vld [vmem:[%s7951_s28 + $0xc8] sm:$0xf]  ;;  %238 = vst [vmem:[%s7955_s29 + $0x5c] sm:$0xf] %v237_v23  ;;  %240 = vst [vmem:[%s7955_s29 + $0x60] sm:$0xf] %v239_v24 }
  0x20   : > { %242 = vst [vmem:[%s7955_s29 + $0x64] sm:$0xf] %v241_v25  ;;  %v243_v26 = vld [vmem:[%s7951_s28 + $0xd0] sm:$0xf]  ;;  %v245_v27 = vld [vmem:[%s7951_s28 + $0xd8] sm:$0xf] }
  0x21   : > { %v247_v28 = vld [vmem:[%s7951_s28 + $0xe0] sm:$0xf]  ;;  %244 = vst [vmem:[%s7955_s29 + $0x68] sm:$0xf] %v243_v26  ;;  %246 = vst [vmem:[%s7955_s29 + $0x6c] sm:$0xf] %v245_v27 }
  0x22   : > { %248 = vst [vmem:[%s7955_s29 + $0x70] sm:$0xf] %v247_v28  ;;  %v249_v29 = vld [vmem:[%s7951_s28 + $0xe8] sm:$0xf]  ;;  %v251_v30 = vld [vmem:[%s7951_s28 + $0xf0] sm:$0xf] }
  0x23   : > { %v253_v31 = vld [vmem:[%s7951_s28 + $0xf8] sm:$0xf]  ;;  %250 = vst [vmem:[%s7955_s29 + $0x74] sm:$0xf] %v249_v29  ;;  %252 = vst [vmem:[%s7955_s29 + $0x78] sm:$0xf] %v251_v30 }
  0x24   : > { %254 = vst [vmem:[%s7955_s29 + $0x7c] sm:$0xf] %v253_v31 }
  0x25 PF: > { %p6395_p5 = scmp.ge.s32.totalorder %s7888_s17, 1  ;;  %p341_p6 = scmp.lt.s32.totalorder %s7888_s17, 3 }
  0x27   : > { %p342_p7 = pnand %p6395_p5, %p341_p6 }
  0x29   : > { %345 = sbr.rel (%p342_p7) target bundleno = 727 (0x2d7), region = 73 }
  0x2e   : > { %v7653_v32 = vld [vmem:[%s10790_s1 + $0x78] sm:$0xff]   ;;  %s378_s6 = smul.u32 40, %s6387_s18  ;;  %v432_v33 = vlaneseq  ;;  %v7654_v34 = vld [vmem:[%s10790_s1 + $0x70] sm:$0xff]   ;;  %v7655_v36 = vld [vmem:[%s10790_s1 + $0x68] sm:$0xff]   ;;  %vm7890_vm0 = vmmov 0   ;;  %v10801_v46 = vmov 0  }
  0x2f   : > { %7179 = vmatprep.subr.bf16.mxu0 %v7653_v32  ;;  %7611 = vmatprep.subr.bf16.mxu1 %v7653_v32  ;;  %v7656_v39 = vld [vmem:[%s10790_s1 + $0x60] sm:$0xff]   ;;  %vm978_vm1 = vmpackc.low %vm7890_vm0, %vm7890_vm0  ;;  %v7657_v48 = vld [vmem:[%s10790_s1 + $0x58] sm:$0xff]   ;;  %vm1041_vm6 = vsmask.f32 3328  ;;  %vm1042_vm8 = vsmask.f32 7440 }
  0x30   : > { %p379_p8 = scmp.lt.s32.totalorder %s378_s6, 79  ;;  %7180 = vmatpush3.bf16.msra.mxu0 %v7653_v32  ;;  %7619 = vmatpush3.bf16.msra.mxu1 %v7653_v32  ;;  %v8029_v35 = vshrl.u32 %v432_v33, 7  ;;  %v1010_v47 = vsel %vm978_vm1, 65537, %v10801_v46  ;;  %vm2356_vm9 = vsmask.f32 256  ;;  %v7658_v55 = vld [vmem:[%s10790_s1 + $0x50] sm:$0xff]   ;;  %vm8099_vm12 = vmor %vm1041_vm6, %vm1042_vm8 }
  0x31   : > { %7181 = vmatprep.subr.bf16.mxu0 %v7654_v34  ;;  %7612 = vmatprep.subr.bf16.mxu1 %v7654_v34  ;;  %v1054_v51 = vshll.u32 %v1010_v47, 16  ;;  %v1058_v52 = vshrl.u32 %v1010_v47, 16  ;;  %vm2357_vm11 = vsmask.f32 4368  ;;  %v7659_v14 = vld [vmem:[%s10790_s1 + $0x48] sm:$0xff]   ;;  %v7660_v28 = vld [vmem:[%s10790_s1 + $0x40] sm:$0xff]  }
  0x32   : > { %s11600_s6 = smov (!%p379_p8, %s378_s6), 79  ;;  %v434_v37 = vadd.s32 8, %v8029_v35  ;;  %v435_v38 = vadd.s32 16, %v8029_v35  ;;  %v469_v43 = vand.u32 15, %v8029_v35  ;;  %vm8108_vm14 = vmor %vm2356_vm9, %vm2357_vm11  ;;  %v7665_v49 = vld [vmem:[%s10790_s1 + $0x38] sm:$0xff]   ;;  %s10545_s7 = sshll.u32 %s6387_s18, 5 }
  0x33   : > { %s6397_s11 = sshll.u32 %s11600_s6, 2  ;;  %v8069_v54 = vrot.slane %v1054_v51, 5  ;;  %v1060_v59 = vrot.slane %v1058_v52, 4  ;;  %v2362_v63 = vrot.slane %v1058_v52, 7  ;;  %p386_p9 = scmp.lt.s32.totalorder %s10545_s7, 63 }
  0x34   : > { %7182 = vmatpush3.bf16.msra.mxu0 %v7654_v34  ;;  %7620 = vmatpush3.bf16.msra.mxu1 %v7654_v34  ;;  %s8038_s14 = scalar_lea.vmem %s10789_s0, %s6397_s11  ;;  %v476_v44 = vand.u32 15, %v434_v37  ;;  %v483_v45 = vand.u32 15, %v435_v38  ;;  %vm849_vm2 = vcmp.eq.s32.totalorder %v469_v43, 0 }
  0x35   : > { %7183 = vmatprep.subr.bf16.mxu0 %v7655_v36  ;;  %7613 = vmatprep.subr.bf16.mxu1 %v7655_v36  ;;  %v8045_v40 = vld [vmem:[%s8038_s14 + $0x8] sm:$0xf]  ;;  %v8048_v41 = vld [vmem:[%s8038_s14 + $0xc] sm:$0xf]  ;;  %vm977_vm5 = vmpackc.low %vm849_vm2, %vm849_vm2  ;;  %v1061_v2 = vor.u32 %v1060_v59, %v8069_v54  ;;  %v8083_v7 = vor.u32 %v2362_v63, %v1054_v51  ;;  %v8104_v17 = vrot.slane %v2362_v63, 4  ;;  %s11602_s7 = smov (!%p386_p9, %s10545_s7), 63 }
  0x36   : > { %v6416_v42 = vcombine.low %v8045_v40, %v8048_v41  ;;  %vm8057_vm3 = vcmp.eq.s32.totalorder %v483_v45, 0  ;;  %vm8061_vm4 = vcmp.eq.s32.totalorder %v476_v44, 15  ;;  %v1009_v53 = vsel %vm977_vm5, 65537, %v10801_v46  ;;  %v394_v4 = vld [vmem:[%s8038_s14 + $0x4] sm:$0xf]  ;;  %s6399_s17 = sshll.u32 %s11602_s7, 2 }
  0x37   : > { %vm979_vm7 = vmpackc.low %vm8057_vm3, %vm8057_vm3  ;;  %v1045_v57 = vshll.u32 %v1009_v53, 16  ;;  %v1048_v58 = vshrl.u32 %v1009_v53, 16  ;;  %v8086_v8 = vld [vmem:[%s8038_s14 + $0x10] sm:$0xf]  ;;  %v8088_v10 = vrot.slane %v1061_v2, 4  ;;  %vm2646_vm15 = vcmp.ne.s16.totalorder %v8083_v7, 0  ;;  %s10606_s9 = scalar_lea.vmem %s10793_s4, %s6399_s17 }
  0x38   : > { %7184 = vmatpush3.bf16.msra.mxu0 %v7655_v36  ;;  %7621 = vmatpush3.bf16.msra.mxu1 %v7655_v36  ;;  %v1011_v56 = vsel %vm979_vm7, 65537, %v10801_v46  ;;  %vm2293_vm10 = vmpackc.low %vm8061_vm4, %vm8061_vm4  ;;  %v411_v12 = vld [vmem:[%s8038_s14 + $0x48] sm:$0xf]  ;;  %v412_v13 = vld [vmem:[%s8038_s14 + $0x4c] sm:$0xf]  ;;  %v4008_v24 = vsel %vm2646_vm15, 0, %v8086_v8 }
  0x39   : > { %7185 = vmatprep.subr.bf16.mxu0 %v7656_v39  ;;  %7614 = vmatprep.subr.bf16.mxu1 %v7656_v39  ;;  %v1064_v60 = vshll.u32 %v1011_v56, 16  ;;  %v1068_v61 = vshrl.u32 %v1011_v56, 16  ;;  %v2325_v62 = vsel %vm2293_vm10, 65537, %v10801_v46  ;;  %v1047_v0 = vrot.slane %v1045_v57, 5  ;;  %11026 = vst [vmem:[#allocation3_spill] sm:$0xff] %v8088_v10 }
  0x3a   : > { %7195 = vmatprep.mubr.bf16.mxu0 %v6416_v42  ;;  %v1050_v1 = vrot.slane %v1048_v58, 4  ;;  %v2368_v3 = vshrl.u32 %v2325_v62, 16  ;;  %v2371_v18 = vshll.u32 %v2325_v62, 16  ;;  %v8131_v29 = vld [vmem:[%s8038_s14 + $0x14] sm:$0xf]  ;;  %v2679_v32 = vsel %vm2646_vm15, 0, %v8045_v40 }
  0x3b   : > { %v8081_v5 = vrot.slane %v1064_v60, 5  ;;  %v1070_v6 = vrot.slane %v1068_v61, 4  ;;  %vm1363_vm13 = vcmp.ne.s16.totalorder %v1047_v0, 0  ;;  %v8143_v33 = vcombine.low %v411_v12, %v412_v13  ;;  %v8146_v34 = vld [vmem:[%s8038_s14 + $0x18] sm:$0xf]  ;;  %v7668_v12 = vld [vmem:[%s10790_s1 + $0xb0] sm:$0xff]  }
  0x3c   : > { %7186 = vmatpush3.bf16.msra.mxu0 %v7656_v39  ;;  %7622 = vmatpush3.bf16.msra.mxu1 %v7656_v39  ;;  %v1051_v9 = vor.u32 %v1050_v1, %v1047_v0  ;;  %v8090_v11 = vrot.slane %v2368_v3, 7  ;;  %v3202_v21 = vsel %vm1363_vm13, 0, %v8048_v41  ;;  %v1396_v27 = vsel %vm1363_vm13, 0, %v394_v4  ;;  %v8161_v42 = vld [vmem:[%s8038_s14 + $0x1c] sm:$0xf] }
  0x3d   : > { %7187 = vmatprep.subr.bf16.mxu0 %v7657_v48  ;;  %7615 = vmatprep.subr.bf16.mxu1 %v7657_v48  ;;  %v1071_v16 = vor.u32 %v1070_v6, %v8081_v5  ;;  %v1067_v26 = vsel %vm8099_vm12, %v8088_v10, %v8081_v5  ;;  %11033 = vst [vmem:[#allocation4_spill] sm:$0xff] %v8143_v33  ;;  %v4530_v39 = vsel %vm1363_vm13, 0, %v8131_v29  ;;  %v413_v47 = vld [vmem:[%s8038_s14 + $0x50] sm:$0xf]  ;;  %v5336_v53 = vsel %vm2646_vm15, 0, %v8146_v34 }
  0x3e   : > { %v1052_v19 = vrot.slane %v1051_v9, 4  ;;  %v2373_v23 = vor.u32 %v2371_v18, %v8090_v11  ;;  %7211 = vmatprep.mubr.bf16.mxu1 %v8143_v33  ;;  %v8197_v58 = vcombine.low %v8086_v8, %v8131_v29  ;;  %v415_v59 = vld [vmem:[%s8038_s14 + $0x58] sm:$0xf]  ;;  %v416_v60 = vld [vmem:[%s8038_s14 + $0x5c] sm:$0xf]  ;;  %vm8201_vm2 = vcmp.ne.s16.totalorder %v1067_v26, 0 }
  0x3f   : > { %v1072_v22 = vrot.slane %v1071_v16, 4  ;;  %v1398_v5 = vsel %vm8201_vm2, 0, %v8048_v41  ;;  %v7667_v9 = vld [vmem:[%s10790_s1 + $0x30] sm:$0xff]   ;;  %v8231_v13 = vcombine.low %v8146_v34, %v8161_v42  ;;  %v8239_v16 = vld [vmem:[%s8038_s14 + $0x24] sm:$0xf]  ;;  %v7674_v26 = vld [vmem:[%s10790_s1 + $0xa8] sm:$0xff]  }
  0x40   : > { %7188 = vmatpush3.bf16.msra.mxu0 %v7657_v48  ;;  %7623 = vmatpush3.bf16.msra.mxu1 %v7657_v48  ;;  %v1057_v25 = vsel %vm8099_vm12, %v1052_v19, %v8069_v54  ;;  %v2374_v31 = vsel %vm8108_vm14, %v8104_v17, %v2373_v23  ;;  %v414_v48 = vld [vmem:[%s8038_s14 + $0x54] sm:$0xf]  ;;  %v417_v18 = vld [vmem:[%s8038_s14 + $0x60] sm:$0xf]  ;;  %v418_v19 = vld [vmem:[%s8038_s14 + $0x64] sm:$0xf] }
  0x41   : > { %7189 = vmatprep.subr.bf16.mxu0 %v7658_v55  ;;  %7616 = vmatprep.subr.bf16.mxu1 %v7658_v55  ;;  %vm8133_vm0 = vcmp.ne.s16.totalorder %v1057_v25, 0  ;;  %vm8151_vm1 = vcmp.ne.s16.totalorder %v2374_v31, 0  ;;  %v1077_v43 = vsel %vm8099_vm12, %v1072_v22, %v8069_v54  ;;  %v8215_v4 = vcombine.low %v413_v47, %v414_v48  ;;  %11044 = vst [vmem:[#allocation9_spill] sm:$0xff] %v8231_v13  ;;  %v7673_v25 = vld [vmem:[%s10790_s1 + $0x28] sm:$0xff]   ;;  %v7676_v47 = vld [vmem:[%s10790_s1 + $0xa0] sm:$0xff]  }
  0x42   : > { %v1397_v36 = vsel %vm8133_vm0, 0, %v8045_v40  ;;  %v3203_v38 = vsel %vm8133_vm0, 0, %v8086_v8  ;;  %v2680_v40 = vsel %vm8151_vm1, 0, %v8048_v41  ;;  %v4009_v51 = vsel %vm8151_vm1, 0, %v8131_v29  ;;  %v8236_v41 = vld [vmem:[%s8038_s14 + $0x20] sm:$0xf] }
  0x43   : > { %v6440_v44 = vcombine.low %v1396_v27, %v1397_v36  ;;  %v8169_v45 = vcombine.low %v3202_v21, %v3203_v38  ;;  %v8177_v50 = vcombine.low %v2679_v32, %v2680_v40  ;;  %v4531_v52 = vsel %vm8133_vm0, 0, %v8146_v34  ;;  %11043 = vst [vmem:[#allocation8_spill] sm:$0xff] %v8215_v4  ;;  %v8262_v30 = vld [vmem:[%s8038_s14 + $0x2c] sm:$0xf]  ;;  %v7675_v36 = vld [vmem:[%s10790_s1 + $0x20] sm:$0xff]  }
  0x44   : > { %7190 = vmatpush3.bf16.msra.mxu0 %v7658_v55  ;;  %7624 = vmatpush3.bf16.msra.mxu1 %v7658_v55  ;;  %v7666_v55 = vld [vmem:[%s10790_s1 + $0xb8] sm:$0xff]   ;;  %v8191_v56 = vcombine.low %v4008_v24, %v4009_v51  ;;  %v8193_v57 = vcombine.low %v4530_v39, %v4531_v52  ;;  %vm8205_vm3 = vcmp.ne.s16.totalorder %v1077_v43, 0  ;;  %v5337_v0 = vsel %vm8151_vm1, 0, %v8161_v42  ;;  %v419_v37 = vld [vmem:[%s8038_s14 + $0x68] sm:$0xf] }
  0x45   : > { %7191 = vmatprep.subr.bf16.mxu0 %v7659_v14  ;;  %7617 = vmatprep.subr.bf16.mxu1 %v7659_v14  ;;  %v1852_v63 = vshrl.u32 %v6440_v44, 16  ;;  %v1855_v1 = vshll.u32 %v6440_v44, 16  ;;  %v2816_v2 = vshll.u32 %v8177_v50, 16  ;;  %v8213_v3 = vcombine.low %v5336_v53, %v5337_v0  ;;  %v420_v38 = vld [vmem:[%s8038_s14 + $0x6c] sm:$0xf]  ;;  %v7681_v0 = vld [vmem:[%s10790_s1 + $0x18] sm:$0xff]  }
  0x46   : > { %11036 = vst [vmem:[#allocation5_spill] sm:$0xff] %v8191_v56  ;;  %11037 = vst [vmem:[#allocation6_spill] sm:$0xff] %v8193_v57  ;;  %v1399_v6 = vsel %vm8205_vm3, 0, %v8086_v8  ;;  %v2814_v23 = vshrl.u32 %v8177_v50, 16  ;;  %v8266_v31 = vcombine.low %v8236_v41, %v8239_v16  ;;  %v8268_v32 = vcombine.low %v417_v18, %v418_v19  ;;  %v8276_v39 = vld [vmem:[%s8038_s14 + $0x30] sm:$0xf] }
  0x47   : > { %11042 = vst [vmem:[#allocation7_spill] sm:$0xff] %v8213_v3  ;;  %v8243_v21 = vrot.slane %v1852_v63, 3  ;;  %v8245_v22 = vrot.slane %v1855_v1, 4  ;;  %v2818_v24 = vrot.slane %v2816_v2, 1  ;;  %v6441_v27 = vcombine.low %v1398_v5, %v1399_v6  ;;  %v8279_v43 = vld [vmem:[%s8038_s14 + $0x34] sm:$0xf] }
  0x48   : > { %7192 = vmatpush3.bf16.msra.mxu0 %v7659_v14  ;;  %7625 = vmatpush3.bf16.msra.mxu1 %v7659_v14  ;;  %v8233_v14 = vcombine.low %v415_v59, %v416_v60  ;;  %11046 = vst [vmem:[#allocation11_spill] sm:$0xff] %v8266_v31  ;;  %11047 = vst [vmem:[#allocation12_spill] sm:$0xff] %v8268_v32  ;;  %v421_v44 = vld [vmem:[%s8038_s14 + $0x70] sm:$0xf]  ;;  %v422_v40 = vld [vmem:[%s8038_s14 + $0x74] sm:$0xf]  ;;  %v8296_v52 = vcombine.low %v419_v37, %v420_v38 }
  0x49   : > { %7193 = vmatprep.subr.bf16.mxu0 %v7660_v28  ;;  %7618 = vmatprep.subr.bf16.mxu1 %v7660_v28  ;;  %v8287_v48 = vld [vmem:[%s8038_s14 + $0x38] sm:$0xf]  ;;  %v1860_v50 = vshrl.u32 %v6441_v27, 16  ;;  %v8301_v59 = vld [vmem:[%s8038_s14 + $0x40] sm:$0xf]  ;;  %v1863_v63 = vshll.u32 %v6441_v27, 16  ;;  %v8314_v5 = vcombine.low %v8276_v39, %v8279_v43  ;;  %v8321_v18 = vor.u32 %v2818_v24, %v2814_v23 }
  0x4a   : > { %11045 = vst [vmem:[#allocation10_spill] sm:$0xff] %v8233_v14  ;;  %11049 = vst [vmem:[#allocation14_spill] sm:$0xff] %v8296_v52  ;;  %v423_v53 = vld [vmem:[%s8038_s14 + $0x78] sm:$0xf]  ;;  %v8304_v60 = vld [vmem:[%s8038_s14 + $0x44] sm:$0xf]  ;;  %v8323_v19 = vcombine.low %v421_v44, %v422_v40 }
  0x4b   : > { %v425_v1 = vld [vmem:[%s8038_s14 + $0x80] sm:$0xf]  ;;  %v1862_v2 = vrot.slane %v1860_v50, 3  ;;  %11050 = vst [vmem:[#allocation15_spill] sm:$0xff] %v8314_v5  ;;  %v7682_v6 = vld [vmem:[%s10790_s1 + $0x98] sm:$0xff]   ;;  %v2375_v27 = vrot.slane %v8090_v11, 4  ;;  %v8342_v38 = vcombine.low %v8301_v59, %v8304_v60 }
  0x4c   : > { %7194 = vmatpush3.bf16.msra.mxu0 %v7660_v28  ;;  %7626 = vmatpush3.bf16.msra.mxu1 %v7660_v28  ;;  %v8259_v28 = vld [vmem:[%s8038_s14 + $0x28] sm:$0xf]  ;;  %11051 = vst [vmem:[#allocation16_spill] sm:$0xff] %v8323_v19  ;;  %vm10819_vm4 = vsmask.f32 4352  ;;  %v437_v23 = vadd.s32 32, %v8029_v35 }
  0x4d   : > { %7227 = vmatprep.subr.bf16.mxu1 %v7665_v49  ;;  %7275 = vmatprep.subr.bf16.mxu0 %v7666_v55  ;;  %v8294_v51 = vcombine.low %v8259_v28, %v8262_v30  ;;  %v438_v24 = vadd.s32 40, %v8029_v35  ;;  %11054 = vst [vmem:[#allocation19_spill] sm:$0xff] %v8342_v38  ;;  %v8347_v44 = vsel %vm8108_vm14, %v2375_v27, %v8083_v7  ;;  %v7683_v40 = vld [vmem:[%s10790_s1 + $0x10] sm:$0xff]   ;;  %v456_v33 = vadd.s32 184, %v8029_v35 }
  0x4e   : > { %11055 = vst [vmem:[#allocation20_spill] sm:$0xff] %v8347_v44  ;;  %vm10816_vm5 = vcmp.ne.s16.totalorder %v8347_v44, 0 }
  0x4f   : > { %7196 = vmatmul.mubr.bf16.vlgmr.msra.gmra.mxu0 %v8197_v58  ;;  %7212 = vmatmul.mubr.bf16.vlgmr.msra.gmra.mxu1 %v8215_v4  ;;  %11048 = vst [vmem:[#allocation13_spill] sm:$0xff] %v8294_v51 }
  0x50   : > { %7228 = vmatpush3.bf16.msra.mxu1 %v7665_v49  ;;  %7276 = vmatpush3.bf16.msra.mxu0 %v7666_v55  ;;  %v8290_v49 = vld [vmem:[%s8038_s14 + $0x3c] sm:$0xf] }
  0x51   : > { %7229 = vmatprep.subr.bf16.mxu1 %v7667_v9  ;;  %7277 = vmatprep.subr.bf16.mxu0 %v7668_v12  ;;  %v424_v55 = vld [vmem:[%s8038_s14 + $0x7c] sm:$0xf] }
  0x52   : > { %7199 = vmatprep.mubr.bf16.mxu0 %v8231_v13  ;;  %7215 = vmatprep.mubr.bf16.mxu1 %v8233_v14  ;;  %v8338_v37 = vcombine.low %v423_v53, %v424_v55  ;;  %v497_v53 = vand.u32 15, %v437_v23  ;;  %v504_v55 = vand.u32 15, %v438_v24 }
  0x54   : > { %7230 = vmatpush3.bf16.msra.mxu1 %v7667_v9  ;;  %7278 = vmatpush3.bf16.msra.mxu0 %v7668_v12  ;;  %v1858_v9 = vor.u32 %v8245_v22, %v8243_v21  ;;  %v1865_v12 = vrot.slane %v1863_v63, 4  ;;  %v8332_v21 = vcombine.low %v8287_v48, %v8290_v49  ;;  %11053 = vst [vmem:[#allocation18_spill] sm:$0xff] %v8338_v37  ;;  %v7684_v63 = vld [vmem:[%s10790_s1 + $0x90] sm:$0xff]   ;;  %vm8369_vm8 = vcmp.eq.s32.totalorder %v497_v53, 0 }
  0x55   : > { %7231 = vmatprep.subr.bf16.mxu1 %v7673_v25  ;;  %7279 = vmatprep.subr.bf16.mxu0 %v7674_v26  ;;  %vm8373_vm9 = vcmp.eq.s32.totalorder %v504_v55, 15  ;;  %vm981_vm10 = vmpackc.low %vm8369_vm8, %vm8369_vm8 }
  0x56   : > { %11052 = vst [vmem:[#allocation17_spill] sm:$0xff] %v8332_v21  ;;  %v8334_v22 = vor.u32 %v1865_v12, %v1862_v2  ;;  %v8367_v2 = vsel %vm10816_vm5, 0, %v8086_v8  ;;  %v7690_v8 = vld [vmem:[%s10790_s1 + $0x88] sm:$0xff]   ;;  %v1013_v3 = vsel %vm981_vm10, 65537, %v10801_v46  ;;  %vm2297_vm11 = vmpackc.low %vm8373_vm9, %vm8373_vm9 }
  0x57   : > { %7200 = vmatmul.mubr.bf16.gmra.mxu0 %v8266_v31  ;;  %7216 = vmatmul.mubr.bf16.gmra.mxu1 %v8268_v32  ;;  %v1084_v12 = vshll.u32 %v1013_v3, 16  ;;  %v11065_v32 = vmov 0  }
  0x58   : > { %7232 = vmatpush3.bf16.msra.mxu1 %v7673_v25  ;;  %7280 = vmatpush3.bf16.msra.mxu0 %v7674_v26  ;;  %v426_v25 = vld [vmem:[%s8038_s14 + $0x84] sm:$0xf]  ;;  %v436_v26 = vadd.s32 24, %v8029_v35 }
  0x59   : > { %7233 = vmatprep.subr.bf16.mxu1 %v7675_v36  ;;  %7281 = vmatprep.subr.bf16.mxu0 %v7676_v47  ;;  %v8352_v50 = vcombine.low %v425_v1, %v426_v25  ;;  %v440_v1 = vadd.s32 56, %v8029_v35  ;;  %v11069_v25 = vmov 0 }
  0x5a   : > { %7203 = vmatprep.mubr.bf16.mxu0 %v8294_v51  ;;  %7219 = vmatprep.mubr.bf16.mxu1 %v8296_v52  ;;  %v490_v11 = vand.u32 15, %v436_v26  ;;  %v7689_v26 = vld [vmem:[%s10790_s1 + $0x8] sm:$0xff]   ;;  %v1088_v52 = vshrl.u32 %v1013_v3, 16  ;;  %v1086_v3 = vrot.slane %v1084_v12, 5 }
  0x5b   : > { %11056 = vst [vmem:[#allocation21_spill] sm:$0xff] %v8352_v50  ;;  %v518_v24 = vand.u32 15, %v440_v1 }
  0x5c   : > { %7234 = vmatpush3.bf16.msra.mxu1 %v7675_v36  ;;  %7282 = vmatpush3.bf16.msra.mxu0 %v7676_v47  ;;  %v8360_v36 = vsel %vm10819_vm4, %v1858_v9, %v8334_v22  ;;  %vm884_vm6 = vcmp.eq.s32.totalorder %v490_v11, 15  ;;  %v439_v47 = vadd.s32 48, %v8029_v35  ;;  %v441_v9 = vadd.s32 64, %v8029_v35 }
  0x5d   : > { %7235 = vmatprep.subr.bf16.mxu1 %v7681_v0  ;;  %7283 = vmatprep.subr.bf16.mxu0 %v7682_v6  ;;  %vm2295_vm7 = vmpackc.low %vm884_vm6, %vm884_vm6  ;;  %v8391_v11 = vadd.s32 72, %v8029_v35  ;;  %vm8400_vm0 = vcmp.eq.s32.totalorder %v518_v24, 15  ;;  %v7692_v24 = vld [vmem:[%s10790_s1 + $0x80] sm:$0xff]   ;;  %vm10818_vm6 = vsmask.f32 7424 }
  0x5e   : > { %v2327_v27 = vsel %vm2295_vm7, 65537, %v10801_v46  ;;  %v511_v23 = vand.u32 15, %v439_v47  ;;  %v2329_v47 = vsel %vm2297_vm11, 65537, %v10801_v46  ;;  %vm2299_vm1 = vmpackc.low %vm8400_vm0, %vm8400_vm0 }
  0x5f   : > { %7204 = vmatmul.mubr.bf16.gmra.mxu0 %v8314_v5  ;;  %7220 = vmatmul.mubr.bf16.gmra.mxu1 %v8323_v19  ;;  %v2386_v53 = vshrl.u32 %v2327_v27, 16  ;;  %v2389_v55 = vshll.u32 %v2327_v27, 16  ;;  %v525_v19 = vand.u32 15, %v441_v9  ;;  %v2407_v1 = vshll.u32 %v2329_v47, 16  ;;  %v7691_v9 = vld [vmem:[%s10790_s1] sm:$0xff]  }
  0x60   : > { %7236 = vmatpush3.bf16.msra.mxu1 %v7681_v0  ;;  %7284 = vmatpush3.bf16.msra.mxu0 %v7682_v6  ;;  %vm855_vm13 = vcmp.eq.s32.totalorder %v511_v23, 0  ;;  %v2404_v6 = vshrl.u32 %v2329_v47, 16  ;;  %v1090_v27 = vrot.slane %v1088_v52, 4 }
  0x61   : > { %7237 = vmatprep.subr.bf16.mxu1 %v7683_v40  ;;  %7285 = vmatprep.subr.bf16.mxu0 %v7684_v63  ;;  %v2388_v0 = vrot.slane %v2386_v53, 7  ;;  %vm983_vm15 = vmpackc.low %vm855_vm13, %vm855_vm13  ;;  %v8412_v53 = vadd.s32 80, %v8029_v35  ;;  %vm8417_vm7 = vcmp.eq.s32.totalorder %v525_v19, 0 }
  0x62   : > { %7207 = vmatprep.mubr.bf16.mxu0 %v8332_v21  ;;  %7223 = vmatprep.mubr.bf16.mxu1 %v8338_v37  ;;  %v1015_v23 = vsel %vm983_vm15, 65537, %v10801_v46  ;;  %v2406_v12 = vrot.slane %v2404_v6, 7  ;;  %vm985_vm0 = vmpackc.low %vm8417_vm7, %vm8417_vm7 }
  0x63   : > { %v2391_v47 = vor.u32 %v2389_v55, %v2388_v0  ;;  %v2393_v37 = vrot.slane %v2388_v0, 4  ;;  %v1104_v52 = vshll.u32 %v1015_v23, 16  ;;  %v1108_v57 = vshrl.u32 %v1015_v23, 16  ;;  %v11326_v0 = vld [vmem:[#allocation14_spill] sm:$0xff] }
  0x64   : > { %7238 = vmatpush3.bf16.msra.mxu1 %v7683_v40  ;;  %7286 = vmatpush3.bf16.msra.mxu0 %v7684_v63  ;;  %v1087_v40 = vsel %vm8099_vm12, %v8088_v10, %v1086_v3  ;;  %v1091_v63 = vor.u32 %v1090_v27, %v1086_v3  ;;  %v8430_v55 = vsel %vm2299_vm1, 65537, %v11065_v32  ;;  %v2409_v3 = vor.u32 %v2407_v1, %v2406_v12 }
  0x65   : > { %7239 = vmatprep.subr.bf16.mxu1 %v7689_v26  ;;  %7287 = vmatprep.subr.bf16.mxu0 %v7690_v8  ;;  %v2392_v19 = vsel %vm8108_vm14, %v8104_v17, %v2391_v47  ;;  %vm8435_vm8 = vcmp.ne.s16.totalorder %v1087_v40, 0  ;;  %v8442_v6 = vsel %vm8108_vm14, %v2393_v37, %v8083_v7  ;;  %v8457_v37 = vld [vmem:[%s10790_s1 + $0xf8] sm:$0xff]  }
  0x66   : > { %11068 = vst [vmem:[#allocation22_spill] sm:$0xff] %v8442_v6  ;;  %vm8446_vm9 = vcmp.ne.s16.totalorder %v2392_v19, 0  ;;  %v1092_v27 = vrot.slane %v1091_v63, 4  ;;  %v1400_v23 = vsel %vm8435_vm8, 0, %v8131_v29  ;;  %vm10814_vm10 = vcmp.ne.s16.totalorder %v8442_v6, 0  ;;  %v7694_v63 = vld [vmem:[%s10790_s1 + $0x138] sm:$0xff]  }
  0x67   : > { %7208 = vmatmul.mubr.bf16.gmra.mxu0 %v8342_v38  ;;  %7224 = vmatmul.mubr.bf16.gmra.mxu1 %v8352_v50  ;;  %v11070_v25 = vsel %vm8446_vm9, 4294967295, %v11069_v25  ;;  %v2682_v1 = vsel %vm8446_vm9, 0, %v8131_v29  ;;  %v2410_v47 = vsel %vm8108_vm14, %v8104_v17, %v2409_v3  ;;  %v2683_v40 = vsel %vm10814_vm10, 0, %v8146_v34 }
  0x68   : > { %11071 = vst [vmem:[#allocation23_spill] sm:$0xff] %v11070_v25  ;;  %7240 = vmatpush3.bf16.msra.mxu1 %v7689_v26  ;;  %7288 = vmatpush3.bf16.msra.mxu0 %v7690_v8  ;;  %v1106_v19 = vrot.slane %v1104_v52, 5  ;;  %v6482_v26 = vcombine.low %v8367_v2, %v2682_v1  ;;  %v1097_v29 = vsel %vm8099_vm12, %v1092_v27, %v8069_v54  ;;  %vm8475_vm11 = vcmp.ne.s16.totalorder %v2410_v47, 0 }
  0x69   : > { %7241 = vmatprep.subr.bf16.mxu1 %v7691_v9  ;;  %7289 = vmatprep.subr.bf16.mxu0 %v7692_v24  ;;  %v11072_v8 = vmov 0  ;;  %v1110_v3 = vrot.slane %v1108_v57, 4  ;;  %vm8480_vm13 = vcmp.ne.s16.totalorder %v1097_v29, 0  ;;  %v2684_v52 = vsel %vm8475_vm11, 0, %v8161_v42 }
  0x6a   : > { %v11073_v8 = vsel %vm8475_vm11, 4294967295, %v11072_v8  ;;  %7243 = vmatprep.mubr.bf16.mxu1 %v8360_v36  ;;  %v1107_v2 = vsel %vm8099_vm12, %v8088_v10, %v1106_v19  ;;  %v2411_v27 = vrot.slane %v2406_v12, 4  ;;  %v2821_v1 = vshll.u32 %v6482_v26, 16 }
  0x6b   : > { %11074 = vst [vmem:[#allocation24_spill] sm:$0xff] %v11073_v8  ;;  %v2825_v47 = vshrl.u32 %v6482_v26, 16  ;;  %v1401_v57 = vsel %vm8480_vm13, 0, %v8146_v34  ;;  %v6483_v36 = vcombine.low %v2683_v40, %v2684_v52  ;;  %v1111_v6 = vor.u32 %v1110_v3, %v1106_v19 }
  0x6c   : > { %7242 = vmatpush3.bf16.msra.mxu1 %v7691_v9  ;;  %7290 = vmatpush3.bf16.msra.mxu0 %v7692_v24  ;;  %v6442_v29 = vcombine.low %v1400_v23, %v1401_v57  ;;  %vm8493_vm15 = vcmp.ne.s16.totalorder %v1107_v2, 0  ;;  %v8500_v8 = vsel %vm8108_vm14, %v2411_v27, %v8083_v7  ;;  %v2823_v12 = vrot.slane %v2821_v1, 1 }
  0x6d   : > { %11079 = vst [vmem:[#allocation25_spill] sm:$0xff] %v8500_v8  ;;  %v2829_v26 = vshll.u32 %v6483_v36, 16  ;;  %7323 = vmatprep.subr.bf16.mxu1 %v8457_v37  ;;  %7371 = vmatprep.subr.bf16.mxu0 %v7694_v63  ;;  %v1402_v34 = vsel %vm8493_vm15, 0, %v8161_v42  ;;  %v2422_v9 = vshrl.u32 %v8430_v55, 16  ;;  %v1112_v40 = vrot.slane %v1111_v6, 4 }
  0x6e   : > { %v1869_v24 = vshrl.u32 %v6442_v29, 16  ;;  %v1872_v23 = vshll.u32 %v6442_v29, 16  ;;  %v2425_v19 = vshll.u32 %v8430_v55, 16  ;;  %v2824_v3 = vsel %vm10818_vm6, %v8321_v18, %v2823_v12  ;;  %v7696_v18 = vld [vmem:[%s10790_s1 + $0x130] sm:$0xff]  }
  0x6f   : > { %v2827_v52 = vor.u32 %v2825_v47, %v2823_v12  ;;  %v2831_v2 = vrot.slane %v2829_v26, 1  ;;  %v2424_v27 = vrot.slane %v2422_v9, 7  ;;  %7291 = vmatprep.mubr.bf16.mxu0 %v2824_v3  ;;  %v1117_v57 = vsel %vm8099_vm12, %v1112_v40, %v8069_v54 }
  0x70   : > { %v1871_v1 = vrot.slane %v1869_v24, 3  ;;  %v1874_v42 = vrot.slane %v1872_v23, 4  ;;  %vm10815_vm1 = vcmp.ne.s16.totalorder %v8500_v8, 0  ;;  %vm8521_vm10 = vcmp.ne.s16.totalorder %v1117_v57, 0  ;;  %v7695_v24 = vld [vmem:[%s10790_s1 + $0xf0] sm:$0xff]  }
  0x71   : > { %v2832_v55 = vsel %vm10818_vm6, %v2827_v52, %v2831_v2  ;;  %v2427_v46 = vor.u32 %v2425_v19, %v2424_v27  ;;  %v2685_v47 = vsel %vm10815_vm1, 0, %v8236_v41  ;;  %v1403_v12 = vsel %vm8521_vm10, 0, %v8236_v41 }
  0x72   : > { %v1875_v29 = vor.u32 %v1874_v42, %v1871_v1  ;;  %7292 = vmatmul.mubr.bf16.vlgmr.msra.gmra.mxu0 %v2832_v55  ;;  %v2833_v26 = vshrl.u32 %v6483_v36, 16  ;;  %v1017_v9 = vsel %vm985_vm0, 65537, %v11065_v32  ;;  %v6443_v23 = vcombine.low %v1402_v34, %v1403_v12 }
  0x73   : > { %7372 = vmatpush3.bf16.msra.mxu0 %v7694_v63  ;;  %v2428_v40 = vsel %vm8108_vm14, %v8104_v17, %v2427_v46  ;;  %v1124_v19 = vshll.u32 %v1017_v9, 16  ;;  %v1128_v3 = vshrl.u32 %v1017_v9, 16  ;;  %v11082_v41 = vmov 0  ;;  %v7698_v63 = vld [vmem:[%s10790_s1 + $0x128] sm:$0xff]  }
  0x74   : > { %v1876_v52 = vsel %vm10819_vm4, %v8334_v22, %v1875_v29  ;;  %vm8540_vm7 = vcmp.ne.s16.totalorder %v2428_v40, 0  ;;  %v2835_v36 = vor.u32 %v2833_v26, %v2831_v2  ;;  %v532_v1 = vand.u32 15, %v8391_v11  ;;  %7373 = vmatprep.subr.bf16.mxu0 %v7696_v18 }
  0x75   : > { %v11083_v41 = vsel %vm8540_vm7, 4294967295, %v11082_v41  ;;  %7244 = vmatmul.mubr.bf16.vlgmr.msra.gmra.mxu1 %v1876_v52  ;;  %v1878_v34 = vshrl.u32 %v6443_v23, 16  ;;  %v1881_v42 = vshll.u32 %v6443_v23, 16  ;;  %v2686_v57 = vsel %vm8540_vm7, 0, %v8239_v16  ;;  %v7697_v23 = vld [vmem:[%s10790_s1 + $0xe8] sm:$0xff]  }
  0x76   : > { %11084 = vst [vmem:[#allocation26_spill] sm:$0xff] %v11083_v41  ;;  %v1126_v22 = vrot.slane %v1124_v19, 5  ;;  %7324 = vmatpush3.bf16.msra.mxu1 %v8457_v37  ;;  %v6484_v55 = vcombine.low %v2685_v47, %v2686_v57  ;;  %v1130_v46 = vrot.slane %v1128_v3, 4  ;;  %vm890_vm0 = vcmp.eq.s32.totalorder %v532_v1, 15  ;;  %v7700_v19 = vld [vmem:[%s10790_s1 + $0x120] sm:$0xff]  }
  0x77   : > { %v2429_v2 = vrot.slane %v2424_v27, 4  ;;  %v1880_v11 = vrot.slane %v1878_v34, 3  ;;  %v1883_v12 = vrot.slane %v1881_v42, 4  ;;  %vm2301_vm1 = vmpackc.low %vm890_vm0, %vm890_vm0  ;;  %7325 = vmatprep.subr.bf16.mxu1 %v7695_v24  ;;  %7374 = vmatpush3.bf16.msra.mxu0 %v7696_v18  ;;  %v539_v9 = vand.u32 15, %v8412_v53  ;;  %v8865_v41 = vld [vmem:[%s8038_s14 + $0x50] sm:$0xf] }
  0x78   : > { %v1127_v26 = vsel %vm8099_vm12, %v8088_v10, %v1126_v22  ;;  %v2837_v37 = vshll.u32 %v6484_v55, 16  ;;  %v1131_v47 = vor.u32 %v1130_v46, %v1126_v22  ;;  %v2333_v27 = vsel %vm2301_vm1, 65537, %v11065_v32  ;;  %7375 = vmatprep.subr.bf16.mxu0 %v7698_v63 }
  0x79   : > { %vm8559_vm5 = vcmp.ne.s16.totalorder %v1127_v26, 0  ;;  %v8567_v18 = vor.u32 %v1883_v12, %v1880_v11  ;;  %v8575_v3 = vsel %vm8108_vm14, %v2429_v2, %v8083_v7  ;;  %v2440_v52 = vshrl.u32 %v2333_v27, 16  ;;  %v7699_v2 = vld [vmem:[%s10790_s1 + $0xe0] sm:$0xff]  }
  0x7a   : > { %v1404_v53 = vsel %vm8559_vm5, 0, %v8239_v16  ;;  %11087 = vst [vmem:[#allocation27_spill] sm:$0xff] %v8575_v3  ;;  %v2839_v1 = vrot.slane %v2837_v37, 1  ;;  %v1132_v34 = vrot.slane %v1131_v47, 4  ;;  %v2443_v42 = vshll.u32 %v2333_v27, 16  ;;  %7326 = vmatpush3.bf16.msra.mxu1 %v7695_v24 }
  0x7b   : > { %vm10817_vm1 = vcmp.ne.s16.totalorder %v8575_v3, 0  ;;  %v1885_v57 = vsel %vm10819_vm4, %v1875_v29, %v8567_v18  ;;  %v2442_v22 = vrot.slane %v2440_v52, 7  ;;  %v2841_v46 = vshrl.u32 %v6484_v55, 16  ;;  %7327 = vmatprep.subr.bf16.mxu1 %v7697_v23  ;;  %7376 = vmatpush3.bf16.msra.mxu0 %v7698_v63  ;;  %v7702_v55 = vld [vmem:[%s10790_s1 + $0x118] sm:$0xff]  }
  0x7c   : > { %v2687_v16 = vsel %vm10817_vm1, 0, %v8259_v28  ;;  %7247 = vmatprep.mubr.bf16.mxu1 %v1885_v57  ;;  %v2840_v11 = vsel %vm10818_vm6, %v2835_v36, %v2839_v1  ;;  %v1137_v24 = vsel %vm8099_vm12, %v1132_v34, %v8069_v54  ;;  %vm859_vm0 = vcmp.eq.s32.totalorder %v539_v9, 0  ;;  %7377 = vmatprep.subr.bf16.mxu0 %v7700_v19  ;;  %v7701_v9 = vld [vmem:[%s10790_s1 + $0xd8] sm:$0xff]  }
  0x7d   : > { %v444_v29 = vadd.s32 88, %v8029_v35  ;;  %7295 = vmatprep.mubr.bf16.mxu0 %v2840_v11  ;;  %vm8594_vm1 = vcmp.ne.s16.totalorder %v1137_v24, 0  ;;  %v2445_v12 = vor.u32 %v2443_v42, %v2442_v22  ;;  %v8598_v26 = vor.u32 %v2841_v46, %v2839_v1  ;;  %vm987_vm6 = vmpackc.low %vm859_vm0, %vm859_vm0 }
  0x7e   : > { %v2447_v36 = vrot.slane %v2442_v22, 4  ;;  %v1405_v37 = vsel %vm8594_vm1, 0, %v8259_v28  ;;  %v1019_v47 = vsel %vm987_vm6, 65537, %v11065_v32  ;;  %v445_v52 = vadd.s32 96, %v8029_v35  ;;  %7328 = vmatpush3.bf16.msra.mxu1 %v7697_v23 }
  0x7f   : > { %v546_v27 = vand.u32 15, %v444_v29  ;;  %v6444_v34 = vcombine.low %v1404_v53, %v1405_v37  ;;  %v2446_v1 = vsel %vm8108_vm14, %v8104_v17, %v2445_v12  ;;  %v1144_v42 = vshll.u32 %v1019_v47, 16  ;;  %7329 = vmatprep.subr.bf16.mxu1 %v7699_v2  ;;  %7378 = vmatpush3.bf16.msra.mxu0 %v7700_v19  ;;  %v7704_v53 = vld [vmem:[%s10790_s1 + $0x110] sm:$0xff]  }
  0x80   : > { %v1148_v57 = vshrl.u32 %v1019_v47, 16  ;;  %vm8611_vm0 = vcmp.ne.s16.totalorder %v2446_v1, 0  ;;  %v11090_v22 = vmov 0  ;;  %v8618_v28 = vsel %vm8108_vm14, %v2447_v36, %v8083_v7  ;;  %7379 = vmatprep.subr.bf16.mxu0 %v7702_v55 }
  0x81   : > { %v11091_v22 = vsel %vm8611_vm0, 4294967295, %v11090_v22  ;;  %vm892_vm4 = vcmp.eq.s32.totalorder %v546_v27, 15  ;;  %11093 = vst [vmem:[#allocation29_spill] sm:$0xff] %v8618_v28  ;;  %v553_v23 = vand.u32 15, %v445_v52  ;;  %v1887_v46 = vshrl.u32 %v6444_v34, 16 }
  0x82   : > { %11092 = vst [vmem:[#allocation28_spill] sm:$0xff] %v11091_v22  ;;  %v1890_v11 = vshll.u32 %v6444_v34, 16  ;;  %v2688_v19 = vsel %vm8611_vm0, 0, %v8262_v30  ;;  %v1146_v24 = vrot.slane %v1144_v42, 5  ;;  %vm2303_vm6 = vmpackc.low %vm892_vm4, %vm892_vm4  ;;  %v1150_v12 = vrot.slane %v1148_v57, 4  ;;  %7330 = vmatpush3.bf16.msra.mxu1 %v7699_v2  ;;  %v7703_v34 = vld [vmem:[%s10790_s1 + $0xd0] sm:$0xff]  }
  0x83   : > { %v6485_v29 = vcombine.low %v2687_v16, %v2688_v19  ;;  %v2335_v37 = vsel %vm2303_vm6, 65537, %v11065_v32  ;;  %vm10826_vm7 = vcmp.ne.s16.totalorder %v8618_v28, 0  ;;  %v1889_v36 = vrot.slane %v1887_v46, 3  ;;  %7331 = vmatprep.subr.bf16.mxu1 %v7701_v9  ;;  %7380 = vmatpush3.bf16.msra.mxu0 %v7702_v55  ;;  %v7706_v57 = vld [vmem:[%s10790_s1 + $0x108] sm:$0xff]  }
  0x84   : > { %v1892_v47 = vrot.slane %v1890_v11, 4  ;;  %v1147_v27 = vsel %vm8099_vm12, %v8088_v10, %v1146_v24  ;;  %v2458_v52 = vshrl.u32 %v2335_v37, 16  ;;  %v1151_v1 = vor.u32 %v1150_v12, %v1146_v24  ;;  %7381 = vmatprep.subr.bf16.mxu0 %v7704_v53  ;;  %v7705_v24 = vld [vmem:[%s10790_s1 + $0xc8] sm:$0xff]  }
  0x85   : > { %v2845_v16 = vshll.u32 %v6485_v29, 16  ;;  %vm8634_vm4 = vcmp.ne.s16.totalorder %v1147_v27, 0  ;;  %v11094_v42 = vmov 0  ;;  %v2461_v2 = vshll.u32 %v2335_v37, 16 }
  0x86   : > { %v11095_v42 = vsel %vm8634_vm4, 4294967295, %v11094_v42  ;;  %v8641_v46 = vor.u32 %v1892_v47, %v1889_v36  ;;  %v1406_v55 = vsel %vm8634_vm4, 0, %v8262_v30  ;;  %v2460_v11 = vrot.slane %v2458_v52, 7  ;;  %7332 = vmatpush3.bf16.msra.mxu1 %v7701_v9 }
  0x87   : > { %v2689_v19 = vsel %vm10826_vm7, 0, %v8276_v39  ;;  %v2847_v12 = vrot.slane %v2845_v16, 1  ;;  %v1152_v37 = vrot.slane %v1151_v1, 4  ;;  %v2849_v27 = vshrl.u32 %v6485_v29, 16  ;;  %7333 = vmatprep.subr.bf16.mxu1 %v7703_v34  ;;  %7382 = vmatpush3.bf16.msra.mxu0 %v7704_v53 }
  0x88   : > { %vm861_vm6 = vcmp.eq.s32.totalorder %v553_v23, 0  ;;  %vm11096_vm0 = vsmask.f32 4352  ;;  %v2463_v47 = vor.u32 %v2461_v2, %v2460_v11  ;;  %v446_v30 = vadd.s32 104, %v8029_v35  ;;  %7383 = vmatprep.subr.bf16.mxu0 %v7706_v57 }
  0x89   : > { %v1894_v36 = vsel %vm11096_vm0, %v8567_v18, %v8641_v46  ;;  %vm989_vm11 = vmpackc.low %vm861_vm6, %vm861_vm6  ;;  %v2465_v52 = vrot.slane %v2460_v11, 4  ;;  %vm11097_vm7 = vsmask.f32 7424  ;;  %v1157_v23 = vsel %vm8099_vm12, %v1152_v37, %v8069_v54  ;;  %v7708_v18 = vld [vmem:[%s10790_s1 + $0x100] sm:$0xff]  }
  0x8a   : > { %7248 = vmatmul.mubr.bf16.gmra.mxu1 %v1894_v36  ;;  %v2848_v22 = vsel %vm11097_vm7, %v8598_v26, %v2847_v12  ;;  %v2851_v9 = vor.u32 %v2849_v27, %v2847_v12  ;;  %v1021_v29 = vsel %vm989_vm11, 65537, %v11065_v32  ;;  %vm8665_vm0 = vcmp.ne.s16.totalorder %v1157_v23, 0 }
  0x8b   : > { %7296 = vmatmul.mubr.bf16.gmra.mxu0 %v2848_v22  ;;  %v11098_v16 = vmov 0  ;;  %v2464_v26 = vsel %vm8108_vm14, %v8104_v17, %v2463_v47  ;;  %v1164_v53 = vshll.u32 %v1021_v29, 16  ;;  %v1168_v1 = vshrl.u32 %v1021_v29, 16  ;;  %7334 = vmatpush3.bf16.msra.mxu1 %v7703_v34 }
  0x8c   : > { %v11099_v16 = vsel %vm8665_vm0, 4294967295, %v11098_v16  ;;  %v1407_v2 = vsel %vm8665_vm0, 0, %v8276_v39  ;;  %vm8675_vm11 = vcmp.ne.s16.totalorder %v2464_v26, 0  ;;  %v11100_v11 = vmov 0  ;;  %7335 = vmatprep.subr.bf16.mxu1 %v7705_v24  ;;  %7384 = vmatpush3.bf16.msra.mxu0 %v7706_v57  ;;  %v7707_v39 = vld [vmem:[%s10790_s1 + $0xc0] sm:$0xff]   ;;  %v7709_v57 = vld [vmem:[%s10790_s1 + $0x178] sm:$0xff]  }
  0x8d   : > { %v11101_v11 = vsel %vm8675_vm11, 4294967295, %v11100_v11  ;;  %v560_v12 = vand.u32 15, %v446_v30  ;;  %v8682_v22 = vsel %vm8108_vm14, %v2465_v52, %v8083_v7  ;;  %v6445_v37 = vcombine.low %v1406_v55, %v1407_v2  ;;  %7385 = vmatprep.subr.bf16.mxu0 %v7708_v18 }
  0x8e   : > { %11102 = vst [vmem:[#allocation30_spill] sm:$0xff] %v11101_v11  ;;  %11103 = vst [vmem:[#allocation31_spill] sm:$0xff] %v8682_v22  ;;  %v2690_v27 = vsel %vm8675_vm11, 0, %v8279_v43  ;;  %v1166_v36 = vrot.slane %v1164_v53, 5  ;;  %v1170_v47 = vrot.slane %v1168_v1, 4  ;;  %v447_v52 = vadd.s32 112, %v8029_v35 }
  0x8f   : > { %v6486_v30 = vcombine.low %v2689_v19, %v2690_v27  ;;  %vm894_vm7 = vcmp.eq.s32.totalorder %v560_v12, 15  ;;  %v1896_v34 = vshrl.u32 %v6445_v37, 16  ;;  %v1899_v55 = vshll.u32 %v6445_v37, 16  ;;  %v7710_v19 = vld [vmem:[%s10790_s1 + $0x1b8] sm:$0xff]   ;;  %7336 = vmatpush3.bf16.msra.mxu1 %v7705_v24 }
  0x90   : > { %v1167_v23 = vsel %vm8099_vm12, %v8088_v10, %v1166_v36  ;;  %v1171_v29 = vor.u32 %v1170_v47, %v1166_v36  ;;  %vm2305_vm11 = vmpackc.low %vm894_vm7, %vm894_vm7  ;;  %v11104_v53 = vmov 0  ;;  %vm11106_vm9 = vcmp.ne.s16.totalorder %v8682_v22, 0  ;;  %7337 = vmatprep.subr.bf16.mxu1 %v7707_v39  ;;  %7386 = vmatpush3.bf16.msra.mxu0 %v7708_v18 }
  0x91   : > { %v2853_v26 = vshll.u32 %v6486_v30, 16  ;;  %vm8701_vm6 = vcmp.ne.s16.totalorder %v1167_v23, 0  ;;  %v2337_v1 = vsel %vm2305_vm11, 65537, %v11065_v32  ;;  %v2691_v2 = vsel %vm11106_vm9, 0, %v8287_v48  ;;  %7467 = vmatprep.subr.bf16.mxu0 %v7710_v19 }
  0x92   : > { %v11105_v53 = vsel %vm8701_vm6, 4294967295, %v11104_v53  ;;  %v1898_v12 = vrot.slane %v1896_v34, 3  ;;  %v1901_v37 = vrot.slane %v1899_v55, 4  ;;  %v1172_v27 = vrot.slane %v1171_v29, 4 }
  0x93   : > { %v1408_v36 = vsel %vm8701_vm6, 0, %v8279_v43  ;;  %v2855_v47 = vrot.slane %v2853_v26, 1  ;;  %v2476_v23 = vshrl.u32 %v2337_v1, 16  ;;  %v2479_v11 = vshll.u32 %v2337_v1, 16  ;;  %7338 = vmatpush3.bf16.msra.mxu1 %v7707_v39 }
  0x94   : > { %v2857_v28 = vshrl.u32 %v6486_v30, 16  ;;  %v1902_v3 = vor.u32 %v1901_v37, %v1898_v12  ;;  %v1177_v22 = vsel %vm8099_vm12, %v1172_v27, %v8069_v54  ;;  %v567_v24 = vand.u32 15, %v447_v52  ;;  %7419 = vmatprep.subr.bf16.mxu1 %v7709_v57 }
  0x95   : > { %v448_v34 = vadd.s32 120, %v8029_v35  ;;  %vm11107_vm9 = vsmask.f32 7424  ;;  %vm8717_vm11 = vcmp.ne.s16.totalorder %v1177_v22, 0  ;;  %v11108_v29 = vmov 0 }
  0x96   : > { %v2856_v55 = vsel %vm11107_vm9, %v2851_v9, %v2855_v47  ;;  %v11109_v29 = vsel %vm8717_vm11, 4294967295, %v11108_v29  ;;  %v2478_v43 = vrot.slane %v2476_v23, 7  ;;  %v2859_v18 = vor.u32 %v2857_v28, %v2855_v47 }
  0x97   : > { %11110 = vst [vmem:[#allocation32_spill] sm:$0xff] %v11109_v29  ;;  %vm11111_vm7 = vsmask.f32 4352  ;;  %7299 = vmatprep.mubr.bf16.mxu0 %v2856_v55  ;;  %v1409_v19 = vsel %vm8717_vm11, 0, %v8287_v48  ;;  %vm863_vm6 = vcmp.eq.s32.totalorder %v567_v24, 0  ;;  %v574_v52 = vand.u32 15, %v448_v34 }
  0x98   : > { %v1903_v30 = vsel %vm11111_vm7, %v8641_v46, %v1902_v3  ;;  %v6446_v9 = vcombine.low %v1408_v36, %v1409_v19  ;;  %v2481_v22 = vor.u32 %v2479_v11, %v2478_v43  ;;  %vm991_vm9 = vmpackc.low %vm863_vm6, %vm863_vm6  ;;  %v2483_v26 = vrot.slane %v2478_v43, 4 }
  0x99   : > { %7251 = vmatprep.mubr.bf16.mxu1 %v1903_v30  ;;  %v449_v1 = vadd.s32 128, %v8029_v35  ;;  %v1023_v28 = vsel %vm991_vm9, 65537, %v11065_v32  ;;  %vm896_vm0 = vcmp.eq.s32.totalorder %v574_v52, 15  ;;  %v450_v46 = vadd.s32 136, %v8029_v35 }
  0x9a   : > { %v8730_v39 = vadd.s32 144, %v8029_v35  ;;  %v1905_v12 = vshrl.u32 %v6446_v9, 16  ;;  %v1908_v48 = vshll.u32 %v6446_v9, 16  ;;  %v2482_v57 = vsel %vm8108_vm14, %v8104_v17, %v2481_v22  ;;  %vm2307_vm7 = vmpackc.low %vm896_vm0, %vm896_vm0 }
  0x9b   : > { %v1184_v37 = vshll.u32 %v1023_v28, 16  ;;  %vm8735_vm6 = vcmp.ne.s16.totalorder %v2482_v57, 0  ;;  %v11112_v11 = vmov 0  ;;  %v1188_v27 = vshrl.u32 %v1023_v28, 16 }
  0x9c   : > { %v11113_v11 = vsel %vm8735_vm6, 4294967295, %v11112_v11  ;;  %v2339_v36 = vsel %vm2307_vm7, 65537, %v11065_v32  ;;  %v8743_v47 = vsel %vm8108_vm14, %v2483_v26, %v8083_v7  ;;  %v1907_v23 = vrot.slane %v1905_v12, 3 }
  0x9d   : > { %11114 = vst [vmem:[#allocation33_spill] sm:$0xff] %v11113_v11  ;;  %11115 = vst [vmem:[#allocation34_spill] sm:$0xff] %v8743_v47  ;;  %v1910_v24 = vrot.slane %v1908_v48, 4  ;;  %v2692_v34 = vsel %vm8735_vm6, 0, %v8290_v49  ;;  %v1186_v55 = vrot.slane %v1184_v37, 5  ;;  %v1190_v30 = vrot.slane %v1188_v27, 4 }
  0x9e   : > { %v6487_v43 = vcombine.low %v2691_v2, %v2692_v34  ;;  %v2494_v19 = vshrl.u32 %v2339_v36, 16  ;;  %v2497_v52 = vshll.u32 %v2339_v36, 16  ;;  %vm10849_vm0 = vcmp.ne.s16.totalorder %v8743_v47, 0 }
  0x9f   : > { %v8748_v9 = vor.u32 %v1910_v24, %v1907_v23  ;;  %v1187_v22 = vsel %vm8099_vm12, %v8088_v10, %v1186_v55  ;;  %v581_v26 = vand.u32 15, %v449_v1  ;;  %v1191_v12 = vor.u32 %v1190_v30, %v1186_v55 }
  0xa0   : > { %v2861_v28 = vshll.u32 %v6487_v43, 16  ;;  %vm8754_vm9 = vcmp.ne.s16.totalorder %v1187_v22, 0  ;;  %v11116_v48 = vmov 0  ;;  %v2496_v57 = vrot.slane %v2494_v19, 7 }
  0xa1   : > { %v11117_v48 = vsel %vm8754_vm9, 4294967295, %v11116_v48  ;;  %vm11118_vm7 = vsmask.f32 4352  ;;  %v1410_v37 = vsel %vm8754_vm9, 0, %v8290_v49  ;;  %v2693_v27 = vsel %vm10849_vm0, 0, %v8301_v59 }
  0xa2   : > { %v1912_v2 = vsel %vm11118_vm7, %v1902_v3, %v8748_v9  ;;  %v2865_v36 = vshrl.u32 %v6487_v43, 16  ;;  %v2863_v1 = vrot.slane %v2861_v28, 1  ;;  %v1192_v23 = vrot.slane %v1191_v12, 4 }
  0xa3   : > { %7252 = vmatmul.mubr.bf16.gmra.mxu1 %v1912_v2  ;;  %v2499_v24 = vor.u32 %v2497_v52, %v2496_v57  ;;  %vm865_vm6 = vcmp.eq.s32.totalorder %v581_v26, 0  ;;  %v588_v34 = vand.u32 15, %v450_v46  ;;  %v2501_v55 = vrot.slane %v2496_v57, 4 }
  0xa4   : > { %vm993_vm11 = vmpackc.low %vm865_vm6, %vm865_vm6  ;;  %v595_v30 = vand.u32 15, %v8730_v39  ;;  %v8768_v3 = vadd.s32 152, %v8029_v35  ;;  %vm11119_vm7 = vsmask.f32 7424  ;;  %v1197_v19 = vsel %vm8099_vm12, %v1192_v23, %v8069_v54 }
  0xa5   : > { %v2864_v49 = vsel %vm11119_vm7, %v2859_v18, %v2863_v1  ;;  %v2500_v43 = vsel %vm8108_vm14, %v8104_v17, %v2499_v24  ;;  %v2867_v52 = vor.u32 %v2865_v36, %v2863_v1  ;;  %vm8777_vm6 = vcmp.ne.s16.totalorder %v1197_v19, 0 }
  0xa6   : > { %7300 = vmatmul.mubr.bf16.gmra.mxu0 %v2864_v49  ;;  %v11120_v46 = vmov 0  ;;  %vm8781_vm0 = vcmp.ne.s16.totalorder %v2500_v43, 0  ;;  %v11122_v39 = vmov 0  ;;  %v1025_v18 = vsel %vm993_vm11, 65537, %v11065_v32 }
  0xa7   : > { %v11121_v46 = vsel %vm8777_vm6, 4294967295, %v11120_v46  ;;  %v11123_v39 = vsel %vm8781_vm0, 4294967295, %v11122_v39  ;;  %vm898_vm7 = vcmp.eq.s32.totalorder %v588_v34, 15  ;;  %v1411_v22 = vsel %vm8777_vm6, 0, %v8301_v59 }
  0xa8   : > { %11124 = vst [vmem:[#allocation35_spill] sm:$0xff] %v11123_v39  ;;  %v2694_v26 = vsel %vm8781_vm0, 0, %v8304_v60  ;;  %v1204_v28 = vshll.u32 %v1025_v18, 16  ;;  %v1208_v12 = vshrl.u32 %v1025_v18, 16  ;;  %vm2309_vm9 = vmpackc.low %vm898_vm7, %vm898_vm7  ;;  %v6447_v57 = vcombine.low %v1410_v37, %v1411_v22  ;;  %v8803_v18 = vld [vmem:[%s8038_s14 + $0x48] sm:$0xf] }
  0xa9   : > { %v6488_v2 = vcombine.low %v2693_v27, %v2694_v26  ;;  %v2341_v36 = vsel %vm2309_vm9, 65537, %v11065_v32  ;;  %v8796_v1 = vsel %vm8108_vm14, %v2501_v55, %v8083_v7  ;;  %vm11128_vm7 = vsmask.f32 7424 }
  0xaa   : > { %11125 = vst [vmem:[#allocation36_spill] sm:$0xff] %v8796_v1  ;;  %v1206_v23 = vrot.slane %v1204_v28, 5  ;;  %v1210_v24 = vrot.slane %v1208_v12, 4  ;;  %v2512_v59 = vshrl.u32 %v2341_v36, 16  ;;  %v2515_v34 = vshll.u32 %v2341_v36, 16 }
  0xab   : > { %v1914_v49 = vshrl.u32 %v6447_v57, 16  ;;  %v1917_v60 = vshll.u32 %v6447_v57, 16  ;;  %v2869_v19 = vshll.u32 %v6488_v2, 16  ;;  %vm10856_vm11 = vcmp.ne.s16.totalorder %v8796_v1, 0  ;;  %v8813_v36 = vld [vmem:[%s8038_s14 + $0x44] sm:$0xf] }
  0xac   : > { %v1207_v37 = vsel %vm8099_vm12, %v8088_v10, %v1206_v23  ;;  %v1211_v27 = vor.u32 %v1210_v24, %v1206_v23  ;;  %v2514_v43 = vrot.slane %v2512_v59, 7  ;;  %v2695_v55 = vsel %vm10856_vm11, 0, %v8803_v18 }
  0xad   : > { %v1916_v22 = vrot.slane %v1914_v49, 3  ;;  %v1919_v26 = vrot.slane %v1917_v60, 4  ;;  %v2871_v28 = vrot.slane %v2869_v19, 1  ;;  %vm8808_vm9 = vcmp.ne.s16.totalorder %v1207_v37, 0 }
  0xae   : > { %v11126_v12 = vmov 0  ;;  %v1212_v57 = vrot.slane %v1211_v27, 4  ;;  %v1412_v23 = vsel %vm8808_vm9, 0, %v8813_v36  ;;  %v2517_v24 = vor.u32 %v2515_v34, %v2514_v43  ;;  %v8841_v27 = vld [vmem:[%s8038_s14 + $0x4c] sm:$0xf] }
  0xaf   : > { %v11127_v12 = vsel %vm8808_vm9, 4294967295, %v11126_v12  ;;  %v2873_v59 = vshrl.u32 %v6488_v2, 16  ;;  %v1920_v39 = vor.u32 %v1919_v26, %v1916_v22  ;;  %v2872_v1 = vsel %vm11128_vm7, %v2867_v52, %v2871_v28 }
  0xb0   : > { %vm867_vm11 = vcmp.eq.s32.totalorder %v595_v30, 0  ;;  %v602_v49 = vand.u32 15, %v8768_v3  ;;  %7303 = vmatprep.mubr.bf16.mxu0 %v2872_v1  ;;  %v1217_v60 = vsel %vm8099_vm12, %v1212_v57, %v8069_v54  ;;  %v2518_v19 = vsel %vm8108_vm14, %v8104_v17, %v2517_v24 }
  0xb1   : > { %v2875_v37 = vor.u32 %v2873_v59, %v2871_v28  ;;  %vm995_vm0 = vmpackc.low %vm867_vm11, %vm867_vm11  ;;  %v2519_v34 = vrot.slane %v2514_v43, 4  ;;  %vm11129_vm9 = vsmask.f32 4352  ;;  %vm8828_vm6 = vcmp.ne.s16.totalorder %v1217_v60, 0 }
  0xb2   : > { %v1921_v2 = vsel %vm11129_vm9, %v8748_v9, %v1920_v39  ;;  %v11130_v52 = vmov 0  ;;  %vm8832_vm7 = vcmp.ne.s16.totalorder %v2518_v19, 0  ;;  %v11132_v30 = vmov 0 }
  0xb3   : > { %v11131_v52 = vsel %vm8828_vm6, 4294967295, %v11130_v52  ;;  %v11133_v30 = vsel %vm8832_vm7, 4294967295, %v11132_v30  ;;  %v1027_v3 = vsel %vm995_vm0, 65537, %v11065_v32  ;;  %7255 = vmatprep.mubr.bf16.mxu1 %v1921_v2  ;;  %v1413_v1 = vsel %vm8828_vm6, 0, %v8803_v18 }
  0xb4   : > { %11134 = vst [vmem:[#allocation37_spill] sm:$0xff] %v11133_v30  ;;  %v2696_v9 = vsel %vm8832_vm7, 0, %v8841_v27  ;;  %v1224_v43 = vshll.u32 %v1027_v3, 16  ;;  %v1228_v22 = vshrl.u32 %v1027_v3, 16  ;;  %v6448_v26 = vcombine.low %v1412_v23, %v1413_v1 }
  0xb5   : > { %v6489_v28 = vcombine.low %v2695_v55, %v2696_v9  ;;  %vm900_vm11 = vcmp.eq.s32.totalorder %v602_v49, 15  ;;  %v8849_v57 = vsel %vm8108_vm14, %v2519_v34, %v8083_v7  ;;  %v453_v60 = vadd.s32 160, %v8029_v35 }
  0xb6   : > { %11135 = vst [vmem:[#allocation38_spill] sm:$0xff] %v8849_v57  ;;  %v1226_v24 = vrot.slane %v1224_v43, 5  ;;  %v1230_v59 = vrot.slane %v1228_v22, 4  ;;  %vm2311_vm0 = vmpackc.low %vm900_vm11, %vm900_vm11  ;;  %vm10879_vm9 = vcmp.ne.s16.totalorder %v8849_v57, 0  ;;  %v1923_v19 = vshrl.u32 %v6448_v26, 16 }
  0xb7   : > { %v1926_v2 = vshll.u32 %v6448_v26, 16  ;;  %v2877_v30 = vshll.u32 %v6489_v28, 16  ;;  %v2343_v23 = vsel %vm2311_vm0, 65537, %v11065_v32  ;;  %v11136_v22 = vmov 0 }
  0xb8   : > { %v1227_v55 = vsel %vm8099_vm12, %v8088_v10, %v1226_v24  ;;  %v1231_v49 = vor.u32 %v1230_v59, %v1226_v24  ;;  %v2530_v34 = vshrl.u32 %v2343_v23, 16  ;;  %v2533_v3 = vshll.u32 %v2343_v23, 16 }
  0xb9   : > { %v1925_v1 = vrot.slane %v1923_v19, 3  ;;  %v1928_v9 = vrot.slane %v1926_v2, 4  ;;  %v2879_v43 = vrot.slane %v2877_v30, 1  ;;  %vm8857_vm11 = vcmp.ne.s16.totalorder %v1227_v55, 0 }
  0xba   : > { %v11137_v22 = vsel %vm8857_vm11, 4294967295, %v11136_v22  ;;  %v1232_v47 = vrot.slane %v1231_v49, 4  ;;  %v1414_v26 = vsel %vm8857_vm11, 0, %v8841_v27  ;;  %v2532_v11 = vrot.slane %v2530_v34, 7 }
  0xbb   : > { %v2697_v24 = vsel %vm10879_vm9, 0, %v8865_v41  ;;  %v1929_v59 = vor.u32 %v1928_v9, %v1925_v1  ;;  %vm11138_vm0 = vsmask.f32 7424  ;;  %v2881_v30 = vshrl.u32 %v6489_v28, 16 }
  0xbc   : > { %v2880_v19 = vsel %vm11138_vm0, %v2875_v37, %v2879_v43  ;;  %v609_v2 = vand.u32 15, %v453_v60  ;;  %v1237_v23 = vsel %vm8099_vm12, %v1232_v47, %v8069_v54  ;;  %v2535_v55 = vor.u32 %v2533_v3, %v2532_v11  ;;  %v8898_v3 = vld [vmem:[%s8038_s14 + $0x54] sm:$0xf] }
  0xbd   : > { %7304 = vmatmul.mubr.bf16.gmra.mxu0 %v2880_v19  ;;  %v454_v49 = vadd.s32 168, %v8029_v35  ;;  %v2537_v34 = vrot.slane %v2532_v11, 4  ;;  %vm11139_vm7 = vsmask.f32 4352  ;;  %vm8876_vm11 = vcmp.ne.s16.totalorder %v1237_v23, 0 }
  0xbe   : > { %v1930_v8 = vsel %vm11139_vm7, %v1920_v39, %v1929_v59  ;;  %v11140_v57 = vmov 0  ;;  %v2883_v1 = vor.u32 %v2881_v30, %v2879_v43  ;;  %vm869_vm0 = vcmp.eq.s32.totalorder %v609_v2, 0  ;;  %v8904_v23 = vld [vmem:[%s8038_s14 + $0x58] sm:$0xf] }
  0xbf   : > { %v11141_v57 = vsel %vm8876_vm11, 4294967295, %v11140_v57  ;;  %7256 = vmatmul.mubr.bf16.gmra.mxu1 %v1930_v8  ;;  %v1415_v37 = vsel %vm8876_vm11, 0, %v8865_v41  ;;  %v2536_v47 = vsel %vm8108_vm14, %v8104_v17, %v2535_v55  ;;  %vm997_vm9 = vmpackc.low %vm869_vm0, %vm869_vm0  ;;  %v616_v11 = vand.u32 15, %v454_v49 }
  0xc0   : > { %v8889_v39 = vsel %vm8108_vm14, %v2537_v34, %v8083_v7  ;;  %v6449_v28 = vcombine.low %v1414_v26, %v1415_v37  ;;  %vm8891_vm7 = vcmp.ne.s16.totalorder %v2536_v47, 0  ;;  %v11143_v60 = vmov 0 }
  0xc1   : > { %11142 = vst [vmem:[#allocation39_spill] sm:$0xff] %v8889_v39  ;;  %v11144_v60 = vsel %vm8891_vm7, 4294967295, %v11143_v60  ;;  %v1029_v8 = vsel %vm997_vm9, 65537, %v11065_v32  ;;  %vm10897_vm11 = vcmp.ne.s16.totalorder %v8889_v39, 0  ;;  %v2698_v9 = vsel %vm8891_vm7, 0, %v8898_v3 }
  0xc2   : > { %11145 = vst [vmem:[#allocation40_spill] sm:$0xff] %v11144_v60  ;;  %v1244_v43 = vshll.u32 %v1029_v8, 16  ;;  %v1248_v19 = vshrl.u32 %v1029_v8, 16  ;;  %vm902_vm0 = vcmp.eq.s32.totalorder %v616_v11, 15  ;;  %v1932_v30 = vshrl.u32 %v6449_v28, 16 }
  0xc3   : > { %v1935_v2 = vshll.u32 %v6449_v28, 16  ;;  %v6490_v26 = vcombine.low %v2697_v24, %v2698_v9  ;;  %vm2313_vm6 = vmpackc.low %vm902_vm0, %vm902_vm0  ;;  %v2699_v55 = vsel %vm10897_vm11, 0, %v8904_v23  ;;  %v455_v47 = vadd.s32 176, %v8029_v35 }
  0xc4   : > { %v1246_v49 = vrot.slane %v1244_v43, 5  ;;  %v1250_v34 = vrot.slane %v1248_v19, 4  ;;  %v2345_v37 = vsel %vm2313_vm6, 65537, %v11065_v32  ;;  %v1934_v60 = vrot.slane %v1932_v30, 3 }
  0xc5   : > { %v1937_v56 = vrot.slane %v1935_v2, 4  ;;  %v2885_v8 = vshll.u32 %v6490_v26, 16  ;;  %v2548_v11 = vshrl.u32 %v2345_v37, 16  ;;  %v2551_v9 = vshll.u32 %v2345_v37, 16 }
  0xc6   : > { %v1247_v24 = vsel %vm8099_vm12, %v8088_v10, %v1246_v49  ;;  %v1251_v28 = vor.u32 %v1250_v34, %v1246_v49  ;;  %v2889_v25 = vshrl.u32 %v6490_v26, 16  ;;  %v11146_v43 = vmov 0 }
  0xc7   : > { %v8914_v44 = vor.u32 %v1937_v56, %v1934_v60  ;;  %v2887_v39 = vrot.slane %v2885_v8, 1  ;;  %vm8916_vm9 = vcmp.ne.s16.totalorder %v1247_v24, 0  ;;  %v2550_v19 = vrot.slane %v2548_v11, 7  ;;  %v8948_v24 = vld [vmem:[%s8038_s14 + $0x5c] sm:$0xf] }
  0xc8   : > { %v11147_v43 = vsel %vm8916_vm9, 4294967295, %v11146_v43  ;;  %v1252_v4 = vrot.slane %v1251_v28, 4  ;;  %v1416_v30 = vsel %vm8916_vm9, 0, %v8898_v3  ;;  %v623_v2 = vand.u32 15, %v455_v47 }
  0xc9   : > { %11148 = vst [vmem:[#allocation41_spill] sm:$0xff] %v11147_v43  ;;  %vm11149_vm6 = vsmask.f32 4352  ;;  %vm11150_vm0 = vsmask.f32 7424  ;;  %v2553_v60 = vor.u32 %v2551_v9, %v2550_v19  ;;  %v2891_v26 = vor.u32 %v2889_v25, %v2887_v39 }
  0xca   : > { %v1939_v49 = vsel %vm11149_vm6, %v1929_v59, %v8914_v44  ;;  %v2888_v56 = vsel %vm11150_vm0, %v2883_v1, %v2887_v39  ;;  %v1257_v34 = vsel %vm8099_vm12, %v1252_v4, %v8069_v54  ;;  %vm871_vm11 = vcmp.eq.s32.totalorder %v623_v2, 0 }
  0xcb   : > { %7259 = vmatprep.mubr.bf16.mxu1 %v1939_v49  ;;  %7307 = vmatprep.mubr.bf16.mxu0 %v2888_v56  ;;  %v630_v37 = vand.u32 15, %v456_v33  ;;  %v2555_v8 = vrot.slane %v2550_v19, 4  ;;  %vm8930_vm7 = vcmp.ne.s16.totalorder %v1257_v34, 0  ;;  %v11151_v47 = vmov 0  ;;  %vm999_vm6 = vmpackc.low %vm871_vm11, %vm871_vm11 }
  0xcc   : > { %v11152_v47 = vsel %vm8930_vm7, 4294967295, %v11151_v47  ;;  %v2554_v59 = vsel %vm8108_vm14, %v8104_v17, %v2553_v60  ;;  %v457_v25 = vadd.s32 192, %v8029_v35  ;;  %v458_v1 = vadd.s32 200, %v8029_v35 }
  0xcd   : > { %11153 = vst [vmem:[#allocation42_spill] sm:$0xff] %v11152_v47  ;;  %v1417_v4 = vsel %vm8930_vm7, 0, %v8904_v23  ;;  %vm8942_vm0 = vcmp.ne.s16.totalorder %v2554_v59, 0  ;;  %v11154_v33 = vmov 0  ;;  %v1031_v39 = vsel %vm999_vm6, 65537, %v11065_v32 }
  0xce   : > { %v11155_v33 = vsel %vm8942_vm0, 4294967295, %v11154_v33  ;;  %vm904_vm9 = vcmp.eq.s32.totalorder %v630_v37, 15  ;;  %v6450_v11 = vcombine.low %v1416_v30, %v1417_v4  ;;  %v2700_v28 = vsel %vm8942_vm0, 0, %v8948_v24 }
  0xcf   : > { %11156 = vst [vmem:[#allocation43_spill] sm:$0xff] %v11155_v33  ;;  %v1264_v9 = vshll.u32 %v1031_v39, 16  ;;  %v1268_v19 = vshrl.u32 %v1031_v39, 16  ;;  %vm2315_vm11 = vmpackc.low %vm904_vm9, %vm904_vm9  ;;  %v6491_v2 = vcombine.low %v2699_v55, %v2700_v28  ;;  %v8957_v56 = vsel %vm8108_vm14, %v2555_v8, %v8083_v7 }
  0xd0   : > { %v2347_v49 = vsel %vm2315_vm11, 65537, %v11065_v32  ;;  %11157 = vst [vmem:[#allocation44_spill] sm:$0xff] %v8957_v56  ;;  %v637_v60 = vand.u32 15, %v457_v25  ;;  %v1941_v30 = vshrl.u32 %v6450_v11, 16  ;;  %v1944_v34 = vshll.u32 %v6450_v11, 16 }
  0xd1   : > { %v1266_v37 = vrot.slane %v1264_v9, 5  ;;  %v1270_v59 = vrot.slane %v1268_v19, 4  ;;  %v2893_v4 = vshll.u32 %v6491_v2, 16  ;;  %v2566_v33 = vshrl.u32 %v2347_v49, 16  ;;  %v8968_v9 = vld [vmem:[%s8038_s14 + $0x60] sm:$0xf] }
  0xd2   : > { %v2569_v38 = vshll.u32 %v2347_v49, 16  ;;  %vm10914_vm6 = vcmp.ne.s16.totalorder %v8957_v56, 0  ;;  %v1943_v39 = vrot.slane %v1941_v30, 3  ;;  %v1946_v55 = vrot.slane %v1944_v34, 4  ;;  %11161 = vst [vmem:[#allocation46_spill] sm:$0xff] %v8968_v9 }
  0xd3   : > { %v1267_v28 = vsel %vm8099_vm12, %v8088_v10, %v1266_v37  ;;  %v1271_v21 = vor.u32 %v1270_v59, %v1266_v37  ;;  %v2895_v8 = vrot.slane %v2893_v4, 1  ;;  %v11158_v25 = vmov 0 }
  0xd4   : > { %vm8963_vm9 = vcmp.ne.s16.totalorder %v1267_v28, 0  ;;  %v2568_v11 = vrot.slane %v2566_v33, 7  ;;  %v2701_v19 = vsel %vm10914_vm6, 0, %v8968_v9  ;;  %v1947_v49 = vor.u32 %v1946_v55, %v1943_v39 }
  0xd5   : > { %v11159_v25 = vsel %vm8963_vm9, 4294967295, %v11158_v25  ;;  %v1272_v30 = vrot.slane %v1271_v21, 4  ;;  %v1418_v34 = vsel %vm8963_vm9, 0, %v8948_v24  ;;  %v2897_v5 = vshrl.u32 %v6491_v2, 16 }
  0xd6   : > { %11160 = vst [vmem:[#allocation45_spill] sm:$0xff] %v11159_v25  ;;  %vm11162_vm11 = vsmask.f32 7424  ;;  %v2571_v59 = vor.u32 %v2569_v38, %v2568_v11  ;;  %vm873_vm0 = vcmp.eq.s32.totalorder %v637_v60, 0  ;;  %v644_v4 = vand.u32 15, %v458_v1 }
  0xd7   : > { %v2896_v37 = vsel %vm11162_vm11, %v2891_v26, %v2895_v8  ;;  %vm11163_vm7 = vsmask.f32 4352  ;;  %v1277_v39 = vsel %vm8099_vm12, %v1272_v30, %v8069_v54  ;;  %v2899_v21 = vor.u32 %v2897_v5, %v2895_v8  ;;  %vm1001_vm6 = vmpackc.low %vm873_vm0, %vm873_vm0  ;;  %v8998_v8 = vld [vmem:[%s8038_s14 + $0x64] sm:$0xf] }
  0xd8   : > { %v1948_v33 = vsel %vm11163_vm7, %v8914_v44, %v1947_v49  ;;  %7308 = vmatmul.mubr.bf16.gmra.mxu0 %v2896_v37  ;;  %v2573_v55 = vrot.slane %v2568_v11, 4  ;;  %vm8982_vm9 = vcmp.ne.s16.totalorder %v1277_v39, 0  ;;  %v11164_v2 = vmov 0  ;;  %11170 = vst [vmem:[#allocation49_spill] sm:$0xff] %v8998_v8 }
  0xd9   : > { %7260 = vmatmul.mubr.bf16.gmra.mxu1 %v1948_v33  ;;  %v11165_v2 = vsel %vm8982_vm9, 4294967295, %v11164_v2  ;;  %v2572_v38 = vsel %vm8108_vm14, %v8104_v17, %v2571_v59  ;;  %v1033_v44 = vsel %vm1001_vm6, 65537, %v11065_v32  ;;  %vm906_vm7 = vcmp.eq.s32.totalorder %v644_v4, 15 }
  0xda   : > { %11166 = vst [vmem:[#allocation47_spill] sm:$0xff] %v11165_v2  ;;  %v1419_v26 = vsel %vm8982_vm9, 0, %v8968_v9  ;;  %vm8993_vm11 = vcmp.ne.s16.totalorder %v2572_v38, 0  ;;  %v11167_v5 = vmov 0  ;;  %v1284_v1 = vshll.u32 %v1033_v44, 16  ;;  %vm2317_vm0 = vmpackc.low %vm906_vm7, %vm906_vm7 }
  0xdb   : > { %v11168_v5 = vsel %vm8993_vm11, 4294967295, %v11167_v5  ;;  %v1288_v60 = vshrl.u32 %v1033_v44, 16  ;;  %v6451_v28 = vcombine.low %v1418_v34, %v1419_v26  ;;  %v2702_v11 = vsel %vm8993_vm11, 0, %v8998_v8 }
  0xdc   : > { %11169 = vst [vmem:[#allocation48_spill] sm:$0xff] %v11168_v5  ;;  %v2349_v30 = vsel %vm2317_vm0, 65537, %v11065_v32  ;;  %v9007_v37 = vsel %vm8108_vm14, %v2573_v55, %v8083_v7  ;;  %v6492_v59 = vcombine.low %v2701_v19, %v2702_v11  ;;  %v1286_v4 = vrot.slane %v1284_v1, 5  ;;  %v9018_v19 = vld [vmem:[%s8038_s14 + $0x68] sm:$0xf] }
  0xdd   : > { %11171 = vst [vmem:[#allocation50_spill] sm:$0xff] %v9007_v37  ;;  %v1290_v33 = vrot.slane %v1288_v60, 4  ;;  %v2584_v39 = vshrl.u32 %v2349_v30, 16  ;;  %v1950_v38 = vshrl.u32 %v6451_v28, 16  ;;  %v1953_v34 = vshll.u32 %v6451_v28, 16  ;;  %11175 = vst [vmem:[#allocation52_spill] sm:$0xff] %v9018_v19 }
  0xde   : > { %v2587_v44 = vshll.u32 %v2349_v30, 16  ;;  %vm10927_vm6 = vcmp.ne.s16.totalorder %v9007_v37, 0  ;;  %v2901_v26 = vshll.u32 %v6492_v59, 16  ;;  %v1287_v5 = vsel %vm8099_vm12, %v8088_v10, %v1286_v4 }
  0xdf   : > { %v1291_v56 = vor.u32 %v1290_v33, %v1286_v4  ;;  %v2586_v51 = vrot.slane %v2584_v39, 7  ;;  %v1952_v2 = vrot.slane %v1950_v38, 3  ;;  %v1955_v55 = vrot.slane %v1953_v34, 4 }
  0xe0   : > { %vm9013_vm7 = vcmp.ne.s16.totalorder %v1287_v5, 0  ;;  %v11172_v25 = vmov 0  ;;  %v2703_v1 = vsel %vm10927_vm6, 0, %v9018_v19  ;;  %v2903_v60 = vrot.slane %v2901_v26, 1 }
  0xe1   : > { %v11173_v25 = vsel %vm9013_vm7, 4294967295, %v11172_v25  ;;  %v1292_v28 = vrot.slane %v1291_v56, 4  ;;  %v1420_v11 = vsel %vm9013_vm7, 0, %v8998_v8  ;;  %v2589_v30 = vor.u32 %v2587_v44, %v2586_v51 }
  0xe2   : > { %11174 = vst [vmem:[#allocation51_spill] sm:$0xff] %v11173_v25  ;;  %v1956_v4 = vor.u32 %v1955_v55, %v1952_v2  ;;  %v2905_v33 = vshrl.u32 %v6492_v59, 16  ;;  %v459_v5 = vadd.s32 208, %v8029_v35  ;;  %v460_v39 = vadd.s32 216, %v8029_v35 }
  0xe3   : > { %vm11176_vm0 = vsmask.f32 7424  ;;  %v1297_v34 = vsel %vm8099_vm12, %v1292_v28, %v8069_v54  ;;  %v2590_v56 = vsel %vm8108_vm14, %v8104_v17, %v2589_v30  ;;  %v2591_v26 = vrot.slane %v2586_v51, 4  ;;  %v9048_v28 = vld [vmem:[%s8038_s14 + $0x6c] sm:$0xf] }
  0xe4   : > { %v2904_v38 = vsel %vm11176_vm0, %v2899_v21, %v2903_v60  ;;  %vm11177_vm6 = vsmask.f32 4352  ;;  %vm9036_vm11 = vcmp.ne.s16.totalorder %v1297_v34, 0  ;;  %v11178_v2 = vmov 0  ;;  %11184 = vst [vmem:[#allocation55_spill] sm:$0xff] %v9048_v28 }
  0xe5   : > { %v1957_v44 = vsel %vm11177_vm6, %v1947_v49, %v1956_v4  ;;  %7311 = vmatprep.mubr.bf16.mxu0 %v2904_v38  ;;  %v11179_v2 = vsel %vm9036_vm11, 4294967295, %v11178_v2  ;;  %vm9040_vm7 = vcmp.ne.s16.totalorder %v2590_v56, 0  ;;  %v11181_v59 = vmov 0 }
  0xe6   : > { %11180 = vst [vmem:[#allocation53_spill] sm:$0xff] %v11179_v2  ;;  %v11182_v59 = vsel %vm9040_vm7, 4294967295, %v11181_v59  ;;  %v2907_v21 = vor.u32 %v2905_v33, %v2903_v60  ;;  %7263 = vmatprep.mubr.bf16.mxu1 %v1957_v44  ;;  %v1421_v55 = vsel %vm9036_vm11, 0, %v9018_v19  ;;  %v2704_v51 = vsel %vm9040_vm7, 0, %v9048_v28 }
  0xe7   : > { %11183 = vst [vmem:[#allocation54_spill] sm:$0xff] %v11182_v59  ;;  %v651_v49 = vand.u32 15, %v459_v5  ;;  %v658_v30 = vand.u32 15, %v460_v39  ;;  %v6452_v38 = vcombine.low %v1420_v11, %v1421_v55  ;;  %v6493_v34 = vcombine.low %v2703_v1, %v2704_v51  ;;  %v9066_v1 = vld [vmem:[%s8038_s14 + $0x70] sm:$0xf] }
  0xe8   : > { %v9056_v60 = vsel %vm8108_vm14, %v2591_v26, %v8083_v7  ;;  %v461_v33 = vadd.s32 224, %v8029_v35  ;;  %v462_v44 = vadd.s32 232, %v8029_v35  ;;  %11188 = vst [vmem:[#allocation57_spill] sm:$0xff] %v9066_v1 }
  0xe9   : > { %11185 = vst [vmem:[#allocation56_spill] sm:$0xff] %v9056_v60  ;;  %vm875_vm6 = vcmp.eq.s32.totalorder %v651_v49, 0  ;;  %vm9059_vm0 = vcmp.eq.s32.totalorder %v658_v30, 15  ;;  %vm10954_vm11 = vcmp.ne.s16.totalorder %v9056_v60, 0  ;;  %v1959_v5 = vshrl.u32 %v6452_v38, 16 }
  0xea   : > { %v1962_v39 = vshll.u32 %v6452_v38, 16  ;;  %v2909_v11 = vshll.u32 %v6493_v34, 16  ;;  %vm1003_vm7 = vmpackc.low %vm875_vm6, %vm875_vm6  ;;  %v2705_v26 = vsel %vm10954_vm11, 0, %v9066_v1  ;;  %v2913_v51 = vshrl.u32 %v6493_v34, 16 }
  0xeb   : > { %v1035_v55 = vsel %vm1003_vm7, 65537, %v11065_v32  ;;  %vm2319_vm9 = vmpackc.low %vm9059_vm0, %vm9059_vm0  ;;  %v665_v49 = vand.u32 15, %v461_v33  ;;  %v672_v30 = vand.u32 15, %v462_v44  ;;  %v1961_v59 = vrot.slane %v1959_v5, 3 }
  0xec   : > { %v1964_v37 = vrot.slane %v1962_v39, 4  ;;  %v2911_v38 = vrot.slane %v2909_v11, 1  ;;  %v1304_v2 = vshll.u32 %v1035_v55, 16  ;;  %v1308_v25 = vshrl.u32 %v1035_v55, 16 }
  0xed   : > { %v2351_v19 = vsel %vm2319_vm9, 65537, %v11065_v32  ;;  %vm877_vm6 = vcmp.eq.s32.totalorder %v665_v49, 0  ;;  %vm9076_vm4 = vcmp.eq.s32.totalorder %v672_v30, 15  ;;  %vm11191_vm7 = vsmask.f32 7424 }
  0xee   : > { %v9080_v8 = vor.u32 %v1964_v37, %v1961_v59  ;;  %v2912_v56 = vsel %vm11191_vm7, %v2907_v21, %v2911_v38  ;;  %v1306_v47 = vrot.slane %v1304_v2, 5  ;;  %v2602_v34 = vshrl.u32 %v2351_v19, 16  ;;  %vm1005_vm0 = vmpackc.low %vm877_vm6, %vm877_vm6 }
  0xef   : > { %7312 = vmatmul.mubr.bf16.gmra.mxu0 %v2912_v56  ;;  %v1310_v33 = vrot.slane %v1308_v25, 4  ;;  %v2605_v44 = vshll.u32 %v2351_v19, 16  ;;  %v2915_v5 = vor.u32 %v2913_v51, %v2911_v38  ;;  %v1037_v39 = vsel %vm1005_vm0, 65537, %v11065_v32  ;;  %vm2321_vm9 = vmpackc.low %vm9076_vm4, %vm9076_vm4 }
  0xf0   : > { %vm11192_vm11 = vsmask.f32 4352  ;;  %v1307_v37 = vsel %vm8099_vm12, %v8088_v10, %v1306_v47  ;;  %v2604_v2 = vrot.slane %v2602_v34, 7  ;;  %v1324_v59 = vshll.u32 %v1037_v39, 16 }
  0xf1   : > { %v1966_v11 = vsel %vm11192_vm11, %v1956_v4, %v9080_v8  ;;  %v1311_v21 = vor.u32 %v1310_v33, %v1306_v47  ;;  %vm9092_vm6 = vcmp.ne.s16.totalorder %v1307_v37, 0  ;;  %v11193_v25 = vmov 0 }
  0xf2   : > { %7264 = vmatmul.mubr.bf16.gmra.mxu1 %v1966_v11  ;;  %v11194_v25 = vsel %vm9092_vm6, 4294967295, %v11193_v25  ;;  %v1328_v19 = vshrl.u32 %v1037_v39, 16  ;;  %v2353_v60 = vsel %vm2321_vm9, 65537, %v11065_v32  ;;  %v1422_v55 = vsel %vm9092_vm6, 0, %v9048_v28 }
  0xf3   : > { %11195 = vst [vmem:[#allocation58_spill] sm:$0xff] %v11194_v25  ;;  %v2607_v4 = vor.u32 %v2605_v44, %v2604_v2  ;;  %v1326_v51 = vrot.slane %v1324_v59, 5  ;;  %v2609_v49 = vrot.slane %v2604_v2, 4  ;;  %v1312_v30 = vrot.slane %v1311_v21, 4 }
  0xf4   : > { %v1330_v38 = vrot.slane %v1328_v19, 4  ;;  %v2620_v56 = vshrl.u32 %v2353_v60, 16  ;;  %v2623_v34 = vshll.u32 %v2353_v60, 16  ;;  %v463_v44 = vadd.s32 240, %v8029_v35  ;;  %v9128_v19 = vld [vmem:[%s8038_s14 + $0x74] sm:$0xf] }
  0xf5   : > { %v2608_v47 = vsel %vm8108_vm14, %v8104_v17, %v2607_v4  ;;  %v1327_v33 = vsel %vm8099_vm12, %v8088_v10, %v1326_v51  ;;  %v9109_v39 = vsel %vm8108_vm14, %v2609_v49, %v8083_v7  ;;  %v1317_v11 = vsel %vm8099_vm12, %v1312_v30, %v8069_v54  ;;  %11206 = vst [vmem:[#allocation63_spill] sm:$0xff] %v9128_v19 }
  0xf6   : > { %11196 = vst [vmem:[#allocation59_spill] sm:$0xff] %v9109_v39  ;;  %vm9115_vm4 = vcmp.ne.s16.totalorder %v2608_v47, 0  ;;  %v11197_v37 = vmov 0  ;;  %v1331_v2 = vor.u32 %v1330_v38, %v1326_v51  ;;  %vm9119_vm11 = vcmp.ne.s16.totalorder %v1327_v33, 0 }
  0xf7   : > { %v11198_v37 = vsel %vm9115_vm4, 4294967295, %v11197_v37  ;;  %v11200_v59 = vmov 0  ;;  %vm9123_vm7 = vcmp.ne.s16.totalorder %v1317_v11, 0  ;;  %v11203_v21 = vmov 0  ;;  %v9141_v11 = vld [vmem:[%s8038_s14 + $0x78] sm:$0xf] }
  0xf8   : > { %11199 = vst [vmem:[#allocation60_spill] sm:$0xff] %v11198_v37  ;;  %v11201_v59 = vsel %vm9119_vm11, 4294967295, %v11200_v59  ;;  %v11204_v21 = vsel %vm9123_vm7, 4294967295, %v11203_v21  ;;  %v2706_v60 = vsel %vm9115_vm4, 0, %v9128_v19  ;;  %v1424_v4 = vsel %vm9119_vm11, 0, %v9128_v19  ;;  %11207 = vst [vmem:[#allocation64_spill] sm:$0xff] %v9141_v11 }
  0xf9   : > { %11202 = vst [vmem:[#allocation61_spill] sm:$0xff] %v11201_v59  ;;  %11205 = vst [vmem:[#allocation62_spill] sm:$0xff] %v11204_v21  ;;  %v2622_v49 = vrot.slane %v2620_v56, 7  ;;  %v1423_v51 = vsel %vm9123_vm7, 0, %v9066_v1  ;;  %v6494_v30 = vcombine.low %v2705_v26, %v2706_v60  ;;  %v1332_v38 = vrot.slane %v1331_v2, 4 }
  0xfa   : > { %vm10963_vm0 = vcmp.ne.s16.totalorder %v9109_v39, 0  ;;  %v6453_v47 = vcombine.low %v1422_v55, %v1423_v51  ;;  %v679_v25 = vand.u32 15, %v463_v44  ;;  %v464_v26 = vadd.s32 248, %v8029_v35 }
  0xfb   : > { %v2625_v33 = vor.u32 %v2623_v34, %v2622_v49  ;;  %v2707_v37 = vsel %vm10963_vm0, 0, %v9141_v11  ;;  %v2917_v59 = vshll.u32 %v6494_v30, 16  ;;  %v1337_v56 = vsel %vm8099_vm12, %v1332_v38, %v8069_v54 }
  0xfc   : > { %v2921_v21 = vshrl.u32 %v6494_v30, 16  ;;  %v1968_v2 = vshrl.u32 %v6453_v47, 16  ;;  %v1971_v60 = vshll.u32 %v6453_v47, 16  ;;  %vm9150_vm9 = vcmp.ne.s16.totalorder %v1337_v56, 0  ;;  %v9165_v56 = vld [vmem:[%s8038_s14 + $0x7c] sm:$0xf] }
  0xfd   : > { %v11208_v55 = vmov 0  ;;  %v2626_v34 = vsel %vm8108_vm14, %v8104_v17, %v2625_v33  ;;  %v2919_v44 = vrot.slane %v2917_v59, 1  ;;  %v1425_v51 = vsel %vm9150_vm9, 0, %v9141_v11 }
  0xfe   : > { %v11209_v55 = vsel %vm9150_vm9, 4294967295, %v11208_v55  ;;  %vm9160_vm0 = vcmp.ne.s16.totalorder %v2626_v34, 0  ;;  %v11211_v38 = vmov 0  ;;  %vm879_vm4 = vcmp.eq.s32.totalorder %v679_v25, 0 }
  0xff   : > { %11210 = vst [vmem:[#allocation65_spill] sm:$0xff] %v11209_v55  ;;  %v11212_v38 = vsel %vm9160_vm0, 4294967295, %v11211_v38  ;;  %v1970_v35 = vrot.slane %v1968_v2, 3  ;;  %v1973_v30 = vrot.slane %v1971_v60, 4  ;;  %v6454_v47 = vcombine.low %v1424_v4, %v1425_v51  ;;  %vm1007_vm11 = vmpackc.low %vm879_vm4, %vm879_vm4 }
 0x100   : > { %11213 = vst [vmem:[#allocation66_spill] sm:$0xff] %v11212_v38  ;;  %v2708_v39 = vsel %vm9160_vm0, 0, %v9165_v56  ;;  %vm11214_vm7 = vsmask.f32 7424  ;;  %v2923_v55 = vor.u32 %v2921_v21, %v2919_v44  ;;  %v1039_v34 = vsel %vm1007_vm11, 65537, %v11065_v32 }
 0x101   : > { %v2920_v59 = vsel %vm11214_vm7, %v2915_v5, %v2919_v44  ;;  %v6495_v33 = vcombine.low %v2707_v37, %v2708_v39  ;;  %v1974_v11 = vor.u32 %v1973_v30, %v1970_v35  ;;  %v1977_v19 = vshrl.u32 %v6454_v47, 16  ;;  %v9206_v30 = vld [vmem:[%s8038_s14 + $0x84] sm:$0xf] }
 0x102   : > { %7315 = vmatprep.mubr.bf16.mxu0 %v2920_v59  ;;  %v1980_v25 = vshll.u32 %v6454_v47, 16  ;;  %v1344_v2 = vshll.u32 %v1039_v34, 16  ;;  %v1348_v4 = vshrl.u32 %v1039_v34, 16  ;;  %v686_v51 = vand.u32 15, %v464_v26  ;;  %v7824_v59 = vld [vmem:[%s8038_s14 + $0x14] sm:$0xf] }
 0x103   : > { %v2925_v60 = vshll.u32 %v6495_v33, 16  ;;  %v2627_v1 = vrot.slane %v2622_v49, 4  ;;  %vm11215_vm9 = vsmask.f32 4352  ;;  %v1979_v28 = vrot.slane %v1977_v19, 3 }
 0x104   : > { %v1975_v38 = vsel %vm11215_vm9, %v9080_v8, %v1974_v11  ;;  %v1982_v9 = vrot.slane %v1980_v25, 4  ;;  %v1346_v43 = vrot.slane %v1344_v2, 5  ;;  %v1350_v39 = vrot.slane %v1348_v4, 4  ;;  %v9215_v34 = vld [vmem:[%s8038_s14 + $0x18] sm:$0xf] }
 0x105   : > { %7267 = vmatprep.mubr.bf16.mxu1 %v1975_v38  ;;  %v2927_v5 = vrot.slane %v2925_v60, 1  ;;  %vm912_vm4 = vcmp.eq.s32.totalorder %v686_v51, 15  ;;  %v9177_v37 = vsel %vm8108_vm14, %v2627_v1, %v8083_v7  ;;  %v2929_v8 = vshrl.u32 %v6495_v33, 16  ;;  %v9197_v38 = vld [vmem:[%s8038_s14 + $0x80] sm:$0xf] }
 0x106   : > { %11216 = vst [vmem:[#allocation67_spill] sm:$0xff] %v9177_v37  ;;  %v9179_v21 = vor.u32 %v1982_v9, %v1979_v28  ;;  %v1347_v49 = vsel %vm8099_vm12, %v8088_v10, %v1346_v43  ;;  %vm2323_vm11 = vmpackc.low %vm912_vm4, %vm912_vm4  ;;  %vm10989_vm7 = vcmp.ne.s16.totalorder %v9177_v37, 0  ;;  %vm11217_vm9 = vsmask.f32 7424 }
 0x107   : > { %v2928_v19 = vsel %vm11217_vm9, %v2923_v55, %v2927_v5  ;;  %v1351_v26 = vor.u32 %v1350_v39, %v1346_v43  ;;  %vm9186_vm0 = vcmp.ne.s16.totalorder %v1347_v49, 0  ;;  %v11218_v44 = vmov 0  ;;  %v9229_v49 = vld [vmem:[%s8038_s14 + $0x88] sm:$0xf] }
 0x108   : > { %v11219_v44 = vsel %vm9186_vm0, 4294967295, %v11218_v44  ;;  %v2355_v7 = vsel %vm2323_vm11, 65537, %v11065_v32  ;;  %vm11220_vm6 = vsmask.f32 4352  ;;  %7316 = vmatmul.mubr.bf16.gmra.mxu0 %v2928_v19  ;;  %v1426_v28 = vsel %vm9186_vm0, 0, %v9165_v56 }
 0x109   : > { %v1984_v9 = vsel %vm11220_vm6, %v1974_v11, %v9179_v21  ;;  %v2638_v1 = vshrl.u32 %v2355_v7, 16  ;;  %v2641_v55 = vshll.u32 %v2355_v7, 16  ;;  %v1352_v43 = vrot.slane %v1351_v26, 4 }
 0x10a   : > { %7268 = vmatmul.mubr.bf16.gmra.mxu1 %v1984_v9  ;;  %v2709_v35 = vsel %vm10989_vm7, 0, %v9197_v38  ;;  %v9202_v32 = vor.u32 %v2929_v8, %v2927_v5  ;;  %vm10990_vm6 = vcmp.ne.s16.totalorder %v8088_v10, 0  ;;  %v3204_v33 = vsel %vm8201_vm2, 0, %v7824_v59 }
 0x10b   : > { %v2640_v11 = vrot.slane %v2638_v1, 7  ;;  %v1428_v47 = vsel %vm10990_vm6, 0, %v9206_v30  ;;  %v3205_v25 = vsel %vm8205_vm3, 0, %v9215_v34  ;;  %v1357_v2 = vsel %vm8099_vm12, %v1352_v43, %v8069_v54 }
 0x10c   : > { %v6456_v60 = vcombine.low %v1428_v47, %v1428_v47  ;;  %v6523_v4 = vcombine.low %v3204_v33, %v3205_v25  ;;  %v3336_v51 = vshrl.u32 %v8169_v45, 16  ;;  %vm9224_vm4 = vcmp.ne.s16.totalorder %v1357_v2, 0 }
 0x10d   : > { %v11221_v5 = vmov 0  ;;  %v2643_v39 = vor.u32 %v2641_v55, %v2640_v11  ;;  %v2645_v8 = vrot.slane %v2640_v11, 4  ;;  %v3339_v19 = vshll.u32 %v8169_v45, 16 }
 0x10e   : > { %v11222_v5 = vsel %vm9224_vm4, 4294967295, %v11221_v5  ;;  %v1427_v26 = vsel %vm9224_vm4, 0, %v9197_v38  ;;  %v1995_v15 = vshrl.u32 %v6456_v60, 16  ;;  %v1998_v54 = vshll.u32 %v6456_v60, 16 }
 0x10f   : > { %11223 = vst [vmem:[#allocation68_spill] sm:$0xff] %v11222_v5  ;;  %v3338_v7 = vrot.slane %v3336_v51, 3  ;;  %v6455_v9 = vcombine.low %v1426_v28, %v1427_v26  ;;  %v2644_v1 = vsel %vm8108_vm14, %v8104_v17, %v2643_v39  ;;  %vm9238_vm12 = vcmp.ne.s16.totalorder %v2645_v8, 0 }
 0x110   : > { %v11224_v43 = vmov 0  ;;  %v3341_v55 = vrot.slane %v3339_v19, 4  ;;  %vm9242_vm11 = vcmp.ne.s16.totalorder %v2644_v1, 0  ;;  %v11227_v11 = vmov 0 }
 0x111   : > { %v11225_v43 = vsel %vm9238_vm12, 4294967295, %v11224_v43  ;;  %v11228_v11 = vsel %vm9242_vm11, 4294967295, %v11227_v11  ;;  %v1997_v45 = vrot.slane %v1995_v15, 3  ;;  %v2000_v47 = vrot.slane %v1998_v54, 4 }
 0x112   : > { %11226 = vst [vmem:[#allocation69_spill] sm:$0xff] %v11225_v43  ;;  %11229 = vst [vmem:[#allocation70_spill] sm:$0xff] %v11228_v11  ;;  %v2711_v59 = vsel %vm9238_vm12, 0, %v9229_v49  ;;  %v1986_v28 = vshrl.u32 %v6455_v9, 16  ;;  %v1989_v33 = vshll.u32 %v6455_v9, 16  ;;  %v2710_v17 = vsel %vm9242_vm11, 0, %v9206_v30 }
 0x113   : > { %v6497_v20 = vcombine.low %v2711_v59, %v2711_v59  ;;  %v6496_v25 = vcombine.low %v2709_v35, %v2710_v17  ;;  %v2001_v2 = vor.u32 %v2000_v47, %v1997_v45  ;;  %v3342_v60 = vor.u32 %v3341_v55, %v3338_v7  ;;  %v9253_v9 = vld [vmem:[%s8038_s14 + $0x1c] sm:$0xf]  ;;  %v9259_v7 = vld [vmem:[%s8038_s14 + $0x20] sm:$0xf] }
 0x114   : > { %v3344_v51 = vshrl.u32 %v6523_v4, 16  ;;  %v1988_v39 = vrot.slane %v1986_v28, 3  ;;  %v1991_v8 = vrot.slane %v1989_v33, 4  ;;  %v3347_v26 = vshll.u32 %v6523_v4, 16  ;;  %v9265_v28 = vld [vmem:[%s8038_s14 + $0x24] sm:$0xf] }
 0x115   : > { %v2941_v19 = vshll.u32 %v6497_v20, 16  ;;  %v2933_v15 = vshll.u32 %v6496_v25, 16  ;;  %v2937_v54 = vshrl.u32 %v6496_v25, 16  ;;  %v3206_v59 = vsel %vm8435_vm8, 0, %v9253_v9  ;;  %v9271_v20 = vld [vmem:[%s8038_s14 + $0x28] sm:$0xf] }
 0x116   : > { %v3346_v1 = vrot.slane %v3344_v51, 3  ;;  %v1992_v35 = vor.u32 %v1991_v8, %v1988_v39  ;;  %v3349_v45 = vrot.slane %v3347_v26, 4  ;;  %v3207_v55 = vsel %vm8480_vm13, 0, %v9259_v7 }
 0x117   : > { %v2943_v17 = vrot.slane %v2941_v19, 1  ;;  %v2935_v47 = vrot.slane %v2933_v15, 1  ;;  %v6524_v4 = vcombine.low %v3206_v59, %v3207_v55  ;;  %v3208_v33 = vsel %vm8493_vm15, 0, %v9265_v28 }
 0x118   : > { %v3209_v25 = vsel %vm8521_vm10, 0, %v9271_v20  ;;  %vm11230_vm14 = vsmask.f32 4352  ;;  %v3350_v8 = vor.u32 %v3349_v45, %v3346_v1  ;;  %vm11232_vm7 = vsmask.f32 7424 }
 0x119   : > { %v1993_v51 = vsel %vm11230_vm14, %v9179_v21, %v1992_v35  ;;  %vm11231_vm9 = vmmov %vm11230_vm14  ;;  %v6525_v19 = vcombine.low %v3208_v33, %v3209_v25  ;;  %v2936_v26 = vsel %vm11232_vm7, %v9202_v32, %v2935_v47  ;;  %v2939_v15 = vor.u32 %v2937_v54, %v2935_v47  ;;  %v9283_v21 = vld [vmem:[%s8038_s14 + $0x2c] sm:$0xf]  ;;  %v9296_v33 = vld [vmem:[%s8038_s14 + $0x34] sm:$0xf] }
 0x11a   : > { %v2002_v39 = vsel %vm11231_vm9, %v1992_v35, %v2001_v2  ;;  %7271 = vmatprep.mubr.bf16.mxu1 %v1993_v51  ;;  %v3353_v59 = vshrl.u32 %v6524_v4, 16  ;;  %v3356_v55 = vshll.u32 %v6524_v4, 16  ;;  %7319 = vmatprep.mubr.bf16.mxu0 %v2936_v26  ;;  %vm11233_vm6 = vmmov %vm11231_vm9  ;;  %v3210_v2 = vsel %vm8559_vm5, 0, %v9283_v21  ;;  %v9290_v35 = vld [vmem:[%s8038_s14 + $0x30] sm:$0xf] }
 0x11b   : > { %7272 = vmatmul.mubr.bf16.gmra.mxu1 %v2002_v39  ;;  %v3351_v43 = vsel %vm11233_vm6, %v3342_v60, %v3350_v8  ;;  %v3362_v11 = vshrl.u32 %v6525_v19, 16  ;;  %v3365_v37 = vshll.u32 %v6525_v19, 16  ;;  %vm11234_vm14 = vmmov %vm11232_vm7  ;;  %v3211_v60 = vsel %vm8594_vm1, 0, %v9290_v35  ;;  %v9303_v25 = vld [vmem:[%s8038_s14 + $0x38] sm:$0xf] }
 0x11c   : > { %v2944_v1 = vsel %vm11234_vm14, %v2939_v15, %v2943_v17  ;;  %7339 = vmatprep.mubr.bf16.mxu1 %v3351_v43  ;;  %v3355_v32 = vrot.slane %v3353_v59, 3  ;;  %v3358_v54 = vrot.slane %v3356_v55, 4  ;;  %v6526_v4 = vcombine.low %v3210_v2, %v3211_v60  ;;  %v9309_v39 = vld [vmem:[%s8038_s14 + $0x3c] sm:$0xf] }
 0x11d   : > { %7320 = vmatmul.mubr.bf16.gmra.mxu0 %v2944_v1  ;;  %v3364_v45 = vrot.slane %v3362_v11, 3  ;;  %v3367_v47 = vrot.slane %v3365_v37, 4  ;;  %vm11235_vm7 = vnez %v11095_v42  ;;  %vm11236_vm6 = vnez %v11099_v16  ;;  %v9315_v11 = vld [vmem:[%s8038_s14 + $0x40] sm:$0xf] }
 0x11e   : > { %v3212_v17 = vsel %vm11235_vm7, 0, %v9296_v33  ;;  %7387 = vmatprep.mubr.bf16.mxu0 %v8197_v58  ;;  %v3359_v43 = vor.u32 %v3358_v54, %v3355_v32  ;;  %v3213_v51 = vsel %vm11236_vm6, 0, %v9303_v25  ;;  %vm11237_vm9 = vnez %v11105_v53  ;;  %v11356_v42 = vld [vmem:[#allocation31_spill] sm:$0xff] }
 0x11f   : > { %v3214_v37 = vsel %vm11237_vm9, 0, %v9309_v39  ;;  %vm11238_vm14 = vnez %v11109_v29  ;;  %v3368_v58 = vor.u32 %v3367_v47, %v3364_v45  ;;  %v3371_v26 = vshrl.u32 %v6526_v4, 16  ;;  %v7711_v45 = vld [vmem:[%s10790_s1 + $0x170] sm:$0xff]  }
 0x120   : > { %v3215_v19 = vsel %vm11238_vm14, 0, %v9315_v11  ;;  %v3374_v15 = vshll.u32 %v6526_v4, 16  ;;  %v6527_v59 = vcombine.low %v3212_v17, %v3213_v51  ;;  %vm11239_vm12 = vsmask.f32 4352 }
 0x121   : > { %v3360_v55 = vsel %vm11239_vm12, %v3350_v8, %v3359_v43  ;;  %v6528_v2 = vcombine.low %v3214_v37, %v3215_v19  ;;  %vm11240_vm11 = vnez %v11117_v48  ;;  %vm11241_vm9 = vnez %v11121_v46  ;;  %vm11242_vm6 = vmmov %vm11239_vm12 }
 0x122   : > { %v3216_v1 = vsel %vm11240_vm11, 0, %v8813_v36  ;;  %v3217_v32 = vsel %vm11241_vm9, 0, %v8803_v18  ;;  %v3369_v54 = vsel %vm11242_vm6, %v3359_v43, %v3368_v58  ;;  %v3373_v60 = vrot.slane %v3371_v26, 3  ;;  %v7712_v36 = vld [vmem:[%s10790_s1 + $0x1b0] sm:$0xff]   ;;  %v7836_v43 = vld [vmem:[%s10790_s1 + $0x178] sm:$0xff]  }
 0x123   : > { %v3376_v29 = vrot.slane %v3374_v15, 4  ;;  %v3380_v47 = vshrl.u32 %v6527_v59, 16  ;;  %v3383_v4 = vshll.u32 %v6527_v59, 16  ;;  %v6529_v8 = vcombine.low %v3216_v1, %v3217_v32  ;;  %7340 = vmatmul.mubr.bf16.vlgmr.msra.gmra.mxu1 %v3360_v55  ;;  %v7713_v59 = vld [vmem:[%s10790_s1 + $0x168] sm:$0xff]  }
 0x124   : > { %v3389_v37 = vshrl.u32 %v6528_v2, 16  ;;  %v3392_v18 = vshll.u32 %v6528_v2, 16  ;;  %7420 = vmatpush3.bf16.msra.mxu1 %v7836_v43  ;;  %7343 = vmatprep.mubr.bf16.mxu1 %v3369_v54  ;;  %vm11243_vm12 = vnez %v11127_v12  ;;  %vm11244_vm6 = vnez %v11131_v52 }
 0x125   : > { %v3377_v17 = vor.u32 %v3376_v29, %v3373_v60  ;;  %v3382_v51 = vrot.slane %v3380_v47, 3  ;;  %v3385_v19 = vrot.slane %v3383_v4, 4  ;;  %v3398_v26 = vshrl.u32 %v6529_v8, 16  ;;  %7388 = vmatmul.mubr.bf16.vlgmr.msra.gmra.mxu0 %v8231_v13  ;;  %7421 = vmatprep.subr.bf16.mxu1 %v7711_v45  ;;  %v7714_v60 = vld [vmem:[%s10790_s1 + $0x1a8] sm:$0xff]   ;;  %v9360_v47 = vpop.f32.mrf.mxu0  ;;  %v9362_v4 = vpop.f32.mrf.mxu1  ;;  %v11262_v13 = vld [vmem:[#allocation47_spill] sm:$0xff] }
 0x126   : > { %v3218_v15 = vsel %vm11243_vm12, 0, %v8841_v27  ;;  %v3219_v29 = vsel %vm11244_vm6, 0, %v8865_v41  ;;  %v3401_v55 = vshll.u32 %v6529_v8, 16  ;;  %vm11245_vm9 = vnez %v11137_v22  ;;  %v7837_v27 = vld [vmem:[%s10790_s1 + $0x1b8] sm:$0xff]   ;;  %7391 = vmatprep.mubr.bf16.mxu0 %v8266_v31  ;;  %11247 = vst [vmem:[#allocation71_spill] sm:$0xff] %v9360_v47  ;;  %11248 = vst [vmem:[#allocation72_spill] sm:$0xff] %v9362_v4 }
 0x127   : > { %v3220_v2 = vsel %vm11245_vm9, 0, %v8898_v3  ;;  %7468 = vmatpush3.bf16.msra.mxu0 %v7837_v27  ;;  %v3386_v41 = vor.u32 %v3385_v19, %v3382_v51  ;;  %vm11246_vm6 = vnez %v11141_v57  ;;  %v3391_v32 = vrot.slane %v3389_v37, 3  ;;  %v7715_v37 = vld [vmem:[%s10790_s1 + $0x160] sm:$0xff]   ;;  %v11254_v27 = vld [vmem:[#allocation42_spill] sm:$0xff]  ;;  %v11261_v31 = vld [vmem:[#allocation52_spill] sm:$0xff] }
 0x128   : > { %v3221_v1 = vsel %vm11246_vm6, 0, %v8904_v23  ;;  %7469 = vmatprep.subr.bf16.mxu0 %v7712_v36  ;;  %v3394_v54 = vrot.slane %v3392_v18, 4  ;;  %v6530_v3 = vcombine.low %v3218_v15, %v3219_v29  ;;  %vm11249_vm9 = vsmask.f32 4352  ;;  %7422 = vmatpush3.bf16.msra.mxu1 %v7711_v45  ;;  %v11251_v18 = vld [vmem:[#allocation41_spill] sm:$0xff]  ;;  %v11253_v29 = vld [vmem:[#allocation46_spill] sm:$0xff]  ;;  %v9377_v45 = vpop.f32.mrf.mxu1 }
 0x129   : > { %v3378_v8 = vsel %vm11249_vm9, %v3368_v58, %v3377_v17  ;;  %v3400_v51 = vrot.slane %v3398_v26, 3  ;;  %v6531_v43 = vcombine.low %v3220_v2, %v3221_v1  ;;  %vm11250_vm12 = vmmov %vm11249_vm9  ;;  %7423 = vmatprep.subr.bf16.mxu1 %v7713_v59  ;;  %v3403_v23 = vrot.slane %v3401_v55, 4  ;;  %v9375_v58 = vpop.f32.mrf.mxu0  ;;  %11257 = vst [vmem:[#allocation73_spill] sm:$0xff] %v9377_v45  ;;  %v7716_v55 = vld [vmem:[%s10790_s1 + $0x1a0] sm:$0xff]   ;;  %v11258_v2 = vld [vmem:[#allocation49_spill] sm:$0xff] }
 0x12a   : > { %v3387_v19 = vsel %vm11250_vm12, %v3377_v17, %v3386_v41  ;;  %vm11252_vm6 = vnez %v11251_v18  ;;  %vm11255_vm11 = vnez %v11254_v27  ;;  %11256 = vst [vmem:[#allocation46_spill] sm:$0xff] %v9375_v58  ;;  %v3395_v17 = vor.u32 %v3394_v54, %v3391_v32  ;;  %v11259_v1 = vld [vmem:[#allocation45_spill] sm:$0xff]  ;;  %v9390_v45 = vpop.f32.mrf.mxu1 }
 0x12b   : > { %v3222_v15 = vsel %vm11252_vm6, 0, %v8948_v24  ;;  %v3223_v4 = vsel %vm11255_vm11, 0, %v11253_v29  ;;  %7470 = vmatpush3.bf16.msra.mxu0 %v7712_v36  ;;  %7344 = vmatmul.mubr.bf16.gmra.mxu1 %v3378_v8  ;;  %v3407_v26 = vshrl.u32 %v6530_v3, 16  ;;  %vm11260_vm9 = vnez %v11259_v1  ;;  %v9388_v58 = vpop.f32.mrf.mxu0  ;;  %11265 = vst [vmem:[#allocation52_spill] sm:$0xff] %v9390_v45  ;;  %v11266_v47 = vld [vmem:[#allocation13_spill] sm:$0xff]  ;;  %v11275_v45 = vld [vmem:[#allocation55_spill] sm:$0xff] }
 0x12c   : > { %7471 = vmatprep.subr.bf16.mxu0 %v7714_v60  ;;  %v3224_v24 = vsel %vm11260_vm9, 0, %v11258_v2  ;;  %vm11263_vm12 = vnez %v11262_v13  ;;  %11264 = vst [vmem:[#allocation49_spill] sm:$0xff] %v9388_v58  ;;  %7347 = vmatprep.mubr.bf16.mxu1 %v3387_v19  ;;  %v3410_v36 = vshll.u32 %v6530_v3, 16  ;;  %v3416_v32 = vshrl.u32 %v6531_v43, 16  ;;  %v7717_v2 = vld [vmem:[%s10790_s1 + $0x158] sm:$0xff]   ;;  %v11269_v58 = vld [vmem:[#allocation15_spill] sm:$0xff] }
 0x12d   : > { %v3225_v29 = vsel %vm11263_vm12, 0, %v11261_v31  ;;  %7424 = vmatpush3.bf16.msra.mxu1 %v7713_v59  ;;  %v3419_v54 = vshll.u32 %v6531_v43, 16  ;;  %v6532_v8 = vcombine.low %v3222_v15, %v3223_v4  ;;  %7392 = vmatmul.mubr.bf16.gmra.mxu0 %v11266_v47  ;;  %v3404_v27 = vor.u32 %v3403_v23, %v3400_v51  ;;  %v9396_v13 = vpop.f32.mrf.mxu0  ;;  %v9398_v31 = vpop.f32.mrf.mxu1  ;;  %v7718_v4 = vld [vmem:[%s10790_s1 + $0x198] sm:$0xff]   ;;  %v11282_v47 = vld [vmem:[#allocation17_spill] sm:$0xff] }
 0x12e   : > { %7425 = vmatprep.subr.bf16.mxu1 %v7715_v37  ;;  %11267 = vst [vmem:[#allocation74_spill] sm:$0xff] %v9396_v13  ;;  %11268 = vst [vmem:[#allocation75_spill] sm:$0xff] %v9398_v31  ;;  %7395 = vmatprep.mubr.bf16.mxu0 %v11269_v58  ;;  %v6533_v59 = vcombine.low %v3224_v24, %v3225_v29  ;;  %vm11270_vm12 = vsmask.f32 4352  ;;  %v3409_v43 = vrot.slane %v3407_v26, 3  ;;  %v3412_v23 = vrot.slane %v3410_v36, 4 }
 0x12f   : > { %7472 = vmatpush3.bf16.msra.mxu0 %v7714_v60  ;;  %v3396_v3 = vsel %vm11270_vm12, %v3386_v41, %v3395_v17  ;;  %v9405_v51 = vpop.f32.mrf.mxu0  ;;  %v9407_v19 = vpop.f32.mrf.mxu1  ;;  %v3418_v15 = vrot.slane %v3416_v32, 3  ;;  %v3421_v13 = vrot.slane %v3419_v54, 4  ;;  %v3425_v31 = vshrl.u32 %v6532_v8, 16  ;;  %vm11273_vm9 = vmmov %vm11270_vm12  ;;  %v7719_v41 = vld [vmem:[%s10790_s1 + $0x150] sm:$0xff]   ;;  %v11287_v1 = vld [vmem:[#allocation62_spill] sm:$0xff] }
 0x130   : > { %7473 = vmatprep.subr.bf16.mxu0 %v7716_v55  ;;  %11271 = vst [vmem:[#allocation76_spill] sm:$0xff] %v9405_v51  ;;  %11272 = vst [vmem:[#allocation77_spill] sm:$0xff] %v9407_v19  ;;  %v3405_v60 = vsel %vm11273_vm9, %v3395_v17, %v3404_v27  ;;  %v3428_v24 = vshll.u32 %v6532_v8, 16  ;;  %v3434_v29 = vshrl.u32 %v6533_v59, 16  ;;  %v3437_v58 = vshll.u32 %v6533_v59, 16  ;;  %v11276_v19 = vld [vmem:[#allocation51_spill] sm:$0xff] }
 0x131   : > { %7426 = vmatpush3.bf16.msra.mxu1 %v7715_v37  ;;  %v9413_v26 = vpop.f32.mrf.mxu1  ;;  %vm11277_vm12 = vnez %v11276_v19  ;;  %v11278_v36 = vld [vmem:[#allocation57_spill] sm:$0xff]  ;;  %v9424_v8 = vpop.f32.mrf.mxu0  ;;  %v3427_v59 = vrot.slane %v3425_v31, 3  ;;  %v11286_v19 = vld [vmem:[#allocation64_spill] sm:$0xff] }
 0x132   : > { %7427 = vmatprep.subr.bf16.mxu1 %v7717_v2  ;;  %11274 = vst [vmem:[#allocation78_spill] sm:$0xff] %v9413_v26  ;;  %v3226_v37 = vsel %vm11277_vm12, 0, %v11275_v45  ;;  %v11279_v32 = vld [vmem:[#allocation53_spill] sm:$0xff]  ;;  %11281 = vst [vmem:[#allocation55_spill] sm:$0xff] %v9424_v8  ;;  %v3422_v26 = vor.u32 %v3421_v13, %v3418_v15  ;;  %v3430_v45 = vrot.slane %v3428_v24, 4  ;;  %v7721_v13 = vld [vmem:[%s10790_s1 + $0x148] sm:$0xff]  }
 0x133   : > { %7474 = vmatpush3.bf16.msra.mxu0 %v7716_v55  ;;  %vm11280_vm11 = vnez %v11279_v32  ;;  %7348 = vmatmul.mubr.bf16.gmra.mxu1 %v3396_v3  ;;  %v7720_v17 = vld [vmem:[%s10790_s1 + $0x190] sm:$0xff]   ;;  %v3413_v55 = vor.u32 %v3412_v23, %v3409_v43  ;;  %v11284_v3 = vld [vmem:[#allocation58_spill] sm:$0xff]  ;;  %v9436_v31 = vpop.f32.mrf.mxu1  ;;  %v3436_v43 = vrot.slane %v3434_v29, 3  ;;  %v3439_v23 = vrot.slane %v3437_v58, 4  ;;  %v7722_v15 = vld [vmem:[%s10790_s1 + $0x188] sm:$0xff]   ;;  %v9445_v24 = vpop.f32.mrf.mxu0 }
 0x134   : > { %v3227_v54 = vsel %vm11280_vm11, 0, %v11278_v36  ;;  %7475 = vmatprep.subr.bf16.mxu0 %v7718_v4  ;;  %7351 = vmatprep.mubr.bf16.mxu1 %v3405_v60  ;;  %v11283_v36 = vld [vmem:[#allocation63_spill] sm:$0xff]  ;;  %vm11285_vm9 = vnez %v11284_v3  ;;  %vm11288_vm11 = vnez %v11287_v1  ;;  %11289 = vst [vmem:[#allocation57_spill] sm:$0xff] %v9436_v31  ;;  %v9443_v60 = vld [vmem:[%s8038_s14 + $0x8c] sm:$0xf]  ;;  %v3431_v31 = vor.u32 %v3430_v45, %v3427_v59 }
 0x135   : > { %7428 = vmatpush3.bf16.msra.mxu1 %v7717_v2  ;;  %7396 = vmatmul.mubr.bf16.gmra.mxu0 %v11282_v47  ;;  %v6534_v51 = vcombine.low %v3226_v37, %v3227_v54  ;;  %v3228_v32 = vsel %vm11285_vm9, 0, %v11283_v36  ;;  %v3229_v18 = vsel %vm11288_vm11, 0, %v11286_v19  ;;  %v11290_v2 = vld [vmem:[#allocation19_spill] sm:$0xff]  ;;  %11291 = vst [vmem:[#allocation63_spill] sm:$0xff] %v9445_v24  ;;  %vm11292_vm11 = vsmask.f32 4352 }
 0x136   : > { %7429 = vmatprep.subr.bf16.mxu1 %v7719_v41  ;;  %7399 = vmatprep.mubr.bf16.mxu0 %v11290_v2  ;;  %v3414_v19 = vsel %vm11292_vm11, %v3404_v27, %v3413_v55  ;;  %v6535_v37 = vcombine.low %v3228_v32, %v3229_v18  ;;  %v11293_v54 = vld [vmem:[#allocation61_spill] sm:$0xff]  ;;  %vm11297_vm6 = vmmov %vm11292_vm11  ;;  %v7724_v27 = vld [vmem:[%s10790_s1 + $0x140] sm:$0xff]   ;;  %v9460_v18 = vor.u32 %v3439_v23, %v3436_v43  ;;  %vm11299_vm11 = vcmp.ne.s16.totalorder %v8088_v10, 0 }
 0x137   : > { %7476 = vmatpush3.bf16.msra.mxu0 %v7718_v4  ;;  %vm11294_vm9 = vnez %v11293_v54  ;;  %v11295_v4 = vld [vmem:[#allocation65_spill] sm:$0xff]  ;;  %v3423_v29 = vsel %vm11297_vm6, %v3413_v55, %v3422_v26  ;;  %v3443_v2 = vshrl.u32 %v6534_v51, 16  ;;  %v3446_v47 = vshll.u32 %v6534_v51, 16  ;;  %v7725_v55 = vld [vmem:[%s10790_s1 + $0x180] sm:$0xff]   ;;  %v11301_v45 = vld [vmem:[#allocation4_spill] sm:$0xff] }
 0x138   : > { %7477 = vmatprep.subr.bf16.mxu0 %v7720_v17  ;;  %v3230_v36 = vsel %vm11294_vm9, 0, %v9165_v56  ;;  %vm11296_vm12 = vnez %v11295_v4  ;;  %v3232_v56 = vsel %vm9186_vm0, 0, %v9206_v30  ;;  %v3234_v51 = vsel %vm11299_vm11, 0, %v9443_v60  ;;  %vm11304_vm11 = vmmov %vm11297_vm6 }
 0x139   : > { %7430 = vmatpush3.bf16.msra.mxu1 %v7719_v41  ;;  %v3231_v58 = vsel %vm11296_vm12, 0, %v9197_v38  ;;  %v9458_v41 = vpop.f32.mrf.mxu1  ;;  %v3233_v38 = vsel %vm9224_vm4, 0, %v9229_v49  ;;  %v3452_v59 = vshrl.u32 %v6535_v37, 16  ;;  %v3455_v30 = vshll.u32 %v6535_v37, 16 }
 0x13a   : > { %7431 = vmatprep.subr.bf16.mxu1 %v7721_v13  ;;  %11298 = vst [vmem:[#allocation58_spill] sm:$0xff] %v9458_v41  ;;  %v6536_v32 = vcombine.low %v3230_v36, %v3231_v58  ;;  %v6537_v43 = vcombine.low %v3232_v56, %v3233_v38  ;;  %v6538_v23 = vcombine.low %v3234_v51, %v3234_v51  ;;  %v11303_v58 = vld [vmem:[#allocation8_spill] sm:$0xff] }
 0x13b   : > { %7478 = vmatpush3.bf16.msra.mxu0 %v7720_v17  ;;  %7352 = vmatmul.mubr.bf16.gmra.mxu1 %v3414_v19  ;;  %v9474_v17 = vpop.f32.mrf.mxu0  ;;  %v9480_v19 = vld [vmem:[%s10790_s1 + $0x1f8] sm:$0xff]   ;;  %v9482_v36 = vpop.f32.mrf.mxu1  ;;  %v3441_v37 = vsel %vm11304_vm11, %v3431_v31, %v9460_v18  ;;  %v11305_v51 = vld [vmem:[#allocation20_spill] sm:$0xff]  ;;  %v9564_v6 = vcombine.low %v9229_v49, %v9443_v60 }
 0x13c   : > { %7479 = vmatprep.subr.bf16.mxu0 %v7722_v15  ;;  %11300 = vst [vmem:[#allocation64_spill] sm:$0xff] %v9474_v17  ;;  %7355 = vmatprep.mubr.bf16.mxu1 %v3423_v29  ;;  %11302 = vst [vmem:[#allocation62_spill] sm:$0xff] %v9482_v36  ;;  %v3432_v17 = vsel %vm11297_vm6, %v3422_v26, %v3431_v31  ;;  %v3448_v29 = vrot.slane %v3446_v47, 4  ;;  %v3461_v56 = vshrl.u32 %v6536_v32, 16  ;;  %v3464_v38 = vshll.u32 %v6536_v32, 16  ;;  %v9497_v26 = vld [vmem:[%s10790_s1 + $0x238] sm:$0xff]  }
 0x13d   : > { %7432 = vmatpush3.bf16.msra.mxu1 %v7721_v13  ;;  %7400 = vmatmul.mubr.bf16.gmra.mxu0 %v11301_v45  ;;  %v3445_v13 = vrot.slane %v3443_v2, 3  ;;  %vm11306_vm4 = vcmp.ne.s16.totalorder %v11305_v51, 0  ;;  %v11307_v45 = vld [vmem:[#allocation23_spill] sm:$0xff]  ;;  %v9499_v31 = vpop.f32.mrf.mxu0  ;;  %v3454_v47 = vrot.slane %v3452_v59, 3  ;;  %v3457_v2 = vrot.slane %v3455_v30, 4  ;;  %v9508_v24 = vpop.f32.mrf.mxu1  ;;  %v11311_v30 = vld [vmem:[#allocation5_spill] sm:$0xff] }
 0x13e   : > { %7433 = vmatprep.subr.bf16.mxu1 %v7724_v27  ;;  %7403 = vmatprep.mubr.bf16.mxu0 %v11303_v58  ;;  %v4010_v41 = vsel %vm11306_vm4, 0, %v9215_v34  ;;  %vm11308_vm0 = vnez %v11307_v45  ;;  %11309 = vst [vmem:[#allocation61_spill] sm:$0xff] %v9499_v31  ;;  %v4533_v34 = vsel %vm8205_vm3, 0, %v9259_v7  ;;  %v3470_v32 = vshrl.u32 %v6537_v43, 16  ;;  %11310 = vst [vmem:[#allocation65_spill] sm:$0xff] %v9508_v24 }
 0x13f   : > { %7480 = vmatpush3.bf16.msra.mxu0 %v7722_v15  ;;  %v4011_v36 = vsel %vm11308_vm0, 0, %v9253_v9  ;;  %v4532_v15 = vsel %vm8201_vm2, 0, %v9253_v9  ;;  %v3473_v58 = vshll.u32 %v6537_v43, 16  ;;  %v3479_v45 = vshrl.u32 %v6538_v23, 16  ;;  %v9512_v61 = vpop.f32.mrf.mxu0  ;;  %vm11318_vm2 = vmmov %vm11297_vm6 }
 0x140   : > { %7481 = vmatprep.subr.bf16.mxu0 %v7725_v55  ;;  %v3482_v51 = vshll.u32 %v6538_v23, 16  ;;  %v6589_v59 = vcombine.low %v4010_v41, %v4011_v36  ;;  %v6630_v31 = vcombine.low %v4532_v15, %v4533_v34  ;;  %11312 = vst [vmem:[#allocation5_spill] sm:$0xff] %v9512_v61  ;;  %v3449_v62 = vor.u32 %v3448_v29, %v3445_v13  ;;  %v11313_v23 = vld [vmem:[#allocation10_spill] sm:$0xff]  ;;  %v9515_v41 = vpop.f32.mrf.mxu1  ;;  %v11315_v36 = vld [vmem:[#allocation12_spill] sm:$0xff]  ;;  %vm11319_vm3 = vmmov %vm11318_vm2 }
 0x141   : > { %7434 = vmatpush3.bf16.msra.mxu1 %v7724_v27  ;;  %v4144_v27 = vshll.u32 %v11311_v30, 16  ;;  %v3458_v9 = vor.u32 %v3457_v2, %v3454_v47  ;;  %v3463_v43 = vrot.slane %v3461_v56, 3  ;;  %v3466_v8 = vrot.slane %v3464_v38, 4  ;;  %11314 = vst [vmem:[#allocation79_spill] sm:$0xff] %v9515_v41  ;;  %v11316_v61 = vld [vmem:[#allocation6_spill] sm:$0xff]  ;;  %v9521_v56 = vpop.f32.mrf.mxu0  ;;  %vm11333_vm11 = vmmov %vm11318_vm2 }
 0x142   : > { %7515 = vmatprep.subr.bf16.mxu1 %v9480_v19  ;;  %v3472_v10 = vrot.slane %v3470_v32, 3  ;;  %v3475_v5 = vrot.slane %v3473_v58, 4  ;;  %v3481_v24 = vrot.slane %v3479_v45, 3  ;;  %v4149_v34 = vshll.u32 %v6589_v59, 16  ;;  %11317 = vst [vmem:[#allocation6_spill] sm:$0xff] %v9521_v56  ;;  %v11320_v32 = vld [vmem:[#allocation22_spill] sm:$0xff]  ;;  %v9532_v41 = vpop.f32.mrf.mxu1 }
 0x143   : > { %7482 = vmatpush3.bf16.msra.mxu0 %v7725_v55  ;;  %7356 = vmatmul.mubr.bf16.gmra.mxu1 %v3432_v17  ;;  %v3484_v55 = vrot.slane %v3482_v51, 4  ;;  %v4142_v17 = vshrl.u32 %v11311_v30, 16  ;;  %v4146_v15 = vrot.slane %v4144_v27, 1  ;;  %v4667_v13 = vshll.u32 %v11316_v61, 16  ;;  %v11322_v27 = vld [vmem:[#allocation24_spill] sm:$0xff]  ;;  %11324 = vst [vmem:[#allocation22_spill] sm:$0xff] %v9532_v41 }
 0x144   : > { %7563 = vmatprep.subr.bf16.mxu0 %v9497_v26  ;;  %7359 = vmatprep.mubr.bf16.mxu1 %v3441_v37  ;;  %v4664_v37 = vshrl.u32 %v11316_v61, 16  ;;  %v4672_v29 = vshrl.u32 %v6630_v31, 16  ;;  %v3450_v58 = vsel %vm11318_vm2, %v9460_v18, %v3449_v62  ;;  %v3459_v45 = vsel %vm11319_vm3, %v3449_v62, %v3458_v9 }
 0x145   : > { %7404 = vmatmul.mubr.bf16.gmra.mxu0 %v11313_v23  ;;  %v3467_v38 = vor.u32 %v3466_v8, %v3463_v43  ;;  %v4675_v51 = vshll.u32 %v6630_v31, 16  ;;  %v3476_v47 = vor.u32 %v3475_v5, %v3472_v10  ;;  %v3485_v2 = vor.u32 %v3484_v55, %v3481_v24  ;;  %v11329_v55 = vld [vmem:[#allocation26_spill] sm:$0xff] }
 0x146   : > { %7407 = vmatprep.mubr.bf16.mxu0 %v11315_v36  ;;  %vm11321_vm4 = vcmp.ne.s16.totalorder %v11320_v32, 0  ;;  %vm11323_vm6 = vnez %v11322_v27  ;;  %v4147_v36 = vor.u32 %v4146_v15, %v4142_v17  ;;  %v4151_v23 = vrot.slane %v4149_v34, 1  ;;  %v9557_v15 = vpop.f32.mrf.mxu1  ;;  %v11332_v34 = vld [vmem:[#allocation16_spill] sm:$0xff]  ;;  %11335 = vst [vmem:[#allocation26_spill] sm:$0xff] %v9564_v6 }
 0x147   : > { %v4012_v30 = vsel %vm11321_vm4, 0, %v9259_v7  ;;  %v4013_v61 = vsel %vm11323_vm6, 0, %v9265_v28  ;;  %v4153_v56 = vshrl.u32 %v6589_v59, 16  ;;  %v4666_v18 = vrot.slane %v4664_v37, 3  ;;  %v9540_v7 = vpop.f32.mrf.mxu0 }
 0x148   : > { %v4669_v62 = vrot.slane %v4667_v13, 4  ;;  %v4674_v8 = vrot.slane %v4672_v29, 3  ;;  %v4534_v10 = vsel %vm8435_vm8, 0, %v9265_v28  ;;  %v4535_v5 = vsel %vm8480_vm13, 0, %v9271_v20  ;;  %11325 = vst [vmem:[#allocation24_spill] sm:$0xff] %v9540_v7  ;;  %v11327_v28 = vld [vmem:[#allocation25_spill] sm:$0xff] }
 0x149   : > { %v4677_v24 = vrot.slane %v4675_v51, 4  ;;  %v9542_v31 = vcombine.low %v4012_v30, %v4013_v61  ;;  %v4536_v59 = vsel %vm8493_vm15, 0, %v9283_v21  ;;  %v4537_v43 = vsel %vm8521_vm10, 0, %v9290_v35  ;;  %11331 = vst [vmem:[#allocation25_spill] sm:$0xff] %v9557_v15  ;;  %vm11334_vm15 = vmmov %vm11318_vm2  ;;  %v11338_v61 = vld [vmem:[#allocation27_spill] sm:$0xff]  ;;  %v11358_v15 = vld [vmem:[#allocation33_spill] sm:$0xff] }
 0x14a   : > { %vm11328_vm8 = vcmp.ne.s16.totalorder %v11327_v28, 0  ;;  %vm11330_vm13 = vnez %v11329_v55  ;;  %v3468_v14 = vsel %vm11333_vm11, %v3458_v9, %v3467_v38  ;;  %v3477_v37 = vsel %vm11334_vm15, %v3467_v38, %v3476_v47  ;;  %vm11336_vm10 = vmmov %vm11318_vm2 }
 0x14b   : > { %7360 = vmatmul.mubr.bf16.gmra.mxu1 %v3450_v58  ;;  %v4014_v50 = vsel %vm11328_vm8, 0, %v9271_v20  ;;  %v4015_v17 = vsel %vm11330_vm13, 0, %v9283_v21  ;;  %v6631_v13 = vcombine.low %v4534_v10, %v4535_v5  ;;  %v3486_v29 = vsel %vm11336_vm10, %v3476_v47, %v3485_v2  ;;  %v11345_v5 = vld [vmem:[#allocation28_spill] sm:$0xff] }
 0x14c   : > { %7363 = vmatprep.mubr.bf16.mxu1 %v3459_v45  ;;  %vm11337_vm2 = vsmask.f32 7424  ;;  %v4155_v58 = vor.u32 %v4153_v56, %v4151_v23  ;;  %v6632_v21 = vcombine.low %v4536_v59, %v4537_v43  ;;  %v9570_v45 = vpop.f32.mrf.mxu0  ;;  %v4670_v51 = vor.u32 %v4669_v62, %v4666_v18  ;;  %v9587_v56 = vpop.f32.mrf.mxu1  ;;  %v11341_v62 = vld [vmem:[#allocation29_spill] sm:$0xff] }
 0x14d   : > { %7408 = vmatmul.mubr.bf16.gmra.mxu0 %v11326_v0  ;;  %v9568_v20 = vsel %vm11337_vm2, %v4147_v36, %v4151_v23  ;;  %v9572_v30 = vor.u32 %v4677_v24, %v4674_v8  ;;  %v4157_v9 = vshll.u32 %v9542_v31, 16  ;;  %v9575_v38 = vcombine.low %v4014_v50, %v4015_v17  ;;  %11340 = vst [vmem:[#allocation27_spill] sm:$0xff] %v9587_v56  ;;  %v9607_v50 = vld [vmem:[%s8038_s14 + $0x44] sm:$0xf]  ;;  %v11360_v0 = vld [vmem:[#allocation34_spill] sm:$0xff] }
 0x14e   : > { %7411 = vmatprep.mubr.bf16.mxu0 %v11332_v34  ;;  %v4161_v49 = vshrl.u32 %v9542_v31, 16  ;;  %vm11339_vm3 = vcmp.ne.s16.totalorder %v11338_v61, 0  ;;  %v4538_v23 = vsel %vm8559_vm5, 0, %v9296_v33  ;;  %v4539_v36 = vsel %vm8594_vm1, 0, %v9303_v25  ;;  %v9604_v59 = vpop.f32.mrf.mxu0  ;;  %11348 = vst [vmem:[#allocation29_spill] sm:$0xff] %v9607_v50 }
 0x14f   : > { %v4016_v47 = vsel %vm11339_vm3, 0, %v9290_v35  ;;  %v4681_v2 = vshrl.u32 %v6631_v13, 16  ;;  %v4684_v18 = vshll.u32 %v6631_v13, 16  ;;  %vm11342_vm4 = vcmp.ne.s16.totalorder %v11341_v62, 0  ;;  %v11343_v35 = vld [vmem:[#allocation30_spill] sm:$0xff] }
 0x150   : > { %v4018_v8 = vsel %vm11342_vm4, 0, %v9303_v25  ;;  %vm11344_vm8 = vnez %v11343_v35  ;;  %v4690_v40 = vshrl.u32 %v6632_v21, 16  ;;  %vm11346_vm5 = vnez %v11345_v5  ;;  %v7738_v35 = vld [vmem:[%s10790_s1 + $0x1c8] sm:$0xff]  }
 0x151   : > { %v4019_v10 = vsel %vm11344_vm8, 0, %v9309_v39  ;;  %v4017_v63 = vsel %vm11346_vm5, 0, %v9296_v33  ;;  %v4540_v24 = vsel %vm11235_vm7, 0, %v9309_v39  ;;  %vm11347_vm1 = vnez %v11099_v16  ;;  %v9613_v33 = vld [vmem:[%s8038_s14 + $0x48] sm:$0xf]  ;;  %vm11353_vm7 = vmmov %vm11336_vm10 }
 0x152   : > { %v4541_v31 = vsel %vm11347_vm1, 0, %v9315_v11  ;;  %v4693_v25 = vshll.u32 %v6632_v21, 16  ;;  %v6633_v43 = vcombine.low %v4538_v23, %v4539_v36  ;;  %vm11349_vm11 = vnez %v11105_v53  ;;  %11350 = vst [vmem:[#allocation28_spill] sm:$0xff] %v9613_v33  ;;  %v9624_v23 = vpop.f32.mrf.mxu1  ;;  %v11355_v53 = vld [vmem:[#allocation21_spill] sm:$0xff] }
 0x153   : > { %7364 = vmatmul.mubr.bf16.gmra.mxu1 %v3468_v14  ;;  %v4542_v17 = vsel %vm11349_vm11, 0, %v9607_v50  ;;  %v4543_v39 = vsel %vm11238_vm14, 0, %v9613_v33  ;;  %v11352_v14 = vld [vmem:[#allocation18_spill] sm:$0xff]  ;;  %v4679_v16 = vsel %vm11353_vm7, %v4670_v51, %v9572_v30  ;;  %v4165_v13 = vshll.u32 %v9575_v38, 16  ;;  %11354 = vst [vmem:[#allocation32_spill] sm:$0xff] %v9624_v23 }
 0x154   : > { %7367 = vmatprep.mubr.bf16.mxu1 %v3477_v37  ;;  %v4159_v37 = vrot.slane %v4157_v9, 1  ;;  %v9622_v21 = vcombine.low %v4018_v8, %v4019_v10  ;;  %v4169_v36 = vshrl.u32 %v9575_v38, 16  ;;  %v6634_v7 = vcombine.low %v4540_v24, %v4541_v31 }
 0x155   : > { %7412 = vmatmul.mubr.bf16.gmra.mxu0 %v11352_v14  ;;  %vm11357_vm14 = vcmp.ne.s16.totalorder %v11356_v42, 0  ;;  %vm11359_vm15 = vnez %v11358_v15  ;;  %v4683_v9 = vrot.slane %v4681_v2, 3  ;;  %v4686_v41 = vrot.slane %v4684_v18, 4  ;;  %v9634_v14 = vpop.f32.mrf.mxu0  ;;  %v9641_v42 = vld [vmem:[%s8038_s14 + $0x4c] sm:$0xf]  ;;  %v11363_v2 = vld [vmem:[#allocation35_spill] sm:$0xff]  ;;  %v9646_v18 = vpop.f32.mrf.mxu1 }
 0x156   : > { %7415 = vmatprep.mubr.bf16.mxu0 %v11355_v53  ;;  %v4020_v56 = vsel %vm11357_vm14, 0, %v9315_v11  ;;  %v4021_v51 = vsel %vm11359_vm15, 0, %v9607_v50  ;;  %v6592_v8 = vcombine.low %v4016_v47, %v4017_v63  ;;  %v6635_v10 = vcombine.low %v4542_v17, %v4543_v39  ;;  %11362 = vst [vmem:[#allocation80_spill] sm:$0xff] %v9641_v42  ;;  %11365 = vst [vmem:[#allocation81_spill] sm:$0xff] %v9646_v18 }
 0x157   : > { %v4692_v23 = vrot.slane %v4690_v40, 3  ;;  %v4695_v53 = vrot.slane %v4693_v25, 4  ;;  %v4699_v34 = vshrl.u32 %v6633_v43, 16  ;;  %v4702_v38 = vshll.u32 %v6633_v43, 16 }
 0x158   : > { %v4181_v24 = vshll.u32 %v9622_v21, 16  ;;  %v6594_v31 = vcombine.low %v4020_v56, %v4021_v51  ;;  %vm11361_vm10 = vcmp.ne.s16.totalorder %v11360_v0, 0  ;;  %vm11364_vm2 = vnez %v11363_v2  ;;  %v9649_v0 = vpop.f32.mrf.mxu0 }
 0x159   : > { %v4022_v11 = vsel %vm11361_vm10, 0, %v9613_v33  ;;  %v4023_v47 = vsel %vm11364_vm2, 0, %v9641_v42  ;;  %vm11366_vm3 = vsmask.f32 7424  ;;  %v4163_v63 = vor.u32 %v4161_v49, %v4159_v37  ;;  %11367 = vst [vmem:[#allocation82_spill] sm:$0xff] %v9649_v0  ;;  %v9657_v49 = vpop.f32.mrf.mxu1 }
 0x15a   : > { %v4160_v40 = vsel %vm11366_vm3, %v4155_v58, %v4159_v37  ;;  %v4708_v25 = vshrl.u32 %v6634_v7, 16  ;;  %v4711_v43 = vshll.u32 %v6634_v7, 16  ;;  %v4687_v17 = vor.u32 %v4686_v41, %v4683_v9  ;;  %vm11371_vm11 = vmmov %vm11366_vm3 }
 0x15b   : > { %7368 = vmatmul.mubr.bf16.gmra.mxu1 %v3486_v29  ;;  %v4167_v56 = vrot.slane %v4165_v13, 1  ;;  %v4717_v39 = vshrl.u32 %v6635_v10, 16  ;;  %v4720_v51 = vshll.u32 %v6635_v10, 16  ;;  %v9652_v15 = vor.u32 %v4695_v53, %v4692_v23  ;;  %v9664_v10 = vld [vmem:[%s8038_s14 + $0x50] sm:$0xf]  ;;  %vm11377_vm3 = vmmov %vm11353_vm7 }
 0x15c   : > { %7435 = vmatprep.mubr.bf16.mxu1 %v9568_v20  ;;  %v4173_v2 = vshll.u32 %v6592_v8, 16  ;;  %v4177_v33 = vshrl.u32 %v6592_v8, 16  ;;  %v9654_v18 = vcombine.low %v4022_v11, %v4023_v47  ;;  %v4701_v58 = vrot.slane %v4699_v34, 3  ;;  %11369 = vst [vmem:[#allocation83_spill] sm:$0xff] %v9664_v10 }
 0x15d   : > { %7416 = vmatmul.mubr.bf16.gmra.mxu0 %v9564_v6  ;;  %v4704_v7 = vrot.slane %v4702_v38, 4  ;;  %v4183_v29 = vrot.slane %v4181_v24, 1  ;;  %v4189_v41 = vshll.u32 %v6594_v31, 16  ;;  %v4710_v37 = vrot.slane %v4708_v25, 3  ;;  %v9669_v38 = vpop.f32.mrf.mxu0  ;;  %v11372_v25 = vld [vmem:[#allocation36_spill] sm:$0xff] }
 0x15e   : > { %7483 = vmatprep.mubr.bf16.mxu0 %v4679_v16  ;;  %v4713_v13 = vrot.slane %v4711_v43, 4  ;;  %v4185_v20 = vshrl.u32 %v9622_v21, 16  ;;  %v4193_v23 = vshrl.u32 %v6594_v31, 16  ;;  %v4719_v53 = vrot.slane %v4717_v39, 3  ;;  %v9682_v43 = vld [vmem:[%s8038_s14 + $0x54] sm:$0xf] }
 0x15f   : > { %v4722_v9 = vrot.slane %v4720_v51, 4  ;;  %vm11368_vm4 = vnez %v11117_v48  ;;  %vm11370_vm1 = vnez %v11121_v46  ;;  %v4168_v16 = vsel %vm11371_vm11, %v4163_v63, %v4167_v56  ;;  %v7728_v48 = vld [vmem:[%s10790_s1 + $0x1f0] sm:$0xff]   ;;  %11374 = vst [vmem:[#allocation84_spill] sm:$0xff] %v9682_v43 }
 0x160   : > { %v4544_v8 = vsel %vm11368_vm4, 0, %v9641_v42  ;;  %v4545_v34 = vsel %vm11370_vm1, 0, %v9664_v10  ;;  %v4171_v24 = vor.u32 %v4169_v36, %v4167_v56  ;;  %v4175_v21 = vrot.slane %v4173_v2, 1  ;;  %v11375_v63 = vld [vmem:[#allocation37_spill] sm:$0xff]  ;;  %v9687_v2 = vpop.f32.mrf.mxu1 }
 0x161   : > { %v4197_v31 = vshll.u32 %v9654_v18, 16  ;;  %v4688_v11 = vsel %vm11353_vm7, %v9572_v30, %v4687_v17  ;;  %v4191_v47 = vrot.slane %v4189_v41, 1  ;;  %vm11373_vm14 = vcmp.ne.s16.totalorder %v11372_v25, 0  ;;  %v7729_v41 = vld [vmem:[%s10790_s1 + $0x230] sm:$0xff]  }
 0x162   : > { %v4024_v46 = vsel %vm11373_vm14, 0, %v9664_v10  ;;  %vm11376_vm10 = vnez %v11375_v63  ;;  %v4697_v30 = vsel %vm11377_vm3, %v4687_v17, %v9652_v15  ;;  %v4705_v56 = vor.u32 %v4704_v7, %v4701_v58  ;;  %v9696_v10 = vpop.f32.mrf.mxu0  ;;  %v9707_v58 = vld [vmem:[%s8038_s14 + $0x58] sm:$0xf] }
 0x163   : > { %v4025_v36 = vsel %vm11376_vm10, 0, %v9682_v43  ;;  %v4179_v39 = vor.u32 %v4177_v33, %v4175_v21  ;;  %v6636_v51 = vcombine.low %v4544_v8, %v4545_v34  ;;  %7436 = vmatmul.mubr.bf16.vlgmr.msra.gmra.mxu1 %v4160_v40  ;;  %v4714_v0 = vor.u32 %v4713_v13, %v4710_v37  ;;  %11379 = vst [vmem:[#allocation85_spill] sm:$0xff] %v9707_v58  ;;  %v11381_v37 = vld [vmem:[#allocation38_spill] sm:$0xff]  ;;  %v9733_v8 = vpop.f32.mrf.mxu1 }
 0x164   : > { %v4187_v6 = vor.u32 %v4185_v20, %v4183_v29  ;;  %v9694_v25 = vor.u32 %v4722_v9, %v4719_v53  ;;  %v4195_v63 = vor.u32 %v4193_v23, %v4191_v47  ;;  %7516 = vmatpush3.bf16.msra.mxu1 %v9480_v19  ;;  %7439 = vmatprep.mubr.bf16.mxu1 %v4168_v16  ;;  %v9699_v17 = vrot.slane %v4197_v31, 1  ;;  %v7730_v19 = vld [vmem:[%s10790_s1 + $0x1e8] sm:$0xff]   ;;  %v9719_v20 = vld [vmem:[%s8038_s14 + $0x5c] sm:$0xf]  ;;  %v9728_v53 = vld [vmem:[%s8038_s14 + $0x60] sm:$0xf] }
 0x165   : > { %v9701_v33 = vcombine.low %v4024_v46, %v4025_v36  ;;  %vm11378_vm4 = vnez %v11127_v12  ;;  %vm11380_vm1 = vnez %v11131_v52  ;;  %7484 = vmatmul.mubr.bf16.vlgmr.msra.gmra.mxu0 %v4688_v11  ;;  %7517 = vmatprep.subr.bf16.mxu1 %v7728_v48  ;;  %vm11382_vm11 = vcmp.ne.s16.totalorder %v11381_v37, 0  ;;  %11383 = vst [vmem:[#allocation86_spill] sm:$0xff] %v9719_v20  ;;  %v11384_v12 = vld [vmem:[#allocation40_spill] sm:$0xff]  ;;  %11387 = vst [vmem:[#allocation87_spill] sm:$0xff] %v9728_v53  ;;  %v9743_v36 = vpop.f32.mrf.mxu0 }
 0x166   : > { %v4546_v40 = vsel %vm11378_vm4, 0, %v9682_v43  ;;  %v4547_v7 = vsel %vm11380_vm1, 0, %v9707_v58  ;;  %v4026_v13 = vsel %vm11382_vm11, 0, %v9707_v58  ;;  %vm11385_vm7 = vnez %v11384_v12  ;;  %7564 = vmatpush3.bf16.msra.mxu0 %v9497_v26  ;;  %7487 = vmatprep.mubr.bf16.mxu0 %v4697_v30  ;;  %v9794_v37 = vld [vmem:[%s8038_s14 + $0x6c] sm:$0xf] }
 0x167   : > { %v4027_v23 = vsel %vm11385_vm7, 0, %v9719_v20  ;;  %vm11386_vm14 = vnez %v11137_v22  ;;  %vm11388_vm3 = vnez %v11141_v57  ;;  %v4726_v34 = vshrl.u32 %v6636_v51, 16  ;;  %7565 = vmatprep.subr.bf16.mxu0 %v7729_v41  ;;  %v7731_v57 = vld [vmem:[%s10790_s1 + $0x228] sm:$0xff]   ;;  %11410 = vst [vmem:[#allocation90_spill] sm:$0xff] %v9794_v37 }
 0x168   : > { %v4548_v52 = vsel %vm11386_vm14, 0, %v9719_v20  ;;  %v4549_v9 = vsel %vm11388_vm3, 0, %v9728_v53  ;;  %v4729_v16 = vshll.u32 %v6636_v51, 16  ;;  %vm11389_vm4 = vsmask.f32 7424  ;;  %7518 = vmatpush3.bf16.msra.mxu1 %v7728_v48 }
 0x169   : > { %v4176_v31 = vsel %vm11389_vm4, %v4171_v24, %v4175_v21  ;;  %vm11390_vm1 = vsmask.f32 4352  ;;  %vm11391_vm11 = vmmov %vm11389_vm4  ;;  %v6637_v46 = vcombine.low %v4546_v40, %v4547_v7  ;;  %v9749_v21 = vcombine.low %v4026_v13, %v4027_v23  ;;  %7519 = vmatprep.subr.bf16.mxu1 %v7730_v19  ;;  %v11398_v40 = vld [vmem:[#allocation41_spill] sm:$0xff]  ;;  %v9773_v7 = vld [vmem:[%s8038_s14 + $0x68] sm:$0xf] }
 0x16a   : > { %v4706_v11 = vsel %vm11390_vm1, %v9652_v15, %v4705_v56  ;;  %v4184_v22 = vsel %vm11391_vm11, %v4179_v39, %v4183_v29  ;;  %vm11392_vm14 = vmmov %vm11390_vm1  ;;  %v6638_v15 = vcombine.low %v4548_v52, %v4549_v9  ;;  %v4201_v48 = vshrl.u32 %v9654_v18, 16  ;;  %7566 = vmatpush3.bf16.msra.mxu0 %v7729_v41  ;;  %11400 = vst [vmem:[#allocation41_spill] sm:$0xff] %v9773_v7  ;;  %v11401_v18 = vld [vmem:[#allocation42_spill] sm:$0xff]  ;;  %v7733_v41 = vld [vmem:[%s10790_s1 + $0x220] sm:$0xff]  }
 0x16b   : > { %v4715_v26 = vsel %vm11392_vm14, %v4705_v56, %v4714_v0  ;;  %vm11393_vm3 = vmmov %vm11389_vm4  ;;  %v4205_v56 = vshll.u32 %v9701_v33, 16  ;;  %v4728_v39 = vrot.slane %v4726_v34, 3  ;;  %v4731_v51 = vrot.slane %v4729_v16, 4  ;;  %7440 = vmatmul.mubr.bf16.gmra.mxu1 %v4176_v31  ;;  %7567 = vmatprep.subr.bf16.mxu0 %v7731_v57  ;;  %v11403_v9 = vld [vmem:[#allocation39_spill] sm:$0xff] }
 0x16c   : > { %v9747_v24 = vsel %vm11393_vm3, %v4187_v6, %v4191_v47  ;;  %vm11394_vm4 = vmmov %vm11390_vm1  ;;  %v7732_v6 = vld [vmem:[%s10790_s1 + $0x1e0] sm:$0xff]   ;;  %v9764_v47 = vpop.f32.mrf.mxu1  ;;  %vm11399_vm11 = vnez %v11398_v40  ;;  %vm11402_vm14 = vnez %v11401_v18  ;;  %v4735_v23 = vshrl.u32 %v6637_v46, 16  ;;  %7443 = vmatprep.mubr.bf16.mxu1 %v4184_v22  ;;  %7520 = vmatpush3.bf16.msra.mxu1 %v7730_v19  ;;  %v11408_v18 = vld [vmem:[#allocation44_spill] sm:$0xff] }
 0x16d   : > { %v9753_v29 = vsel %vm11394_vm4, %v4714_v0, %v9694_v25  ;;  %vm11395_vm1 = vmmov %vm11393_vm3  ;;  %11396 = vst [vmem:[#allocation88_spill] sm:$0xff] %v9764_v47  ;;  %v9767_v0 = vld [vmem:[%s8038_s14 + $0x64] sm:$0xf]  ;;  %v4551_v13 = vsel %vm11402_vm14, 0, %v9773_v7  ;;  %v4738_v52 = vshll.u32 %v6637_v46, 16  ;;  %vm11404_vm3 = vcmp.ne.s16.totalorder %v11403_v9, 0  ;;  %v9787_v47 = vpop.f32.mrf.mxu0  ;;  %7488 = vmatmul.mubr.bf16.gmra.mxu0 %v4706_v11  ;;  %7521 = vmatprep.subr.bf16.mxu1 %v7732_v6 }
 0x16e   : > { %v9757_v30 = vsel %vm11395_vm1, %v4195_v63, %v9699_v17  ;;  %11397 = vst [vmem:[#allocation89_spill] sm:$0xff] %v9767_v0  ;;  %v4550_v63 = vsel %vm11399_vm11, 0, %v9767_v0  ;;  %v4028_v34 = vsel %vm11404_vm3, 0, %v9728_v53  ;;  %v11405_v16 = vld [vmem:[#allocation43_spill] sm:$0xff]  ;;  %11407 = vst [vmem:[#allocation42_spill] sm:$0xff] %v9787_v47  ;;  %v4213_v31 = vshll.u32 %v9749_v21, 16  ;;  %7491 = vmatprep.mubr.bf16.mxu0 %v4715_v26  ;;  %7568 = vmatpush3.bf16.msra.mxu0 %v7731_v57 }
 0x16f   : > { %vm11406_vm4 = vnez %v11405_v16  ;;  %v4744_v46 = vshrl.u32 %v6638_v15, 16  ;;  %vm11409_vm1 = vcmp.ne.s16.totalorder %v11408_v18, 0  ;;  %v11411_v9 = vld [vmem:[#allocation48_spill] sm:$0xff]  ;;  %v4747_v16 = vshll.u32 %v6638_v15, 16  ;;  %v7734_v19 = vld [vmem:[%s10790_s1 + $0x1d8] sm:$0xff]   ;;  %v11413_v22 = vld [vmem:[#allocation45_spill] sm:$0xff]  ;;  %7569 = vmatprep.subr.bf16.mxu0 %v7733_v41  ;;  %v9824_v57 = vpop.f32.mrf.mxu0 }
 0x170   : > { %v4029_v40 = vsel %vm11406_vm4, 0, %v9767_v0  ;;  %v4030_v12 = vsel %vm11409_vm1, 0, %v9773_v7  ;;  %vm11412_vm11 = vnez %v11411_v9  ;;  %v6639_v0 = vcombine.low %v4550_v63, %v4551_v13  ;;  %v9806_v18 = vld [vmem:[%s8038_s14 + $0x70] sm:$0xf]  ;;  %v11416_v7 = vld [vmem:[#allocation47_spill] sm:$0xff]  ;;  %v9811_v9 = vpop.f32.mrf.mxu1  ;;  %7522 = vmatpush3.bf16.msra.mxu1 %v7732_v6 }
 0x171   : > { %v4031_v53 = vsel %vm11412_vm11, 0, %v9794_v37  ;;  %vm11414_vm14 = vnez %v11413_v22  ;;  %11415 = vst [vmem:[#allocation45_spill] sm:$0xff] %v9806_v18  ;;  %vm11417_vm3 = vnez %v11416_v7  ;;  %v9813_v11 = vor.u32 %v4731_v51, %v4728_v39  ;;  %v7735_v7 = vld [vmem:[%s10790_s1 + $0x218] sm:$0xff]   ;;  %7523 = vmatprep.subr.bf16.mxu1 %v7734_v19 }
 0x172   : > { %v4552_v47 = vsel %vm11414_vm14, 0, %v9794_v37  ;;  %v4553_v20 = vsel %vm11417_vm3, 0, %v9806_v18  ;;  %v4203_v15 = vor.u32 %v4201_v48, %v9699_v17  ;;  %v4207_v63 = vrot.slane %v4205_v56, 1  ;;  %v11418_v17 = vld [vmem:[#allocation50_spill] sm:$0xff]  ;;  %v9830_v56 = vld [vmem:[%s8038_s14 + $0x74] sm:$0xf]  ;;  %v9839_v6 = vpop.f32.mrf.mxu1  ;;  %7570 = vmatpush3.bf16.msra.mxu0 %v7733_v41 }
 0x173   : > { %v9816_v13 = vcombine.low %v4028_v34, %v4029_v40  ;;  %v4737_v22 = vrot.slane %v4735_v23, 3  ;;  %v4740_v37 = vrot.slane %v4738_v52, 4  ;;  %v4209_v58 = vshrl.u32 %v9701_v33, 16  ;;  %11420 = vst [vmem:[#allocation47_spill] sm:$0xff] %v9830_v56  ;;  %v11421_v51 = vld [vmem:[#allocation54_spill] sm:$0xff]  ;;  %7444 = vmatmul.mubr.bf16.gmra.mxu1 %v9747_v24  ;;  %7571 = vmatprep.subr.bf16.mxu0 %v7735_v7  ;;  %v9862_v24 = vpop.f32.mrf.mxu0 }
 0x174   : > { %v9822_v43 = vcombine.low %v4030_v12, %v4031_v53  ;;  %v4215_v26 = vrot.slane %v4213_v31, 1  ;;  %v6640_v39 = vcombine.low %v4552_v47, %v4553_v20  ;;  %vm11419_vm1 = vcmp.ne.s16.totalorder %v11418_v17, 0  ;;  %v7736_v20 = vld [vmem:[%s10790_s1 + $0x1d0] sm:$0xff]   ;;  %v9854_v17 = vld [vmem:[%s8038_s14 + $0x78] sm:$0xf]  ;;  %7447 = vmatprep.mubr.bf16.mxu1 %v9757_v30  ;;  %7524 = vmatpush3.bf16.msra.mxu1 %v7734_v19  ;;  %v9870_v50 = vpop.f32.mrf.mxu1  ;;  %v11429_v30 = vld [vmem:[#allocation56_spill] sm:$0xff] }
 0x175   : > { %v4032_v48 = vsel %vm11419_vm1, 0, %v9806_v18  ;;  %vm11422_vm14 = vnez %v11421_v51  ;;  %v4746_v23 = vrot.slane %v4744_v46, 3  ;;  %v4749_v52 = vrot.slane %v4747_v16, 4  ;;  %v11425_v46 = vld [vmem:[#allocation51_spill] sm:$0xff]  ;;  %7492 = vmatmul.mubr.bf16.gmra.mxu0 %v9753_v29  ;;  %7525 = vmatprep.subr.bf16.mxu1 %v7736_v20  ;;  %v9876_v19 = vld [vmem:[%s8038_s14 + $0x7c] sm:$0xf] }
 0x176   : > { %v4033_v33 = vsel %vm11422_vm14, 0, %v9830_v56  ;;  %v4217_v12 = vshrl.u32 %v9749_v21, 16  ;;  %v4753_v53 = vshrl.u32 %v6639_v0, 16  ;;  %vm11423_vm3 = vsmask.f32 4352  ;;  %7572 = vmatpush3.bf16.msra.mxu0 %v7735_v7  ;;  %v7739_v7 = vld [vmem:[%s10790_s1 + $0x208] sm:$0xff]  }
 0x177   : > { %v4733_v47 = vsel %vm11423_vm3, %v9694_v25, %v9813_v11  ;;  %vm11424_vm1 = vsmask.f32 7424  ;;  %v4221_v16 = vshll.u32 %v9816_v13, 16  ;;  %v4756_v40 = vshll.u32 %v6639_v0, 16  ;;  %v11427_v25 = vld [vmem:[#allocation53_spill] sm:$0xff] }
 0x178   : > { %v4208_v34 = vsel %vm11424_vm1, %v4203_v15, %v4207_v63  ;;  %v4229_v21 = vshll.u32 %v9822_v43, 16  ;;  %v9848_v31 = vcombine.low %v4032_v48, %v4033_v33  ;;  %vm11426_vm14 = vnez %v11425_v46  ;;  %v7737_v0 = vld [vmem:[%s10790_s1 + $0x210] sm:$0xff]   ;;  %7495 = vmatprep.mubr.bf16.mxu0 %v4733_v47  ;;  %7526 = vmatpush3.bf16.msra.mxu1 %v7736_v20  ;;  %v7740_v20 = vld [vmem:[%s10790_s1 + $0x1c0] sm:$0xff]  }
 0x179   : > { %v4554_v51 = vsel %vm11426_vm14, 0, %v9830_v56  ;;  %vm11428_vm3 = vnez %v11427_v25  ;;  %v4741_v15 = vor.u32 %v4740_v37, %v4737_v22  ;;  %v4211_v48 = vor.u32 %v4209_v58, %v4207_v63  ;;  %v11431_v63 = vld [vmem:[#allocation60_spill] sm:$0xff]  ;;  %7573 = vmatprep.subr.bf16.mxu0 %v7737_v0  ;;  %7527 = vmatprep.subr.bf16.mxu1 %v7738_v35 }
 0x17a   : > { %v4555_v41 = vsel %vm11428_vm3, 0, %v9854_v17  ;;  %v4762_v33 = vshrl.u32 %v6640_v39, 16  ;;  %v4765_v46 = vshll.u32 %v6640_v39, 16  ;;  %v4750_v56 = vor.u32 %v4749_v52, %v4746_v23  ;;  %7574 = vmatpush3.bf16.msra.mxu0 %v7737_v0 }
 0x17b   : > { %v4219_v18 = vor.u32 %v4217_v12, %v4215_v26  ;;  %v4755_v25 = vrot.slane %v4753_v53, 3  ;;  %v4225_v42 = vshrl.u32 %v9816_v13, 16  ;;  %v4758_v58 = vrot.slane %v4756_v40, 4  ;;  %7448 = vmatmul.mubr.bf16.gmra.mxu1 %v4208_v34  ;;  %7575 = vmatprep.subr.bf16.mxu0 %v7739_v7 }
 0x17c   : > { %v6641_v37 = vcombine.low %v4554_v51, %v4555_v41  ;;  %vm11430_vm14 = vcmp.ne.s16.totalorder %v11429_v30, 0  ;;  %vm11432_vm1 = vnez %v11431_v63  ;;  %v4223_v22 = vrot.slane %v4221_v16, 1  ;;  %v9886_v51 = vpop.f32.mrf.mxu0  ;;  %v9892_v16 = vld [vmem:[%s8038_s14 + $0x80] sm:$0xf]  ;;  %7528 = vmatpush3.bf16.msra.mxu1 %v7738_v35 }
 0x17d   : > { %v4034_v29 = vsel %vm11430_vm14, 0, %v9854_v17  ;;  %v4035_v13 = vsel %vm11432_vm1, 0, %v9876_v19  ;;  %v4231_v39 = vrot.slane %v4229_v21, 1  ;;  %v4233_v23 = vshrl.u32 %v9822_v43, 16  ;;  %7529 = vmatprep.subr.bf16.mxu1 %v7740_v20 }
 0x17e   : > { %v4237_v52 = vshll.u32 %v9848_v31, 16  ;;  %v4764_v12 = vrot.slane %v4762_v33, 3  ;;  %v4767_v53 = vrot.slane %v4765_v46, 4  ;;  %vm11433_vm3 = vnez %v11284_v3  ;;  %v9905_v3 = vpop.f32.mrf.mxu1  ;;  %7576 = vmatpush3.bf16.msra.mxu0 %v7739_v7 }
 0x17f   : > { %v4556_v47 = vsel %vm11433_vm3, 0, %v9876_v19  ;;  %vm11434_vm14 = vnez %v11287_v1  ;;  %vm11435_vm1 = vsmask.f32 4352  ;;  %vm11436_vm11 = vsmask.f32 7424  ;;  %11437 = vst [vmem:[#allocation51_spill] sm:$0xff] %v9905_v3 }
 0x180   : > { %v4557_v43 = vsel %vm11434_vm14, 0, %v9892_v16  ;;  %v4742_v40 = vsel %vm11435_vm1, %v9813_v11, %v4741_v15  ;;  %v4216_v21 = vsel %vm11436_vm11, %v4211_v48, %v4215_v26  ;;  %v9900_v41 = vcombine.low %v4034_v29, %v4035_v13  ;;  %vm11438_vm3 = vmmov %vm11435_vm1  ;;  %v7741_v26 = vld [vmem:[%s10790_s1 + $0x200] sm:$0xff]   ;;  %v9911_v48 = vpop.f32.mrf.mxu0  ;;  %v9925_v13 = vld [vmem:[%s8038_s14 + $0x88] sm:$0xf]  ;;  %v9933_v35 = vpop.f32.mrf.mxu1  ;;  %7530 = vmatpush3.bf16.msra.mxu1 %v7740_v20 }
 0x181   : > { %v4759_v33 = vor.u32 %v4758_v58, %v4755_v25  ;;  %v4227_v46 = vor.u32 %v4225_v42, %v4223_v22  ;;  %v4771_v63 = vshrl.u32 %v6641_v37, 16  ;;  %v4774_v30 = vshll.u32 %v6641_v37, 16  ;;  %11439 = vst [vmem:[#allocation53_spill] sm:$0xff] %v9911_v48  ;;  %7451 = vmatprep.mubr.bf16.mxu1 %v4216_v21  ;;  %7496 = vmatmul.mubr.bf16.gmra.mxu0 %v4742_v40  ;;  %v9919_v37 = vld [vmem:[%s8038_s14 + $0x84] sm:$0xf]  ;;  %vm11440_vm14 = vmmov %vm11436_vm11  ;;  %v11451_v20 = vld [vmem:[#allocation70_spill] sm:$0xff] }
 0x182   : > { %v4751_v1 = vsel %vm11438_vm3, %v4741_v15, %v4750_v56  ;;  %v6642_v11 = vcombine.low %v4556_v47, %v4557_v43  ;;  %v4224_v42 = vsel %vm11436_vm11, %v4219_v18, %v4223_v22  ;;  %v9914_v25 = vor.u32 %v4767_v53, %v4764_v12  ;;  %v9931_v22 = vld [vmem:[%s8038_s14 + $0x90] sm:$0xf]  ;;  %v11441_v47 = vld [vmem:[#allocation59_spill] sm:$0xff]  ;;  %v11443_v43 = vld [vmem:[#allocation66_spill] sm:$0xff]  ;;  %7577 = vmatprep.subr.bf16.mxu0 %v7741_v26  ;;  %v9943_v21 = vpop.f32.mrf.mxu0 }
 0x183   : > { %v4235_v0 = vor.u32 %v4233_v23, %v4231_v39  ;;  %v4239_v58 = vrot.slane %v4237_v52, 1  ;;  %v4241_v34 = vshrl.u32 %v9848_v31, 16  ;;  %v4245_v15 = vshll.u32 %v9900_v41, 16  ;;  %7499 = vmatprep.mubr.bf16.mxu0 %v4751_v1  ;;  %v11449_v3 = vld [vmem:[#allocation67_spill] sm:$0xff]  ;;  %7578 = vmatpush3.bf16.msra.mxu0 %v7741_v26  ;;  %v11454_v26 = vld [vmem:[#allocation49_spill] sm:$0xff] }
 0x184   : > { %v4558_v29 = vsel %vm11294_vm9, 0, %v9919_v37  ;;  %v4559_v18 = vsel %vm11296_vm12, 0, %v9925_v13  ;;  %v4760_v31 = vsel %vm11435_vm1, %v4750_v56, %v4759_v33  ;;  %v4232_v23 = vsel %vm11440_vm14, %v4227_v46, %v4231_v39  ;;  %v11448_v39 = vld [vmem:[#allocation71_spill] sm:$0xff]  ;;  %7452 = vmatmul.mubr.bf16.gmra.mxu1 %v4224_v42 }
 0x185   : > { %v4773_v52 = vrot.slane %v4771_v63, 3  ;;  %v4776_v12 = vrot.slane %v4774_v30, 4  ;;  %v4780_v54 = vshrl.u32 %v6642_v11, 16  ;;  %v4783_v53 = vshll.u32 %v6642_v11, 16  ;;  %v11446_v30 = vld [vmem:[#allocation68_spill] sm:$0xff]  ;;  %7455 = vmatprep.mubr.bf16.mxu1 %v4232_v23 }
 0x186   : > { %vm11442_vm9 = vcmp.ne.s16.totalorder %v11441_v47, 0  ;;  %vm11444_vm12 = vnez %v11443_v43  ;;  %v6643_v1 = vcombine.low %v4558_v29, %v4559_v18  ;;  %vm11445_vm3 = vnez %v11219_v44  ;;  %v9956_v18 = vpop.f32.mrf.mxu1 }
 0x187   : > { %v4036_v4 = vsel %vm11442_vm9, 0, %v9892_v16  ;;  %v4037_v40 = vsel %vm11444_vm12, 0, %v9919_v37  ;;  %v4560_v56 = vsel %vm11445_vm3, 0, %v9443_v60  ;;  %vm11447_vm11 = vnez %v11446_v30 }
 0x188   : > { %v4561_v63 = vsel %vm11447_vm11, 0, %v9931_v22  ;;  %v2110_v7 = vadd.f32 %v9657_v49, %v11448_v39  ;;  %v4769_v46 = vsel %vm11435_vm1, %v4759_v33, %v9914_v25  ;;  %v4240_v11 = vsel %vm11440_vm14, %v4235_v0, %v4239_v58  ;;  %vm11455_vm11 = vmmov %vm11440_vm14 }
 0x189   : > { %v4243_v48 = vor.u32 %v4241_v34, %v4239_v58  ;;  %v4247_v29 = vrot.slane %v4245_v15, 1  ;;  %v6602_v44 = vcombine.low %v4036_v4, %v4037_v40  ;;  %vm11450_vm9 = vcmp.ne.s16.totalorder %v11449_v3, 0  ;;  %v9968_v34 = vld [vmem:[%s8038_s14 + $0x94] sm:$0xf]  ;;  %v11453_v15 = vld [vmem:[#allocation46_spill] sm:$0xff]  ;;  %v9972_v40 = vpop.f32.mrf.mxu0  ;;  %7500 = vmatmul.mubr.bf16.gmra.mxu0 %v4760_v31 }
 0x18a   : > { %v4038_v30 = vsel %vm11450_vm9, 0, %v9925_v13  ;;  %vm11452_vm3 = vnez %v11451_v20  ;;  %v9965_v49 = vadd.f32 %v9669_v38, %v2110_v7  ;;  %v4782_v33 = vrot.slane %v4780_v54, 3  ;;  %7503 = vmatprep.mubr.bf16.mxu0 %v4769_v46 }
 0x18b   : > { %v4039_v43 = vsel %vm11452_vm3, 0, %v9443_v60  ;;  %v4785_v0 = vrot.slane %v4783_v53, 4  ;;  %v6644_v58 = vcombine.low %v4560_v56, %v4561_v63  ;;  %v2102_v4 = vadd.f32 %v9687_v2, %v11453_v15  ;;  %v7254_v2 = vpop.f32.mrf.mxu1  ;;  %v7302_v7 = vpop.f32.mrf.mxu0 }
 0x18c   : > { %v4777_v39 = vor.u32 %v4776_v12, %v4773_v52  ;;  %v4249_v20 = vshrl.u32 %v9900_v41, 16  ;;  %v4789_v60 = vshrl.u32 %v6643_v1, 16  ;;  %v2113_v38 = vadd.f32 %v9733_v8, %v11454_v26  ;;  %v11456_v52 = vld [vmem:[#allocation3_spill] sm:$0xff]  ;;  %7456 = vmatmul.mubr.bf16.gmra.mxu1 %v4240_v11 }
 0x18d   : > { %v4248_v42 = vsel %vm11455_vm11, %v4243_v48, %v4247_v29  ;;  %v4792_v54 = vshll.u32 %v6643_v1, 16  ;;  %v9978_v53 = vcombine.low %v4038_v30, %v4039_v43  ;;  %v9981_v56 = vadd.f32 %v9696_v10, %v2102_v4  ;;  %v11458_v1 = vld [vmem:[#allocation76_spill] sm:$0xff]  ;;  %v11459_v30 = vld [vmem:[#allocation69_spill] sm:$0xff]  ;;  %v11462_v4 = vld [vmem:[#allocation63_spill] sm:$0xff] }
 0x18e   : > { %v4253_v63 = vshll.u32 %v6602_v44, 16  ;;  %v4257_v23 = vshrl.u32 %v6602_v44, 16  ;;  %vm11457_vm1 = vcmp.ne.s16.totalorder %v11456_v52, 0  ;;  %v9987_v12 = vadd.f32 %v9743_v36, %v2113_v38  ;;  %v11461_v44 = vld [vmem:[#allocation55_spill] sm:$0xff]  ;;  %7459 = vmatprep.mubr.bf16.mxu1 %v4248_v42 }
 0x18f   : > { %v4562_v41 = vsel %vm11457_vm1, 0, %v9968_v34  ;;  %v4786_v8 = vor.u32 %v4785_v0, %v4782_v33  ;;  %v4798_v31 = vshrl.u32 %v6644_v58, 16  ;;  %v4801_v48 = vshll.u32 %v6644_v58, 16 }
 0x190   : > { %v2126_v43 = vadd.f32 %v9811_v9, %v11458_v1  ;;  %v4791_v10 = vrot.slane %v4789_v60, 3  ;;  %vm11460_vm14 = vnez %v11459_v30  ;;  %v2118_v15 = vadd.f32 %v9839_v6, %v11461_v44  ;;  %v10002_v9 = vpop.f32.mrf.mxu1  ;;  %v10013_v1 = vpop.f32.mrf.mxu0  ;;  %v7856_v44 = vld [vmem:[%s8038_s14 + $0x20] sm:$0xf] }
 0x191   : > { %v4040_v46 = vsel %vm11460_vm14, 0, %v9931_v22  ;;  %v2129_v26 = vadd.f32 %v9870_v50, %v11462_v4  ;;  %v4794_v36 = vrot.slane %v4792_v54, 4  ;;  %v4261_v33 = vshll.u32 %v9978_v53, 16  ;;  %v11465_v4 = vld [vmem:[#allocation20_spill] sm:$0xff] }
 0x192   : > { %v6645_v0 = vcombine.low %v4562_v41, %v4562_v41  ;;  %v10000_v58 = vadd.f32 %v9824_v57, %v2126_v43  ;;  %vm11463_vm9 = vsmask.f32 4352  ;;  %v4251_v38 = vor.u32 %v4249_v20, %v4247_v29  ;;  %v7857_v29 = vld [vmem:[%s8038_s14 + $0x24] sm:$0xf] }
 0x193   : > { %v4778_v60 = vsel %vm11463_vm9, %v9914_v25, %v4777_v39  ;;  %v10007_v6 = vadd.f32 %v9862_v24, %v2118_v15  ;;  %v10010_v50 = vadd.f32 %v9886_v51, %v2129_v26  ;;  %vm11464_vm11 = vmmov %vm11463_vm9  ;;  %v4255_v52 = vrot.slane %v4253_v63, 1  ;;  %v11468_v51 = vld [vmem:[#allocation61_spill] sm:$0xff]  ;;  %v7257_v15 = vpop.f32.mrf.mxu1  ;;  %v11470_v24 = vld [vmem:[#allocation7_spill] sm:$0xff] }
 0x194   : > { %v4787_v54 = vsel %vm11464_vm11, %v4777_v39, %v4786_v8  ;;  %v4800_v41 = vrot.slane %v4798_v31, 3  ;;  %v4803_v57 = vrot.slane %v4801_v48, 4  ;;  %v6604_v43 = vcombine.low %v4040_v46, %v4040_v46  ;;  %7504 = vmatmul.mubr.bf16.gmra.mxu0 %v4778_v60  ;;  %v11469_v26 = vld [vmem:[#allocation5_spill] sm:$0xff]  ;;  %v11471_v60 = vld [vmem:[#allocation6_spill] sm:$0xff] }
 0x195   : > { %vm11466_vm1 = vcmp.ne.s16.totalorder %v11465_v4, 0  ;;  %v5339_v20 = vsel %vm11308_vm0, 0, %v7857_v29  ;;  %v2142_v11 = vadd.f32 %v9933_v35, %v11468_v51  ;;  %v4795_v39 = vor.u32 %v4794_v36, %v4791_v10  ;;  %7507 = vmatprep.mubr.bf16.mxu0 %v4787_v54  ;;  %v7305_v10 = vpop.f32.mrf.mxu0  ;;  %v2149_v36 = vpop.f32.mrf.mxu1  ;;  %v7858_v51 = vld [vmem:[%s8038_s14 + $0x28] sm:$0xf] }
 0x196   : > { %v5338_v25 = vsel %vm11466_vm1, 0, %v7856_v44  ;;  %v4259_v63 = vor.u32 %v4257_v23, %v4255_v52  ;;  %v4263_v31 = vrot.slane %v4261_v33, 1  ;;  %v4807_v48 = vshrl.u32 %v6645_v0, 16 }
 0x197   : > { %v4810_v42 = vshll.u32 %v6645_v0, 16  ;;  %v10024_v46 = vadd.f32 %v9943_v21, %v2142_v11  ;;  %v2134_v44 = vadd.f32 %v9956_v18, %v11469_v26  ;;  %v4804_v4 = vor.u32 %v4803_v57, %v4800_v41  ;;  %v3091_v11 = vpop.f32.mrf.mxu0 }
 0x198   : > { %v10028_v29 = vcombine.low %v5338_v25, %v5339_v20  ;;  %v5472_v35 = vshll.u32 %v11470_v24, 16  ;;  %v2145_v23 = vadd.f32 %v7254_v2, %v11471_v60  ;;  %vm11472_vm0 = vsmask.f32 7424 }
 0x199   : > { %v4256_v33 = vsel %vm11472_vm0, %v4251_v38, %v4255_v52  ;;  %v4265_v0 = vshrl.u32 %v9978_v53, 16  ;;  %v4269_v21 = vshll.u32 %v6604_v43, 16  ;;  %v10035_v54 = vadd.f32 %v9972_v40, %v2134_v44  ;;  %vm11473_vm11 = vmmov %vm11472_vm0  ;;  %v7859_v38 = vld [vmem:[%s8038_s14 + $0x2c] sm:$0xf]  ;;  %v7861_v44 = vld [vmem:[%s8038_s14 + $0x34] sm:$0xf]  ;;  %v7306_v55 = vpop.f32.mrf.mxu0 }
 0x19a   : > { %v4796_v18 = vsel %vm11463_vm9, %v4786_v8, %v4795_v39  ;;  %v4264_v41 = vsel %vm11473_vm11, %v4259_v63, %v4263_v31  ;;  %v4809_v57 = vrot.slane %v4807_v48, 3  ;;  %v10039_v25 = vadd.f32 %v7302_v7, %v2145_v23  ;;  %7460 = vmatmul.mubr.bf16.gmra.mxu1 %v4256_v33  ;;  %vm11475_vm0 = vmmov %vm11463_vm9  ;;  %v7258_v63 = vpop.f32.mrf.mxu1 }
 0x19b   : > { %v4812_v20 = vrot.slane %v4810_v42, 4  ;;  %v5470_v2 = vshrl.u32 %v11470_v24, 16  ;;  %vm11474_vm1 = vcmp.ne.s16.totalorder %v11320_v32, 0  ;;  %v5341_v40 = vsel %vm11323_vm6, 0, %v7859_v38  ;;  %7463 = vmatprep.mubr.bf16.mxu1 %v4264_v41  ;;  %v7860_v32 = vld [vmem:[%s8038_s14 + $0x30] sm:$0xf]  ;;  %vm11477_vm6 = vmmov %vm11473_vm11 }
 0x19c   : > { %v5340_v53 = vsel %vm11474_vm1, 0, %v7858_v51  ;;  %v4805_v8 = vsel %vm11475_vm0, %v4795_v39, %v4804_v4  ;;  %v5474_v52 = vrot.slane %v5472_v35, 1  ;;  %v5477_v7 = vshll.u32 %v10028_v29, 16  ;;  %7508 = vmatmul.mubr.bf16.gmra.mxu0 %v4796_v18  ;;  %v7863_v18 = vld [vmem:[%s8038_s14 + $0x3c] sm:$0xf]  ;;  %vm11480_vm1 = vmmov %vm11477_vm6  ;;  %v11481_v51 = vld [vmem:[#allocation9_spill] sm:$0xff] }
 0x19d   : > { %v2158_v43 = vadd.f32 %v7257_v15, %v9570_v45  ;;  %v4267_v48 = vor.u32 %v4265_v0, %v4263_v31  ;;  %v4271_v42 = vrot.slane %v4269_v21, 1  ;;  %vm11476_vm9 = vcmp.ne.s16.totalorder %v11327_v28, 0  ;;  %7511 = vmatprep.mubr.bf16.mxu0 %v4805_v8 }
 0x19e   : > { %v5342_v26 = vsel %vm11476_vm9, 0, %v7860_v32  ;;  %v5343_v27 = vsel %vm11330_vm13, 0, %v7861_v44  ;;  %v6697_v39 = vcombine.low %v5340_v53, %v5341_v40  ;;  %v2150_v45 = vadd.f32 %v2149_v36, %v9604_v59  ;;  %vm11478_vm13 = vmmov %vm11475_vm0  ;;  %v7862_v36 = vld [vmem:[%s8038_s14 + $0x38] sm:$0xf]  ;;  %v7864_v53 = vld [vmem:[%s8038_s14 + $0x40] sm:$0xf] }
 0x19f   : > { %v10057_v24 = vadd.f32 %v7305_v10, %v2158_v43  ;;  %v4813_v15 = vor.u32 %v4812_v20, %v4809_v57  ;;  %v2161_v31 = vadd.f32 %v7258_v63, %v9634_v14  ;;  %v5475_v35 = vor.u32 %v5474_v52, %v5470_v2  ;;  %v10082_v52 = vpop.f32.mrf.mxu0  ;;  %v10084_v63 = vpop.f32.mrf.mxu1  ;;  %v11486_v32 = vld [vmem:[#allocation31_spill] sm:$0xff]  ;;  %v11488_v44 = vld [vmem:[#allocation80_spill] sm:$0xff]  ;;  %vm11492_vm9 = vmmov %vm11480_vm1 }
 0x1a0   : > { %v5479_v60 = vrot.slane %v5477_v7, 1  ;;  %v6698_v28 = vcombine.low %v5342_v26, %v5343_v27  ;;  %v10061_v23 = vadd.f32 %v3091_v11, %v2150_v45  ;;  %v4272_v33 = vsel %vm11477_vm6, %v4267_v48, %v4271_v42  ;;  %v11501_v27 = vld [vmem:[#allocation52_spill] sm:$0xff] }
 0x1a1   : > { %v10064_v0 = vadd.f32 %v7306_v55, %v2161_v31  ;;  %v5485_v10 = vshll.u32 %v6697_v39, 16  ;;  %v4814_v21 = vsel %vm11478_vm13, %v4804_v4, %v4813_v15  ;;  %v5481_v59 = vshrl.u32 %v10028_v29, 16  ;;  %v11483_v29 = vld [vmem:[#allocation29_spill] sm:$0xff]  ;;  %v7309_v31 = vpop.f32.mrf.mxu0  ;;  %vm11510_vm13 = vmmov %vm11480_vm1 }
 0x1a2   : > { %vm11479_vm11 = vcmp.ne.s16.totalorder %v11338_v61, 0  ;;  %v5345_v41 = vsel %vm11346_vm5, 0, %v7863_v18  ;;  %7464 = vmatmul.mubr.bf16.gmra.mxu1 %v4272_v33  ;;  %v5480_v57 = vsel %vm11480_vm1, %v5475_v35, %v5479_v60  ;;  %v5489_v20 = vshrl.u32 %v6697_v39, 16  ;;  %v11491_v35 = vld [vmem:[#allocation11_spill] sm:$0xff]  ;;  %v11498_v18 = vld [vmem:[#allocation13_spill] sm:$0xff] }
 0x1a3   : > { %v5344_v14 = vsel %vm11479_vm11, 0, %v7862_v36  ;;  %v5493_v2 = vshll.u32 %v6698_v28, 16  ;;  %7531 = vmatprep.mubr.bf16.mxu1 %v11481_v51  ;;  %vm11482_vm0 = vcmp.ne.s16.totalorder %v11341_v62, 0  ;;  %v5347_v61 = vsel %vm11344_vm8, 0, %v11483_v29  ;;  %v11485_v62 = vld [vmem:[#allocation28_spill] sm:$0xff]  ;;  %vm11490_vm8 = vmmov %vm11480_vm1  ;;  %v11493_v33 = vld [vmem:[#allocation83_spill] sm:$0xff] }
 0x1a4   : > { %v5346_v4 = vsel %vm11482_vm0, 0, %v7864_v53  ;;  %7512 = vmatmul.mubr.bf16.gmra.mxu0 %v4814_v21  ;;  %v5487_v40 = vrot.slane %v5485_v10, 1  ;;  %v6699_v8 = vcombine.low %v5344_v14, %v5345_v41  ;;  %v5483_v5 = vor.u32 %v5481_v59, %v5479_v60  ;;  %v11496_v21 = vld [vmem:[#allocation84_spill] sm:$0xff]  ;;  %v7261_v14 = vpop.f32.mrf.mxu1 }
 0x1a5   : > { %7579 = vmatprep.mubr.bf16.mxu0 %v5480_v57  ;;  %v5495_v43 = vrot.slane %v5493_v2, 1  ;;  %v6700_v11 = vcombine.low %v5346_v4, %v5347_v61  ;;  %v5497_v48 = vshrl.u32 %v6698_v28, 16  ;;  %vm11487_vm5 = vcmp.ne.s16.totalorder %v11486_v32, 0  ;;  %v11494_v28 = vld [vmem:[#allocation34_spill] sm:$0xff]  ;;  %v11499_v57 = vld [vmem:[#allocation72_spill] sm:$0xff]  ;;  %v3107_v2 = vpop.f32.mrf.mxu0 }
 0x1a6   : > { %v5491_v7 = vor.u32 %v5489_v20, %v5487_v40  ;;  %v5501_v42 = vshll.u32 %v6699_v8, 16  ;;  %v5348_v26 = vsel %vm11487_vm5, 0, %v11485_v62  ;;  %v5349_v39 = vsel %vm11359_vm15, 0, %v11488_v44  ;;  %v2165_v4 = vpop.f32.mrf.mxu1  ;;  %vm11502_vm15 = vmmov %vm11480_vm1 }
 0x1a7   : > { %v5488_v45 = vsel %vm11490_vm8, %v5483_v5, %v5487_v40  ;;  %v5505_v15 = vshrl.u32 %v6699_v8, 16  ;;  %v5509_v55 = vshll.u32 %v6700_v11, 16  ;;  %vm11495_vm6 = vcmp.ne.s16.totalorder %v11494_v28, 0  ;;  %v11500_v40 = vld [vmem:[#allocation73_spill] sm:$0xff]  ;;  %v7310_v32 = vpop.f32.mrf.mxu0  ;;  %v11506_v28 = vld [vmem:[#allocation86_spill] sm:$0xff] }
 0x1a8   : > { %v5496_v60 = vsel %vm11492_vm9, %v5491_v7, %v5495_v43  ;;  %v5350_v10 = vsel %vm11495_vm6, 0, %v11493_v33  ;;  %v5351_v36 = vsel %vm11364_vm2, 0, %v11496_v21  ;;  %v6701_v41 = vcombine.low %v5348_v26, %v5349_v39  ;;  %v7262_v62 = vpop.f32.mrf.mxu1  ;;  %v11508_v21 = vld [vmem:[#allocation75_spill] sm:$0xff]  ;;  %vm11538_vm6 = vmmov %vm11480_vm1 }
 0x1a9   : > { %v2174_v20 = vadd.f32 %v7261_v14, %v11499_v57  ;;  %v5499_v51 = vor.u32 %v5497_v48, %v5495_v43  ;;  %v5503_v53 = vrot.slane %v5501_v42, 1  ;;  %v6670_v29 = vcombine.low %v9931_v22, %v9968_v34  ;;  %v11512_v57 = vld [vmem:[#allocation87_spill] sm:$0xff] }
 0x1aa   : > { %7532 = vmatmul.mubr.bf16.vlgmr.msra.gmra.mxu1 %v11491_v35  ;;  %v6702_v38 = vcombine.low %v5350_v10, %v5351_v36  ;;  %v2166_v8 = vadd.f32 %v2165_v4, %v11500_v40  ;;  %v5511_v7 = vrot.slane %v5509_v55, 1  ;;  %v5517_v26 = vshll.u32 %v6701_v41, 16  ;;  %v11504_v35 = vld [vmem:[#allocation36_spill] sm:$0xff]  ;;  %v11509_v36 = vld [vmem:[#allocation15_spill] sm:$0xff] }
 0x1ab   : > { %7535 = vmatprep.mubr.bf16.mxu1 %v11498_v18  ;;  %v10105_v61 = vadd.f32 %v7309_v31, %v2174_v20  ;;  %v5507_v5 = vor.u32 %v5505_v15, %v5503_v53  ;;  %v2177_v43 = vadd.f32 %v7262_v62, %v11501_v27  ;;  %v5504_v48 = vsel %vm11502_vm15, %v5499_v51, %v5503_v53  ;;  %v11511_v18 = vld [vmem:[#allocation17_spill] sm:$0xff]  ;;  %v11513_v20 = vld [vmem:[#allocation38_spill] sm:$0xff] }
 0x1ac   : > { %7580 = vmatmul.mubr.bf16.vlgmr.msra.gmra.mxu0 %v5488_v45  ;;  %v10108_v44 = vadd.f32 %v3107_v2, %v2166_v8  ;;  %v5513_v42 = vshrl.u32 %v6700_v11, 16  ;;  %v5521_v39 = vshrl.u32 %v6701_v41, 16  ;;  %v11503_v45 = vld [vmem:[#allocation85_spill] sm:$0xff]  ;;  %vm11505_vm2 = vcmp.ne.s16.totalorder %v11504_v35, 0  ;;  %v3110_v11 = vpop.f32.mrf.mxu0 }
 0x1ad   : > { %7583 = vmatprep.mubr.bf16.mxu0 %v5496_v60  ;;  %v5352_v31 = vsel %vm11505_vm2, 0, %v11503_v45  ;;  %v2168_v60 = vpop.f32.mrf.mxu1  ;;  %v5525_v33 = vshll.u32 %v6702_v38, 16  ;;  %v5353_v55 = vsel %vm11376_vm10, 0, %v11506_v28  ;;  %v10118_v10 = vadd.f32 %v7310_v32, %v2177_v43  ;;  %v11515_v51 = vld [vmem:[#allocation89_spill] sm:$0xff]  ;;  %vm11517_vm10 = vmmov %vm11480_vm1  ;;  %v11519_v28 = vld [vmem:[#allocation39_spill] sm:$0xff] }
 0x1ae   : > { %v2169_v59 = vadd.f32 %v2168_v60, %v11508_v21  ;;  %v5512_v14 = vsel %vm11510_vm13, %v5507_v5, %v5511_v7  ;;  %v5519_v41 = vrot.slane %v5517_v26, 1  ;;  %vm11514_vm11 = vcmp.ne.s16.totalorder %v11513_v20, 0  ;;  %v11518_v60 = vld [vmem:[#allocation41_spill] sm:$0xff]  ;;  %v11521_v21 = vld [vmem:[#allocation90_spill] sm:$0xff]  ;;  %vm11547_vm13 = vmmov %vm11480_vm1 }
 0x1af   : > { %v5354_v2 = vsel %vm11514_vm11, 0, %v11512_v57  ;;  %v5355_v4 = vsel %vm11385_vm7, 0, %v11515_v51  ;;  %v6703_v8 = vcombine.low %v5352_v31, %v5353_v55  ;;  %v5515_v62 = vor.u32 %v5513_v42, %v5511_v7  ;;  %v11523_v31 = vld [vmem:[#allocation19_spill] sm:$0xff] }
 0x1b0   : > { %v10130_v40 = vadd.f32 %v3110_v11, %v2169_v59  ;;  %v5523_v32 = vor.u32 %v5521_v39, %v5519_v41  ;;  %v5527_v5 = vrot.slane %v5525_v33, 1  ;;  %v6704_v27 = vcombine.low %v5354_v2, %v5355_v4  ;;  %v11524_v39 = vld [vmem:[#allocation45_spill] sm:$0xff]  ;;  %v11525_v33 = vld [vmem:[#allocation44_spill] sm:$0xff]  ;;  %v11527_v55 = vld [vmem:[#allocation47_spill] sm:$0xff]  ;;  %v7313_v2 = vpop.f32.mrf.mxu0 }
 0x1b1   : > { %v5529_v43 = vshrl.u32 %v6702_v38, 16  ;;  %v5533_v45 = vshll.u32 %v6703_v8, 16  ;;  %v5520_v26 = vsel %vm11517_vm10, %v5515_v62, %v5519_v41  ;;  %vm11520_vm0 = vcmp.ne.s16.totalorder %v11519_v28, 0  ;;  %v11530_v11 = vld [vmem:[#allocation4_spill] sm:$0xff]  ;;  %vm11551_vm10 = vmmov %vm11480_vm1 }
 0x1b2   : > { %7536 = vmatmul.mubr.bf16.gmra.mxu1 %v11509_v36  ;;  %v5528_v35 = vsel %vm11480_vm1, %v5523_v32, %v5527_v5  ;;  %v5356_v15 = vsel %vm11520_vm0, 0, %v11518_v60  ;;  %v5537_v7 = vshrl.u32 %v6703_v8, 16  ;;  %v5541_v42 = vshll.u32 %v6704_v27, 16  ;;  %v11528_v36 = vld [vmem:[#allocation48_spill] sm:$0xff]  ;;  %v7265_v4 = vpop.f32.mrf.mxu1  ;;  %v3123_v8 = vpop.f32.mrf.mxu0  ;;  %v11532_v60 = vld [vmem:[#allocation77_spill] sm:$0xff] }
 0x1b3   : > { %7539 = vmatprep.mubr.bf16.mxu1 %v11511_v18  ;;  %vm11526_vm7 = vcmp.ne.s16.totalorder %v11525_v33, 0  ;;  %vm11529_vm5 = vnez %v11528_v36  ;;  %v5531_v18 = vor.u32 %v5529_v43, %v5527_v5  ;;  %v5535_v41 = vrot.slane %v5533_v45, 1  ;;  %v11535_v43 = vld [vmem:[#allocation54_spill] sm:$0xff] }
 0x1b4   : > { %7584 = vmatmul.mubr.bf16.gmra.mxu0 %v5504_v48  ;;  %v5357_v48 = vsel %vm11406_vm4, 0, %v11521_v21  ;;  %v5358_v38 = vsel %vm11526_vm7, 0, %v11524_v39  ;;  %v5543_v53 = vrot.slane %v5541_v42, 1  ;;  %vm11531_vm4 = vmmov %vm11480_vm1  ;;  %v2190_v28 = vadd.f32 %v7265_v4, %v11532_v60  ;;  %v11539_v42 = vld [vmem:[#allocation78_spill] sm:$0xff] }
 0x1b5   : > { %7587 = vmatprep.mubr.bf16.mxu0 %v5512_v14  ;;  %v5359_v14 = vsel %vm11529_vm5, 0, %v11527_v55  ;;  %v6705_v57 = vcombine.low %v5356_v15, %v5357_v48  ;;  %v5539_v51 = vor.u32 %v5537_v7, %v5535_v41  ;;  %v5536_v62 = vsel %vm11531_vm4, %v5531_v18, %v5535_v41  ;;  %v11545_v41 = vld [vmem:[#allocation57_spill] sm:$0xff]  ;;  %vm11557_vm0 = vmmov %vm11531_vm4 }
 0x1b6   : > { %v6706_v20 = vcombine.low %v5358_v38, %v5359_v14  ;;  %v5545_v21 = vshrl.u32 %v6704_v27, 16  ;;  %vm11536_vm9 = vnez %v11535_v43  ;;  %v10158_v7 = vadd.f32 %v7313_v2, %v2190_v28  ;;  %v11540_v27 = vld [vmem:[#allocation10_spill] sm:$0xff]  ;;  %v7314_v38 = vpop.f32.mrf.mxu0  ;;  %vm11567_vm7 = vmmov %vm11557_vm0 }
 0x1b7   : > { %v5549_v32 = vshll.u32 %v6705_v57, 16  ;;  %v5361_v45 = vsel %vm11536_vm9, 0, %v9876_v19  ;;  %v5544_v15 = vsel %vm11538_vm6, %v5539_v51, %v5543_v53  ;;  %v5553_v48 = vshrl.u32 %v6705_v57, 16  ;;  %v11543_v19 = vld [vmem:[#allocation60_spill] sm:$0xff] }
 0x1b8   : > { %v5557_v59 = vshll.u32 %v6706_v20, 16  ;;  %vm11544_vm2 = vnez %v11543_v19  ;;  %v5547_v2 = vor.u32 %v5545_v21, %v5543_v53  ;;  %vm11548_vm11 = vcmp.ne.s16.totalorder %v11441_v47, 0  ;;  %v7865_v53 = vld [vmem:[%s8038_s14 + $0x8c] sm:$0xf]  ;;  %v431_v19 = vld [vmem:[%s8038_s14 + $0x98] sm:$0xf] }
 0x1b9   : > { %v5363_v36 = vsel %vm11544_vm2, 0, %v9919_v37  ;;  %v5551_v14 = vrot.slane %v5549_v32, 1  ;;  %v5561_v32 = vshrl.u32 %v6706_v20, 16  ;;  %vm11553_vm1 = vcmp.ne.s16.totalorder %v11449_v3, 0  ;;  %v11560_v21 = vld [vmem:[#allocation65_spill] sm:$0xff]  ;;  %s348_s14 = sand.u32 1, %s7880_s15  }
 0x1ba   : > { %7540 = vmatmul.mubr.bf16.gmra.mxu1 %v11523_v31  ;;  %v11533_v31 = vld [vmem:[#allocation50_spill] sm:$0xff]  ;;  %v5559_v51 = vrot.slane %v5557_v59, 1  ;;  %v5365_v59 = vsel %vm11444_vm12, 0, %v7865_v53  ;;  %v5366_v20 = vsel %vm11553_vm1, 0, %v9931_v22  ;;  %vm11555_vm12 = vmmov %vm11531_vm4  ;;  %v11571_v22 = vld [vmem:[#allocation81_spill] sm:$0xff]  ;;  %s6396_s30 = sshll.u32 %s348_s14, 7 }
 0x1bb   : > { %7543 = vmatprep.mubr.bf16.mxu1 %v11530_v11  ;;  %vm11534_vm8 = vcmp.ne.s16.totalorder %v11533_v31, 0  ;;  %v5555_v60 = vor.u32 %v5553_v48, %v5551_v14  ;;  %s10451_s6 = scalar_lea.vmem [#allocation2], %s6396_s30 }
 0x1bc   : > { %7588 = vmatmul.mubr.bf16.gmra.mxu0 %v5520_v26  ;;  %v5360_v5 = vsel %vm11534_vm8, 0, %v9854_v17  ;;  %v2181_v26 = vpop.f32.mrf.mxu1  ;;  %v11541_v17 = vld [vmem:[#allocation56_spill] sm:$0xff] }
 0x1bd   : > { %7591 = vmatprep.mubr.bf16.mxu0 %v5528_v35  ;;  %v11537_v35 = vld [vmem:[#allocation8_spill] sm:$0xff]  ;;  %v2182_v39 = vadd.f32 %v2181_v26, %v11539_v42  ;;  %vm11542_vm15 = vcmp.ne.s16.totalorder %v11541_v17, 0  ;;  %v6707_v11 = vcombine.low %v5360_v5, %v5361_v45  ;;  %v3126_v26 = vpop.f32.mrf.mxu0  ;;  %v5364_v5 = vsel %vm11548_vm11, 0, %v9925_v13  ;;  %v11552_v42 = vld [vmem:[#allocation14_spill] sm:$0xff] }
 0x1be   : > { %v7266_v33 = vpop.f32.mrf.mxu1  ;;  %v5362_v55 = vsel %vm11542_vm15, 0, %v9892_v16  ;;  %v11546_v16 = vld [vmem:[#allocation58_spill] sm:$0xff]  ;;  %v11550_v45 = vld [vmem:[#allocation12_spill] sm:$0xff]  ;;  %v5367_v13 = vsel %vm11452_vm3, 0, %v9968_v34  ;;  %vm11562_vm3 = vmmov %vm11557_vm0 }
 0x1bf   : > { %v10168_v18 = vadd.f32 %v3123_v8, %v2182_v39  ;;  %v2193_v57 = vadd.f32 %v7266_v33, %v11545_v41  ;;  %v6708_v43 = vcombine.low %v5362_v55, %v5363_v36  ;;  %v5565_v37 = vshll.u32 %v6707_v11, 16  ;;  %v11556_v41 = vld [vmem:[#allocation16_spill] sm:$0xff] }
 0x1c0   : > { %v2184_v4 = vpop.f32.mrf.mxu1  ;;  %v5552_v8 = vsel %vm11547_vm13, %v5547_v2, %v5551_v14  ;;  %v5563_v33 = vor.u32 %v5561_v32, %v5559_v51  ;;  %v6710_v55 = vcombine.low %v5366_v20, %v5367_v13 }
 0x1c1   : > { %v10171_v28 = vadd.f32 %v7314_v38, %v2193_v57  ;;  %v2185_v31 = vadd.f32 %v2184_v4, %v11546_v16  ;;  %v5573_v48 = vshll.u32 %v6708_v43, 16  ;;  %v5567_v39 = vrot.slane %v5565_v37, 1  ;;  %v11558_v16 = vld [vmem:[#allocation18_spill] sm:$0xff] }
 0x1c2   : > { %7544 = vmatmul.mubr.bf16.gmra.mxu1 %v11537_v35  ;;  %v5560_v35 = vsel %vm11551_vm10, %v5555_v60, %v5559_v51  ;;  %v5589_v4 = vshll.u32 %v6710_v55, 16  ;;  %v5368_v60 = vsel %vm11460_vm14, 0, %v431_v19  ;;  %vm11565_vm14 = vmmov %vm11557_vm0 }
 0x1c3   : > { %7547 = vmatprep.mubr.bf16.mxu1 %v11540_v27  ;;  %v6709_v27 = vcombine.low %v5364_v5, %v5365_v59  ;;  %v5575_v17 = vrot.slane %v5573_v48, 1  ;;  %v5568_v14 = vsel %vm11555_vm12, %v5563_v33, %v5567_v39  ;;  %v6711_v5 = vcombine.low %v5368_v60, %v5368_v60  ;;  %v11563_v33 = vld [vmem:[#allocation21_spill] sm:$0xff] }
 0x1c4   : > { %7592 = vmatmul.mubr.bf16.gmra.mxu0 %v5536_v62  ;;  %v10174_v62 = vadd.f32 %v3126_v26, %v2185_v31  ;;  %v11559_v31 = vld [vmem:[#allocation62_spill] sm:$0xff] }
 0x1c5   : > { %7595 = vmatprep.mubr.bf16.mxu0 %v5544_v15  ;;  %v5569_v15 = vshrl.u32 %v6707_v11, 16  ;;  %v5581_v36 = vshll.u32 %v6709_v27, 16  ;;  %v5577_v11 = vshrl.u32 %v6708_v43, 16  ;;  %v5585_v2 = vshrl.u32 %v6709_v27, 16 }
 0x1c6   : > { %v5597_v27 = vshll.u32 %v6711_v5, 16  ;;  %v11570_v5 = vld [vmem:[#allocation32_spill] sm:$0xff] }
 0x1c7   : > { %v5571_v38 = vor.u32 %v5569_v15, %v5567_v39  ;;  %v5583_v37 = vrot.slane %v5581_v36, 1  ;;  %v5579_v43 = vor.u32 %v5577_v11, %v5575_v17  ;;  %v5593_v39 = vshrl.u32 %v6710_v55, 16  ;;  %v11566_v11 = vld [vmem:[#allocation26_spill] sm:$0xff] }
 0x1c8   : > { %v7317_v57 = vpop.f32.mrf.mxu0 }
 0x1c9   : > { %v5576_v3 = vsel %vm11557_vm0, %v5571_v38, %v5575_v17  ;;  %v5584_v47 = vsel %vm11562_vm3, %v5579_v43, %v5583_v37  ;;  %v11564_v17 = vld [vmem:[#allocation22_spill] sm:$0xff] }
 0x1ca   : > { %7548 = vmatmul.mubr.bf16.gmra.mxu1 %v11550_v45  ;;  %v7269_v51 = vpop.f32.mrf.mxu1  ;;  %v5587_v45 = vor.u32 %v5585_v2, %v5583_v37 }
 0x1cb   : > { %7551 = vmatprep.mubr.bf16.mxu1 %v11552_v42  ;;  %v2206_v26 = vadd.f32 %v7269_v51, %v11559_v31  ;;  %v11561_v42 = vld [vmem:[#allocation79_spill] sm:$0xff] }
 0x1cc   : > { %7596 = vmatmul.mubr.bf16.gmra.mxu0 %v5552_v8  ;;  %v3139_v8 = vpop.f32.mrf.mxu0  ;;  %v2197_v32 = vpop.f32.mrf.mxu1 }
 0x1cd   : > { %7599 = vmatprep.mubr.bf16.mxu0 %v5560_v35  ;;  %v10200_v53 = vadd.f32 %v7317_v57, %v2206_v26  ;;  %v2198_v59 = vadd.f32 %v2197_v32, %v11560_v21  ;;  %v5591_v35 = vrot.slane %v5589_v4, 1  ;;  %v5599_v57 = vrot.slane %v5597_v27, 1  ;;  %v11568_v4 = vld [vmem:[#allocation25_spill] sm:$0xff]  ;;  %v11569_v26 = vld [vmem:[#allocation27_spill] sm:$0xff] }
 0x1ce   : > { %v7270_v30 = vpop.f32.mrf.mxu1  ;;  %v7318_v15 = vpop.f32.mrf.mxu0 }
 0x1cf   : > { %v10203_v48 = vadd.f32 %v3139_v8, %v2198_v59  ;;  %v2209_v20 = vadd.f32 %v7270_v30, %v11561_v42  ;;  %v5592_v36 = vsel %vm11565_vm14, %v5587_v45, %v5591_v35  ;;  %v11573_v42 = vld [vmem:[#allocation88_spill] sm:$0xff] }
 0x1d0   : > { %v2200_v13 = vpop.f32.mrf.mxu1 }
 0x1d1   : > { %v10208_v38 = vadd.f32 %v7318_v15, %v2209_v20  ;;  %v2201_v19 = vadd.f32 %v2200_v13, %v11564_v17  ;;  %v11572_v15 = vld [vmem:[#allocation74_spill] sm:$0xff] }
 0x1d2   : > { %7552 = vmatmul.mubr.bf16.gmra.mxu1 %v11556_v41  ;;  %v2105_v20 = vadd.f32 %v11573_v42, %v11572_v15 }
 0x1d3   : > { %7555 = vmatprep.mubr.bf16.mxu1 %v11558_v16 }
 0x1d4   : > { %7600 = vmatmul.mubr.bf16.gmra.mxu0 %v5568_v14  ;;  %v3142_v14 = vpop.f32.mrf.mxu0 }
 0x1d5   : > { %7603 = vmatprep.mubr.bf16.mxu0 %v5576_v3  ;;  %v10213_v41 = vadd.f32 %v3142_v14, %v2201_v19  ;;  %v5595_v3 = vor.u32 %v5593_v39, %v5591_v35  ;;  %v11574_v14 = vld [vmem:[#allocation42_spill] sm:$0xff] }
 0x1d7   : > { %v5600_v55 = vsel %vm11567_vm7, %v5595_v3, %v5599_v57 }
 0x1da   : > { %7556 = vmatmul.mubr.bf16.gmra.mxu1 %v11563_v33 }
 0x1db   : > { %7559 = vmatprep.mubr.bf16.mxu1 %v11566_v11  ;;  %v7273_v2 = vpop.f32.mrf.mxu1  ;;  %v3171_v11 = vadd.f32 %v11574_v14, %v2105_v20 }
 0x1dc   : > { %7604 = vmatmul.mubr.bf16.gmra.mxu0 %v5584_v47  ;;  %v2222_v60 = vadd.f32 %v7273_v2, %v11568_v4 }
 0x1dd   : > { %7607 = vmatprep.mubr.bf16.mxu0 %v5592_v36  ;;  %v7321_v16 = vpop.f32.mrf.mxu0  ;;  %v2213_v51 = vpop.f32.mrf.mxu1 }
 0x1de   : > { %v10220_v31 = vadd.f32 %v7321_v16, %v2222_v60  ;;  %v2214_v37 = vadd.f32 %v2213_v51, %v11569_v26  ;;  %v11575_v51 = vld [vmem:[#allocation64_spill] sm:$0xff]  ;;  %v11576_v26 = vld [vmem:[#allocation51_spill] sm:$0xff] }
 0x1df   : > { %v3155_v8 = vpop.f32.mrf.mxu0  ;;  %v7274_v43 = vpop.f32.mrf.mxu1 }
 0x1e0   : > { %v10223_v32 = vadd.f32 %v3155_v8, %v2214_v37  ;;  %v2225_v21 = vadd.f32 %v7274_v43, %v11570_v5  ;;  %v2121_v37 = vadd.f32 %v11576_v26, %v11575_v51 }
 0x1e1   : > { %v7322_v59 = vpop.f32.mrf.mxu0  ;;  %v2216_v45 = vpop.f32.mrf.mxu1 }
 0x1e2   : > { %7560 = vmatmul.mubr.bf16.gmra.mxu1 %v6670_v29  ;;  %v10226_v35 = vadd.f32 %v7322_v59, %v2225_v21  ;;  %v2217_v34 = vadd.f32 %v2216_v45, %v11571_v22  ;;  %v11577_v22 = vld [vmem:[#allocation53_spill] sm:$0xff] }
 0x1e3   : > { %v3158_v29 = vpop.f32.mrf.mxu0  ;;  %v7341_v30 = vpop.f32.mrf.mxu1 }
 0x1e4   : > { %7608 = vmatmul.mubr.bf16.gmra.mxu0 %v5600_v55  ;;  %v10231_v47 = vadd.f32 %v3158_v29, %v2217_v34  ;;  %v3714_v13 = vadd.f32 %v7341_v30, %v9965_v49  ;;  %v3175_v34 = vadd.f32 %v11577_v22, %v2121_v37 }
 0x1e5   : > { %v7389_v39 = vpop.f32.mrf.mxu0  ;;  %v3585_v27 = vpop.f32.mrf.mxu1 }
 0x1e6   : > { %v10234_v33 = vadd.f32 %v7389_v39, %v3714_v13  ;;  %v3712_v17 = vadd.f32 %v3585_v27, %v9981_v56  ;;  %v11578_v27 = vld [vmem:[#allocation24_spill] sm:$0xff] }
 0x1e7   : > { %v3849_v19 = vpop.f32.mrf.mxu0  ;;  %v7342_v36 = vpop.f32.mrf.mxu1 }
 0x1e8   : > { %v10238_v3 = vadd.f32 %v3849_v19, %v3712_v17  ;;  %v3715_v57 = vadd.f32 %v7342_v36, %v9987_v12  ;;  %v2137_v17 = vadd.f32 %v10002_v9, %v11578_v27 }
 0x1e9   : > { %v7390_v55 = vpop.f32.mrf.mxu0  ;;  %v3588_v2 = vpop.f32.mrf.mxu1 }
 0x1ea   : > { %v10241_v4 = vadd.f32 %v7390_v55, %v3715_v57  ;;  %v3713_v60 = vadd.f32 %v3588_v2, %v3171_v11  ;;  %v3179_v2 = vadd.f32 %v10013_v1, %v2137_v17 }
 0x1eb   : > { %v3852_v49 = vpop.f32.mrf.mxu0  ;;  %v7345_v16 = vpop.f32.mrf.mxu1 }
 0x1ec   : > { %v10245_v8 = vadd.f32 %v3852_v49, %v3713_v60  ;;  %v3718_v56 = vadd.f32 %v7345_v16, %v10000_v58 }
 0x1ed   : > { %v7393_v43 = vpop.f32.mrf.mxu0  ;;  %v3601_v5 = vpop.f32.mrf.mxu1 }
 0x1ee   : > { %v10248_v21 = vadd.f32 %v7393_v43, %v3718_v56  ;;  %v3716_v12 = vadd.f32 %v3601_v5, %v10007_v6  ;;  %v11579_v56 = vld [vmem:[#allocation82_spill] sm:$0xff] }
 0x1ef   : > { %v3865_v59 = vpop.f32.mrf.mxu0  ;;  %v7346_v45 = vpop.f32.mrf.mxu1  ;;  %v2153_v43 = vadd.f32 %v10084_v63, %v11579_v56 }
 0x1f0   : > { %v10252_v29 = vadd.f32 %v3865_v59, %v3716_v12  ;;  %v3719_v30 = vadd.f32 %v7346_v45, %v10010_v50 }
 0x1f1   : > { %v7394_v15 = vpop.f32.mrf.mxu0  ;;  %v3604_v42 = vpop.f32.mrf.mxu1 }
 0x1f2   : > { %v10255_v20 = vadd.f32 %v7394_v15, %v3719_v30  ;;  %v3717_v13 = vadd.f32 %v3604_v42, %v3175_v34  ;;  %v3183_v34 = vadd.f32 %v10082_v52, %v2153_v43 }
 0x1f3   : > { %v3868_v58 = vpop.f32.mrf.mxu0  ;;  %v7349_v39 = vpop.f32.mrf.mxu1 }
 0x1f4   : > { %v10259_v19 = vadd.f32 %v3868_v58, %v3717_v13  ;;  %v3722_v6 = vadd.f32 %v7349_v39, %v10024_v46 }
 0x1f5   : > { %v7397_v36 = vpop.f32.mrf.mxu0  ;;  %v3617_v14 = vpop.f32.mrf.mxu1 }
 0x1f6   : > { %v10262_v11 = vadd.f32 %v7397_v36, %v3722_v6  ;;  %v3720_v50 = vadd.f32 %v3617_v14, %v10035_v54 }
 0x1f7   : > { %v3881_v57 = vpop.f32.mrf.mxu0  ;;  %v7350_v55 = vpop.f32.mrf.mxu1 }
 0x1f8   : > { %v10266_v60 = vadd.f32 %v3881_v57, %v3720_v50  ;;  %v3723_v49 = vadd.f32 %v7350_v55, %v10039_v25 }
 0x1f9   : > { %v7398_v16 = vpop.f32.mrf.mxu0  ;;  %v3620_v9 = vpop.f32.mrf.mxu1 }
 0x1fa   : > { %v10269_v51 = vadd.f32 %v7398_v16, %v3723_v49  ;;  %v3721_v26 = vadd.f32 %v3620_v9, %v3179_v2 }
 0x1fb   : > { %v3884_v46 = vpop.f32.mrf.mxu0  ;;  %v7353_v37 = vpop.f32.mrf.mxu1 }
 0x1fc   : > { %v10273_v5 = vadd.f32 %v3884_v46, %v3721_v26  ;;  %v3726_v54 = vadd.f32 %v7353_v37, %v10057_v24 }
 0x1fd   : > { %v7401_v12 = vpop.f32.mrf.mxu0  ;;  %v3633_v1 = vpop.f32.mrf.mxu1 }
 0x1fe   : > { %v10276_v59 = vadd.f32 %v7401_v12, %v3726_v54  ;;  %v3724_v25 = vadd.f32 %v3633_v1, %v10061_v23 }
 0x1ff   : > { %v3897_v45 = vpop.f32.mrf.mxu0  ;;  %v7354_v22 = vpop.f32.mrf.mxu1 }
 0x200   : > { %v10280_v30 = vadd.f32 %v3897_v45, %v3724_v25  ;;  %v3727_v15 = vadd.f32 %v7354_v22, %v10064_v0 }
 0x201   : > { %v7402_v42 = vpop.f32.mrf.mxu0  ;;  %v3636_v63 = vpop.f32.mrf.mxu1 }
 0x202   : > { %v10283_v13 = vadd.f32 %v7402_v42, %v3727_v15  ;;  %v3725_v58 = vadd.f32 %v3636_v63, %v3183_v34 }
 0x203   : > { %v3900_v24 = vpop.f32.mrf.mxu0  ;;  %v7357_v39 = vpop.f32.mrf.mxu1 }
 0x204   : > { %v10285_v27 = vadd.f32 %v3900_v24, %v3725_v58  ;;  %v3730_v17 = vadd.f32 %v7357_v39, %v10105_v61 }
 0x205   : > { %v7405_v23 = vpop.f32.mrf.mxu0  ;;  %v3649_v6 = vpop.f32.mrf.mxu1 }
 0x206   : > { %v10288_v36 = vadd.f32 %v7405_v23, %v3730_v17  ;;  %v3728_v52 = vadd.f32 %v3649_v6, %v10108_v44 }
 0x207   : > { %v3913_v14 = vpop.f32.mrf.mxu0  ;;  %v7358_v50 = vpop.f32.mrf.mxu1 }
 0x208   : > { %v10291_v0 = vadd.f32 %v3913_v14, %v3728_v52  ;;  %v3731_v57 = vadd.f32 %v7358_v50, %v10118_v10 }
 0x209   : > { %v7406_v55 = vpop.f32.mrf.mxu0  ;;  %v3652_v2 = vpop.f32.mrf.mxu1 }
 0x20a   : > { %v10294_v49 = vadd.f32 %v7406_v55, %v3731_v57  ;;  %v3729_v16 = vadd.f32 %v3652_v2, %v10130_v40 }
 0x20b   : > { %v3916_v9 = vpop.f32.mrf.mxu0  ;;  %v7361_v61 = vpop.f32.mrf.mxu1 }
 0x20c   : > { %v10297_v26 = vadd.f32 %v3916_v9, %v3729_v16  ;;  %v3734_v46 = vadd.f32 %v7361_v61, %v10158_v7 }
 0x20d   : > { %v7409_v37 = vpop.f32.mrf.mxu0  ;;  %v3665_v44 = vpop.f32.mrf.mxu1 }
 0x20e   : > { %v10300_v56 = vadd.f32 %v7409_v37, %v3734_v46  ;;  %v3732_v43 = vadd.f32 %v3665_v44, %v10168_v18 }
 0x20f   : > { %v3929_v54 = vpop.f32.mrf.mxu0  ;;  %v7362_v10 = vpop.f32.mrf.mxu1 }
 0x210   : > { %v10303_v12 = vadd.f32 %v3929_v54, %v3732_v43  ;;  %v3735_v1 = vadd.f32 %v7362_v10, %v10171_v28 }
 0x211   : > { %v7410_v25 = vpop.f32.mrf.mxu0  ;;  %v3668_v40 = vpop.f32.mrf.mxu1 }
 0x212   : > { %v10306_v45 = vadd.f32 %v7410_v25, %v3735_v1  ;;  %v3733_v22 = vadd.f32 %v3668_v40, %v10174_v62 }
 0x213   : > { %v3932_v34 = vpop.f32.mrf.mxu0  ;;  %v7365_v7 = vpop.f32.mrf.mxu1 }
 0x214   : > { %v10309_v15 = vadd.f32 %v3932_v34, %v3733_v22  ;;  %v3738_v42 = vadd.f32 %v7365_v7, %v10200_v53 }
 0x215   : > { %v7413_v63 = vpop.f32.mrf.mxu0  ;;  %v3681_v18 = vpop.f32.mrf.mxu1 }
 0x216   : > { %v10312_v58 = vadd.f32 %v7413_v63, %v3738_v42  ;;  %v3736_v24 = vadd.f32 %v3681_v18, %v10203_v48 }
 0x217   : > { %v3945_v39 = vpop.f32.mrf.mxu0  ;;  %v7366_v28 = vpop.f32.mrf.mxu1 }
 0x218   : > { %v10315_v17 = vadd.f32 %v3945_v39, %v3736_v24  ;;  %v3739_v23 = vadd.f32 %v7366_v28, %v10208_v38 }
 0x219   : > { %v7414_v6 = vpop.f32.mrf.mxu0  ;;  %v3684_v62 = vpop.f32.mrf.mxu1 }
 0x21a   : > { %v10318_v52 = vadd.f32 %v7414_v6, %v3739_v23  ;;  %v3737_v14 = vadd.f32 %v3684_v62, %v10213_v41 }
 0x21b   : > { %v3948_v50 = vpop.f32.mrf.mxu0  ;;  %v7369_v53 = vpop.f32.mrf.mxu1 }
 0x21c   : > { %v10321_v57 = vadd.f32 %v3948_v50, %v3737_v14  ;;  %v3742_v55 = vadd.f32 %v7369_v53, %v10220_v31 }
 0x21d   : > { %v7417_v2 = vpop.f32.mrf.mxu0  ;;  %v3697_v48 = vpop.f32.mrf.mxu1 }
 0x21e   : > { %v10324_v16 = vadd.f32 %v7417_v2, %v3742_v55  ;;  %v3740_v9 = vadd.f32 %v3697_v48, %v10223_v32 }
 0x21f   : > { %v3961_v61 = vpop.f32.mrf.mxu0  ;;  %v7370_v38 = vpop.f32.mrf.mxu1 }
 0x220   : > { %v10327_v46 = vadd.f32 %v3961_v61, %v3740_v9  ;;  %v3743_v37 = vadd.f32 %v7370_v38, %v10226_v35 }
 0x221   : > { %v7418_v44 = vpop.f32.mrf.mxu0  ;;  %v3700_v41 = vpop.f32.mrf.mxu1 }
 0x222   : > { %v10330_v43 = vadd.f32 %v7418_v44, %v3743_v37  ;;  %v3741_v54 = vadd.f32 %v3700_v41, %v10231_v47 }
 0x223   : > { %v3964_v10 = vpop.f32.mrf.mxu0  ;;  %v7437_v31 = vpop.f32.mrf.mxu1 }
 0x224   : > { %v10333_v1 = vadd.f32 %v3964_v10, %v3741_v54  ;;  %v4500_v25 = vadd.f32 %v7437_v31, %v10234_v33 }
 0x225   : > { %v7485_v40 = vpop.f32.mrf.mxu0  ;;  %v4371_v32 = vpop.f32.mrf.mxu1 }
 0x226   : > { %v10336_v22 = vadd.f32 %v7485_v40, %v4500_v25  ;;  %v4498_v34 = vadd.f32 %v4371_v32, %v10238_v3 }
 0x227   : > { %v4913_v7 = vpop.f32.mrf.mxu0  ;;  %v10339_v35 = vpop.f32.mrf.mxu1 }
 0x228   : > { %v10341_v42 = vadd.f32 %v4913_v7, %v4498_v34 }
 0x229   : > { %v10343_v63 = vpop.f32.mrf.mxu0  ;;  %v10345_v47 = vpop.f32.mrf.mxu1 }
 0x22b   : > { %v10347_v18 = vpop.f32.mrf.mxu0  ;;  %v7441_v24 = vpop.f32.mrf.mxu1 }
 0x22c   : > { %v4504_v33 = vadd.f32 %v7441_v24, %v10248_v21 }
 0x22d   : > { %v7489_v39 = vpop.f32.mrf.mxu0  ;;  %v4387_v28 = vpop.f32.mrf.mxu1 }
 0x22e   : > { %v10350_v23 = vadd.f32 %v7489_v39, %v4504_v33  ;;  %v4502_v3 = vadd.f32 %v4387_v28, %v10252_v29 }
 0x22f   : > { %v4929_v6 = vpop.f32.mrf.mxu0  ;;  %v10353_v62 = vpop.f32.mrf.mxu1 }
 0x230   : > { %v10355_v14 = vadd.f32 %v4929_v6, %v4502_v3 }
 0x231   : > { %v10357_v50 = vpop.f32.mrf.mxu0  ;;  %v10359_v53 = vpop.f32.mrf.mxu1 }
 0x233   : > { %v10361_v55 = vpop.f32.mrf.mxu0  ;;  %v7445_v2 = vpop.f32.mrf.mxu1 }
 0x234   : > { %v4508_v21 = vadd.f32 %v7445_v2, %v10262_v11 }
 0x235   : > { %v7493_v48 = vpop.f32.mrf.mxu0  ;;  %v4403_v9 = vpop.f32.mrf.mxu1 }
 0x236   : > { %v10364_v61 = vadd.f32 %v7493_v48, %v4508_v21  ;;  %v4506_v29 = vadd.f32 %v4403_v9, %v10266_v60 }
 0x237   : > { %v4945_v38 = vpop.f32.mrf.mxu0  ;;  %v10367_v37 = vpop.f32.mrf.mxu1 }
 0x238   : > { %v10369_v44 = vadd.f32 %v4945_v38, %v4506_v29 }
 0x239   : > { %v10371_v41 = vpop.f32.mrf.mxu0  ;;  %v10373_v54 = vpop.f32.mrf.mxu1 }
 0x23b   : > { %v10375_v10 = vpop.f32.mrf.mxu0  ;;  %v7449_v31 = vpop.f32.mrf.mxu1 }
 0x23c   : > { %v4512_v11 = vadd.f32 %v7449_v31, %v10276_v59 }
 0x23d   : > { %v4419_v40 = vpop.f32.mrf.mxu1 }
 0x23e   : > { %v4510_v60 = vadd.f32 %v4419_v40, %v10280_v30 }
 0x23f   : > { %v10381_v7 = vpop.f32.mrf.mxu1 }
 0x241   : > { %v7497_v25 = vpop.f32.mrf.mxu0  ;;  %v10387_v39 = vpop.f32.mrf.mxu1 }
 0x242   : > { %v10378_v32 = vadd.f32 %v7497_v25, %v4512_v11 }
 0x243   : > { %v4961_v34 = vpop.f32.mrf.mxu0 }
 0x244   : > { %v10383_v24 = vadd.f32 %v4961_v34, %v4510_v60  ;;  %v7453_v3 = vpop.f32.mrf.mxu1 }
 0x245   : > { %v10385_v33 = vpop.f32.mrf.mxu0  ;;  %v4516_v59 = vadd.f32 %v7453_v3, %v10288_v36 }
 0x246   : > { %v4435_v2 = vpop.f32.mrf.mxu1 }
 0x247   : > { %v10389_v28 = vpop.f32.mrf.mxu0  ;;  %v4514_v30 = vadd.f32 %v4435_v2, %v10291_v0 }
 0x248   : > { %v7454_v9 = vpop.f32.mrf.mxu1 }
 0x249   : > { %v7501_v6 = vpop.f32.mrf.mxu0  ;;  %v4517_v38 = vadd.f32 %v7454_v9, %v10294_v49 }
 0x24a   : > { %v10392_v21 = vadd.f32 %v7501_v6, %v4516_v59  ;;  %v4438_v11 = vpop.f32.mrf.mxu1 }
 0x24b   : > { %v4977_v48 = vpop.f32.mrf.mxu0  ;;  %v4515_v40 = vadd.f32 %v4438_v11, %v10297_v26 }
 0x24c   : > { %v10395_v29 = vadd.f32 %v4977_v48, %v4514_v30  ;;  %v7457_v36 = vpop.f32.mrf.mxu1 }
 0x24d   : > { %v7502_v31 = vpop.f32.mrf.mxu0  ;;  %v4520_v3 = vadd.f32 %v7457_v36, %v10300_v56 }
 0x24e   : > { %v10398_v25 = vadd.f32 %v7502_v31, %v4517_v38  ;;  %v4451_v0 = vpop.f32.mrf.mxu1 }
 0x24f   : > { %v4980_v60 = vpop.f32.mrf.mxu0  ;;  %v4518_v2 = vadd.f32 %v4451_v0, %v10303_v12 }
 0x250   : > { %v10401_v34 = vadd.f32 %v4980_v60, %v4515_v40  ;;  %v7458_v49 = vpop.f32.mrf.mxu1 }
 0x251   : > { %v4521_v9 = vadd.f32 %v7458_v49, %v10306_v45 }
 0x252   : > { %v4454_v26 = vpop.f32.mrf.mxu1 }
 0x253   : > { %v4519_v11 = vadd.f32 %v4454_v26, %v10309_v15 }
 0x254   : > { %v7505_v59 = vpop.f32.mrf.mxu0 }
 0x255   : > { %v10404_v6 = vadd.f32 %v7505_v59, %v4520_v3 }
 0x256   : > { %v4993_v30 = vpop.f32.mrf.mxu0 }
 0x257   : > { %v10407_v48 = vadd.f32 %v4993_v30, %v4518_v2 }
 0x258   : > { %v7506_v38 = vpop.f32.mrf.mxu0 }
 0x259   : > { %v10410_v31 = vadd.f32 %v7506_v38, %v4521_v9 }
 0x25a   : > { %v4996_v40 = vpop.f32.mrf.mxu0  ;;  %v7461_v56 = vpop.f32.mrf.mxu1 }
 0x25b   : > { %v10413_v60 = vadd.f32 %v4996_v40, %v4519_v11  ;;  %v4524_v36 = vadd.f32 %v7461_v56, %v10312_v58 }
 0x25c   : > { %v7509_v3 = vpop.f32.mrf.mxu0  ;;  %v4467_v12 = vpop.f32.mrf.mxu1 }
 0x25d   : > { %v10416_v59 = vadd.f32 %v7509_v3, %v4524_v36  ;;  %v4522_v0 = vadd.f32 %v4467_v12, %v10315_v17 }
 0x25e   : > { %v5009_v45 = vpop.f32.mrf.mxu0  ;;  %v7462_v2 = vpop.f32.mrf.mxu1 }
 0x25f   : > { %v10419_v30 = vadd.f32 %v5009_v45, %v4522_v0  ;;  %v4525_v49 = vadd.f32 %v7462_v2, %v10318_v52 }
 0x260   : > { %v7510_v15 = vpop.f32.mrf.mxu0  ;;  %v4470_v9 = vpop.f32.mrf.mxu1 }
 0x261   : > { %v10422_v38 = vadd.f32 %v7510_v15, %v4525_v49  ;;  %v4523_v26 = vadd.f32 %v4470_v9, %v10321_v57  ;;  %v4501_v15 = vadd.f32 %v10339_v35, %v10241_v4 }
 0x262   : > { %v5012_v58 = vpop.f32.mrf.mxu0  ;;  %v7465_v11 = vpop.f32.mrf.mxu1 }
 0x263   : > { %v10425_v40 = vadd.f32 %v5012_v58, %v4523_v26  ;;  %v4528_v56 = vadd.f32 %v7465_v11, %v10324_v16  ;;  %v5043_v35 = vadd.f32 %v10343_v63, %v4501_v15  ;;  %v10462_v63 = vld [vmem:[%s10451_s6] sm:$0xff]  }
 0x264   : > { %v7513_v36 = vpop.f32.mrf.mxu0  ;;  %v4483_v17 = vpop.f32.mrf.mxu1 }
 0x265   : > { %v10429_v3 = vadd.f32 %v7513_v36, %v4528_v56  ;;  %v4526_v12 = vadd.f32 %v4483_v17, %v10327_v46  ;;  %v4499_v46 = vadd.f32 %v10345_v47, %v10245_v8  ;;  %v10448_v36 = vld [vmem:[%s10791_s2] ss:$0 sm:$0xff] }
 0x266   : > { %v5025_v52 = vpop.f32.mrf.mxu0  ;;  %v7466_v0 = vpop.f32.mrf.mxu1 }
 0x267   : > { %v10432_v45 = vadd.f32 %v5025_v52, %v4526_v12  ;;  %v4529_v2 = vadd.f32 %v7466_v0, %v10330_v43  ;;  %v5041_v12 = vadd.f32 %v10347_v18, %v4499_v46  ;;  %v10472_v46 = vld [vmem:[%s10451_s6 + $0x18] sm:$0xff]  }
 0x268   : > { %v7514_v57 = vpop.f32.mrf.mxu0  ;;  %v4486_v49 = vpop.f32.mrf.mxu1 }
 0x269   : > { %v10437_v16 = vadd.f32 %v7514_v57, %v4529_v2  ;;  %v4527_v9 = vadd.f32 %v4486_v49, %v10333_v1  ;;  %v10454_v1 = vld [vmem:[%s10451_s6 + $0x8] sm:$0xff]   ;;  %v4505_v57 = vadd.f32 %v10353_v62, %v10255_v20  ;;  %v6791_v20 = vunpack.c.l.bf16 %v10462_v63 }
 0x26a   : > { %v5028_v26 = vpop.f32.mrf.mxu0  ;;  %v7533_v58 = vpop.f32.mrf.mxu1  ;;  %v6795_v49 = vunpack.c.l.bf16 %v10454_v1 }
 0x26b   : > { %v10442_v11 = vadd.f32 %v5028_v26, %v4527_v9  ;;  %v5306_v56 = vadd.f32 %v7533_v58, %v10336_v22 }
 0x26c   : > { %v7581_v43 = vpop.f32.mrf.mxu0  ;;  %v5177_v4 = vpop.f32.mrf.mxu1 }
 0x26d   : > { %v5828_v17 = vadd.f32 %v7581_v43, %v5306_v56  ;;  %v5304_v8 = vadd.f32 %v5177_v4, %v10341_v42  ;;  %v10475_v56 = vld [vmem:[%s10451_s6 + $0x10] sm:$0xff]   ;;  %v4503_v43 = vadd.f32 %v10359_v53, %v10259_v19 }
 0x26e   : > { %v5699_v22 = vpop.f32.mrf.mxu0  ;;  %v7534_v47 = vpop.f32.mrf.mxu1 }
 0x26f   : > { %v10459_v52 = vadd.f32 %v10448_v36, %v5828_v17  ;;  %v5826_v0 = vadd.f32 %v5699_v22, %v5304_v8  ;;  %v5307_v2 = vadd.f32 %v7534_v47, %v5043_v35 }
 0x270   : > { %v7582_v15 = vpop.f32.mrf.mxu0  ;;  %v5180_v42 = vpop.f32.mrf.mxu1 }
 0x271   : > { %v5899_v9 = vmul.f32 0.5, %v10459_v52  ;;  %v10469_v26 = vadd.f32 %v10448_v36, %v5826_v0  ;;  %v5829_v18 = vadd.f32 %v7582_v15, %v5307_v2  ;;  %v5305_v58 = vadd.f32 %v5180_v42, %v5041_v12 }
 0x272   : > { %v5702_v4 = vpop.f32.mrf.mxu0  ;;  %v7537_v17 = vpop.f32.mrf.mxu1  ;;  %v5047_v12 = vadd.f32 %v10357_v50, %v4505_v57  ;;  %v10499_v50 = vld [vmem:[%s10451_s6 + $0x20] sm:$0xff]  }
 0x273   : > { %7743 = vtanh.f32 %v5899_v9  ;;  %v5897_v8 = vmul.f32 0.5, %v10469_v26  ;;  %v10484_v22 = vadd.f32 %v10448_v36, %v5829_v18  ;;  %v5827_v47 = vadd.f32 %v5702_v4, %v5305_v58  ;;  %v10496_v58 = vld [vmem:[%s10451_s6 + $0x28] sm:$0xff]  }
 0x274   : > { %v5310_v19 = vadd.f32 %v7537_v17, %v10350_v23  ;;  %v7585_v53 = vpop.f32.mrf.mxu0  ;;  %v5193_v2 = vpop.f32.mrf.mxu1  ;;  %v5045_v23 = vadd.f32 %v10361_v55, %v4503_v43 }
 0x275   : > { %7745 = vtanh.f32 %v5897_v8  ;;  %v5900_v42 = vmul.f32 0.5, %v10484_v22  ;;  %v10492_v9 = vadd.f32 %v10448_v36, %v5827_v47  ;;  %v5308_v18 = vadd.f32 %v5193_v2, %v10355_v14  ;;  %v10506_v14 = vld [vmem:[%s10451_s6 + $0x38] sm:$0xff]  }
 0x276   : > { %v5832_v57 = vadd.f32 %v7585_v53, %v5310_v19  ;;  %v5715_v4 = vpop.f32.mrf.mxu0  ;;  %v7538_v17 = vpop.f32.mrf.mxu1  ;;  %v4509_v2 = vadd.f32 %v10367_v37, %v10269_v51 }
 0x277   : > { %7747 = vtanh.f32 %v5900_v42  ;;  %v5898_v47 = vmul.f32 0.5, %v10492_v9  ;;  %v5830_v0 = vadd.f32 %v5715_v4, %v5308_v18  ;;  %v5311_v35 = vadd.f32 %v7538_v17, %v5047_v12  ;;  %v10519_v4 = vld [vmem:[%s10451_s6 + $0x30] sm:$0xff]  }
 0x278   : > { %v10511_v55 = vadd.f32 %v10448_v36, %v5832_v57  ;;  %v7586_v43 = vpop.f32.mrf.mxu0  ;;  %v5196_v19 = vpop.f32.mrf.mxu1 }
 0x279   : > { %7749 = vtanh.f32 %v5898_v47  ;;  %v10516_v42 = vadd.f32 %v10448_v36, %v5830_v0  ;;  %v5833_v18 = vadd.f32 %v7586_v43, %v5311_v35  ;;  %v5309_v12 = vadd.f32 %v5196_v19, %v5045_v23 }
 0x27a   : > { %v5903_v17 = vmul.f32 0.5, %v10511_v55  ;;  %v5718_v51 = vpop.f32.mrf.mxu0  ;;  %v7541_v37 = vpop.f32.mrf.mxu1  ;;  %v5051_v43 = vadd.f32 %v10371_v41, %v4509_v2  ;;  %v4507_v19 = vadd.f32 %v10373_v54, %v10273_v5 }
 0x27b   : > { %v5901_v47 = vmul.f32 0.5, %v10516_v42  ;;  %v10527_v0 = vadd.f32 %v10448_v36, %v5833_v18  ;;  %v5831_v35 = vadd.f32 %v5718_v51, %v5309_v12  ;;  %v5314_v23 = vadd.f32 %v7541_v37, %v10364_v61  ;;  %v10539_v51 = vld [vmem:[%s10451_s6 + $0x48] sm:$0xff]  }
 0x27c   : > { %7751 = vtanh.f32 %v5903_v17  ;;  %v7589_v57 = vpop.f32.mrf.mxu0  ;;  %v5209_v15 = vpop.f32.mrf.mxu1  ;;  %v4513_v61 = vadd.f32 %v10381_v7, %v10283_v13  ;;  %v10555_v13 = vld [vmem:[%s10451_s6 + $0x40] sm:$0xff]  }
 0x27d   : > { %7753 = vtanh.f32 %v5901_v47  ;;  %v5904_v53 = vmul.f32 0.5, %v10527_v0  ;;  %v10536_v18 = vadd.f32 %v10448_v36, %v5831_v35  ;;  %v5836_v12 = vadd.f32 %v7589_v57, %v5314_v23 }
 0x27e   : > { %v5312_v5 = vadd.f32 %v5209_v15, %v10369_v44  ;;  %v5731_v41 = vpop.f32.mrf.mxu0  ;;  %v7542_v54 = vpop.f32.mrf.mxu1  ;;  %v5049_v35 = vadd.f32 %v10375_v10, %v4507_v19  ;;  %v4511_v44 = vadd.f32 %v10387_v39, %v10285_v27 }
 0x27f   : > { %7755 = vtanh.f32 %v5904_v53  ;;  %v5902_v37 = vmul.f32 0.5, %v10536_v18  ;;  %v10552_v57 = vadd.f32 %v10448_v36, %v5836_v12  ;;  %v5315_v47 = vadd.f32 %v7542_v54, %v5051_v43 }
 0x280   : > { %v7744_v7 = vpop.eup %7743  ;;  %v5834_v15 = vadd.f32 %v5731_v41, %v5312_v5  ;;  %v7590_v23 = vpop.f32.mrf.mxu0  ;;  %v5055_v54 = vadd.f32 %v10385_v33, %v4513_v61 }
 0x281   : > { %v5212_v2 = vpop.f32.mrf.mxu1  ;;  %v5963_v53 = vmul.f32 0.5, %v7744_v7  ;;  %7757 = vtanh.f32 %v5902_v37  ;;  %v5907_v12 = vmul.f32 0.5, %v10552_v57  ;;  %v5837_v8 = vadd.f32 %v7590_v23, %v5315_v47 }
 0x282   : > { %v7746_v43 = vpop.eup %7745  ;;  %v10565_v62 = vadd.f32 %v10448_v36, %v5834_v15  ;;  %v5313_v10 = vadd.f32 %v5212_v2, %v5049_v35  ;;  %v5734_v19 = vpop.f32.mrf.mxu0  ;;  %v5053_v7 = vadd.f32 %v10389_v28, %v4511_v44 }
 0x283   : > { %v7545_v27 = vpop.f32.mrf.mxu1  ;;  %v5995_v5 = vadd.f32 0.5, %v5963_v53  ;;  %v5961_v41 = vmul.f32 0.5, %v7746_v43  ;;  %7759 = vtanh.f32 %v5907_v12  ;;  %v10569_v37 = vadd.f32 %v10448_v36, %v5837_v8 }
 0x284   : > { %v7748_v47 = vpop.eup %7747  ;;  %v5905_v33 = vmul.f32 0.5, %v10565_v62  ;;  %v5835_v61 = vadd.f32 %v5734_v19, %v5313_v10  ;;  %v5318_v2 = vadd.f32 %v7545_v27, %v10378_v32  ;;  %v7593_v35 = vpop.f32.mrf.mxu0 }
 0x285   : > { %v5225_v15 = vpop.f32.mrf.mxu1  ;;  %v6027_v23 = vmul.f32 %v5995_v5, %v10459_v52  ;;  %v5993_v17 = vadd.f32 0.5, %v5961_v41  ;;  %v5964_v53 = vmul.f32 0.5, %v7748_v47  ;;  %v5908_v8 = vmul.f32 0.5, %v10569_v37 }
 0x286   : > { %v7750_v12 = vpop.eup %7749  ;;  %7761 = vtanh.f32 %v5905_v33  ;;  %v10582_v28 = vadd.f32 %v10448_v36, %v5835_v61  ;;  %v5840_v44 = vadd.f32 %v7593_v35, %v5318_v2  ;;  %v5316_v32 = vadd.f32 %v5225_v15, %v10383_v24  ;;  %v5747_v43 = vpop.f32.mrf.mxu0 }
 0x287   : > { %v7546_v10 = vpop.f32.mrf.mxu1  ;;  %v6123_v52 = vadd.f32 %v6795_v49, %v6027_v23  ;;  %v6025_v19 = vmul.f32 %v5993_v17, %v10469_v26  ;;  %v5996_v27 = vadd.f32 0.5, %v5964_v53  ;;  %v5962_v5 = vmul.f32 0.5, %v7750_v12 }
 0x288   : > { %7763 = vtanh.f32 %v5908_v8  ;;  %v5906_v41 = vmul.f32 0.5, %v10582_v28  ;;  %v10590_v47 = vadd.f32 %v10448_v36, %v5840_v44  ;;  %v5838_v33 = vadd.f32 %v5747_v43, %v5316_v32  ;;  %v7594_v61 = vpop.f32.mrf.mxu0 }
 0x289   : > { %v5228_v2 = vpop.f32.mrf.mxu1  ;;  %v7752_v35 = vpop.eup %7751  ;;  %v6121_v24 = vadd.f32 %v6791_v20, %v6025_v19  ;;  %v6028_v49 = vmul.f32 %v5996_v27, %v10484_v22  ;;  %v5994_v15 = vadd.f32 0.5, %v5962_v5  ;;  %v5319_v26 = vadd.f32 %v7546_v10, %v5055_v54 }
 0x28a   : > { %v7754_v17 = vpop.eup %7753  ;;  %v5967_v23 = vmul.f32 0.5, %v7752_v35  ;;  %7765 = vtanh.f32 %v5906_v41  ;;  %v5911_v53 = vmul.f32 0.5, %v10590_v47  ;;  %v10598_v8 = vadd.f32 %v10448_v36, %v5838_v33  ;;  %v5750_v12 = vpop.f32.mrf.mxu0 }
 0x28b   : > { %v7549_v44 = vpop.f32.mrf.mxu1  ;;  %v11580_v32 = vunpack.c.h.bf16 %v10454_v1  ;;  %v6026_v20 = vmul.f32 %v5994_v15, %v10492_v9  ;;  %v5965_v19 = vmul.f32 0.5, %v7754_v17  ;;  %v5841_v39 = vadd.f32 %v7594_v61, %v5319_v26 }
 0x28c   : > { %v7756_v22 = vpop.eup %7755  ;;  %v5999_v54 = vadd.f32 0.5, %v5967_v23  ;;  %7767 = vtanh.f32 %v5911_v53  ;;  %v5909_v10 = vmul.f32 0.5, %v10598_v8  ;;  %v5317_v27 = vadd.f32 %v5228_v2, %v5053_v7  ;;  %v7597_v5 = vpop.f32.mrf.mxu0 }
 0x28d   : > { %v6124_v43 = vadd.f32 %v11580_v32, %v6028_v49  ;;  %v5241_v41 = vpop.f32.mrf.mxu1  ;;  %v11581_v33 = vunpack.c.h.bf16 %v10462_v63  ;;  %v5997_v35 = vadd.f32 0.5, %v5965_v19  ;;  %v5968_v61 = vmul.f32 0.5, %v7756_v22 }
 0x28e   : > { %v7758_v49 = vpop.eup %7757  ;;  %v6031_v15 = vmul.f32 %v5999_v54, %v10511_v55  ;;  %7769 = vtanh.f32 %v5909_v10  ;;  %v10613_v26 = vadd.f32 %v10448_v36, %v5841_v39  ;;  %v5839_v17 = vadd.f32 %v5750_v12, %v5317_v27  ;;  %v5763_v23 = vpop.f32.mrf.mxu0 }
 0x28f   : > { %v6861_v1 = vpack.c.bf16 %v6124_v43, %v6123_v52  ;;  %v6122_v9 = vadd.f32 %v11581_v33, %v6026_v20  ;;  %v7550_v53 = vpop.f32.mrf.mxu1  ;;  %v6029_v52 = vmul.f32 %v5997_v35, %v10516_v42  ;;  %v6000_v2 = vadd.f32 0.5, %v5968_v61 }
 0x290   : > { %v5966_v63 = vmul.f32 0.5, %v7758_v49  ;;  %v7760_v32 = vpop.eup %7759  ;;  %v11582_v43 = vunpack.c.l.bf16 %v10472_v46  ;;  %v5912_v55 = vmul.f32 0.5, %v10613_v26  ;;  %v10621_v19 = vadd.f32 %v10448_v36, %v5839_v17  ;;  %v7598_v12 = vpop.f32.mrf.mxu0 }
 0x291   : > { %6948 = vst [vmem:[%s10606_s9 + $0x8] sm:$0xff] %v6861_v1   ;;  %v6856_v7 = vpack.c.bf16 %v6122_v9, %v6121_v24  ;;  %v5322_v39 = vadd.f32 %v7549_v44, %v10392_v21  ;;  %v5244_v22 = vpop.f32.mrf.mxu1  ;;  %v11583_v24 = vunpack.c.l.bf16 %v10475_v56  ;;  %v6032_v42 = vmul.f32 %v6000_v2, %v10527_v0 }
 0x292   : > { %v6127_v20 = vadd.f32 %v11582_v43, %v6031_v15  ;;  %v5998_v10 = vadd.f32 0.5, %v5966_v63  ;;  %v5971_v27 = vmul.f32 0.5, %v7760_v32  ;;  %7771 = vtanh.f32 %v5912_v55  ;;  %v5766_v35 = vpop.f32.mrf.mxu0 }
 0x293   : > { %6857 = vst [vmem:[%s10606_s9] sm:$0xff] %v6856_v7   ;;  %v6125_v54 = vadd.f32 %v11583_v24, %v6029_v52  ;;  %v5910_v1 = vmul.f32 0.5, %v10621_v19  ;;  %v5844_v33 = vadd.f32 %v7597_v5, %v5322_v39  ;;  %v5320_v9 = vadd.f32 %v5241_v41, %v10395_v29  ;;  %v7553_v61 = vpop.f32.mrf.mxu1  ;;  %v7762_v49 = vpop.eup %7761 }
 0x294   : > { %v11584_v21 = vunpack.c.h.bf16 %v10472_v46  ;;  %v6030_v15 = vmul.f32 %v5998_v10, %v10536_v18  ;;  %v6003_v17 = vadd.f32 0.5, %v5971_v27  ;;  %v5323_v7 = vadd.f32 %v7550_v53, %v10398_v25  ;;  %v7601_v2 = vpop.f32.mrf.mxu0 }
 0x295   : > { %v5969_v0 = vmul.f32 0.5, %v7762_v49  ;;  %7773 = vtanh.f32 %v5910_v1  ;;  %v10635_v52 = vadd.f32 %v10448_v36, %v5844_v33  ;;  %v5842_v5 = vadd.f32 %v5763_v23, %v5320_v9  ;;  %v5257_v29 = vpop.f32.mrf.mxu1  ;;  %v7764_v41 = vpop.eup %7763 }
 0x296   : > { %v6128_v44 = vadd.f32 %v11584_v21, %v6032_v42  ;;  %v11585_v32 = vunpack.c.h.bf16 %v10475_v56  ;;  %v6035_v43 = vmul.f32 %v6003_v17, %v10552_v57  ;;  %v5845_v18 = vadd.f32 %v7598_v12, %v5323_v7  ;;  %v5779_v24 = vpop.f32.mrf.mxu0 }
 0x297   : > { %v6001_v55 = vadd.f32 0.5, %v5969_v0  ;;  %v5972_v39 = vmul.f32 0.5, %v7764_v41  ;;  %v5915_v25 = vmul.f32 0.5, %v10635_v52  ;;  %v10642_v53 = vadd.f32 %v10448_v36, %v5842_v5  ;;  %v7554_v23 = vpop.f32.mrf.mxu1  ;;  %v7766_v42 = vpop.eup %7765 }
 0x298   : > { %v6871_v63 = vpack.c.bf16 %v6128_v44, %v6127_v20  ;;  %v6126_v46 = vadd.f32 %v11585_v32, %v6030_v15  ;;  %v11586_v20 = vunpack.c.l.bf16 %v10496_v58  ;;  %v10648_v27 = vadd.f32 %v10448_v36, %v5845_v18  ;;  %v7602_v9 = vpop.f32.mrf.mxu0 }
 0x299   : > { %v5321_v57 = vadd.f32 %v5244_v22, %v10401_v34  ;;  %v6033_v12 = vmul.f32 %v6001_v55, %v10565_v62  ;;  %v6004_v1 = vadd.f32 0.5, %v5972_v39  ;;  %v5970_v33 = vmul.f32 0.5, %v7766_v42  ;;  %v5260_v49 = vpop.f32.mrf.mxu1  ;;  %v7768_v21 = vpop.eup %7767 }
 0x29a   : > { %6950 = vst [vmem:[%s10606_s9 + $0x18] sm:$0xff] %v6871_v63   ;;  %v6866_v10 = vpack.c.bf16 %v6126_v46, %v6125_v54  ;;  %v6131_v56 = vadd.f32 %v11586_v20, %v6035_v43  ;;  %7775 = vtanh.f32 %v5915_v25  ;;  %v5913_v44 = vmul.f32 0.5, %v10642_v53  ;;  %v5782_v5 = vpop.f32.mrf.mxu0 }
 0x29b   : > { %v5916_v54 = vmul.f32 0.5, %v10648_v27  ;;  %v5843_v15 = vadd.f32 %v5766_v35, %v5321_v57  ;;  %v5326_v17 = vadd.f32 %v7553_v61, %v10404_v6  ;;  %v11587_v7 = vunpack.c.l.bf16 %v10499_v50  ;;  %v7557_v41 = vpop.f32.mrf.mxu1  ;;  %v7770_v63 = vpop.eup %7769 }
 0x29c   : > { %6949 = vst [vmem:[%s10606_s9 + $0x10] sm:$0xff] %v6866_v10   ;;  %v6036_v34 = vmul.f32 %v6004_v1, %v10569_v37  ;;  %v6002_v62 = vadd.f32 0.5, %v5970_v33  ;;  %v5975_v22 = vmul.f32 0.5, %v7768_v21  ;;  %7777 = vtanh.f32 %v5913_v44  ;;  %v7605_v37 = vpop.f32.mrf.mxu0 }
 0x29d   : > { %v6129_v0 = vadd.f32 %v11587_v7, %v6033_v12  ;;  %v10660_v32 = vadd.f32 %v10448_v36, %v5843_v15  ;;  %v5848_v46 = vadd.f32 %v7601_v2, %v5326_v17  ;;  %v5324_v43 = vadd.f32 %v5257_v29, %v10407_v48  ;;  %v5273_v39 = vpop.f32.mrf.mxu1 }
 0x29e   : > { %v11588_v35 = vunpack.c.h.bf16 %v10496_v58  ;;  %v6034_v61 = vmul.f32 %v6002_v62, %v10582_v28  ;;  %v6007_v18 = vadd.f32 0.5, %v5975_v22  ;;  %v5973_v55 = vmul.f32 0.5, %v7770_v63  ;;  %v5795_v28 = vpop.f32.mrf.mxu0 }
 0x29f   : > { %7779 = vtanh.f32 %v5916_v54  ;;  %v5914_v25 = vmul.f32 0.5, %v10660_v32  ;;  %v10668_v42 = vadd.f32 %v10448_v36, %v5848_v46  ;;  %v5846_v10 = vadd.f32 %v5779_v24, %v5324_v43  ;;  %v7558_v57 = vpop.f32.mrf.mxu1  ;;  %v7772_v12 = vpop.eup %7771 }
 0x2a0   : > { %v6132_v6 = vadd.f32 %v11588_v35, %v6036_v34  ;;  %v11589_v48 = vunpack.c.h.bf16 %v10499_v50  ;;  %v6039_v58 = vmul.f32 %v6007_v18, %v10590_v47  ;;  %v6005_v20 = vadd.f32 0.5, %v5973_v55  ;;  %v7606_v54 = vpop.f32.mrf.mxu0 }
 0x2a1   : > { %7781 = vtanh.f32 %v5914_v25  ;;  %v5919_v1 = vmul.f32 0.5, %v10668_v42  ;;  %v10675_v33 = vadd.f32 %v10448_v36, %v5846_v10  ;;  %v5327_v21 = vadd.f32 %v7554_v23, %v10410_v31  ;;  %v5276_v15 = vpop.f32.mrf.mxu1 }
 0x2a2   : > { %v6881_v2 = vpack.c.bf16 %v6132_v6, %v6131_v56  ;;  %v6130_v29 = vadd.f32 %v11589_v48, %v6034_v61  ;;  %v11590_v50 = vunpack.c.l.bf16 %v10506_v14  ;;  %v6037_v47 = vmul.f32 %v6005_v20, %v10598_v8  ;;  %v7774_v17 = vpop.eup %7773  ;;  %v5798_v35 = vpop.f32.mrf.mxu0 }
 0x2a3   : > { %v5976_v44 = vmul.f32 0.5, %v7772_v12  ;;  %7783 = vtanh.f32 %v5919_v1  ;;  %v5917_v7 = vmul.f32 0.5, %v10675_v33  ;;  %v5849_v34 = vadd.f32 %v7602_v9, %v5327_v21  ;;  %v7561_v6 = vpop.f32.mrf.mxu1 }
 0x2a4   : > { %6952 = vst [vmem:[%s10606_s9 + $0x28] sm:$0xff] %v6881_v2   ;;  %v6876_v24 = vpack.c.bf16 %v6130_v29, %v6129_v0  ;;  %v6135_v56 = vadd.f32 %v11590_v50, %v6039_v58  ;;  %v5325_v62 = vadd.f32 %v5260_v49, %v10413_v60  ;;  %v11591_v31 = vunpack.c.l.bf16 %v10519_v4  ;;  %v7609_v48 = vpop.f32.mrf.mxu0 }
 0x2a5   : > { %v6008_v0 = vadd.f32 0.5, %v5976_v44  ;;  %v5974_v22 = vmul.f32 0.5, %v7774_v17  ;;  %v5330_v63 = vadd.f32 %v7557_v41, %v10416_v59  ;;  %7785 = vtanh.f32 %v5917_v7  ;;  %v5289_v29 = vpop.f32.mrf.mxu1 }
 0x2a6   : > { %6951 = vst [vmem:[%s10606_s9 + $0x20] sm:$0xff] %v6876_v24   ;;  %v6133_v23 = vadd.f32 %v11591_v31, %v6037_v47  ;;  %v10689_v8 = vadd.f32 %v10448_v36, %v5849_v34  ;;  %v5847_v46 = vadd.f32 %v5782_v5, %v5325_v62  ;;  %v5328_v43 = vadd.f32 %v5273_v39, %v10419_v30 }
 0x2a7   : > { %v6040_v9 = vmul.f32 %v6008_v0, %v10613_v26  ;;  %v6006_v60 = vadd.f32 0.5, %v5974_v22  ;;  %v5852_v49 = vadd.f32 %v7605_v37, %v5330_v63  ;;  %v5331_v61 = vadd.f32 %v7558_v57, %v10422_v38  ;;  %v7776_v18 = vpop.eup %7775 }
 0x2a8   : > { %v5920_v55 = vmul.f32 0.5, %v10689_v8  ;;  %v10696_v59 = vadd.f32 %v10448_v36, %v5847_v46  ;;  %v5850_v41 = vadd.f32 %v5795_v28, %v5328_v43  ;;  %v5329_v25 = vadd.f32 %v5276_v15, %v10425_v40  ;;  %v7562_v15 = vpop.f32.mrf.mxu1 }
 0x2a9   : > { %v11592_v5 = vunpack.c.h.bf16 %v10506_v14  ;;  %v6038_v39 = vmul.f32 %v6006_v60, %v10621_v19  ;;  %v5979_v10 = vmul.f32 0.5, %v7776_v18  ;;  %v10703_v26 = vadd.f32 %v10448_v36, %v5852_v49  ;;  %v7778_v40 = vpop.eup %7777 }
 0x2aa   : > { %7787 = vtanh.f32 %v5920_v55  ;;  %v5918_v38 = vmul.f32 0.5, %v10696_v59  ;;  %v10707_v37 = vadd.f32 %v10448_v36, %v5850_v41  ;;  %v5853_v2 = vadd.f32 %v7606_v54, %v5331_v61  ;;  %v5811_v54 = vpop.f32.mrf.mxu0 }
 0x2ab   : > { %v6136_v30 = vadd.f32 %v11592_v5, %v6040_v9  ;;  %v11593_v14 = vunpack.c.h.bf16 %v10519_v4  ;;  %v6011_v19 = vadd.f32 0.5, %v5979_v10  ;;  %v5923_v28 = vmul.f32 0.5, %v10703_v26 }
 0x2ac   : > { %v5977_v57 = vmul.f32 0.5, %v7778_v40  ;;  %7789 = vtanh.f32 %v5918_v38  ;;  %v5921_v12 = vmul.f32 0.5, %v10707_v37  ;;  %v10714_v1 = vadd.f32 %v10448_v36, %v5853_v2  ;;  %v7780_v21 = vpop.eup %7779 }
 0x2ad   : > { %v6891_v58 = vpack.c.bf16 %v6136_v30, %v6135_v56  ;;  %v6134_v20 = vadd.f32 %v11593_v14, %v6038_v39  ;;  %v6828_v50 = vunpack.c.h.bf16 %v10539_v51  ;;  %7791 = vtanh.f32 %v5923_v28 }
 0x2ae   : > { %v5851_v56 = vadd.f32 %v5798_v35, %v5329_v25  ;;  %v6009_v4 = vadd.f32 0.5, %v5977_v57  ;;  %v5980_v47 = vmul.f32 0.5, %v7780_v21  ;;  %7793 = vtanh.f32 %v5921_v12  ;;  %v7782_v17 = vpop.eup %7781  ;;  %v6942_v12 = vld [vmem:[%s10451_s6 + $0x50] sm:$0xff]  }
 0x2af   : > { %6954 = vst [vmem:[%s10606_s9 + $0x38] sm:$0xff] %v6891_v58   ;;  %v6886_v24 = vpack.c.bf16 %v6134_v20, %v6133_v23  ;;  %v5924_v44 = vmul.f32 0.5, %v10714_v1  ;;  %v6824_v7 = vunpack.c.h.bf16 %v10555_v13  ;;  %v5334_v62 = vadd.f32 %v7561_v6, %v10429_v3  ;;  %v7610_v6 = vpop.f32.mrf.mxu0  ;;  %v6943_v58 = vld [vmem:[%s10451_s6 + $0x58] sm:$0xff]  }
 0x2b0   : > { %v10722_v34 = vadd.f32 %v10448_v36, %v5851_v56  ;;  %v5332_v31 = vadd.f32 %v5289_v29, %v10432_v45  ;;  %v6043_v23 = vmul.f32 %v6011_v19, %v10635_v52  ;;  %v6012_v0 = vadd.f32 0.5, %v5980_v47  ;;  %v7784_v63 = vpop.eup %7783  ;;  %v5292_v45 = vpop.f32.mrf.mxu1 }
 0x2b1   : > { %6953 = vst [vmem:[%s10606_s9 + $0x30] sm:$0xff] %v6886_v24   ;;  %v5978_v22 = vmul.f32 0.5, %v7782_v17  ;;  %7795 = vtanh.f32 %v5924_v44  ;;  %v5856_v43 = vadd.f32 %v7609_v48, %v5334_v62  ;;  %v5335_v9 = vadd.f32 %v7562_v15, %v10437_v16 }
 0x2b2   : > { %v5922_v46 = vmul.f32 0.5, %v10722_v34  ;;  %v5854_v35 = vadd.f32 %v5811_v54, %v5332_v31  ;;  %v6041_v60 = vmul.f32 %v6009_v4, %v10642_v53  ;;  %v6044_v49 = vmul.f32 %v6012_v0, %v10648_v27  ;;  %v7786_v18 = vpop.eup %7785 }
 0x2b3   : > { %v6010_v61 = vadd.f32 0.5, %v5978_v22  ;;  %v5983_v3 = vmul.f32 0.5, %v7784_v63  ;;  %v10732_v52 = vadd.f32 %v10448_v36, %v5856_v43  ;;  %v5857_v41 = vadd.f32 %v7610_v6, %v5335_v9 }
 0x2b4   : > { %7797 = vtanh.f32 %v5922_v46  ;;  %v10735_v55 = vadd.f32 %v10448_v36, %v5854_v35  ;;  %v11594_v16 = vunpack.c.l.bf16 %v10539_v51  ;;  %v6140_v53 = vadd.f32 %v6828_v50, %v6044_v49 }
 0x2b5   : > { %v6042_v27 = vmul.f32 %v6010_v61, %v10660_v32  ;;  %v5981_v5 = vmul.f32 0.5, %v7786_v18  ;;  %v5927_v30 = vmul.f32 0.5, %v10732_v52  ;;  %v10743_v10 = vadd.f32 %v10448_v36, %v5857_v41  ;;  %v5814_v32 = vpop.f32.mrf.mxu0  ;;  %v6944_v18 = vld [vmem:[%s10451_s6 + $0x60] sm:$0xff]  }
 0x2b6   : > { %v6139_v25 = vadd.f32 %v11594_v16, %v6043_v23  ;;  %v5925_v39 = vmul.f32 0.5, %v10735_v55  ;;  %v5333_v38 = vadd.f32 %v5292_v45, %v10442_v11  ;;  %v11595_v2 = vunpack.c.l.bf16 %v10555_v13 }
 0x2b7   : > { %v6138_v29 = vadd.f32 %v6824_v7, %v6042_v27  ;;  %v6015_v40 = vadd.f32 0.5, %v5983_v3  ;;  %v7788_v14 = vpop.eup %7787  ;;  %v6013_v20 = vadd.f32 0.5, %v5981_v5  ;;  %7799 = vtanh.f32 %v5927_v30 }
 0x2b8   : > { %v6137_v48 = vadd.f32 %v11595_v2, %v6041_v60  ;;  %v6901_v51 = vpack.c.bf16 %v6140_v53, %v6139_v25  ;;  %v5928_v19 = vmul.f32 0.5, %v10743_v10  ;;  %v5855_v28 = vadd.f32 %v5814_v32, %v5333_v38  ;;  %v6947_v32 = vld [vmem:[%s10451_s6 + $0x78] sm:$0xff]  }
 0x2b9   : > { %v5984_v21 = vmul.f32 0.5, %v7788_v14  ;;  %v7790_v11 = vpop.eup %7789  ;;  %v6835_v24 = vunpack.c.l.bf16 %v6943_v58  ;;  %v6836_v13 = vunpack.c.h.bf16 %v6943_v58  ;;  %7801 = vtanh.f32 %v5925_v39 }
 0x2ba   : > { %6956 = vst [vmem:[%s10606_s9 + $0x48] sm:$0xff] %v6901_v51   ;;  %v6896_v57 = vpack.c.bf16 %v6138_v29, %v6137_v48  ;;  %v10753_v50 = vadd.f32 %v10448_v36, %v5855_v28  ;;  %v7792_v56 = vpop.eup %7791  ;;  %v6047_v4 = vmul.f32 %v6015_v40, %v10668_v42  ;;  %v5982_v44 = vmul.f32 0.5, %v7790_v11  ;;  %v6945_v36 = vld [vmem:[%s10451_s6 + $0x68] sm:$0xff]  }
 0x2bb   : > { %v6016_v47 = vadd.f32 0.5, %v5984_v21  ;;  %7803 = vtanh.f32 %v5928_v19  ;;  %v7794_v54 = vpop.eup %7793  ;;  %v6045_v15 = vmul.f32 %v6013_v20, %v10675_v33  ;;  %v6831_v17 = vunpack.c.l.bf16 %v6942_v12 }
 0x2bc   : > { %6955 = vst [vmem:[%s10606_s9 + $0x40] sm:$0xff] %v6896_v57   ;;  %v5987_v7 = vmul.f32 0.5, %v7792_v56  ;;  %v5926_v62 = vmul.f32 0.5, %v10753_v50  ;;  %v6014_v23 = vadd.f32 0.5, %v5982_v44  ;;  %v6832_v0 = vunpack.c.h.bf16 %v6942_v12 }
 0x2bd   : > { %v6048_v31 = vmul.f32 %v6016_v47, %v10689_v8  ;;  %v5985_v22 = vmul.f32 0.5, %v7794_v54  ;;  %v6143_v42 = vadd.f32 %v6835_v24, %v6047_v4  ;;  %v6141_v9 = vadd.f32 %v6831_v17, %v6045_v15 }
 0x2be   : > { %v7796_v63 = vpop.eup %7795  ;;  %v6019_v46 = vadd.f32 0.5, %v5987_v7  ;;  %7805 = vtanh.f32 %v5926_v62  ;;  %v6046_v35 = vmul.f32 %v6014_v23, %v10696_v59  ;;  %v6843_v60 = vunpack.c.l.bf16 %v6945_v36 }
 0x2bf   : > { %v6144_v43 = vadd.f32 %v6836_v13, %v6048_v31  ;;  %v5988_v33 = vmul.f32 0.5, %v7796_v63  ;;  %v6017_v49 = vadd.f32 0.5, %v5985_v22  ;;  %v6844_v61 = vunpack.c.h.bf16 %v6945_v36 }
 0x2c0   : > { %v6142_v6 = vadd.f32 %v6832_v0, %v6046_v35  ;;  %v6051_v45 = vmul.f32 %v6019_v46, %v10703_v26  ;;  %v6839_v27 = vunpack.c.l.bf16 %v6944_v18  ;;  %v6840_v30 = vunpack.c.h.bf16 %v6944_v18 }
 0x2c1   : > { %v7798_v8 = vpop.eup %7797  ;;  %v6911_v3 = vpack.c.bf16 %v6144_v43, %v6143_v42  ;;  %v6020_v41 = vadd.f32 0.5, %v5988_v33  ;;  %v6049_v59 = vmul.f32 %v6017_v49, %v10707_v37  ;;  %v6851_v21 = vunpack.c.l.bf16 %v6947_v32 }
 0x2c2   : > { %v5986_v16 = vmul.f32 0.5, %v7798_v8  ;;  %v6906_v25 = vpack.c.bf16 %v6142_v6, %v6141_v9  ;;  %v6147_v38 = vadd.f32 %v6843_v60, %v6051_v45  ;;  %v6852_v24 = vunpack.c.h.bf16 %v6947_v32 }
 0x2c3   : > { %6958 = vst [vmem:[%s10606_s9 + $0x58] sm:$0xff] %v6911_v3   ;;  %v6052_v53 = vmul.f32 %v6020_v41, %v10714_v1  ;;  %v6145_v1 = vadd.f32 %v6839_v27, %v6049_v59 }
 0x2c4   : > { %v6018_v5 = vadd.f32 0.5, %v5986_v16  ;;  %v7800_v39 = vpop.eup %7799  ;;  %6957 = vst [vmem:[%s10606_s9 + $0x50] sm:$0xff] %v6906_v25  }
 0x2c5   : > { %v6148_v2 = vadd.f32 %v6844_v61, %v6052_v53  ;;  %v5991_v48 = vmul.f32 0.5, %v7800_v39 }
 0x2c6   : > { %v6050_v26 = vmul.f32 %v6018_v5, %v10722_v34  ;;  %v7802_v51 = vpop.eup %7801  ;;  %v6946_v34 = vld [vmem:[%s10451_s6 + $0x70] sm:$0xff]  }
 0x2c7   : > { %v6921_v29 = vpack.c.bf16 %v6148_v2, %v6147_v38  ;;  %v6023_v37 = vadd.f32 0.5, %v5991_v48  ;;  %v5989_v14 = vmul.f32 0.5, %v7802_v51  ;;  %v6847_v47 = vunpack.c.l.bf16 %v6946_v34 }
 0x2c8   : > { %v7804_v40 = vpop.eup %7803  ;;  %v6146_v58 = vadd.f32 %v6840_v30, %v6050_v26  ;;  %v6848_v54 = vunpack.c.h.bf16 %v6946_v34 }
 0x2c9   : > { %6960 = vst [vmem:[%s10606_s9 + $0x68] sm:$0xff] %v6921_v29   ;;  %v5992_v20 = vmul.f32 0.5, %v7804_v40  ;;  %v6021_v28 = vadd.f32 0.5, %v5989_v14  ;;  %v6055_v12 = vmul.f32 %v6023_v37, %v10732_v52 }
 0x2ca   : > { %v6916_v19 = vpack.c.bf16 %v6146_v58, %v6145_v1 }
 0x2cb   : > { %v7806_v57 = vpop.eup %7805  ;;  %v6024_v11 = vadd.f32 0.5, %v5992_v20  ;;  %v6053_v4 = vmul.f32 %v6021_v28, %v10735_v55  ;;  %v6151_v15 = vadd.f32 %v6851_v21, %v6055_v12 }
 0x2cc   : > { %6959 = vst [vmem:[%s10606_s9 + $0x60] sm:$0xff] %v6916_v19   ;;  %v5990_v13 = vmul.f32 0.5, %v7806_v57 }
 0x2cd   : > { %v6056_v56 = vmul.f32 %v6024_v11, %v10743_v10  ;;  %v6149_v62 = vadd.f32 %v6847_v47, %v6053_v4 }
 0x2ce   : > { %v6022_v44 = vadd.f32 0.5, %v5990_v13 }
 0x2cf   : > { %v6152_v17 = vadd.f32 %v6852_v24, %v6056_v56 }
 0x2d0   : > { %v6054_v7 = vmul.f32 %v6022_v44, %v10753_v50 }
 0x2d1   : > { %v6931_v52 = vpack.c.bf16 %v6152_v17, %v6151_v15 }
 0x2d2   : > { %v6150_v31 = vadd.f32 %v6848_v54, %v6054_v7 }
 0x2d3   : > { %6962 = vst [vmem:[%s10606_s9 + $0x78] sm:$0xff] %v6931_v52  }
 0x2d4   : > { %v6926_v23 = vpack.c.bf16 %v6150_v31, %v6149_v62 }
 0x2d6   : > { %6961 = vst [vmem:[%s10606_s9 + $0x70] sm:$0xff] %v6926_v23  }
 0x2d7 PF: > { %p11_p10 = scmp.ge.s32.totalorder %s7934_s19, 4   ;;  %s11596_s15 = smov %s7884_s16 }
 0x2d8   : > { %s11597_s16 = smov %s7943_s22  ;;  %s11598_s17 = smov %s7934_s19 }
 0x2d9   :  { %13 = sbr.rel (!%p11_p10) target bundleno = 2 (0x2), region = 123 }

</bundles_post_ra>
